<compile_context>
chip_gen: v7x
topology: tpu7x:2x2x1
jax: 0.10.0
libtpu: 0.0.40
codegen_flags: <defaults>
</compile_context>

<pallas_src>
import functools
import math

import jax
import jax.numpy as jnp
from jax import lax
from jax.experimental import pallas as pl
from jax.experimental.pallas import tpu as pltpu

_EPS = 1e-7
_TT = 256          # peripheral time tile (output samples per in-kernel tile)


def _round_up(v, m):
    return (v + m - 1) // m * m


# ----------------------------- fused forward kernel -----------------------------
def _phaselocknet_kernel(x_ref, tfb_ref, lpb_ref, a1_ref, c1b_ref, a2_ref, c2b_ref,
                         fcw_ref, fcb_ref, hw_ref, hb_ref, o_ref, *,
                         n_f, n_tile, l_in, l1p, ww1, ww2p, ww3p, c2):
    # ---------------- peripheral (cochlear) model -> nervegram in VMEM ----------
    xw = x_ref[0]                                                  # [E, Lw] waveform
    halves = []
    for t in range(n_tile):                                        # static unroll
        xt = xw[:, t * _TT:t * _TT + l_in].astype(jnp.bfloat16)    # [E, l_in]
        # cochlear FIR filterbank: one MXU matmul against a banded Toeplitz matrix
        sub = jnp.dot(xt, tfb_ref[...], preferred_element_type=jnp.float32)
        # lane-group-aligned split into subband rows (row order = (cf, ear))
        sub = jnp.concatenate(
            [sub[:, f * l1p:(f + 1) * l1p] for f in range(n_f)], axis=0)  # [F*E, l1p]
        # IHC transduction: half-wave rectification + power-law compression
        g = jnp.exp(0.3 * jnp.log(jnp.maximum(sub, 0.0) + _EPS)).astype(jnp.bfloat16)
        # IHC lowpass FIR: one MXU matmul against a banded Toeplitz matrix
        env = jnp.dot(g, lpb_ref[...], preferred_element_type=jnp.float32)  # [F*E, TT]
        # ANF sigmoid rate-level function (expected rates)
        db = (20.0 / math.log(10.0)) * jnp.log(jnp.abs(env) + _EPS)
        rate = 70.0 + 180.0 * pl.reciprocal(1.0 + jnp.exp(0.1 * (10.0 - db)),
                                            approx=True)
        halves.append(rate.astype(jnp.bfloat16))
    # TODO(synk): binomial ANF spike generator and the random nervegram slice are
    # replaced by expected rates and the deterministic buffer offset.
    ng = jnp.concatenate(halves, axis=1)                           # [F*E, t_size] bf16

    # ---------------- perceptual CNN -> classification logits -------------------
    # conv1 (3x3 valid) + bias + ReLU as ONE MXU matmul: the frequency axis of the
    # kernel is folded into a block-Toeplitz weight matrix (a1); the data side
    # only needs the 3 time-shifted slabs of the nervegram.
    bmat = jnp.concatenate([ng[:, 0:ww1], ng[:, 1:1 + ww1], ng[:, 2:2 + ww1]],
                           axis=0)                                 # [3*F*E, ww1]
    h1 = jnp.dot(a1_ref[...], bmat, preferred_element_type=jnp.float32) + c1b_ref[...]
    h1 = jnp.maximum(h1, 0.0).astype(jnp.bfloat16)                 # [c1*hh1, ww1]

    # 2x2 average pool: column half = matmul against a pool matrix generated
    # in-kernel from iota; row half is folded into the conv2 weight matrix (a2).
    r_i = lax.broadcasted_iota(jnp.int32, (ww1, ww2p), 0)
    c_i = lax.broadcasted_iota(jnp.int32, (ww1, ww2p), 1)
    pc = jnp.where((r_i >> 1) == c_i, 0.25, 0.0).astype(jnp.bfloat16)   # [ww1, ww2p]
    hq = jnp.dot(h1, pc, preferred_element_type=jnp.float32).astype(jnp.bfloat16)

    # conv2 (3x3 valid, row-pool folded in) + bias + ReLU as ONE MXU matmul
    b2m = jnp.concatenate([hq[:, 0:ww3p], hq[:, 1:1 + ww3p], hq[:, 2:2 + ww3p]],
                          axis=0)                                  # [3*c1*hh1, ww3p]
    h2 = jnp.dot(a2_ref[...], b2m, preferred_element_type=jnp.float32) + c2b_ref[...]
    h2 = jnp.maximum(h2, 0.0).astype(jnp.bfloat16)                 # [c2, ww3p]

    # flatten (lane-group aligned, ww3 padded to 256) + ONE FC matmul + ReLU
    h2f = jnp.concatenate([h2[c:c + 1, :] for c in range(c2)], axis=1)  # [1, c2*ww3p]
    fc = jnp.dot(h2f, fcw_ref[...], preferred_element_type=jnp.float32) + fcb_ref[...]
    h = jnp.maximum(fc, 0.0).astype(jnp.bfloat16)                  # [1, n_hidden]

    # both classification heads fused into one lane-dense (padded to 128) matmul
    o_ref[0] = (jnp.dot(h, hw_ref[...], preferred_element_type=jnp.float32)
                + hb_ref[...])


# ----------------------------------- wrapper -------------------------------------
def phaselocknet_forward(x, filt_fb, lp_taps, params, *, config_random_slice,
                         n_classes_dict):
    """x: [batch, time, ear] waveform -> dict of classification logits."""
    B, T, E = x.shape
    F, K_FB = filt_fb.shape
    K_LP = lp_taps.shape[0]
    f_size, t_size = config_random_slice["size"]
    f_buf, t_buf = config_random_slice["buffer"]
    assert f_buf == 0 and f_size == F, "toy model computes the full freq axis"
    assert t_size % _TT == 0
    n_tile = t_size // _TT
    l1 = _TT + K_LP - 1                     # subband samples needed per tile
    l1p = _round_up(l1, 128)                # lane-group aligned padding
    l_in = l1 + K_FB - 1                    # waveform samples needed per tile
    need = t_size + K_FB + K_LP - 2         # total waveform samples needed
    assert t_buf + need <= T

    c1, cin, kh, kw = params["conv1_w"].shape
    c2 = params["conv2_w"].shape[0]
    assert cin == E and kh == 3 and kw == 3
    hh1, ww1 = F - 2, t_size - 2            # conv1 output (valid)
    hh3, ww3 = hh1 // 2 - 2, ww1 // 2 - 2   # conv2 output (valid, after 2x2 pool)
    assert hh3 == 1, "toy architecture assumes conv2 collapses the freq axis"
    ww3p = _round_up(ww3, 128)
    ww2p = ww3p + 2
    n_hidden = params["fc_w"].shape[1]
    n_word = n_classes_dict["label_word"]
    n_loc = n_classes_dict["label_loc"]
    n_head = _round_up(n_word + n_loc, 128)

    f32, bf16 = jnp.float32, jnp.bfloat16

    # ---- waveform: [B, time, ear] -> [B, E, Lw], sliced at the buffer offset ----
    xe = jnp.transpose(x, (0, 2, 1))[:, :, t_buf:t_buf + need].astype(f32)
    lw = _round_up(need, 128)
    xe = jnp.pad(xe, ((0, 0), (0, 0), (0, lw - need)))

    # ---- cochlear filterbank as a banded Toeplitz matrix  [l_in, F*l1p] ----------
    m_i = jnp.arange(l_in)[:, None]
    j_i = jnp.arange(l1p)[None, :]
    d = m_i - j_i
    band = (d >= 0) & (d < K_FB) & (j_i < l1)
    tfb = jnp.where(band[None], filt_fb.astype(f32)[:, jnp.clip(d, 0, K_FB - 1)], 0.0)
    tfb = jnp.transpose(tfb, (1, 0, 2)).reshape(l_in, F * l1p).astype(bf16)

    # ---- IHC lowpass FIR as a banded Toeplitz matrix  [l1p, _TT] -----------------
    j2 = jnp.arange(l1p)[:, None]
    i2 = jnp.arange(_TT)[None, :]
    dd = j2 - i2
    lpb = jnp.where((dd >= 0) & (dd < K_LP) & (j2 < l1),
                    lp_taps.astype(f32)[jnp.clip(dd, 0, K_LP - 1)], 0.0).astype(bf16)

    # ---- conv1 as a block-Toeplitz weight matrix over the freq axis --------------
    w1 = params["conv1_w"].astype(f32)                   # [c1, cin, kh, kw]
    iy = jnp.arange(hh1)
    ip = jnp.arange(F)
    di = ip[None, :] - iy[:, None]                       # [hh1, F]
    msk = (di >= 0) & (di < kh)
    w1g = w1[:, :, jnp.clip(di, 0, kh - 1), :] * msk[None, None, :, :, None]
    # rows = (c_out, out_freq); cols = (dj, in_freq, ear) to match the kernel's
    # nervegram row order (cf-major, ear-minor).
    a1 = jnp.transpose(w1g, (0, 2, 4, 3, 1)).reshape(c1 * hh1, kw * F * cin).astype(bf16)
    c1b = jnp.repeat(params["conv1_b"].astype(f32), hh1).reshape(c1 * hh1, 1)

    # ---- conv2 with the avg-pool row half folded in  [c2, 3*c1*hh1] --------------
    w2 = params["conv2_w"].astype(f32)                   # [c2, c1, kh, kw]
    w2g = w2[:, :, iy // 2, :]                           # [c2, c1, hh1, kw]
    a2 = jnp.transpose(w2g, (0, 3, 1, 2)).reshape(c2, kw * c1 * hh1).astype(bf16)
    c2b = params["conv2_b"].astype(f32).reshape(c2, 1)

    # ---- FC weights padded to the lane-group aligned flatten  [c2*ww3p, n_hid] ---
    fcw = params["fc_w"].astype(f32).reshape(c2, ww3, n_hidden)
    fcw = jnp.pad(fcw, ((0, 0), (0, ww3p - ww3), (0, 0)))
    fcw = fcw.reshape(c2 * ww3p, n_hidden).astype(bf16)
    fcb = params["fc_b"].astype(f32).reshape(1, n_hidden)

    # ---- both classification heads fused into one padded matmul ------------------
    hw = jnp.concatenate([params["head_label_word_w"],
                          params["head_label_loc_w"]], axis=1).astype(f32)
    hw = jnp.pad(hw, ((0, 0), (0, n_head - n_word - n_loc))).astype(bf16)
    hb = jnp.concatenate([params["head_label_word_b"], params["head_label_loc_b"]])
    hb = jnp.pad(hb, (0, n_head - n_word - n_loc)).reshape(1, n_head).astype(f32)

    kern = functools.partial(
        _phaselocknet_kernel, n_f=F, n_tile=n_tile, l_in=l_in, l1p=l1p,
        ww1=ww1, ww2p=ww2p, ww3p=ww3p, c2=c2)
    const = lambda b: (0, 0)
    logits = pl.pallas_call(
        kern,
        out_shape=jax.ShapeDtypeStruct((B, 1, n_head), f32),
        grid=(B,),
        in_specs=[
            pl.BlockSpec((1, E, lw), lambda b: (b, 0, 0)),       # waveform
            pl.BlockSpec((l_in, F * l1p), const),                # filterbank Toeplitz
            pl.BlockSpec((l1p, _TT), const),                     # IHC lowpass Toeplitz
            pl.BlockSpec((c1 * hh1, kw * F * cin), const),       # conv1 weights
            pl.BlockSpec((c1 * hh1, 1), const),                  # conv1 bias
            pl.BlockSpec((c2, kw * c1 * hh1), const),            # conv2(+pool) weights
            pl.BlockSpec((c2, 1), const),                        # conv2 bias
            pl.BlockSpec((c2 * ww3p, n_hidden), const),          # FC weights
            pl.BlockSpec((1, n_hidden), const),                  # FC bias
            pl.BlockSpec((n_hidden, n_head), const),             # fused head weights
            pl.BlockSpec((1, n_head), const),                    # fused head bias
        ],
        out_specs=pl.BlockSpec((1, 1, n_head), lambda b: (b, 0, 0)),
        compiler_params=pltpu.CompilerParams(dimension_semantics=("parallel",)),
    )(xe, tfb, lpb, a1, c1b, a2, c2b, fcw, fcb, hw, hb)

    logits = logits[:, 0, :]
    return {"label_word": logits[:, :n_word],
            "label_loc": logits[:, n_word:n_word + n_loc]}


# ------------------------------- pure-JAX reference -------------------------------
def phaselocknet_reference(x, filt_fb, lp_taps, params, *, config_random_slice,
                           n_classes_dict):
    """f32 reference of the same forward pass (no Pallas), for validation."""
    del n_classes_dict
    B, _, _ = x.shape
    F, K_FB = filt_fb.shape
    K_LP = lp_taps.shape[0]
    _, t_size = config_random_slice["size"]
    _, t_buf = config_random_slice["buffer"]
    xe = jnp.transpose(x, (0, 2, 1)).astype(jnp.float32)            # [B, E, T]
    l1 = t_size + K_LP - 1
    idx = t_buf + jnp.arange(l1)[:, None] + jnp.arange(K_FB)[None, :]
    sub = jnp.einsum("beik,fk->befi", xe[:, :, idx], filt_fb.astype(jnp.float32))
    g = jnp.power(jnp.maximum(sub, 0.0) + _EPS, 0.3)
    idx2 = jnp.arange(t_size)[:, None] + jnp.arange(K_LP)[None, :]
    env = jnp.einsum("befik,k->befi", g[:, :, :, idx2], lp_taps.astype(jnp.float32))
    db = (20.0 / math.log(10.0)) * jnp.log(jnp.abs(env) + _EPS)
    ng = 70.0 + 180.0 / (1.0 + jnp.exp(0.1 * (10.0 - db)))          # [B, E, F, t]

    dn = ("NCHW", "OIHW", "NCHW")
    h1 = lax.conv_general_dilated(ng, params["conv1_w"], (1, 1), "VALID",
                                  dimension_numbers=dn)
    h1 = jnp.maximum(h1 + params["conv1_b"][None, :, None, None], 0.0)
    hp = 0.25 * (h1[:, :, 0::2, 0::2] + h1[:, :, 0::2, 1::2]
                 + h1[:, :, 1::2, 0::2] + h1[:, :, 1::2, 1::2])
    h2 = lax.conv_general_dilated(hp, params["conv2_w"], (1, 1), "VALID",
                                  dimension_numbers=dn)
    h2 = jnp.maximum(h2 + params["conv2_b"][None, :, None, None], 0.0)
    h = jnp.maximum(h2.reshape(B, -1) @ params["fc_w"] + params["fc_b"], 0.0)
    return {"label_word": h @ params["head_label_word_w"] + params["head_label_word_b"],
            "label_loc": h @ params["head_label_loc_w"] + params["head_label_loc_b"]}


# ----------------------------------- main ------------------------------------------
if __name__ == "__main__":
    B, T, E = 2, 2048, 2
    F, K_FB, K_LP = 8, 64, 32
    SR = 20000.0
    config_random_slice = {"size": [8, 512], "buffer": [0, 16]}
    n_classes_dict = {"label_word": 32, "label_loc": 24}

    # deterministic cochlear filterbank (windowed cosines at log-spaced CFs)
    cfs = jnp.logspace(jnp.log10(200.0), jnp.log10(8000.0), F)
    t_ax = jnp.arange(K_FB) / SR
    win = 0.5 - 0.5 * jnp.cos(2.0 * jnp.pi * jnp.arange(K_FB) / (K_FB - 1))
    filt_fb = jnp.cos(2.0 * jnp.pi * cfs[:, None] * t_ax[None, :]) * win[None, :]
    filt_fb = filt_fb / jnp.sqrt(jnp.sum(filt_fb ** 2, axis=1, keepdims=True))

    # deterministic IHC lowpass FIR taps
    lp_taps = 0.5 - 0.5 * jnp.cos(2.0 * jnp.pi * jnp.arange(K_LP) / (K_LP - 1))
    lp_taps = lp_taps / jnp.sum(lp_taps)

    # deterministic perceptual-model parameters
    F_s, T_s = config_random_slice["size"]
    H3, W3 = (F_s - 2) // 2 - 2, (T_s - 2) // 2 - 2
    flat_dim = 16 * H3 * W3
    ks = jax.random.split(jax.random.PRNGKey(0), 6)
    params = {
        "conv1_w": 0.1 * jax.random.normal(ks[0], (8, E, 3, 3), jnp.float32),
        "conv1_b": 0.01 * jnp.ones((8,), jnp.float32),
        "conv2_w": 0.1 * jax.random.normal(ks[1], (16, 8, 3, 3), jnp.float32),
        "conv2_b": 0.01 * jnp.ones((16,), jnp.float32),
        "fc_w": 0.02 * jax.random.normal(ks[2], (flat_dim, 64), jnp.float32),
        "fc_b": jnp.zeros((64,), jnp.float32),
        "head_label_word_w": 0.1 * jax.random.normal(ks[3], (64, 32), jnp.float32),
        "head_label_word_b": jnp.zeros((32,), jnp.float32),
        "head_label_loc_w": 0.1 * jax.random.normal(ks[4], (64, 24), jnp.float32),
        "head_label_loc_b": jnp.zeros((24,), jnp.float32),
    }

    # deterministic example input waveform
    x = jax.random.normal(ks[5], (B, T, E), jnp.float32)

    fwd = jax.jit(functools.partial(phaselocknet_forward,
                                    config_random_slice=config_random_slice,
                                    n_classes_dict=n_classes_dict))
    out = fwd(x, filt_fb, lp_taps, params)
    jax.block_until_ready(out)

    assert out["label_word"].shape == (B, n_classes_dict["label_word"])
    assert out["label_loc"].shape == (B, n_classes_dict["label_loc"])
    assert all(bool(jnp.all(jnp.isfinite(v))) for v in out.values())

    # pure-JAX f32 reference check (loose tolerance: the kernel runs the matmul
    # chain in bf16 with f32 accumulation)
    ref = phaselocknet_reference(x, filt_fb, lp_taps, params,
                                 config_random_slice=config_random_slice,
                                 n_classes_dict=n_classes_dict)
    for k in out:
        err = float(jnp.max(jnp.abs(out[k] - ref[k])))
        scale = float(jnp.max(jnp.abs(ref[k])))
        assert err <= 0.1 * scale + 2.0, (k, err, scale)

    print("KERNEL_OK")
</pallas_src>

<mosaic_0001>
module attributes {stable_mosaic.version = 11 : i64} {
  func.func @_phaselocknet_kernel(%arg0: i32, %arg1: memref<1x2x640xf32, #tpu.memory_space<vmem>>, %arg2: memref<350x3072xbf16, #tpu.memory_space<vmem>>, %arg3: memref<384x256xbf16, #tpu.memory_space<vmem>>, %arg4: memref<48x48xbf16, #tpu.memory_space<vmem>>, %arg5: memref<48x1xf32, #tpu.memory_space<vmem>>, %arg6: memref<16x144xbf16, #tpu.memory_space<vmem>>, %arg7: memref<16x1xf32, #tpu.memory_space<vmem>>, %arg8: memref<4096x64xbf16, #tpu.memory_space<vmem>>, %arg9: memref<1x64xf32, #tpu.memory_space<vmem>>, %arg10: memref<64x128xbf16, #tpu.memory_space<vmem>>, %arg11: memref<1x128xf32, #tpu.memory_space<vmem>>, %arg12: memref<1x1x128xf32, #tpu.memory_space<vmem>>) attributes {dimension_semantics = [#tpu.dimension_semantics<parallel>], iteration_bounds = array<i64: 2>, scalar_prefetch = 0 : i64, scratch_operands = 0 : i64, tpu.core_type = #tpu.core_type<tc>, window_params = [{transform_indices = @transform_0, window_bounds = array<i64: 1, 2, 640>}, {pipeline_mode = #tpu.pipeline_mode<synchronous>, transform_indices = @transform_1, window_bounds = array<i64: 350, 3072>}, {pipeline_mode = #tpu.pipeline_mode<synchronous>, transform_indices = @transform_2, window_bounds = array<i64: 384, 256>}, {pipeline_mode = #tpu.pipeline_mode<synchronous>, transform_indices = @transform_3, window_bounds = array<i64: 48, 48>}, {pipeline_mode = #tpu.pipeline_mode<synchronous>, transform_indices = @transform_4, window_bounds = array<i64: 48, 1>}, {pipeline_mode = #tpu.pipeline_mode<synchronous>, transform_indices = @transform_5, window_bounds = array<i64: 16, 144>}, {pipeline_mode = #tpu.pipeline_mode<synchronous>, transform_indices = @transform_6, window_bounds = array<i64: 16, 1>}, {pipeline_mode = #tpu.pipeline_mode<synchronous>, transform_indices = @transform_7, window_bounds = array<i64: 4096, 64>}, {pipeline_mode = #tpu.pipeline_mode<synchronous>, transform_indices = @transform_8, window_bounds = array<i64: 1, 64>}, {pipeline_mode = #tpu.pipeline_mode<synchronous>, transform_indices = @transform_9, window_bounds = array<i64: 64, 128>}, {pipeline_mode = #tpu.pipeline_mode<synchronous>, transform_indices = @transform_10, window_bounds = array<i64: 1, 128>}, {transform_indices = @transform_11, window_bounds = array<i64: 1, 1, 128>}]} {
    %c0 = arith.constant 0 : index
    %c0_0 = arith.constant 0 : index
    %c0_1 = arith.constant 0 : index
    %0 = vector.load %arg1[%c0, %c0_0, %c0_1] : memref<1x2x640xf32, #tpu.memory_space<vmem>>, vector<1x2x640xf32>
    %1 = vector.shape_cast %0 : vector<1x2x640xf32> to vector<2x640xf32>
    %2 = vector.extract_strided_slice %1 {offsets = [0, 0], sizes = [2, 350], strides = [1, 1]} : vector<2x640xf32> to vector<2x350xf32>
    %3 = arith.truncf %2 : vector<2x350xf32> to vector<2x350xbf16>
    %c0_2 = arith.constant 0 : index
    %c0_3 = arith.constant 0 : index
    %4 = vector.load %arg2[%c0_2, %c0_3] : memref<350x3072xbf16, #tpu.memory_space<vmem>>, vector<350x3072xbf16>
    %cst = arith.constant dense<0.000000e+00> : vector<2x3072xf32>
    %5 = tpu.matmul %3, %4, %cst {dimension_numbers = #tpu.dot_dimension_numbers<[1], [0], [0], [1], [0, 0, 1, 1], [], []>} : vector<2x350xbf16>, vector<350x3072xbf16>, vector<2x3072xf32> -> vector<2x3072xf32>
    %6 = vector.extract_strided_slice %5 {offsets = [0, 0], sizes = [2, 384], strides = [1, 1]} : vector<2x3072xf32> to vector<2x384xf32>
    %7 = vector.extract_strided_slice %5 {offsets = [0, 384], sizes = [2, 384], strides = [1, 1]} : vector<2x3072xf32> to vector<2x384xf32>
    %8 = vector.extract_strided_slice %5 {offsets = [0, 768], sizes = [2, 384], strides = [1, 1]} : vector<2x3072xf32> to vector<2x384xf32>
    %9 = vector.extract_strided_slice %5 {offsets = [0, 1152], sizes = [2, 384], strides = [1, 1]} : vector<2x3072xf32> to vector<2x384xf32>
    %10 = vector.extract_strided_slice %5 {offsets = [0, 1536], sizes = [2, 384], strides = [1, 1]} : vector<2x3072xf32> to vector<2x384xf32>
    %11 = vector.extract_strided_slice %5 {offsets = [0, 1920], sizes = [2, 384], strides = [1, 1]} : vector<2x3072xf32> to vector<2x384xf32>
    %12 = vector.extract_strided_slice %5 {offsets = [0, 2304], sizes = [2, 384], strides = [1, 1]} : vector<2x3072xf32> to vector<2x384xf32>
    %13 = vector.extract_strided_slice %5 {offsets = [0, 2688], sizes = [2, 384], strides = [1, 1]} : vector<2x3072xf32> to vector<2x384xf32>
    %14 = tpu.concatenate %6, %7, %8, %9, %10, %11, %12, %13 in 0 : vector<2x384xf32>, vector<2x384xf32>, vector<2x384xf32>, vector<2x384xf32>, vector<2x384xf32>, vector<2x384xf32>, vector<2x384xf32>, vector<2x384xf32> -> vector<16x384xf32>
    %cst_4 = arith.constant 0.000000e+00 : f32
    %15 = vector.broadcast %cst_4 : f32 to vector<16x384xf32>
    %16 = arith.maximumf %14, %15 : vector<16x384xf32>
    %cst_5 = arith.constant 1.000000e-07 : f32
    %17 = vector.broadcast %cst_5 : f32 to vector<16x384xf32>
    %18 = arith.addf %16, %17 : vector<16x384xf32>
    %19 = math.log %18 : vector<16x384xf32>
    %cst_6 = arith.constant 3.000000e-01 : f32
    %20 = vector.broadcast %cst_6 : f32 to vector<16x384xf32>
    %21 = arith.mulf %20, %19 : vector<16x384xf32>
    %22 = math.exp %21 : vector<16x384xf32>
    %23 = arith.truncf %22 : vector<16x384xf32> to vector<16x384xbf16>
    %c0_7 = arith.constant 0 : index
    %c0_8 = arith.constant 0 : index
    %24 = vector.load %arg3[%c0_7, %c0_8] : memref<384x256xbf16, #tpu.memory_space<vmem>>, vector<384x256xbf16>
    %cst_9 = arith.constant dense<0.000000e+00> : vector<16x256xf32>
    %25 = tpu.matmul %23, %24, %cst_9 {dimension_numbers = #tpu.dot_dimension_numbers<[1], [0], [0], [1], [0, 0, 1, 1], [], []>} : vector<16x384xbf16>, vector<384x256xbf16>, vector<16x256xf32> -> vector<16x256xf32>
    %26 = math.absf %25 : vector<16x256xf32>
    %cst_10 = arith.constant 1.000000e-07 : f32
    %27 = vector.broadcast %cst_10 : f32 to vector<16x256xf32>
    %28 = arith.addf %26, %27 : vector<16x256xf32>
    %29 = math.log %28 : vector<16x256xf32>
    %cst_11 = arith.constant 8.68588924 : f32
    %30 = vector.broadcast %cst_11 : f32 to vector<16x256xf32>
    %31 = arith.mulf %30, %29 : vector<16x256xf32>
    %cst_12 = arith.constant 1.000000e+01 : f32
    %32 = vector.broadcast %cst_12 : f32 to vector<16x256xf32>
    %33 = arith.subf %32, %31 : vector<16x256xf32>
    %cst_13 = arith.constant 1.000000e-01 : f32
    %34 = vector.broadcast %cst_13 : f32 to vector<16x256xf32>
    %35 = arith.mulf %34, %33 : vector<16x256xf32>
    %36 = math.exp %35 : vector<16x256xf32>
    %cst_14 = arith.constant 1.000000e+00 : f32
    %37 = vector.broadcast %cst_14 : f32 to vector<16x256xf32>
    %38 = arith.addf %37, %36 : vector<16x256xf32>
    %39 = tpu.reciprocal %38 {approx = true} : vector<16x256xf32> -> vector<16x256xf32>
    %cst_15 = arith.constant 1.800000e+02 : f32
    %40 = vector.broadcast %cst_15 : f32 to vector<16x256xf32>
    %41 = arith.mulf %40, %39 : vector<16x256xf32>
    %cst_16 = arith.constant 7.000000e+01 : f32
    %42 = vector.broadcast %cst_16 : f32 to vector<16x256xf32>
    %43 = arith.addf %42, %41 : vector<16x256xf32>
    %44 = arith.truncf %43 : vector<16x256xf32> to vector<16x256xbf16>
    %45 = vector.extract_strided_slice %1 {offsets = [0, 256], sizes = [2, 350], strides = [1, 1]} : vector<2x640xf32> to vector<2x350xf32>
    %46 = arith.truncf %45 : vector<2x350xf32> to vector<2x350xbf16>
    %c0_17 = arith.constant 0 : index
    %c0_18 = arith.constant 0 : index
    %47 = vector.load %arg2[%c0_17, %c0_18] : memref<350x3072xbf16, #tpu.memory_space<vmem>>, vector<350x3072xbf16>
    %cst_19 = arith.constant dense<0.000000e+00> : vector<2x3072xf32>
    %48 = tpu.matmul %46, %47, %cst_19 {dimension_numbers = #tpu.dot_dimension_numbers<[1], [0], [0], [1], [0, 0, 1, 1], [], []>} : vector<2x350xbf16>, vector<350x3072xbf16>, vector<2x3072xf32> -> vector<2x3072xf32>
    %49 = vector.extract_strided_slice %48 {offsets = [0, 0], sizes = [2, 384], strides = [1, 1]} : vector<2x3072xf32> to vector<2x384xf32>
    %50 = vector.extract_strided_slice %48 {offsets = [0, 384], sizes = [2, 384], strides = [1, 1]} : vector<2x3072xf32> to vector<2x384xf32>
    %51 = vector.extract_strided_slice %48 {offsets = [0, 768], sizes = [2, 384], strides = [1, 1]} : vector<2x3072xf32> to vector<2x384xf32>
    %52 = vector.extract_strided_slice %48 {offsets = [0, 1152], sizes = [2, 384], strides = [1, 1]} : vector<2x3072xf32> to vector<2x384xf32>
    %53 = vector.extract_strided_slice %48 {offsets = [0, 1536], sizes = [2, 384], strides = [1, 1]} : vector<2x3072xf32> to vector<2x384xf32>
    %54 = vector.extract_strided_slice %48 {offsets = [0, 1920], sizes = [2, 384], strides = [1, 1]} : vector<2x3072xf32> to vector<2x384xf32>
    %55 = vector.extract_strided_slice %48 {offsets = [0, 2304], sizes = [2, 384], strides = [1, 1]} : vector<2x3072xf32> to vector<2x384xf32>
    %56 = vector.extract_strided_slice %48 {offsets = [0, 2688], sizes = [2, 384], strides = [1, 1]} : vector<2x3072xf32> to vector<2x384xf32>
    %57 = tpu.concatenate %49, %50, %51, %52, %53, %54, %55, %56 in 0 : vector<2x384xf32>, vector<2x384xf32>, vector<2x384xf32>, vector<2x384xf32>, vector<2x384xf32>, vector<2x384xf32>, vector<2x384xf32>, vector<2x384xf32> -> vector<16x384xf32>
    %cst_20 = arith.constant 0.000000e+00 : f32
    %58 = vector.broadcast %cst_20 : f32 to vector<16x384xf32>
    %59 = arith.maximumf %57, %58 : vector<16x384xf32>
    %cst_21 = arith.constant 1.000000e-07 : f32
    %60 = vector.broadcast %cst_21 : f32 to vector<16x384xf32>
    %61 = arith.addf %59, %60 : vector<16x384xf32>
    %62 = math.log %61 : vector<16x384xf32>
    %cst_22 = arith.constant 3.000000e-01 : f32
    %63 = vector.broadcast %cst_22 : f32 to vector<16x384xf32>
    %64 = arith.mulf %63, %62 : vector<16x384xf32>
    %65 = math.exp %64 : vector<16x384xf32>
    %66 = arith.truncf %65 : vector<16x384xf32> to vector<16x384xbf16>
    %c0_23 = arith.constant 0 : index
    %c0_24 = arith.constant 0 : index
    %67 = vector.load %arg3[%c0_23, %c0_24] : memref<384x256xbf16, #tpu.memory_space<vmem>>, vector<384x256xbf16>
    %cst_25 = arith.constant dense<0.000000e+00> : vector<16x256xf32>
    %68 = tpu.matmul %66, %67, %cst_25 {dimension_numbers = #tpu.dot_dimension_numbers<[1], [0], [0], [1], [0, 0, 1, 1], [], []>} : vector<16x384xbf16>, vector<384x256xbf16>, vector<16x256xf32> -> vector<16x256xf32>
    %69 = math.absf %68 : vector<16x256xf32>
    %cst_26 = arith.constant 1.000000e-07 : f32
    %70 = vector.broadcast %cst_26 : f32 to vector<16x256xf32>
    %71 = arith.addf %69, %70 : vector<16x256xf32>
    %72 = math.log %71 : vector<16x256xf32>
    %cst_27 = arith.constant 8.68588924 : f32
    %73 = vector.broadcast %cst_27 : f32 to vector<16x256xf32>
    %74 = arith.mulf %73, %72 : vector<16x256xf32>
    %cst_28 = arith.constant 1.000000e+01 : f32
    %75 = vector.broadcast %cst_28 : f32 to vector<16x256xf32>
    %76 = arith.subf %75, %74 : vector<16x256xf32>
    %cst_29 = arith.constant 1.000000e-01 : f32
    %77 = vector.broadcast %cst_29 : f32 to vector<16x256xf32>
    %78 = arith.mulf %77, %76 : vector<16x256xf32>
    %79 = math.exp %78 : vector<16x256xf32>
    %cst_30 = arith.constant 1.000000e+00 : f32
    %80 = vector.broadcast %cst_30 : f32 to vector<16x256xf32>
    %81 = arith.addf %80, %79 : vector<16x256xf32>
    %82 = tpu.reciprocal %81 {approx = true} : vector<16x256xf32> -> vector<16x256xf32>
    %cst_31 = arith.constant 1.800000e+02 : f32
    %83 = vector.broadcast %cst_31 : f32 to vector<16x256xf32>
    %84 = arith.mulf %83, %82 : vector<16x256xf32>
    %cst_32 = arith.constant 7.000000e+01 : f32
    %85 = vector.broadcast %cst_32 : f32 to vector<16x256xf32>
    %86 = arith.addf %85, %84 : vector<16x256xf32>
    %87 = arith.truncf %86 : vector<16x256xf32> to vector<16x256xbf16>
    %88 = tpu.concatenate %44, %87 in 1 : vector<16x256xbf16>, vector<16x256xbf16> -> vector<16x512xbf16>
    %89 = vector.extract_strided_slice %88 {offsets = [0, 0], sizes = [16, 510], strides = [1, 1]} : vector<16x512xbf16> to vector<16x510xbf16>
    %90 = vector.extract_strided_slice %88 {offsets = [0, 1], sizes = [16, 510], strides = [1, 1]} : vector<16x512xbf16> to vector<16x510xbf16>
    %91 = vector.extract_strided_slice %88 {offsets = [0, 2], sizes = [16, 510], strides = [1, 1]} : vector<16x512xbf16> to vector<16x510xbf16>
    %92 = tpu.concatenate %89, %90, %91 in 0 : vector<16x510xbf16>, vector<16x510xbf16>, vector<16x510xbf16> -> vector<48x510xbf16>
    %c0_33 = arith.constant 0 : index
    %c0_34 = arith.constant 0 : index
    %93 = vector.load %arg4[%c0_33, %c0_34] : memref<48x48xbf16, #tpu.memory_space<vmem>>, vector<48x48xbf16>
    %cst_35 = arith.constant dense<0.000000e+00> : vector<48x510xf32>
    %94 = tpu.matmul %93, %92, %cst_35 {dimension_numbers = #tpu.dot_dimension_numbers<[1], [0], [0], [1], [0, 0, 1, 1], [], []>} : vector<48x48xbf16>, vector<48x510xbf16>, vector<48x510xf32> -> vector<48x510xf32>
    %c0_36 = arith.constant 0 : index
    %c0_37 = arith.constant 0 : index
    %95 = vector.load %arg5[%c0_36, %c0_37] : memref<48x1xf32, #tpu.memory_space<vmem>>, vector<48x1xf32>
    %96 = vector.broadcast %95 : vector<48x1xf32> to vector<48x510xf32>
    %97 = arith.addf %94, %96 : vector<48x510xf32>
    %cst_38 = arith.constant 0.000000e+00 : f32
    %98 = vector.broadcast %cst_38 : f32 to vector<48x510xf32>
    %99 = arith.maximumf %97, %98 : vector<48x510xf32>
    %100 = arith.truncf %99 : vector<48x510xf32> to vector<48x510xbf16>
    %101 = tpu.iota {dimensions = array<i32: 0>} : vector<510x258xi32>
    %102 = tpu.iota {dimensions = array<i32: 1>} : vector<510x258xi32>
    %c1_i32 = arith.constant 1 : i32
    %103 = vector.broadcast %c1_i32 : i32 to vector<510x258xi32>
    %104 = arith.shrsi %101, %103 : vector<510x258xi32>
    %105 = arith.cmpi eq, %104, %102 : vector<510x258xi32>
    %cst_39 = arith.constant 2.500000e-01 : f32
    %cst_40 = arith.constant 0.000000e+00 : f32
    %106 = vector.broadcast %cst_39 : f32 to vector<510x258xf32>
    %107 = vector.broadcast %cst_40 : f32 to vector<510x258xf32>
    %108 = arith.select %105, %106, %107 : vector<510x258xi1>, vector<510x258xf32>
    %109 = arith.truncf %108 : vector<510x258xf32> to vector<510x258xbf16>
    %cst_41 = arith.constant dense<0.000000e+00> : vector<48x258xf32>
    %110 = tpu.matmul %100, %109, %cst_41 {dimension_numbers = #tpu.dot_dimension_numbers<[1], [0], [0], [1], [0, 0, 1, 1], [], []>} : vector<48x510xbf16>, vector<510x258xbf16>, vector<48x258xf32> -> vector<48x258xf32>
    %111 = arith.truncf %110 : vector<48x258xf32> to vector<48x258xbf16>
    %112 = vector.extract_strided_slice %111 {offsets = [0, 0], sizes = [48, 256], strides = [1, 1]} : vector<48x258xbf16> to vector<48x256xbf16>
    %113 = vector.extract_strided_slice %111 {offsets = [0, 1], sizes = [48, 256], strides = [1, 1]} : vector<48x258xbf16> to vector<48x256xbf16>
    %114 = vector.extract_strided_slice %111 {offsets = [0, 2], sizes = [48, 256], strides = [1, 1]} : vector<48x258xbf16> to vector<48x256xbf16>
    %115 = tpu.concatenate %112, %113, %114 in 0 : vector<48x256xbf16>, vector<48x256xbf16>, vector<48x256xbf16> -> vector<144x256xbf16>
    %c0_42 = arith.constant 0 : index
    %c0_43 = arith.constant 0 : index
    %116 = vector.load %arg6[%c0_42, %c0_43] : memref<16x144xbf16, #tpu.memory_space<vmem>>, vector<16x144xbf16>
    %cst_44 = arith.constant dense<0.000000e+00> : vector<16x256xf32>
    %117 = tpu.matmul %116, %115, %cst_44 {dimension_numbers = #tpu.dot_dimension_numbers<[1], [0], [0], [1], [0, 0, 1, 1], [], []>} : vector<16x144xbf16>, vector<144x256xbf16>, vector<16x256xf32> -> vector<16x256xf32>
    %c0_45 = arith.constant 0 : index
    %c0_46 = arith.constant 0 : index
    %118 = vector.load %arg7[%c0_45, %c0_46] : memref<16x1xf32, #tpu.memory_space<vmem>>, vector<16x1xf32>
    %119 = vector.broadcast %118 : vector<16x1xf32> to vector<16x256xf32>
    %120 = arith.addf %117, %119 : vector<16x256xf32>
    %cst_47 = arith.constant 0.000000e+00 : f32
    %121 = vector.broadcast %cst_47 : f32 to vector<16x256xf32>
    %122 = arith.maximumf %120, %121 : vector<16x256xf32>
    %123 = arith.truncf %122 : vector<16x256xf32> to vector<16x256xbf16>
    %124 = vector.extract_strided_slice %123 {offsets = [0, 0], sizes = [1, 256], strides = [1, 1]} : vector<16x256xbf16> to vector<1x256xbf16>
    %125 = vector.extract_strided_slice %123 {offsets = [1, 0], sizes = [1, 256], strides = [1, 1]} : vector<16x256xbf16> to vector<1x256xbf16>
    %126 = vector.extract_strided_slice %123 {offsets = [2, 0], sizes = [1, 256], strides = [1, 1]} : vector<16x256xbf16> to vector<1x256xbf16>
    %127 = vector.extract_strided_slice %123 {offsets = [3, 0], sizes = [1, 256], strides = [1, 1]} : vector<16x256xbf16> to vector<1x256xbf16>
    %128 = vector.extract_strided_slice %123 {offsets = [4, 0], sizes = [1, 256], strides = [1, 1]} : vector<16x256xbf16> to vector<1x256xbf16>
    %129 = vector.extract_strided_slice %123 {offsets = [5, 0], sizes = [1, 256], strides = [1, 1]} : vector<16x256xbf16> to vector<1x256xbf16>
    %130 = vector.extract_strided_slice %123 {offsets = [6, 0], sizes = [1, 256], strides = [1, 1]} : vector<16x256xbf16> to vector<1x256xbf16>
    %131 = vector.extract_strided_slice %123 {offsets = [7, 0], sizes = [1, 256], strides = [1, 1]} : vector<16x256xbf16> to vector<1x256xbf16>
    %132 = vector.extract_strided_slice %123 {offsets = [8, 0], sizes = [1, 256], strides = [1, 1]} : vector<16x256xbf16> to vector<1x256xbf16>
    %133 = vector.extract_strided_slice %123 {offsets = [9, 0], sizes = [1, 256], strides = [1, 1]} : vector<16x256xbf16> to vector<1x256xbf16>
    %134 = vector.extract_strided_slice %123 {offsets = [10, 0], sizes = [1, 256], strides = [1, 1]} : vector<16x256xbf16> to vector<1x256xbf16>
    %135 = vector.extract_strided_slice %123 {offsets = [11, 0], sizes = [1, 256], strides = [1, 1]} : vector<16x256xbf16> to vector<1x256xbf16>
    %136 = vector.extract_strided_slice %123 {offsets = [12, 0], sizes = [1, 256], strides = [1, 1]} : vector<16x256xbf16> to vector<1x256xbf16>
    %137 = vector.extract_strided_slice %123 {offsets = [13, 0], sizes = [1, 256], strides = [1, 1]} : vector<16x256xbf16> to vector<1x256xbf16>
    %138 = vector.extract_strided_slice %123 {offsets = [14, 0], sizes = [1, 256], strides = [1, 1]} : vector<16x256xbf16> to vector<1x256xbf16>
    %139 = vector.extract_strided_slice %123 {offsets = [15, 0], sizes = [1, 256], strides = [1, 1]} : vector<16x256xbf16> to vector<1x256xbf16>
    %140 = tpu.concatenate %124, %125, %126, %127, %128, %129, %130, %131, %132, %133, %134, %135, %136, %137, %138, %139 in 1 : vector<1x256xbf16>, vector<1x256xbf16>, vector<1x256xbf16>, vector<1x256xbf16>, vector<1x256xbf16>, vector<1x256xbf16>, vector<1x256xbf16>, vector<1x256xbf16>, vector<1x256xbf16>, vector<1x256xbf16>, vector<1x256xbf16>, vector<1x256xbf16>, vector<1x256xbf16>, vector<1x256xbf16>, vector<1x256xbf16>, vector<1x256xbf16> -> vector<1x4096xbf16>
    %c0_48 = arith.constant 0 : index
    %c0_49 = arith.constant 0 : index
    %141 = vector.load %arg8[%c0_48, %c0_49] : memref<4096x64xbf16, #tpu.memory_space<vmem>>, vector<4096x64xbf16>
    %cst_50 = arith.constant dense<0.000000e+00> : vector<1x64xf32>
    %142 = tpu.matmul %140, %141, %cst_50 {dimension_numbers = #tpu.dot_dimension_numbers<[1], [0], [0], [1], [0, 0, 1, 1], [], []>} : vector<1x4096xbf16>, vector<4096x64xbf16>, vector<1x64xf32> -> vector<1x64xf32>
    %c0_51 = arith.constant 0 : index
    %c0_52 = arith.constant 0 : index
    %143 = vector.load %arg9[%c0_51, %c0_52] : memref<1x64xf32, #tpu.memory_space<vmem>>, vector<1x64xf32>
    %144 = arith.addf %142, %143 : vector<1x64xf32>
    %cst_53 = arith.constant 0.000000e+00 : f32
    %145 = vector.broadcast %cst_53 : f32 to vector<1x64xf32>
    %146 = arith.maximumf %144, %145 : vector<1x64xf32>
    %147 = arith.truncf %146 : vector<1x64xf32> to vector<1x64xbf16>
    %c0_54 = arith.constant 0 : index
    %c0_55 = arith.constant 0 : index
    %148 = vector.load %arg10[%c0_54, %c0_55] : memref<64x128xbf16, #tpu.memory_space<vmem>>, vector<64x128xbf16>
    %cst_56 = arith.constant dense<0.000000e+00> : vector<1x128xf32>
    %149 = tpu.matmul %147, %148, %cst_56 {dimension_numbers = #tpu.dot_dimension_numbers<[1], [0], [0], [1], [0, 0, 1, 1], [], []>} : vector<1x64xbf16>, vector<64x128xbf16>, vector<1x128xf32> -> vector<1x128xf32>
    %c0_57 = arith.constant 0 : index
    %c0_58 = arith.constant 0 : index
    %150 = vector.load %arg11[%c0_57, %c0_58] : memref<1x128xf32, #tpu.memory_space<vmem>>, vector<1x128xf32>
    %151 = arith.addf %149, %150 : vector<1x128xf32>
    %c0_59 = arith.constant 0 : index
    %c0_60 = arith.constant 0 : index
    %c0_61 = arith.constant 0 : index
    %152 = vector.load %arg12[%c0_59, %c0_60, %c0_61] : memref<1x1x128xf32, #tpu.memory_space<vmem>>, vector<1x1x128xf32>
    %153 = vector.shape_cast %152 : vector<1x1x128xf32> to vector<1x128xf32>
    %154 = vector.shape_cast %151 : vector<1x128xf32> to vector<1x1x128xf32>
    tpu.vector_store %arg12[%c0_59, %c0_60, %c0_61], %154 {strides = array<i32>} : memref<1x1x128xf32, #tpu.memory_space<vmem>>, vector<1x1x128xf32>,
    return
  }
  func.func @transform_0(%arg0: i32) -> (i32, i32, i32) {
    %c0_i32 = arith.constant 0 : i32
    %c0_i32_0 = arith.constant 0 : i32
    %c0_i32_1 = arith.constant 0 : i32
    return %arg0, %c0_i32, %c0_i32_0 : i32, i32, i32
  }
  func.func @transform_1(%arg0: i32) -> (i32, i32) {
    %c0_i32 = arith.constant 0 : i32
    %c0_i32_0 = arith.constant 0 : i32
    %c0_i32_1 = arith.constant 0 : i32
    return %c0_i32, %c0_i32_0 : i32, i32
  }
  func.func @transform_2(%arg0: i32) -> (i32, i32) {
    %c0_i32 = arith.constant 0 : i32
    %c0_i32_0 = arith.constant 0 : i32
    %c0_i32_1 = arith.constant 0 : i32
    return %c0_i32, %c0_i32_0 : i32, i32
  }
  func.func @transform_3(%arg0: i32) -> (i32, i32) {
    %c0_i32 = arith.constant 0 : i32
    %c0_i32_0 = arith.constant 0 : i32
    %c0_i32_1 = arith.constant 0 : i32
    return %c0_i32, %c0_i32_0 : i32, i32
  }
  func.func @transform_4(%arg0: i32) -> (i32, i32) {
    %c0_i32 = arith.constant 0 : i32
    %c0_i32_0 = arith.constant 0 : i32
    %c0_i32_1 = arith.constant 0 : i32
    return %c0_i32, %c0_i32_0 : i32, i32
  }
  func.func @transform_5(%arg0: i32) -> (i32, i32) {
    %c0_i32 = arith.constant 0 : i32
    %c0_i32_0 = arith.constant 0 : i32
    %c0_i32_1 = arith.constant 0 : i32
    return %c0_i32, %c0_i32_0 : i32, i32
  }
  func.func @transform_6(%arg0: i32) -> (i32, i32) {
    %c0_i32 = arith.constant 0 : i32
    %c0_i32_0 = arith.constant 0 : i32
    %c0_i32_1 = arith.constant 0 : i32
    return %c0_i32, %c0_i32_0 : i32, i32
  }
  func.func @transform_7(%arg0: i32) -> (i32, i32) {
    %c0_i32 = arith.constant 0 : i32
    %c0_i32_0 = arith.constant 0 : i32
    %c0_i32_1 = arith.constant 0 : i32
    return %c0_i32, %c0_i32_0 : i32, i32
  }
  func.func @transform_8(%arg0: i32) -> (i32, i32) {
    %c0_i32 = arith.constant 0 : i32
    %c0_i32_0 = arith.constant 0 : i32
    %c0_i32_1 = arith.constant 0 : i32
    return %c0_i32, %c0_i32_0 : i32, i32
  }
  func.func @transform_9(%arg0: i32) -> (i32, i32) {
    %c0_i32 = arith.constant 0 : i32
    %c0_i32_0 = arith.constant 0 : i32
    %c0_i32_1 = arith.constant 0 : i32
    return %c0_i32, %c0_i32_0 : i32, i32
  }
  func.func @transform_10(%arg0: i32) -> (i32, i32) {
    %c0_i32 = arith.constant 0 : i32
    %c0_i32_0 = arith.constant 0 : i32
    %c0_i32_1 = arith.constant 0 : i32
    return %c0_i32, %c0_i32_0 : i32, i32
  }
  func.func @transform_11(%arg0: i32) -> (i32, i32, i32) {
    %c0_i32 = arith.constant 0 : i32
    %c0_i32_0 = arith.constant 0 : i32
    %c0_i32_1 = arith.constant 0 : i32
    return %arg0, %c0_i32, %c0_i32_0 : i32, i32, i32
  }
}

</mosaic_0001>

<bundles_post_ra>
// kernel: phaselocknet_forward.1
= control target key start
LH: loop header
LB: loop body
LE: loop exit
PB: predicated region body
PF: predicated region fallthrough
CT: control target
= control target key end

     0   :  { %s12821_s17 = smov 0   ;;  %s19347_s0 = inlined_call_operand.vmem [shape: f32[2,2,640], index: 0, kind: input, shape index: {}]   ;;  %s19348_s1 = inlined_call_operand.vmem [shape: bf16[350,3072], index: 1, kind: input, shape index: {}]   ;;  %s19349_s2 = inlined_call_operand.vmem [shape: bf16[384,256], index: 2, kind: input, shape index: {}]   ;;  %s19350_s3 = inlined_call_operand.vmem [shape: bf16[48,48], index: 3, kind: input, shape index: {}]   ;;  %s19351_s4 = inlined_call_operand.vmem [shape: f32[48,1], index: 4, kind: input, shape index: {}]   ;;  %s19352_s5 = inlined_call_operand.vmem [shape: bf16[16,144], index: 5, kind: input, shape index: {}]   ;;  %s19353_s6 = inlined_call_operand.vmem [shape: f32[16,1], index: 6, kind: input, shape index: {}]   ;;  %s19354_s7 = inlined_call_operand.vmem [shape: bf16[4096,64], index: 7, kind: input, shape index: {}]   ;;  %s19355_s8 = inlined_call_operand.vmem [shape: f32[1,64], index: 8, kind: input, shape index: {}]   ;;  %s19356_s9 = inlined_call_operand.vmem [shape: bf16[64,128], index: 9, kind: input, shape index: {}]   ;;  %s19357_s10 = inlined_call_operand.vmem [shape: f32[1,128], index: 10, kind: input, shape index: {}]   ;;  %s19358_s11 = inlined_call_operand.vmem [shape: f32[2,1,128], index: 11, kind: output, shape index: {}]  }
   0x1 LB: > { %s10592_s18 = sadd.s32 4294967295, %s12752_s17   ;;  %p10596_p0 = scmp.ge.s32.totalorder %s12752_s17, 1  ;;  %s12752_s17 = sphi %s12821_s17, %s21_s17  }
   0x2   : > { %p337_p1 = scmp.lt.s32.totalorder %s12752_s17, 3 }
   0x4   : > { %p338_p2 = pnand %p10596_p0, %p337_p1 }
   0x6   : > { %341 = sbr.rel (%p338_p2) target bundleno = 3483 (0xd9b), region = 64 }
   0xd   : > { %v409_v0 = vld [vmem:[%s19348_s1] sm:$0xff]  ;;  %v410_v2 = vld [vmem:[%s19348_s1 + $0x8] sm:$0xff]  ;;  %p12899_p3 = scmp.lt.s32.totalorder %s10592_s18, 1  ;;  %v19360_v26 = vmov 0   ;;  %v12755_v33 = vmov 1983009808   ;;  %v19359_v35 = vlaneseq }
   0xe   : > { %v421_v1 = vld [vmem:[%s19348_s1 + $0x60] sm:$0xff]  ;;  %v422_v4 = vld [vmem:[%s19348_s1 + $0x68] sm:$0xff]  ;;  %12262 = vset.pattern.permute.xlu1 %v19360_v26  ;;  %12261 = vset.pattern.permute.xlu0 %v19360_v26  ;;  %v389_v34 = vunpack.c.l.s4 %v12755_v33  ;;  %vm19843_vm0 = vcmask 1046528   ;;  %vm3553_vm1 = vcmask 769024   ;;  %vm4668_vm2 = vcmask 1041408   ;;  %s12756_s14 = smov 127  }
   0xf   : > { %v12838_v3 = vcombine.high %v409_v0, %v421_v1  ;;  %v12843_v5 = vcombine.low %v409_v0, %v421_v1  ;;  %v433_v6 = vld [vmem:[%s19348_s1 + $0xc0] sm:$0xff]  ;;  %v12851_v8 = vcombine.high %v410_v2, %v422_v4  ;;  %v12853_v9 = vcombine.low %v410_v2, %v422_v4  ;;  %v434_v11 = vld [vmem:[%s19348_s1 + $0xc8] sm:$0xff]  ;;  %s20947_s18 = smov (!%p12899_p3, %s10592_s18), 1  ;;  %s12757_s15 = smov 126  }
  0x10   : > { %v445_v7 = vld [vmem:[%s19348_s1 + $0x120] sm:$0xff]  ;;  %v446_v12 = vld [vmem:[%s19348_s1 + $0x128] sm:$0xff]  ;;  %s12245_s30 = smul.u32 10, %s20947_s18  ;;  %v390_v44 = vunpack.c.0.s8 %v389_v34  ;;  %v12961_v45 = vshrl.u32 %v19359_v35, 7  ;;  %vm4672_vm3 = vcmask 1043456   ;;  %vm4676_vm4 = vcmask 1045504   ;;  %s382_s16 = scalar_lea.vmem %s19358_s11, %s20947_s18 }
  0x11   : > { %19845 = vst [vmem:[#allocation2_spill] sm:$0xff] %v12851_v8  ;;  %19846 = vst [vmem:[#allocation3_spill] sm:$0xff] %v12853_v9  ;;  %v12855_v10 = vcombine.high %v433_v6, %v445_v7  ;;  %v457_v13 = vld [vmem:[%s19348_s1 + $0x180] sm:$0xff]  ;;  %3630 = vmatprep.subr.bf16.mxu0 %v12838_v3  ;;  %v12867_v14 = vcombine.high %v434_v11, %v446_v12  ;;  %v458_v16 = vld [vmem:[%s19348_s1 + $0x188] sm:$0xff]  ;;  %3712 = vmatprep.subr.bf16.mxu1 %v12851_v8  ;;  %vm19842_vm5 = vcmask 1039360   ;;  %vm19844_vm6 = vcmask 1031168  }
  0x12   : > { %v469_v15 = vld [vmem:[%s19348_s1 + $0x1e0] sm:$0xff]  ;;  %v470_v17 = vld [vmem:[%s19348_s1 + $0x1e8] sm:$0xff]  ;;  %3631 = vmatpush1.bf16.msra.mxu0 %v12843_v5  ;;  %v12880_v18 = vcombine.low %v433_v6, %v445_v7  ;;  %3713 = vmatpush1.bf16.msra.mxu1 %v12853_v9  ;;  %v12884_v19 = vcombine.low %v434_v11, %v446_v12  ;;  %19855 = vst [vmem:[#allocation11_spill] sm:$0xff] %v12961_v45  ;;  %s12990_s24 = scalar_lea.vmem %s19347_s0, %s12245_s30  ;;  %v459_v8 = vld [vmem:[%s19348_s1 + $0x190] sm:$0xff]  ;;  %vm6512_vm12 = vcmask 392192  }
  0x13   : > { %19847 = vst [vmem:[#allocation4_spill] sm:$0xff] %v12867_v14  ;;  %3632 = vmatprep.subr.bf16.mxu0 %v12855_v10  ;;  %v12886_v20 = vcombine.high %v457_v13, %v469_v15  ;;  %3714 = vmatprep.subr.bf16.mxu1 %v12867_v14  ;;  %v12889_v21 = vcombine.high %v458_v16, %v470_v17  ;;  %v481_v22 = vld [vmem:[%s19348_s1 + $0x240] sm:$0xff]  ;;  %v482_v24 = vld [vmem:[%s19348_s1 + $0x248] sm:$0xff]  ;;  %v411_v14 = vld [vmem:[%s19348_s1 + $0x10] sm:$0xff] }
  0x14   : > { %19848 = vst [vmem:[#allocation5_spill] sm:$0xff] %v12884_v19  ;;  %v493_v23 = vld [vmem:[%s19348_s1 + $0x2a0] sm:$0xff]  ;;  %v494_v25 = vld [vmem:[%s19348_s1 + $0x2a8] sm:$0xff]  ;;  %v12912_v27 = vcombine.low %v457_v13, %v469_v15  ;;  %v12916_v28 = vcombine.low %v458_v16, %v470_v17  ;;  %v12993_v54 = vsub.s32 %v390_v44, %v12961_v45 }
  0x15   : > { %19849 = vst [vmem:[#allocation6_spill] sm:$0xff] %v12889_v21  ;;  %v12918_v29 = vcombine.high %v481_v22, %v493_v23  ;;  %v12921_v30 = vcombine.high %v482_v24, %v494_v25  ;;  %v505_v31 = vld [vmem:[%s19348_s1 + $0x300] sm:$0xff]  ;;  %v506_v36 = vld [vmem:[%s19348_s1 + $0x308] sm:$0xff]  ;;  %v12942_v38 = vcombine.low %v481_v22, %v493_v23  ;;  %v12946_v39 = vcombine.low %v482_v24, %v494_v25 }
  0x16   : > { %3633 = vmatpush1.bf16.msra.mxu0 %v12880_v18  ;;  %3715 = vmatpush1.bf16.msra.mxu1 %v12884_v19  ;;  %19851 = vst [vmem:[#allocation7_spill] sm:$0xff] %v12916_v28  ;;  %v517_v32 = vld [vmem:[%s19348_s1 + $0x360] sm:$0xff]  ;;  %v518_v37 = vld [vmem:[%s19348_s1 + $0x368] sm:$0xff] }
  0x17   : > { %3634 = vmatprep.subr.bf16.mxu0 %v12886_v20  ;;  %3716 = vmatprep.subr.bf16.mxu1 %v12889_v21  ;;  %19852 = vst [vmem:[#allocation8_spill] sm:$0xff] %v12921_v30  ;;  %19853 = vst [vmem:[#allocation9_spill] sm:$0xff] %v12946_v39  ;;  %v12948_v40 = vcombine.high %v505_v31, %v517_v32  ;;  %v12951_v41 = vcombine.high %v506_v36, %v518_v37  ;;  %v529_v42 = vld [vmem:[%s19348_s1 + $0x3c0] sm:$0xff]  ;;  %v530_v46 = vld [vmem:[%s19348_s1 + $0x3c8] sm:$0xff] }
  0x18   : > { %v541_v43 = vld [vmem:[%s19348_s1 + $0x420] sm:$0xff]  ;;  %v542_v47 = vld [vmem:[%s19348_s1 + $0x428] sm:$0xff]  ;;  %v12970_v48 = vcombine.low %v505_v31, %v517_v32  ;;  %v12974_v49 = vcombine.low %v506_v36, %v518_v37 }
  0x19   : > { %19854 = vst [vmem:[#allocation10_spill] sm:$0xff] %v12951_v41  ;;  %v12976_v50 = vcombine.high %v529_v42, %v541_v43  ;;  %v12979_v51 = vcombine.high %v530_v46, %v542_v47  ;;  %v553_v52 = vld [vmem:[%s19348_s1 + $0x480] sm:$0xff]  ;;  %v554_v55 = vld [vmem:[%s19348_s1 + $0x488] sm:$0xff]  ;;  %v13002_v57 = vcombine.low %v529_v42, %v541_v43  ;;  %v13006_v58 = vcombine.low %v530_v46, %v542_v47 }
  0x1a   : > { %3635 = vmatpush1.bf16.msra.mxu0 %v12912_v27  ;;  %3717 = vmatpush1.bf16.msra.mxu1 %v12916_v28  ;;  %19856 = vst [vmem:[#allocation12_spill] sm:$0xff] %v12974_v49  ;;  %v565_v53 = vld [vmem:[%s19348_s1 + $0x4e0] sm:$0xff]  ;;  %v566_v56 = vld [vmem:[%s19348_s1 + $0x4e8] sm:$0xff] }
  0x1b   : > { %3636 = vmatprep.subr.bf16.mxu0 %v12918_v29  ;;  %3718 = vmatprep.subr.bf16.mxu1 %v12921_v30  ;;  %19857 = vst [vmem:[#allocation13_spill] sm:$0xff] %v12979_v51  ;;  %19858 = vst [vmem:[#allocation14_spill] sm:$0xff] %v13006_v58  ;;  %v13008_v59 = vcombine.high %v553_v52, %v565_v53  ;;  %v13011_v60 = vld [vmem:[%s12990_s24] sm:$0xff]  ;;  %v13014_v61 = vcombine.high %v554_v55, %v566_v56  ;;  %v578_v1 = vld [vmem:[%s19348_s1 + $0x548] sm:$0xff] }
  0x1c   : > { %v577_v62 = vld [vmem:[%s19348_s1 + $0x540] sm:$0xff]  ;;  %v13024_v0 = vrot.slane %v13011_v60, %v12993_v54  ;;  %v590_v2 = vld [vmem:[%s19348_s1 + $0x5a8] sm:$0xff]  ;;  %v13033_v4 = vcombine.low %v553_v52, %v565_v53  ;;  %v13039_v7 = vcombine.low %v554_v55, %v566_v56 }
  0x1d   : > { %19859 = vst [vmem:[#allocation15_spill] sm:$0xff] %v13014_v61  ;;  %v589_v63 = vld [vmem:[%s19348_s1 + $0x5a0] sm:$0xff]  ;;  %v13044_v12 = vcombine.high %v578_v1, %v590_v2  ;;  %v602_v17 = vld [vmem:[%s19348_s1 + $0x608] sm:$0xff]  ;;  %v13066_v24 = vcombine.low %v578_v1, %v590_v2 }
  0x1e   : > { %3637 = vmatpush1.bf16.msra.mxu0 %v12942_v38  ;;  %3719 = vmatpush1.bf16.msra.mxu1 %v12946_v39  ;;  %v402_v6 = vcombine.high %v13024_v0, %v13024_v0  ;;  %19860 = vst [vmem:[#allocation16_spill] sm:$0xff] %v13039_v7  ;;  %v13041_v11 = vcombine.high %v577_v62, %v589_v63  ;;  %v601_v13 = vld [vmem:[%s19348_s1 + $0x600] sm:$0xff]  ;;  %v614_v22 = vld [vmem:[%s19348_s1 + $0x668] sm:$0xff] }
  0x1f   : > { %3638 = vmatprep.subr.bf16.mxu0 %v12948_v40  ;;  %3720 = vmatprep.subr.bf16.mxu1 %v12951_v41  ;;  %19861 = vst [vmem:[#allocation17_spill] sm:$0xff] %v13044_v12  ;;  %v613_v15 = vld [vmem:[%s19348_s1 + $0x660] sm:$0xff]  ;;  %v13061_v23 = vcombine.low %v577_v62, %v589_v63  ;;  %19862 = vst [vmem:[#allocation18_spill] sm:$0xff] %v13066_v24  ;;  %v13071_v31 = vcombine.high %v602_v17, %v614_v22  ;;  %v626_v34 = vld [vmem:[%s19348_s1 + $0x6c8] sm:$0xff] }
  0x20   : > { %v13052_v16 = vpack.c.bf16 %v402_v6, %v402_v6  ;;  %v13068_v25 = vcombine.high %v601_v13, %v613_v15  ;;  %v625_v32 = vld [vmem:[%s19348_s1 + $0x6c0] sm:$0xff]  ;;  %v638_v36 = vld [vmem:[%s19348_s1 + $0x728] sm:$0xff]  ;;  %v13087_v37 = vcombine.low %v601_v13, %v613_v15  ;;  %v13091_v42 = vcombine.low %v602_v17, %v614_v22 }
  0x21   : > { %19863 = vst [vmem:[#allocation19_spill] sm:$0xff] %v13071_v31  ;;  %v637_v33 = vld [vmem:[%s19348_s1 + $0x720] sm:$0xff]  ;;  %v13096_v44 = vcombine.high %v626_v34, %v638_v36  ;;  %v650_v52 = vld [vmem:[%s19348_s1 + $0x788] sm:$0xff]  ;;  %v13115_v56 = vcombine.low %v626_v34, %v638_v36 }
  0x22   : > { %3639 = vmatpush1.bf16.msra.mxu0 %v12970_v48  ;;  %3721 = vmatpush1.bf16.msra.mxu1 %v12974_v49  ;;  %19864 = vst [vmem:[#allocation20_spill] sm:$0xff] %v13091_v42  ;;  %v13093_v43 = vcombine.high %v625_v32, %v637_v33  ;;  %v649_v46 = vld [vmem:[%s19348_s1 + $0x780] sm:$0xff]  ;;  %v662_v53 = vld [vmem:[%s19348_s1 + $0x7e8] sm:$0xff]  ;;  %v13111_v55 = vcombine.low %v625_v32, %v637_v33 }
  0x23   : > { %3640 = vmatprep.subr.bf16.mxu0 %v12976_v50  ;;  %3722 = vmatprep.subr.bf16.mxu1 %v12979_v51  ;;  %19865 = vst [vmem:[#allocation21_spill] sm:$0xff] %v13096_v44  ;;  %v661_v47 = vld [vmem:[%s19348_s1 + $0x7e0] sm:$0xff]  ;;  %19866 = vst [vmem:[#allocation22_spill] sm:$0xff] %v13115_v56  ;;  %v13120_v63 = vcombine.high %v650_v52, %v662_v53  ;;  %v674_v6 = vld [vmem:[%s19348_s1 + $0x848] sm:$0xff]  ;;  %v13139_v17 = vcombine.low %v650_v52, %v662_v53 }
  0x24   : > { %3662 = vmatprep.mubr.bf16.mxu0 %v13052_v16  ;;  %3744 = vmatprep.mubr.bf16.mxu1 %v13052_v16  ;;  %v13117_v62 = vcombine.high %v649_v46, %v661_v47  ;;  %v673_v1 = vld [vmem:[%s19348_s1 + $0x840] sm:$0xff]  ;;  %v686_v13 = vld [vmem:[%s19348_s1 + $0x8a8] sm:$0xff]  ;;  %v13135_v15 = vcombine.low %v649_v46, %v661_v47 }
  0x25   : > { %19867 = vst [vmem:[#allocation23_spill] sm:$0xff] %v13120_v63  ;;  %v685_v2 = vld [vmem:[%s19348_s1 + $0x8a0] sm:$0xff]  ;;  %19868 = vst [vmem:[#allocation24_spill] sm:$0xff] %v13139_v17  ;;  %v13144_v32 = vcombine.high %v674_v6, %v686_v13  ;;  %v698_v36 = vld [vmem:[%s19348_s1 + $0x908] sm:$0xff]  ;;  %v13163_v52 = vcombine.low %v674_v6, %v686_v13 }
  0x26   : > { %3641 = vmatpush1.bf16.msra.mxu0 %v13002_v57  ;;  %3723 = vmatpush1.bf16.msra.mxu1 %v13006_v58  ;;  %v13141_v22 = vcombine.high %v673_v1, %v685_v2  ;;  %v697_v33 = vld [vmem:[%s19348_s1 + $0x900] sm:$0xff]  ;;  %v710_v46 = vld [vmem:[%s19348_s1 + $0x968] sm:$0xff]  ;;  %v13159_v47 = vcombine.low %v673_v1, %v685_v2 }
  0x27   : > { %3642 = vmatprep.subr.bf16.mxu0 %v13008_v59  ;;  %3724 = vmatprep.subr.bf16.mxu1 %v13014_v61  ;;  %19869 = vst [vmem:[#allocation25_spill] sm:$0xff] %v13144_v32  ;;  %v709_v34 = vld [vmem:[%s19348_s1 + $0x960] sm:$0xff]  ;;  %19870 = vst [vmem:[#allocation26_spill] sm:$0xff] %v13163_v52  ;;  %v13168_v35 = vcombine.high %v698_v36, %v710_v46  ;;  %v722_v2 = vld [vmem:[%s19348_s1 + $0x9c8] sm:$0xff]  ;;  %v13187_v45 = vcombine.low %v698_v36, %v710_v46 }
  0x28   : > { %v13165_v53 = vcombine.high %v697_v33, %v709_v34  ;;  %v721_v26 = vld [vmem:[%s19348_s1 + $0x9c0] sm:$0xff]  ;;  %v734_v6 = vld [vmem:[%s19348_s1 + $0xa28] sm:$0xff]  ;;  %v13183_v13 = vcombine.low %v697_v33, %v709_v34 }
  0x29   : > { %19871 = vst [vmem:[#allocation27_spill] sm:$0xff] %v13168_v35  ;;  %v733_v1 = vld [vmem:[%s19348_s1 + $0xa20] sm:$0xff]  ;;  %19872 = vst [vmem:[#allocation28_spill] sm:$0xff] %v13187_v45  ;;  %v746_v34 = vld [vmem:[%s19348_s1 + $0xa88] sm:$0xff] }
  0x2a   : > { %3643 = vmatpush1.bf16.msra.mxu0 %v13033_v4  ;;  %3725 = vmatpush1.bf16.msra.mxu1 %v13039_v7  ;;  %v757_v33 = vld [vmem:[%s19348_s1 + $0xae0] sm:$0xff]  ;;  %v758_v36 = vld [vmem:[%s19348_s1 + $0xae8] sm:$0xff]  ;;  %v13207_v46 = vcombine.low %v721_v26, %v733_v1 }
  0x2b   : > { %3644 = vmatprep.subr.bf16.mxu0 %v13041_v11  ;;  %3726 = vmatprep.subr.bf16.mxu1 %v13044_v12  ;;  %v817_v12 = vld [vmem:[%s19348_s1 + $0xcc0] sm:$0xff] }
  0x2c   : > { %v841_v7 = vld [vmem:[%s19348_s1 + $0xd80] sm:$0xff] }
  0x2d   : > { %v853_v61 = vld [vmem:[%s19348_s1 + $0xde0] sm:$0xff] }
  0x2e   : > { %3645 = vmatpush1.bf16.msra.mxu0 %v13061_v23  ;;  %3727 = vmatpush1.bf16.msra.mxu1 %v13066_v24  ;;  %v865_v58 = vld [vmem:[%s19348_s1 + $0xe40] sm:$0xff] }
  0x2f   : > { %3646 = vmatprep.subr.bf16.mxu0 %v13068_v25  ;;  %3728 = vmatprep.subr.bf16.mxu1 %v13071_v31  ;;  %v793_v31 = vld [vmem:[%s19348_s1 + $0xc00] sm:$0xff] }
  0x30   : > { %v877_v51 = vld [vmem:[%s19348_s1 + $0xea0] sm:$0xff] }
  0x31   : > { %v889_v41 = vld [vmem:[%s19348_s1 + $0xf00] sm:$0xff] }
  0x32   : > { %3647 = vmatpush1.bf16.msra.mxu0 %v13087_v37  ;;  %3729 = vmatpush1.bf16.msra.mxu1 %v13091_v42  ;;  %v901_v39 = vld [vmem:[%s19348_s1 + $0xf60] sm:$0xff] }
  0x33   : > { %3648 = vmatprep.subr.bf16.mxu0 %v13093_v43  ;;  %3730 = vmatprep.subr.bf16.mxu1 %v13096_v44  ;;  %v769_v44 = vld [vmem:[%s19348_s1 + $0xb40] sm:$0xff]  ;;  %v13365_v30 = vcombine.high %v889_v41, %v901_v39 }
  0x34   : > { %v925_v28 = vld [vmem:[%s19348_s1 + $0x1020] sm:$0x77] }
  0x35   : > { %19897 = vst [vmem:[#allocation52_spill] sm:$0xff] %v13365_v30 }
  0x36   : > { %3649 = vmatpush1.bf16.msra.mxu0 %v13111_v55  ;;  %3731 = vmatpush1.bf16.msra.mxu1 %v13115_v56  ;;  %v13216_v56 = vcombine.high %v746_v34, %v758_v36 }
  0x37   : > { %3650 = vmatprep.subr.bf16.mxu0 %v13117_v62  ;;  %3732 = vmatprep.subr.bf16.mxu1 %v13120_v63  ;;  %v745_v63 = vld [vmem:[%s19348_s1 + $0xa80] sm:$0xff] }
  0x38   : > { %19875 = vst [vmem:[#allocation31_spill] sm:$0xff] %v13216_v56 }
  0x3a   : > { %3651 = vmatpush1.bf16.msra.mxu0 %v13135_v15  ;;  %3733 = vmatpush1.bf16.msra.mxu1 %v13139_v17  ;;  %v13192_v17 = vcombine.high %v722_v2, %v734_v6 }
  0x3b   : > { %3652 = vmatprep.subr.bf16.mxu0 %v13141_v22  ;;  %3734 = vmatprep.subr.bf16.mxu1 %v13144_v32  ;;  %v13189_v32 = vcombine.high %v721_v26, %v733_v1  ;;  %v781_v26 = vld [vmem:[%s19348_s1 + $0xba0] sm:$0xff]  ;;  %v770_v1 = vld [vmem:[%s19348_s1 + $0xb48] sm:$0xff] }
  0x3c   : > { %19873 = vst [vmem:[#allocation29_spill] sm:$0xff] %v13192_v17 }
  0x3e   : > { %3653 = vmatpush1.bf16.msra.mxu0 %v13159_v47  ;;  %3735 = vmatpush1.bf16.msra.mxu1 %v13163_v52  ;;  %v13213_v52 = vcombine.high %v745_v63, %v757_v33 }
  0x3f   : > { %3654 = vmatprep.subr.bf16.mxu0 %v13165_v53  ;;  %3736 = vmatprep.subr.bf16.mxu1 %v13168_v35  ;;  %v13211_v35 = vcombine.low %v722_v2, %v734_v6  ;;  %v782_v2 = vld [vmem:[%s19348_s1 + $0xba8] sm:$0xff]  ;;  %v13231_v6 = vcombine.low %v745_v63, %v757_v33  ;;  %v805_v63 = vld [vmem:[%s19348_s1 + $0xc60] sm:$0xff] }
  0x40   : > { %v13240_v42 = vcombine.high %v770_v1, %v782_v2  ;;  %v794_v33 = vld [vmem:[%s19348_s1 + $0xc08] sm:$0xff] }
  0x41   : > { %19874 = vst [vmem:[#allocation30_spill] sm:$0xff] %v13211_v35 }
  0x42   : > { %3655 = vmatpush1.bf16.msra.mxu0 %v13183_v13  ;;  %3737 = vmatpush1.bf16.msra.mxu1 %v13187_v45  ;;  %v13237_v45 = vcombine.high %v769_v44, %v781_v26  ;;  %19877 = vst [vmem:[#allocation33_spill] sm:$0xff] %v13240_v42 }
  0x43   : > { %3656 = vmatprep.subr.bf16.mxu0 %v13189_v32  ;;  %3738 = vmatprep.subr.bf16.mxu1 %v13192_v17  ;;  %v13235_v17 = vcombine.low %v746_v34, %v758_v36  ;;  %v806_v34 = vld [vmem:[%s19348_s1 + $0xc68] sm:$0xff]  ;;  %v13255_v36 = vcombine.low %v769_v44, %v781_v26  ;;  %v829_v44 = vld [vmem:[%s19348_s1 + $0xd20] sm:$0xff]  ;;  %v13274_v26 = vpack.c.bf16 %v13024_v0, %v13024_v0 }
  0x44   : > { %v13264_v24 = vcombine.high %v794_v33, %v806_v34  ;;  %v13289_v0 = vcombine.high %v817_v12, %v829_v44 }
  0x45   : > { %19876 = vst [vmem:[#allocation32_spill] sm:$0xff] %v13235_v17  ;;  %19878 = vst [vmem:[#allocation34_spill] sm:$0xff] %v13255_v36 }
  0x46   : > { %3657 = vmatpush1.bf16.msra.mxu0 %v13207_v46  ;;  %3739 = vmatpush1.bf16.msra.mxu1 %v13211_v35  ;;  %v13261_v35 = vcombine.high %v793_v31, %v805_v63  ;;  %19881 = vst [vmem:[#allocation37_spill] sm:$0xff] %v13264_v24  ;;  %19884 = vst [vmem:[#allocation40_spill] sm:$0xff] %v13289_v0 }
  0x47   : > { %3658 = vmatprep.subr.bf16.mxu0 %v13213_v52  ;;  %3740 = vmatprep.subr.bf16.mxu1 %v13216_v56  ;;  %v13259_v56 = vcombine.low %v770_v1, %v782_v2  ;;  %v818_v1 = vld [vmem:[%s19348_s1 + $0xcc8] sm:$0xff] }
  0x48   : > { %19880 = vst [vmem:[#allocation36_spill] sm:$0xff] %v13261_v35  ;;  %v830_v2 = vld [vmem:[%s19348_s1 + $0xd28] sm:$0xff] }
  0x49   : > { %19879 = vst [vmem:[#allocation35_spill] sm:$0xff] %v13259_v56 }
  0x4a   : > { %3659 = vmatpush1.bf16.msra.mxu0 %v13231_v6  ;;  %3741 = vmatpush1.bf16.msra.mxu1 %v13235_v17  ;;  %v13287_v17 = vcombine.low %v794_v33, %v806_v34  ;;  %v854_v33 = vld [vmem:[%s19348_s1 + $0xde8] sm:$0xff]  ;;  %v13309_v34 = vcombine.low %v817_v12, %v829_v44 }
  0x4b   : > { %3660 = vmatprep.subr.bf16.mxu0 %v13237_v45  ;;  %3742 = vmatprep.subr.bf16.mxu1 %v13240_v42  ;;  %v13283_v42 = vcombine.low %v793_v31, %v805_v63  ;;  %v842_v31 = vld [vmem:[%s19348_s1 + $0xd88] sm:$0xff]  ;;  %v13301_v63 = vcombine.high %v818_v1, %v830_v2 }
  0x4c   : > { %19883 = vst [vmem:[#allocation39_spill] sm:$0xff] %v13287_v17  ;;  %19886 = vst [vmem:[#allocation42_spill] sm:$0xff] %v13309_v34  ;;  %v866_v12 = vld [vmem:[%s19348_s1 + $0xe48] sm:$0xff]  ;;  %v13327_v44 = vcombine.high %v842_v31, %v854_v33  ;;  %v13339_v49 = vcombine.low %v842_v31, %v854_v33  ;;  %v13359_v33 = vcombine.low %v865_v58, %v877_v51 }
  0x4d   : > { %19882 = vst [vmem:[#allocation38_spill] sm:$0xff] %v13283_v42  ;;  %19885 = vst [vmem:[#allocation41_spill] sm:$0xff] %v13301_v63  ;;  %v902_v31 = vld [vmem:[%s19348_s1 + $0xf68] sm:$0xff] }
  0x4e   : > { %3661 = vmatpush1.bf16.msra.mxu0 %v13255_v36  ;;  %3743 = vmatpush1.bf16.msra.mxu1 %v13259_v56  ;;  %v13313_v56 = vcombine.low %v818_v1, %v830_v2  ;;  %19889 = vst [vmem:[#allocation45_spill] sm:$0xff] %v13327_v44  ;;  %v878_v1 = vld [vmem:[%s19348_s1 + $0xea8] sm:$0xff]  ;;  %v19890_v2 = vmov 0   ;;  %19892 = vst [vmem:[#allocation47_spill] sm:$0xff] %v13339_v49 }
  0x4f   : > { %3671 = vmatprep.subr.bf16.mxu0 %v13261_v35  ;;  %3753 = vmatprep.subr.bf16.mxu1 %v13264_v24  ;;  %v13315_v24 = vcombine.high %v841_v7, %v853_v61  ;;  %19895 = vst [vmem:[#allocation50_spill] sm:$0xff] %v13359_v33 }
  0x50   : > { %19887 = vst [vmem:[#allocation43_spill] sm:$0xff] %v13313_v56 }
  0x51   : > { %3663 = vmatmul.mubr.bf16.vlgmr.msra.gmra.mrb[0].mxu0 %v13274_v26  ;;  %3745 = vmatmul.mubr.bf16.vlgmr.msra.gmra.mrb[0].mxu1 %v13274_v26  ;;  %19888 = vst [vmem:[#allocation44_spill] sm:$0xff] %v13315_v24 }
  0x52   : > { %3672 = vmatpush1.bf16.msra.mxu0 %v13283_v42  ;;  %3754 = vmatpush1.bf16.msra.mxu1 %v13287_v17  ;;  %v13335_v17 = vcombine.low %v841_v7, %v853_v61  ;;  %v890_v61 = vld [vmem:[%s19348_s1 + $0xf08] sm:$0xff]  ;;  %v13353_v7 = vcombine.high %v866_v12, %v878_v1 }
  0x53   : > { %3673 = vmatprep.subr.bf16.mxu0 %v13289_v0  ;;  %3755 = vmatprep.subr.bf16.mxu1 %v13301_v63  ;;  %v13341_v63 = vcombine.high %v865_v58, %v877_v51  ;;  %v914_v51 = vld [vmem:[%s19348_s1 + $0xfc8] sm:$0xff]  ;;  %v13377_v58 = vcombine.high %v890_v61, %v902_v31  ;;  %v13389_v21 = vcombine.low %v890_v61, %v902_v31 }
  0x54   : > { %3703 = vmatprep.mubr.bf16.mxu0 %v19890_v2  ;;  %3785 = vmatprep.mubr.bf16.mxu1 %v19890_v2  ;;  %19891 = vst [vmem:[#allocation46_spill] sm:$0xff] %v13335_v17  ;;  %19894 = vst [vmem:[#allocation49_spill] sm:$0xff] %v13353_v7 }
  0x55   : > { %19893 = vst [vmem:[#allocation48_spill] sm:$0xff] %v13341_v63  ;;  %19898 = vst [vmem:[#allocation53_spill] sm:$0xff] %v13377_v58 }
  0x56   : > { %3674 = vmatpush1.bf16.msra.mxu0 %v13309_v34  ;;  %3756 = vmatpush1.bf16.msra.mxu1 %v13313_v56  ;;  %v13363_v56 = vcombine.low %v866_v12, %v878_v1  ;;  %v926_v12 = vld [vmem:[%s19348_s1 + $0x1028] sm:$0x77]  ;;  %v387_v1 = vcombine.high %v13011_v60, %v13011_v60  ;;  %19900 = vst [vmem:[#allocation55_spill] sm:$0xff] %v13389_v21  ;;  %v423_v60 = vld [vmem:[%s19348_s1 + $0x70] sm:$0xff] }
  0x57   : > { %3675 = vmatprep.subr.bf16.mxu0 %v13315_v24  ;;  %3757 = vmatprep.subr.bf16.mxu1 %v13327_v44  ;;  %v913_v44 = vld [vmem:[%s19348_s1 + $0xfc0] sm:$0xff]  ;;  %v11104_v61 = vcombine.low %v914_v51, %v926_v12  ;;  %v13444_v9 = vcombine.low %v411_v14, %v423_v60  ;;  %v703_v34 = vld [vmem:[%s19348_s1 + $0x930] sm:$0xff] }
  0x58   : > { %19896 = vst [vmem:[#allocation51_spill] sm:$0xff] %v13363_v56  ;;  %v11102_v19 = vcombine.low %v913_v44, %v925_v28 }
  0x59   : > { %19907 = vst [vmem:[#allocation62_spill] sm:$0xff] %v13444_v9 }
  0x5a   : > { %3676 = vmatpush1.bf16.msra.mxu0 %v13335_v17  ;;  %3758 = vmatpush1.bf16.msra.mxu1 %v13339_v49  ;;  %v13385_v49 = vcombine.low %v889_v41, %v901_v39  ;;  %v412_v39 = vld [vmem:[%s19348_s1 + $0x18] sm:$0xff]  ;;  %v13403_v41 = vcombine.high %v914_v51, %v926_v12  ;;  %v13416_v31 = vsel %vm19843_vm0, %v11102_v19, 0  ;;  %v435_v51 = vld [vmem:[%s19348_s1 + $0xd0] sm:$0xff]  ;;  %v13432_v19 = vsel %vm19843_vm0, %v11104_v61, 0 }
  0x5b   : > { %3677 = vmatprep.subr.bf16.mxu0 %v13341_v63  ;;  %3759 = vmatprep.subr.bf16.mxu1 %v13353_v7  ;;  %v13391_v7 = vcombine.high %v913_v44, %v925_v28  ;;  %v424_v28 = vld [vmem:[%s19348_s1 + $0x78] sm:$0xff]  ;;  %v13409_v44 = vrot.slane %v387_v1, %v12993_v54  ;;  %19903 = vst [vmem:[#allocation58_spill] sm:$0xff] %v13416_v31  ;;  %v447_v54 = vld [vmem:[%s19348_s1 + $0x130] sm:$0xff]  ;;  %19905 = vst [vmem:[#allocation60_spill] sm:$0xff] %v13432_v19 }
  0x5c   : > { %19899 = vst [vmem:[#allocation54_spill] sm:$0xff] %v13385_v49  ;;  %19902 = vst [vmem:[#allocation57_spill] sm:$0xff] %v13403_v41  ;;  %v436_v12 = vld [vmem:[%s19348_s1 + $0xd8] sm:$0xff]  ;;  %v13434_v1 = vcombine.high %v412_v39, %v424_v28  ;;  %v13448_v61 = vcombine.low %v412_v39, %v424_v28  ;;  %v13472_v28 = vcombine.low %v435_v51, %v447_v54 }
  0x5d   : > { %19901 = vst [vmem:[#allocation56_spill] sm:$0xff] %v13391_v7  ;;  %v472_v39 = vld [vmem:[%s19348_s1 + $0x1f8] sm:$0xff] }
  0x5e   : > { %3678 = vmatpush1.bf16.msra.mxu0 %v13359_v33  ;;  %3760 = vmatpush1.bf16.msra.mxu1 %v13363_v56  ;;  %19906 = vst [vmem:[#allocation61_spill] sm:$0xff] %v13434_v1  ;;  %v13441_v56 = vpack.c.bf16 %v13409_v44, %v13409_v44  ;;  %19908 = vst [vmem:[#allocation63_spill] sm:$0xff] %v13448_v61 }
  0x5f   : > { %3679 = vmatprep.subr.bf16.mxu0 %v13365_v30  ;;  %3761 = vmatprep.subr.bf16.mxu1 %v13377_v58  ;;  %v13418_v58 = vcombine.high %v411_v14, %v423_v60  ;;  %v460_v14 = vld [vmem:[%s19348_s1 + $0x198] sm:$0xff]  ;;  %19911 = vst [vmem:[#allocation66_spill] sm:$0xff] %v13472_v28 }
  0x61   : > { %19904 = vst [vmem:[#allocation59_spill] sm:$0xff] %v13418_v58 }
  0x62   : > { %3680 = vmatpush1.bf16.msra.mxu0 %v13385_v49  ;;  %3762 = vmatpush1.bf16.msra.mxu1 %v13389_v21  ;;  %v448_v21 = vld [vmem:[%s19348_s1 + $0x138] sm:$0xff]  ;;  %v425_v49 = vld [vmem:[%s19348_s1 + $0x80] sm:$0xff] }
  0x63   : > { %11126 = vmatprep.subr.msk.bf16.mxu0 %vm19843_vm0, %v13391_v7  ;;  %11128 = vmatprep.subr.msk.bf16.mxu1 %vm19843_vm0, %v13403_v41  ;;  %v13450_v41 = vcombine.high %v435_v51, %v447_v54  ;;  %v471_v7 = vld [vmem:[%s19348_s1 + $0x1f0] sm:$0xff]  ;;  %v13462_v60 = vcombine.high %v436_v12, %v448_v21  ;;  %v484_v51 = vld [vmem:[%s19348_s1 + $0x258] sm:$0xff]  ;;  %v13490_v54 = vcombine.high %v460_v14, %v472_v39 }
  0x65   : > { %19909 = vst [vmem:[#allocation64_spill] sm:$0xff] %v13450_v41  ;;  %19910 = vst [vmem:[#allocation65_spill] sm:$0xff] %v13462_v60 }
  0x66   : > { %3682 = vmatpush1.bf16.msra.mxu0 %v13416_v31  ;;  %3764 = vmatpush1.bf16.msra.mxu1 %v13432_v19  ;;  %v483_v19 = vld [vmem:[%s19348_s1 + $0x250] sm:$0xff]  ;;  %19914 = vst [vmem:[#allocation69_spill] sm:$0xff] %v13490_v54 }
  0x67   : > { %3794 = vmatprep.subr.bf16.mxu0 %v13418_v58  ;;  %3876 = vmatprep.subr.bf16.mxu1 %v13434_v1  ;;  %v13476_v58 = vcombine.low %v436_v12, %v448_v21  ;;  %v13478_v1 = vcombine.high %v459_v8, %v471_v7  ;;  %v495_v31 = vld [vmem:[%s19348_s1 + $0x2b0] sm:$0xff]  ;;  %v496_v21 = vld [vmem:[%s19348_s1 + $0x2b8] sm:$0xff]  ;;  %v13498_v12 = vcombine.low %v459_v8, %v471_v7 }
  0x68   : > { %v508_v8 = vld [vmem:[%s19348_s1 + $0x318] sm:$0xff]  ;;  %v13516_v7 = vcombine.high %v484_v51, %v496_v21 }
  0x69   : > { %11127 = vmatmul.mubr.msk.bf16.vlgmr.msra.gmra.mrb[0].mxu0 %vm3553_vm1, %v13441_v56  ;;  %11129 = vmatmul.mubr.msk.bf16.vlgmr.msra.gmra.mrb[0].mxu1 %vm3553_vm1, %v13441_v56  ;;  %19912 = vst [vmem:[#allocation67_spill] sm:$0xff] %v13476_v58  ;;  %19913 = vst [vmem:[#allocation68_spill] sm:$0xff] %v13478_v1 }
  0x6a   : > { %3795 = vmatpush1.bf16.msra.mxu0 %v13444_v9  ;;  %3877 = vmatpush1.bf16.msra.mxu1 %v13448_v61  ;;  %19915 = vst [vmem:[#allocation70_spill] sm:$0xff] %v13498_v12  ;;  %v13504_v9 = vcombine.high %v483_v19, %v495_v31  ;;  %v519_v61 = vld [vmem:[%s19348_s1 + $0x370] sm:$0xff]  ;;  %19918 = vst [vmem:[#allocation73_spill] sm:$0xff] %v13516_v7 }
  0x6b   : > { %3796 = vmatprep.subr.bf16.mxu0 %v13450_v41  ;;  %3878 = vmatprep.subr.bf16.mxu1 %v13462_v60  ;;  %v13502_v41 = vcombine.low %v460_v14, %v472_v39  ;;  %v507_v60 = vld [vmem:[%s19348_s1 + $0x310] sm:$0xff]  ;;  %v520_v14 = vld [vmem:[%s19348_s1 + $0x378] sm:$0xff]  ;;  %v13522_v39 = vcombine.low %v483_v19, %v495_v31 }
  0x6c   : > { %3826 = vmatprep.mubr.bf16.mxu0 %v13052_v16  ;;  %3908 = vmatprep.mubr.bf16.mxu1 %v13052_v16  ;;  %19917 = vst [vmem:[#allocation72_spill] sm:$0xff] %v13504_v9  ;;  %v532_v31 = vld [vmem:[%s19348_s1 + $0x3d8] sm:$0xff]  ;;  %v13540_v19 = vcombine.high %v508_v8, %v520_v14 }
  0x6d   : > { %19916 = vst [vmem:[#allocation71_spill] sm:$0xff] %v13502_v41  ;;  %19919 = vst [vmem:[#allocation74_spill] sm:$0xff] %v13522_v39 }
  0x6e   : > { %3797 = vmatpush1.bf16.msra.mxu0 %v13472_v28  ;;  %3879 = vmatpush1.bf16.msra.mxu1 %v13476_v58  ;;  %v13528_v28 = vcombine.high %v507_v60, %v519_v61  ;;  %v543_v58 = vld [vmem:[%s19348_s1 + $0x430] sm:$0xff]  ;;  %19922 = vst [vmem:[#allocation77_spill] sm:$0xff] %v13540_v19 }
  0x6f   : > { %3798 = vmatprep.subr.bf16.mxu0 %v13478_v1  ;;  %3880 = vmatprep.subr.bf16.mxu1 %v13490_v54  ;;  %v13526_v1 = vcombine.low %v484_v51, %v496_v21  ;;  %v531_v54 = vld [vmem:[%s19348_s1 + $0x3d0] sm:$0xff]  ;;  %v544_v51 = vld [vmem:[%s19348_s1 + $0x438] sm:$0xff]  ;;  %v13546_v21 = vcombine.low %v507_v60, %v519_v61 }
  0x70   : > { %19921 = vst [vmem:[#allocation76_spill] sm:$0xff] %v13528_v28  ;;  %v556_v61 = vld [vmem:[%s19348_s1 + $0x498] sm:$0xff]  ;;  %v13564_v60 = vcombine.high %v532_v31, %v544_v51 }
  0x71   : > { %19920 = vst [vmem:[#allocation75_spill] sm:$0xff] %v13526_v1  ;;  %19923 = vst [vmem:[#allocation78_spill] sm:$0xff] %v13546_v21 }
  0x72   : > { %3799 = vmatpush1.bf16.msra.mxu0 %v13498_v12  ;;  %3881 = vmatpush1.bf16.msra.mxu1 %v13502_v41  ;;  %v13552_v12 = vcombine.high %v531_v54, %v543_v58  ;;  %v567_v41 = vld [vmem:[%s19348_s1 + $0x4f0] sm:$0xff]  ;;  %19926 = vst [vmem:[#allocation81_spill] sm:$0xff] %v13564_v60 }
  0x73   : > { %3800 = vmatprep.subr.bf16.mxu0 %v13504_v9  ;;  %3882 = vmatprep.subr.bf16.mxu1 %v13516_v7  ;;  %v13550_v9 = vcombine.low %v508_v8, %v520_v14  ;;  %v555_v7 = vld [vmem:[%s19348_s1 + $0x490] sm:$0xff]  ;;  %v568_v8 = vld [vmem:[%s19348_s1 + $0x4f8] sm:$0xff]  ;;  %v13570_v14 = vcombine.low %v531_v54, %v543_v58 }
  0x74   : > { %19925 = vst [vmem:[#allocation80_spill] sm:$0xff] %v13552_v12  ;;  %v580_v58 = vld [vmem:[%s19348_s1 + $0x558] sm:$0xff]  ;;  %v13588_v54 = vcombine.high %v556_v61, %v568_v8 }
  0x75   : > { %19924 = vst [vmem:[#allocation79_spill] sm:$0xff] %v13550_v9  ;;  %19927 = vst [vmem:[#allocation82_spill] sm:$0xff] %v13570_v14 }
  0x76   : > { %3801 = vmatpush1.bf16.msra.mxu0 %v13522_v39  ;;  %3883 = vmatpush1.bf16.msra.mxu1 %v13526_v1  ;;  %v13576_v39 = vcombine.high %v555_v7, %v567_v41  ;;  %v591_v1 = vld [vmem:[%s19348_s1 + $0x5b0] sm:$0xff]  ;;  %19930 = vst [vmem:[#allocation85_spill] sm:$0xff] %v13588_v54 }
  0x77   : > { %3802 = vmatprep.subr.bf16.mxu0 %v13528_v28  ;;  %3884 = vmatprep.subr.bf16.mxu1 %v13540_v19  ;;  %v13574_v28 = vcombine.low %v532_v31, %v544_v51  ;;  %v579_v19 = vld [vmem:[%s19348_s1 + $0x550] sm:$0xff]  ;;  %v592_v31 = vld [vmem:[%s19348_s1 + $0x5b8] sm:$0xff]  ;;  %v13594_v51 = vcombine.low %v555_v7, %v567_v41 }
  0x78   : > { %19929 = vst [vmem:[#allocation84_spill] sm:$0xff] %v13576_v39  ;;  %v604_v41 = vld [vmem:[%s19348_s1 + $0x618] sm:$0xff]  ;;  %v13612_v7 = vcombine.high %v580_v58, %v592_v31 }
  0x79   : > { %19928 = vst [vmem:[#allocation83_spill] sm:$0xff] %v13574_v28  ;;  %19931 = vst [vmem:[#allocation86_spill] sm:$0xff] %v13594_v51 }
  0x7a   : > { %3803 = vmatpush1.bf16.msra.mxu0 %v13546_v21  ;;  %3885 = vmatpush1.bf16.msra.mxu1 %v13550_v9  ;;  %v13600_v21 = vcombine.high %v579_v19, %v591_v1  ;;  %v615_v9 = vld [vmem:[%s19348_s1 + $0x670] sm:$0xff]  ;;  %19934 = vst [vmem:[#allocation89_spill] sm:$0xff] %v13612_v7 }
  0x7b   : > { %3804 = vmatprep.subr.bf16.mxu0 %v13552_v12  ;;  %3886 = vmatprep.subr.bf16.mxu1 %v13564_v60  ;;  %v13598_v12 = vcombine.low %v556_v61, %v568_v8  ;;  %v603_v60 = vld [vmem:[%s19348_s1 + $0x610] sm:$0xff]  ;;  %v616_v61 = vld [vmem:[%s19348_s1 + $0x678] sm:$0xff]  ;;  %v13618_v8 = vcombine.low %v579_v19, %v591_v1 }
  0x7c   : > { %19933 = vst [vmem:[#allocation88_spill] sm:$0xff] %v13600_v21  ;;  %v628_v1 = vld [vmem:[%s19348_s1 + $0x6d8] sm:$0xff]  ;;  %v13636_v19 = vcombine.high %v604_v41, %v616_v61 }
  0x7d   : > { %19932 = vst [vmem:[#allocation87_spill] sm:$0xff] %v13598_v12  ;;  %19935 = vst [vmem:[#allocation90_spill] sm:$0xff] %v13618_v8 }
  0x7e   : > { %3805 = vmatpush1.bf16.msra.mxu0 %v13570_v14  ;;  %3887 = vmatpush1.bf16.msra.mxu1 %v13574_v28  ;;  %v13624_v14 = vcombine.high %v603_v60, %v615_v9  ;;  %v639_v28 = vld [vmem:[%s19348_s1 + $0x730] sm:$0xff]  ;;  %19938 = vst [vmem:[#allocation93_spill] sm:$0xff] %v13636_v19 }
  0x7f   : > { %3806 = vmatprep.subr.bf16.mxu0 %v13576_v39  ;;  %3888 = vmatprep.subr.bf16.mxu1 %v13588_v54  ;;  %v13622_v39 = vcombine.low %v580_v58, %v592_v31  ;;  %v627_v54 = vld [vmem:[%s19348_s1 + $0x6d0] sm:$0xff]  ;;  %v640_v58 = vld [vmem:[%s19348_s1 + $0x738] sm:$0xff]  ;;  %v13642_v31 = vcombine.low %v603_v60, %v615_v9 }
  0x80   : > { %19937 = vst [vmem:[#allocation92_spill] sm:$0xff] %v13624_v14  ;;  %v652_v9 = vld [vmem:[%s19348_s1 + $0x798] sm:$0xff]  ;;  %v13660_v60 = vcombine.high %v628_v1, %v640_v58 }
  0x81   : > { %19936 = vst [vmem:[#allocation91_spill] sm:$0xff] %v13622_v39  ;;  %19939 = vst [vmem:[#allocation94_spill] sm:$0xff] %v13642_v31 }
  0x82   : > { %3807 = vmatpush1.bf16.msra.mxu0 %v13594_v51  ;;  %3889 = vmatpush1.bf16.msra.mxu1 %v13598_v12  ;;  %v13648_v51 = vcombine.high %v627_v54, %v639_v28  ;;  %v663_v12 = vld [vmem:[%s19348_s1 + $0x7f0] sm:$0xff]  ;;  %19942 = vst [vmem:[#allocation97_spill] sm:$0xff] %v13660_v60 }
  0x83   : > { %3808 = vmatprep.subr.bf16.mxu0 %v13600_v21  ;;  %3890 = vmatprep.subr.bf16.mxu1 %v13612_v7  ;;  %v13646_v21 = vcombine.low %v604_v41, %v616_v61  ;;  %v651_v7 = vld [vmem:[%s19348_s1 + $0x790] sm:$0xff]  ;;  %v664_v41 = vld [vmem:[%s19348_s1 + $0x7f8] sm:$0xff]  ;;  %v13666_v61 = vcombine.low %v627_v54, %v639_v28 }
  0x84   : > { %19941 = vst [vmem:[#allocation96_spill] sm:$0xff] %v13648_v51  ;;  %v676_v28 = vld [vmem:[%s19348_s1 + $0x858] sm:$0xff]  ;;  %v13684_v54 = vcombine.high %v652_v9, %v664_v41 }
  0x85   : > { %19940 = vst [vmem:[#allocation95_spill] sm:$0xff] %v13646_v21  ;;  %19943 = vst [vmem:[#allocation98_spill] sm:$0xff] %v13666_v61 }
  0x86   : > { %3809 = vmatpush1.bf16.msra.mxu0 %v13618_v8  ;;  %3891 = vmatpush1.bf16.msra.mxu1 %v13622_v39  ;;  %v13672_v8 = vcombine.high %v651_v7, %v663_v12  ;;  %v687_v39 = vld [vmem:[%s19348_s1 + $0x8b0] sm:$0xff]  ;;  %19946 = vst [vmem:[#allocation101_spill] sm:$0xff] %v13684_v54 }
  0x87   : > { %3810 = vmatprep.subr.bf16.mxu0 %v13624_v14  ;;  %3892 = vmatprep.subr.bf16.mxu1 %v13636_v19  ;;  %v13670_v14 = vcombine.low %v628_v1, %v640_v58  ;;  %v675_v19 = vld [vmem:[%s19348_s1 + $0x850] sm:$0xff]  ;;  %v688_v1 = vld [vmem:[%s19348_s1 + $0x8b8] sm:$0xff]  ;;  %v13690_v58 = vcombine.low %v651_v7, %v663_v12 }
  0x88   : > { %19945 = vst [vmem:[#allocation100_spill] sm:$0xff] %v13672_v8  ;;  %v700_v12 = vld [vmem:[%s19348_s1 + $0x918] sm:$0xff]  ;;  %v13708_v7 = vcombine.high %v676_v28, %v688_v1 }
  0x89   : > { %19944 = vst [vmem:[#allocation99_spill] sm:$0xff] %v13670_v14  ;;  %19947 = vst [vmem:[#allocation102_spill] sm:$0xff] %v13690_v58 }
  0x8a   : > { %3811 = vmatpush1.bf16.msra.mxu0 %v13642_v31  ;;  %3893 = vmatpush1.bf16.msra.mxu1 %v13646_v21  ;;  %v13696_v31 = vcombine.high %v675_v19, %v687_v39  ;;  %v711_v21 = vld [vmem:[%s19348_s1 + $0x970] sm:$0xff]  ;;  %19950 = vst [vmem:[#allocation105_spill] sm:$0xff] %v13708_v7 }
  0x8b   : > { %3812 = vmatprep.subr.bf16.mxu0 %v13648_v51  ;;  %3894 = vmatprep.subr.bf16.mxu1 %v13660_v60  ;;  %v13694_v51 = vcombine.low %v652_v9, %v664_v41  ;;  %v699_v60 = vld [vmem:[%s19348_s1 + $0x910] sm:$0xff]  ;;  %v712_v9 = vld [vmem:[%s19348_s1 + $0x978] sm:$0xff]  ;;  %v13714_v41 = vcombine.low %v675_v19, %v687_v39 }
  0x8c   : > { %19949 = vst [vmem:[#allocation104_spill] sm:$0xff] %v13696_v31  ;;  %v724_v39 = vld [vmem:[%s19348_s1 + $0x9d8] sm:$0xff]  ;;  %v13732_v19 = vcombine.high %v700_v12, %v712_v9 }
  0x8d   : > { %19948 = vst [vmem:[#allocation103_spill] sm:$0xff] %v13694_v51  ;;  %19951 = vst [vmem:[#allocation106_spill] sm:$0xff] %v13714_v41 }
  0x8e   : > { %3813 = vmatpush1.bf16.msra.mxu0 %v13666_v61  ;;  %3895 = vmatpush1.bf16.msra.mxu1 %v13670_v14  ;;  %v13720_v61 = vcombine.high %v699_v60, %v711_v21  ;;  %v735_v14 = vld [vmem:[%s19348_s1 + $0xa30] sm:$0xff]  ;;  %19954 = vst [vmem:[#allocation109_spill] sm:$0xff] %v13732_v19 }
  0x8f   : > { %3814 = vmatprep.subr.bf16.mxu0 %v13672_v8  ;;  %3896 = vmatprep.subr.bf16.mxu1 %v13684_v54  ;;  %v13718_v8 = vcombine.low %v676_v28, %v688_v1  ;;  %v723_v54 = vld [vmem:[%s19348_s1 + $0x9d0] sm:$0xff]  ;;  %v736_v28 = vld [vmem:[%s19348_s1 + $0xa38] sm:$0xff]  ;;  %v13738_v1 = vcombine.low %v699_v60, %v711_v21 }
  0x90   : > { %19953 = vst [vmem:[#allocation108_spill] sm:$0xff] %v13720_v61  ;;  %v748_v21 = vld [vmem:[%s19348_s1 + $0xa98] sm:$0xff]  ;;  %v13756_v60 = vcombine.high %v724_v39, %v736_v28 }
  0x91   : > { %19952 = vst [vmem:[#allocation107_spill] sm:$0xff] %v13718_v8  ;;  %19955 = vst [vmem:[#allocation110_spill] sm:$0xff] %v13738_v1 }
  0x92   : > { %3815 = vmatpush1.bf16.msra.mxu0 %v13690_v58  ;;  %3897 = vmatpush1.bf16.msra.mxu1 %v13694_v51  ;;  %v13744_v58 = vcombine.high %v723_v54, %v735_v14  ;;  %v759_v51 = vld [vmem:[%s19348_s1 + $0xaf0] sm:$0xff]  ;;  %19958 = vst [vmem:[#allocation113_spill] sm:$0xff] %v13756_v60 }
  0x93   : > { %3816 = vmatprep.subr.bf16.mxu0 %v13696_v31  ;;  %3898 = vmatprep.subr.bf16.mxu1 %v13708_v7  ;;  %v13742_v31 = vcombine.low %v700_v12, %v712_v9  ;;  %v747_v7 = vld [vmem:[%s19348_s1 + $0xa90] sm:$0xff]  ;;  %v760_v12 = vld [vmem:[%s19348_s1 + $0xaf8] sm:$0xff]  ;;  %v13762_v9 = vcombine.low %v723_v54, %v735_v14 }
  0x94   : > { %19957 = vst [vmem:[#allocation112_spill] sm:$0xff] %v13744_v58  ;;  %v772_v14 = vld [vmem:[%s19348_s1 + $0xb58] sm:$0xff]  ;;  %v13780_v54 = vcombine.high %v748_v21, %v760_v12 }
  0x95   : > { %19956 = vst [vmem:[#allocation111_spill] sm:$0xff] %v13742_v31  ;;  %19959 = vst [vmem:[#allocation114_spill] sm:$0xff] %v13762_v9 }
  0x96   : > { %3817 = vmatpush1.bf16.msra.mxu0 %v13714_v41  ;;  %3899 = vmatpush1.bf16.msra.mxu1 %v13718_v8  ;;  %v13768_v41 = vcombine.high %v747_v7, %v759_v51  ;;  %v783_v8 = vld [vmem:[%s19348_s1 + $0xbb0] sm:$0xff]  ;;  %19962 = vst [vmem:[#allocation117_spill] sm:$0xff] %v13780_v54 }
  0x97   : > { %3818 = vmatprep.subr.bf16.mxu0 %v13720_v61  ;;  %3900 = vmatprep.subr.bf16.mxu1 %v13732_v19  ;;  %v13766_v61 = vcombine.low %v724_v39, %v736_v28  ;;  %v771_v19 = vld [vmem:[%s19348_s1 + $0xb50] sm:$0xff]  ;;  %v784_v39 = vld [vmem:[%s19348_s1 + $0xbb8] sm:$0xff]  ;;  %v13786_v28 = vcombine.low %v747_v7, %v759_v51 }
  0x98   : > { %19961 = vst [vmem:[#allocation116_spill] sm:$0xff] %v13768_v41  ;;  %v796_v51 = vld [vmem:[%s19348_s1 + $0xc18] sm:$0xff]  ;;  %v13804_v7 = vcombine.high %v772_v14, %v784_v39 }
  0x99   : > { %19960 = vst [vmem:[#allocation115_spill] sm:$0xff] %v13766_v61  ;;  %19963 = vst [vmem:[#allocation118_spill] sm:$0xff] %v13786_v28 }
  0x9a   : > { %3819 = vmatpush1.bf16.msra.mxu0 %v13738_v1  ;;  %3901 = vmatpush1.bf16.msra.mxu1 %v13742_v31  ;;  %v13792_v1 = vcombine.high %v771_v19, %v783_v8  ;;  %v807_v31 = vld [vmem:[%s19348_s1 + $0xc70] sm:$0xff]  ;;  %19966 = vst [vmem:[#allocation121_spill] sm:$0xff] %v13804_v7 }
  0x9b   : > { %3820 = vmatprep.subr.bf16.mxu0 %v13744_v58  ;;  %3902 = vmatprep.subr.bf16.mxu1 %v13756_v60  ;;  %v13790_v58 = vcombine.low %v748_v21, %v760_v12  ;;  %v795_v60 = vld [vmem:[%s19348_s1 + $0xc10] sm:$0xff]  ;;  %v808_v21 = vld [vmem:[%s19348_s1 + $0xc78] sm:$0xff]  ;;  %v13810_v12 = vcombine.low %v771_v19, %v783_v8 }
  0x9c   : > { %19965 = vst [vmem:[#allocation120_spill] sm:$0xff] %v13792_v1  ;;  %v820_v8 = vld [vmem:[%s19348_s1 + $0xcd8] sm:$0xff]  ;;  %v13828_v19 = vcombine.high %v796_v51, %v808_v21 }
  0x9d   : > { %19964 = vst [vmem:[#allocation119_spill] sm:$0xff] %v13790_v58  ;;  %19967 = vst [vmem:[#allocation122_spill] sm:$0xff] %v13810_v12 }
  0x9e   : > { %3821 = vmatpush1.bf16.msra.mxu0 %v13762_v9  ;;  %3903 = vmatpush1.bf16.msra.mxu1 %v13766_v61  ;;  %v13816_v9 = vcombine.high %v795_v60, %v807_v31  ;;  %v831_v61 = vld [vmem:[%s19348_s1 + $0xd30] sm:$0xff]  ;;  %19970 = vst [vmem:[#allocation125_spill] sm:$0xff] %v13828_v19 }
  0x9f   : > { %3822 = vmatprep.subr.bf16.mxu0 %v13768_v41  ;;  %3904 = vmatprep.subr.bf16.mxu1 %v13780_v54  ;;  %v13814_v41 = vcombine.low %v772_v14, %v784_v39  ;;  %v819_v54 = vld [vmem:[%s19348_s1 + $0xcd0] sm:$0xff]  ;;  %v832_v14 = vld [vmem:[%s19348_s1 + $0xd38] sm:$0xff]  ;;  %v13834_v39 = vcombine.low %v795_v60, %v807_v31 }
  0xa0   : > { %19969 = vst [vmem:[#allocation124_spill] sm:$0xff] %v13816_v9  ;;  %v844_v31 = vld [vmem:[%s19348_s1 + $0xd98] sm:$0xff]  ;;  %v13852_v60 = vcombine.high %v820_v8, %v832_v14 }
  0xa1   : > { %19968 = vst [vmem:[#allocation123_spill] sm:$0xff] %v13814_v41  ;;  %19971 = vst [vmem:[#allocation126_spill] sm:$0xff] %v13834_v39 }
  0xa2   : > { %3823 = vmatpush1.bf16.msra.mxu0 %v13786_v28  ;;  %3905 = vmatpush1.bf16.msra.mxu1 %v13790_v58  ;;  %v13840_v28 = vcombine.high %v819_v54, %v831_v61  ;;  %v855_v58 = vld [vmem:[%s19348_s1 + $0xdf0] sm:$0xff]  ;;  %19974 = vst [vmem:[#allocation129_spill] sm:$0xff] %v13852_v60 }
  0xa3   : > { %3824 = vmatprep.subr.bf16.mxu0 %v13792_v1  ;;  %3906 = vmatprep.subr.bf16.mxu1 %v13804_v7  ;;  %v13838_v1 = vcombine.low %v796_v51, %v808_v21  ;;  %v843_v7 = vld [vmem:[%s19348_s1 + $0xd90] sm:$0xff]  ;;  %v856_v51 = vld [vmem:[%s19348_s1 + $0xdf8] sm:$0xff]  ;;  %v13860_v21 = vcombine.low %v819_v54, %v831_v61 }
  0xa4   : > { %19973 = vst [vmem:[#allocation128_spill] sm:$0xff] %v13840_v28  ;;  %v868_v61 = vld [vmem:[%s19348_s1 + $0xe58] sm:$0xff]  ;;  %v13878_v54 = vcombine.high %v844_v31, %v856_v51 }
  0xa5   : > { %19972 = vst [vmem:[#allocation127_spill] sm:$0xff] %v13838_v1  ;;  %19975 = vst [vmem:[#allocation130_spill] sm:$0xff] %v13860_v21 }
  0xa6   : > { %3825 = vmatpush1.bf16.msra.mxu0 %v13810_v12  ;;  %3907 = vmatpush1.bf16.msra.mxu1 %v13814_v41  ;;  %v13866_v12 = vcombine.high %v843_v7, %v855_v58  ;;  %19978 = vst [vmem:[#allocation133_spill] sm:$0xff] %v13878_v54  ;;  %v903_v41 = vld [vmem:[%s19348_s1 + $0xf70] sm:$0xff] }
  0xa7   : > { %3835 = vmatprep.subr.bf16.mxu0 %v13816_v9  ;;  %3917 = vmatprep.subr.bf16.mxu1 %v13828_v19  ;;  %v13864_v9 = vcombine.low %v820_v8, %v832_v14  ;;  %v867_v19 = vld [vmem:[%s19348_s1 + $0xe50] sm:$0xff]  ;;  %v880_v8 = vld [vmem:[%s19348_s1 + $0xeb8] sm:$0xff]  ;;  %v13886_v14 = vcombine.low %v843_v7, %v855_v58 }
  0xa8   : > { %19977 = vst [vmem:[#allocation132_spill] sm:$0xff] %v13866_v12  ;;  %v892_v58 = vld [vmem:[%s19348_s1 + $0xf18] sm:$0xff]  ;;  %v13904_v7 = vcombine.high %v868_v61, %v880_v8 }
  0xa9   : > { %3827 = vmatmul.mubr.bf16.vlgmr.msra.gmra.mrb[4].mxu0 %v13274_v26  ;;  %3909 = vmatmul.mubr.bf16.vlgmr.msra.gmra.mrb[4].mxu1 %v13274_v26  ;;  %19976 = vst [vmem:[#allocation131_spill] sm:$0xff] %v13864_v9  ;;  %19979 = vst [vmem:[#allocation134_spill] sm:$0xff] %v13886_v14 }
  0xaa   : > { %3836 = vmatpush1.bf16.msra.mxu0 %v13834_v39  ;;  %3918 = vmatpush1.bf16.msra.mxu1 %v13838_v1  ;;  %v879_v39 = vld [vmem:[%s19348_s1 + $0xeb0] sm:$0xff]  ;;  %19982 = vst [vmem:[#allocation137_spill] sm:$0xff] %v13904_v7 }
  0xab   : > { %3837 = vmatprep.subr.bf16.mxu0 %v13840_v28  ;;  %3919 = vmatprep.subr.bf16.mxu1 %v13852_v60  ;;  %v13890_v28 = vcombine.low %v844_v31, %v856_v51  ;;  %v13892_v60 = vcombine.high %v867_v19, %v879_v39  ;;  %v891_v1 = vld [vmem:[%s19348_s1 + $0xf10] sm:$0xff]  ;;  %v904_v31 = vld [vmem:[%s19348_s1 + $0xf78] sm:$0xff]  ;;  %v13910_v51 = vcombine.low %v867_v19, %v879_v39 }
  0xac   : > { %3867 = vmatprep.mubr.bf16.mxu0 %v19890_v2  ;;  %3949 = vmatprep.mubr.bf16.mxu1 %v19890_v2  ;;  %v916_v19 = vld [vmem:[%s19348_s1 + $0xfd8] sm:$0xff]  ;;  %v13928_v39 = vcombine.high %v892_v58, %v904_v31 }
  0xad   : > { %19980 = vst [vmem:[#allocation135_spill] sm:$0xff] %v13890_v28  ;;  %19981 = vst [vmem:[#allocation136_spill] sm:$0xff] %v13892_v60 }
  0xae   : > { %3838 = vmatpush1.bf16.msra.mxu0 %v13860_v21  ;;  %3920 = vmatpush1.bf16.msra.mxu1 %v13864_v9  ;;  %19983 = vst [vmem:[#allocation138_spill] sm:$0xff] %v13910_v51  ;;  %v13916_v21 = vcombine.high %v891_v1, %v903_v41  ;;  %v927_v9 = vld [vmem:[%s19348_s1 + $0x1030] sm:$0x77]  ;;  %19986 = vst [vmem:[#allocation141_spill] sm:$0xff] %v13928_v39 }
  0xaf   : > { %3839 = vmatprep.subr.bf16.mxu0 %v13866_v12  ;;  %3921 = vmatprep.subr.bf16.mxu1 %v13878_v54  ;;  %v13914_v12 = vcombine.low %v868_v61, %v880_v8  ;;  %v915_v54 = vld [vmem:[%s19348_s1 + $0xfd0] sm:$0xff]  ;;  %v928_v61 = vld [vmem:[%s19348_s1 + $0x1038] sm:$0x77]  ;;  %v13934_v8 = vcombine.low %v891_v1, %v903_v41  ;;  %v414_v41 = vld [vmem:[%s19348_s1 + $0x28] sm:$0xff] }
  0xb0   : > { %19985 = vst [vmem:[#allocation140_spill] sm:$0xff] %v13916_v21  ;;  %v13952_v1 = vcombine.high %v916_v19, %v928_v61 }
  0xb1   : > { %19984 = vst [vmem:[#allocation139_spill] sm:$0xff] %v13914_v12  ;;  %19987 = vst [vmem:[#allocation142_spill] sm:$0xff] %v13934_v8 }
  0xb2   : > { %3840 = vmatpush1.bf16.msra.mxu0 %v13886_v14  ;;  %3922 = vmatpush1.bf16.msra.mxu1 %v13890_v28  ;;  %v13940_v14 = vcombine.high %v915_v54, %v927_v9  ;;  %v11106_v28 = vcombine.low %v915_v54, %v927_v9  ;;  %19990 = vst [vmem:[#allocation145_spill] sm:$0xff] %v13952_v1  ;;  %v426_v9 = vld [vmem:[%s19348_s1 + $0x88] sm:$0xff] }
  0xb3   : > { %3841 = vmatprep.subr.bf16.mxu0 %v13892_v60  ;;  %3923 = vmatprep.subr.bf16.mxu1 %v13904_v7  ;;  %v13938_v60 = vcombine.low %v892_v58, %v904_v31  ;;  %v413_v7 = vld [vmem:[%s19348_s1 + $0x20] sm:$0xff]  ;;  %v11108_v58 = vcombine.low %v916_v19, %v928_v61 }
  0xb4   : > { %19989 = vst [vmem:[#allocation144_spill] sm:$0xff] %v13940_v14  ;;  %v13962_v54 = vsel %vm19843_vm0, %v11106_v28, 0  ;;  %v13964_v31 = vcombine.high %v413_v7, %v425_v49  ;;  %v437_v19 = vld [vmem:[%s19348_s1 + $0xe0] sm:$0xff] }
  0xb5   : > { %19988 = vst [vmem:[#allocation143_spill] sm:$0xff] %v13938_v60  ;;  %19991 = vst [vmem:[#allocation146_spill] sm:$0xff] %v13962_v54  ;;  %v449_v61 = vld [vmem:[%s19348_s1 + $0x140] sm:$0xff]  ;;  %v13978_v28 = vsel %vm19843_vm0, %v11108_v58, 0 }
  0xb6   : > { %3842 = vmatpush1.bf16.msra.mxu0 %v13910_v51  ;;  %3924 = vmatpush1.bf16.msra.mxu1 %v13914_v12  ;;  %19992 = vst [vmem:[#allocation147_spill] sm:$0xff] %v13964_v31  ;;  %19993 = vst [vmem:[#allocation148_spill] sm:$0xff] %v13978_v28  ;;  %v13986_v51 = vcombine.low %v413_v7, %v425_v49  ;;  %v461_v58 = vld [vmem:[%s19348_s1 + $0x1a0] sm:$0xff]  ;;  %v462_v49 = vld [vmem:[%s19348_s1 + $0x1a8] sm:$0xff] }
  0xb7   : > { %3843 = vmatprep.subr.bf16.mxu0 %v13916_v21  ;;  %3925 = vmatprep.subr.bf16.mxu1 %v13928_v39  ;;  %v450_v21 = vld [vmem:[%s19348_s1 + $0x148] sm:$0xff]  ;;  %v473_v39 = vld [vmem:[%s19348_s1 + $0x200] sm:$0xff]  ;;  %v427_v12 = vld [vmem:[%s19348_s1 + $0x90] sm:$0xff] }
  0xb8   : > { %19995 = vst [vmem:[#allocation150_spill] sm:$0xff] %v13986_v51 }
  0xba   : > { %3844 = vmatpush1.bf16.msra.mxu0 %v13934_v8  ;;  %3926 = vmatpush1.bf16.msra.mxu1 %v13938_v60  ;;  %v438_v8 = vld [vmem:[%s19348_s1 + $0xe8] sm:$0xff]  ;;  %v13990_v60 = vcombine.low %v414_v41, %v426_v9 }
  0xbb   : > { %11130 = vmatprep.subr.msk.bf16.mxu0 %vm19843_vm0, %v13940_v14  ;;  %11132 = vmatprep.subr.msk.bf16.mxu1 %vm19843_vm0, %v13952_v1  ;;  %v13980_v14 = vcombine.high %v414_v41, %v426_v9  ;;  %v13992_v1 = vcombine.high %v437_v19, %v449_v61  ;;  %v14004_v7 = vcombine.high %v438_v8, %v450_v21  ;;  %v474_v41 = vld [vmem:[%s19348_s1 + $0x208] sm:$0xff] }
  0xbc   : > { %19996 = vst [vmem:[#allocation151_spill] sm:$0xff] %v13990_v60  ;;  %v14014_v9 = vcombine.low %v437_v19, %v449_v61  ;;  %v486_v19 = vld [vmem:[%s19348_s1 + $0x268] sm:$0xff]  ;;  %v14032_v61 = vcombine.high %v462_v49, %v474_v41 }
  0xbd   : > { %19994 = vst [vmem:[#allocation149_spill] sm:$0xff] %v13980_v14  ;;  %19997 = vst [vmem:[#allocation152_spill] sm:$0xff] %v13992_v1 }
  0xbe   : > { %3846 = vmatpush1.bf16.msra.mxu0 %v13962_v54  ;;  %3928 = vmatpush1.bf16.msra.mxu1 %v13978_v28  ;;  %19998 = vst [vmem:[#allocation153_spill] sm:$0xff] %v14004_v7  ;;  %19999 = vst [vmem:[#allocation154_spill] sm:$0xff] %v14014_v9  ;;  %v14020_v54 = vcombine.high %v461_v58, %v473_v39  ;;  %v497_v28 = vld [vmem:[%s19348_s1 + $0x2c0] sm:$0xff] }
  0xbf   : > { %3958 = vmatprep.subr.bf16.mxu0 %v13964_v31  ;;  %4040 = vmatprep.subr.bf16.mxu1 %v13980_v14  ;;  %v14018_v31 = vcombine.low %v438_v8, %v450_v21  ;;  %v485_v14 = vld [vmem:[%s19348_s1 + $0x260] sm:$0xff]  ;;  %20002 = vst [vmem:[#allocation157_spill] sm:$0xff] %v14032_v61  ;;  %v498_v21 = vld [vmem:[%s19348_s1 + $0x2c8] sm:$0xff]  ;;  %v14040_v8 = vcombine.low %v461_v58, %v473_v39 }
  0xc0   : > { %20001 = vst [vmem:[#allocation156_spill] sm:$0xff] %v14020_v54  ;;  %v510_v39 = vld [vmem:[%s19348_s1 + $0x328] sm:$0xff]  ;;  %v14058_v58 = vcombine.high %v486_v19, %v498_v21 }
  0xc1   : > { %11131 = vmatmul.mubr.msk.bf16.vlgmr.msra.gmra.mrb[4].mxu0 %vm3553_vm1, %v13441_v56  ;;  %11133 = vmatmul.mubr.msk.bf16.vlgmr.msra.gmra.mrb[4].mxu1 %vm3553_vm1, %v13441_v56  ;;  %20000 = vst [vmem:[#allocation155_spill] sm:$0xff] %v14018_v31  ;;  %20003 = vst [vmem:[#allocation158_spill] sm:$0xff] %v14040_v8 }
  0xc2   : > { %3959 = vmatpush1.bf16.msra.mxu0 %v13986_v51  ;;  %4041 = vmatpush1.bf16.msra.mxu1 %v13990_v60  ;;  %v14046_v51 = vcombine.high %v485_v14, %v497_v28  ;;  %v521_v60 = vld [vmem:[%s19348_s1 + $0x380] sm:$0xff]  ;;  %20006 = vst [vmem:[#allocation161_spill] sm:$0xff] %v14058_v58 }
  0xc3   : > { %3960 = vmatprep.subr.bf16.mxu0 %v13992_v1  ;;  %4042 = vmatprep.subr.bf16.mxu1 %v14004_v7  ;;  %v14044_v1 = vcombine.low %v462_v49, %v474_v41  ;;  %v509_v7 = vld [vmem:[%s19348_s1 + $0x320] sm:$0xff]  ;;  %v522_v49 = vld [vmem:[%s19348_s1 + $0x388] sm:$0xff]  ;;  %v14064_v41 = vcombine.low %v485_v14, %v497_v28 }
  0xc4   : > { %3990 = vmatprep.mubr.bf16.mxu0 %v13052_v16  ;;  %4072 = vmatprep.mubr.bf16.mxu1 %v13052_v16  ;;  %20005 = vst [vmem:[#allocation160_spill] sm:$0xff] %v14046_v51  ;;  %v534_v14 = vld [vmem:[%s19348_s1 + $0x3e8] sm:$0xff]  ;;  %v14082_v28 = vcombine.high %v510_v39, %v522_v49 }
  0xc5   : > { %20004 = vst [vmem:[#allocation159_spill] sm:$0xff] %v14044_v1  ;;  %20007 = vst [vmem:[#allocation162_spill] sm:$0xff] %v14064_v41 }
  0xc6   : > { %3961 = vmatpush1.bf16.msra.mxu0 %v14014_v9  ;;  %4043 = vmatpush1.bf16.msra.mxu1 %v14018_v31  ;;  %v14070_v9 = vcombine.high %v509_v7, %v521_v60  ;;  %v545_v31 = vld [vmem:[%s19348_s1 + $0x440] sm:$0xff]  ;;  %20010 = vst [vmem:[#allocation165_spill] sm:$0xff] %v14082_v28 }
  0xc7   : > { %3962 = vmatprep.subr.bf16.mxu0 %v14020_v54  ;;  %4044 = vmatprep.subr.bf16.mxu1 %v14032_v61  ;;  %v14068_v54 = vcombine.low %v486_v19, %v498_v21  ;;  %v533_v61 = vld [vmem:[%s19348_s1 + $0x3e0] sm:$0xff]  ;;  %v546_v19 = vld [vmem:[%s19348_s1 + $0x448] sm:$0xff]  ;;  %v14088_v21 = vcombine.low %v509_v7, %v521_v60 }
  0xc8   : > { %20009 = vst [vmem:[#allocation164_spill] sm:$0xff] %v14070_v9  ;;  %v558_v60 = vld [vmem:[%s19348_s1 + $0x4a8] sm:$0xff]  ;;  %v14106_v7 = vcombine.high %v534_v14, %v546_v19 }
  0xc9   : > { %20008 = vst [vmem:[#allocation163_spill] sm:$0xff] %v14068_v54  ;;  %20011 = vst [vmem:[#allocation166_spill] sm:$0xff] %v14088_v21 }
  0xca   : > { %3963 = vmatpush1.bf16.msra.mxu0 %v14040_v8  ;;  %4045 = vmatpush1.bf16.msra.mxu1 %v14044_v1  ;;  %v14094_v8 = vcombine.high %v533_v61, %v545_v31  ;;  %v569_v1 = vld [vmem:[%s19348_s1 + $0x500] sm:$0xff]  ;;  %20014 = vst [vmem:[#allocation169_spill] sm:$0xff] %v14106_v7 }
  0xcb   : > { %3964 = vmatprep.subr.bf16.mxu0 %v14046_v51  ;;  %4046 = vmatprep.subr.bf16.mxu1 %v14058_v58  ;;  %v14092_v51 = vcombine.low %v510_v39, %v522_v49  ;;  %v557_v58 = vld [vmem:[%s19348_s1 + $0x4a0] sm:$0xff]  ;;  %v570_v39 = vld [vmem:[%s19348_s1 + $0x508] sm:$0xff]  ;;  %v14112_v49 = vcombine.low %v533_v61, %v545_v31 }
  0xcc   : > { %20013 = vst [vmem:[#allocation168_spill] sm:$0xff] %v14094_v8  ;;  %v582_v31 = vld [vmem:[%s19348_s1 + $0x568] sm:$0xff]  ;;  %v14130_v61 = vcombine.high %v558_v60, %v570_v39 }
  0xcd   : > { %20012 = vst [vmem:[#allocation167_spill] sm:$0xff] %v14092_v51  ;;  %20015 = vst [vmem:[#allocation170_spill] sm:$0xff] %v14112_v49 }
  0xce   : > { %3965 = vmatpush1.bf16.msra.mxu0 %v14064_v41  ;;  %4047 = vmatpush1.bf16.msra.mxu1 %v14068_v54  ;;  %v14118_v41 = vcombine.high %v557_v58, %v569_v1  ;;  %v593_v54 = vld [vmem:[%s19348_s1 + $0x5c0] sm:$0xff]  ;;  %20018 = vst [vmem:[#allocation173_spill] sm:$0xff] %v14130_v61 }
  0xcf   : > { %3966 = vmatprep.subr.bf16.mxu0 %v14070_v9  ;;  %4048 = vmatprep.subr.bf16.mxu1 %v14082_v28  ;;  %v14116_v9 = vcombine.low %v534_v14, %v546_v19  ;;  %v581_v28 = vld [vmem:[%s19348_s1 + $0x560] sm:$0xff]  ;;  %v594_v14 = vld [vmem:[%s19348_s1 + $0x5c8] sm:$0xff]  ;;  %v14136_v19 = vcombine.low %v557_v58, %v569_v1 }
  0xd0   : > { %20017 = vst [vmem:[#allocation172_spill] sm:$0xff] %v14118_v41  ;;  %v606_v1 = vld [vmem:[%s19348_s1 + $0x628] sm:$0xff]  ;;  %v14154_v58 = vcombine.high %v582_v31, %v594_v14 }
  0xd1   : > { %20016 = vst [vmem:[#allocation171_spill] sm:$0xff] %v14116_v9  ;;  %20019 = vst [vmem:[#allocation174_spill] sm:$0xff] %v14136_v19 }
  0xd2   : > { %3967 = vmatpush1.bf16.msra.mxu0 %v14088_v21  ;;  %4049 = vmatpush1.bf16.msra.mxu1 %v14092_v51  ;;  %v14142_v21 = vcombine.high %v581_v28, %v593_v54  ;;  %v617_v51 = vld [vmem:[%s19348_s1 + $0x680] sm:$0xff]  ;;  %20022 = vst [vmem:[#allocation177_spill] sm:$0xff] %v14154_v58 }
  0xd3   : > { %3968 = vmatprep.subr.bf16.mxu0 %v14094_v8  ;;  %4050 = vmatprep.subr.bf16.mxu1 %v14106_v7  ;;  %v14140_v8 = vcombine.low %v558_v60, %v570_v39  ;;  %v605_v7 = vld [vmem:[%s19348_s1 + $0x620] sm:$0xff]  ;;  %v618_v60 = vld [vmem:[%s19348_s1 + $0x688] sm:$0xff]  ;;  %v14160_v39 = vcombine.low %v581_v28, %v593_v54 }
  0xd4   : > { %20021 = vst [vmem:[#allocation176_spill] sm:$0xff] %v14142_v21  ;;  %v630_v54 = vld [vmem:[%s19348_s1 + $0x6e8] sm:$0xff]  ;;  %v14178_v28 = vcombine.high %v606_v1, %v618_v60 }
  0xd5   : > { %20020 = vst [vmem:[#allocation175_spill] sm:$0xff] %v14140_v8  ;;  %20023 = vst [vmem:[#allocation178_spill] sm:$0xff] %v14160_v39 }
  0xd6   : > { %3969 = vmatpush1.bf16.msra.mxu0 %v14112_v49  ;;  %4051 = vmatpush1.bf16.msra.mxu1 %v14116_v9  ;;  %v14166_v49 = vcombine.high %v605_v7, %v617_v51  ;;  %v641_v9 = vld [vmem:[%s19348_s1 + $0x740] sm:$0xff]  ;;  %20026 = vst [vmem:[#allocation181_spill] sm:$0xff] %v14178_v28 }
  0xd7   : > { %3970 = vmatprep.subr.bf16.mxu0 %v14118_v41  ;;  %4052 = vmatprep.subr.bf16.mxu1 %v14130_v61  ;;  %v14164_v41 = vcombine.low %v582_v31, %v594_v14  ;;  %v629_v61 = vld [vmem:[%s19348_s1 + $0x6e0] sm:$0xff]  ;;  %v642_v31 = vld [vmem:[%s19348_s1 + $0x748] sm:$0xff]  ;;  %v14184_v14 = vcombine.low %v605_v7, %v617_v51 }
  0xd8   : > { %20025 = vst [vmem:[#allocation180_spill] sm:$0xff] %v14166_v49  ;;  %v654_v51 = vld [vmem:[%s19348_s1 + $0x7a8] sm:$0xff]  ;;  %v14202_v7 = vcombine.high %v630_v54, %v642_v31 }
  0xd9   : > { %20024 = vst [vmem:[#allocation179_spill] sm:$0xff] %v14164_v41  ;;  %20027 = vst [vmem:[#allocation182_spill] sm:$0xff] %v14184_v14 }
  0xda   : > { %3971 = vmatpush1.bf16.msra.mxu0 %v14136_v19  ;;  %4053 = vmatpush1.bf16.msra.mxu1 %v14140_v8  ;;  %v14190_v19 = vcombine.high %v629_v61, %v641_v9  ;;  %v665_v8 = vld [vmem:[%s19348_s1 + $0x800] sm:$0xff]  ;;  %20030 = vst [vmem:[#allocation185_spill] sm:$0xff] %v14202_v7 }
  0xdb   : > { %3972 = vmatprep.subr.bf16.mxu0 %v14142_v21  ;;  %4054 = vmatprep.subr.bf16.mxu1 %v14154_v58  ;;  %v14188_v21 = vcombine.low %v606_v1, %v618_v60  ;;  %v653_v58 = vld [vmem:[%s19348_s1 + $0x7a0] sm:$0xff]  ;;  %v666_v1 = vld [vmem:[%s19348_s1 + $0x808] sm:$0xff]  ;;  %v14208_v60 = vcombine.low %v629_v61, %v641_v9 }
  0xdc   : > { %20029 = vst [vmem:[#allocation184_spill] sm:$0xff] %v14190_v19  ;;  %v678_v9 = vld [vmem:[%s19348_s1 + $0x868] sm:$0xff]  ;;  %v14226_v61 = vcombine.high %v654_v51, %v666_v1 }
  0xdd   : > { %20028 = vst [vmem:[#allocation183_spill] sm:$0xff] %v14188_v21  ;;  %20031 = vst [vmem:[#allocation186_spill] sm:$0xff] %v14208_v60 }
  0xde   : > { %3973 = vmatpush1.bf16.msra.mxu0 %v14160_v39  ;;  %4055 = vmatpush1.bf16.msra.mxu1 %v14164_v41  ;;  %v14214_v39 = vcombine.high %v653_v58, %v665_v8  ;;  %v689_v41 = vld [vmem:[%s19348_s1 + $0x8c0] sm:$0xff]  ;;  %20034 = vst [vmem:[#allocation189_spill] sm:$0xff] %v14226_v61 }
  0xdf   : > { %3974 = vmatprep.subr.bf16.mxu0 %v14166_v49  ;;  %4056 = vmatprep.subr.bf16.mxu1 %v14178_v28  ;;  %v14212_v49 = vcombine.low %v630_v54, %v642_v31  ;;  %v677_v28 = vld [vmem:[%s19348_s1 + $0x860] sm:$0xff]  ;;  %v690_v54 = vld [vmem:[%s19348_s1 + $0x8c8] sm:$0xff]  ;;  %v14232_v31 = vcombine.low %v653_v58, %v665_v8 }
  0xe0   : > { %20033 = vst [vmem:[#allocation188_spill] sm:$0xff] %v14214_v39  ;;  %v702_v8 = vld [vmem:[%s19348_s1 + $0x928] sm:$0xff]  ;;  %v14250_v58 = vcombine.high %v678_v9, %v690_v54 }
  0xe1   : > { %20032 = vst [vmem:[#allocation187_spill] sm:$0xff] %v14212_v49  ;;  %20035 = vst [vmem:[#allocation190_spill] sm:$0xff] %v14232_v31 }
  0xe2   : > { %3975 = vmatpush1.bf16.msra.mxu0 %v14184_v14  ;;  %4057 = vmatpush1.bf16.msra.mxu1 %v14188_v21  ;;  %v14238_v14 = vcombine.high %v677_v28, %v689_v41  ;;  %v713_v21 = vld [vmem:[%s19348_s1 + $0x980] sm:$0xff]  ;;  %20038 = vst [vmem:[#allocation193_spill] sm:$0xff] %v14250_v58 }
  0xe3   : > { %3976 = vmatprep.subr.bf16.mxu0 %v14190_v19  ;;  %4058 = vmatprep.subr.bf16.mxu1 %v14202_v7  ;;  %v14236_v19 = vcombine.low %v654_v51, %v666_v1  ;;  %v701_v7 = vld [vmem:[%s19348_s1 + $0x920] sm:$0xff]  ;;  %v714_v51 = vld [vmem:[%s19348_s1 + $0x988] sm:$0xff]  ;;  %v14256_v1 = vcombine.low %v677_v28, %v689_v41 }
  0xe4   : > { %20037 = vst [vmem:[#allocation192_spill] sm:$0xff] %v14238_v14  ;;  %v726_v41 = vld [vmem:[%s19348_s1 + $0x9e8] sm:$0xff]  ;;  %v14274_v28 = vcombine.high %v702_v8, %v714_v51 }
  0xe5   : > { %20036 = vst [vmem:[#allocation191_spill] sm:$0xff] %v14236_v19  ;;  %20039 = vst [vmem:[#allocation194_spill] sm:$0xff] %v14256_v1 }
  0xe6   : > { %3977 = vmatpush1.bf16.msra.mxu0 %v14208_v60  ;;  %4059 = vmatpush1.bf16.msra.mxu1 %v14212_v49  ;;  %v14262_v60 = vcombine.high %v701_v7, %v713_v21  ;;  %v737_v49 = vld [vmem:[%s19348_s1 + $0xa40] sm:$0xff]  ;;  %20042 = vst [vmem:[#allocation197_spill] sm:$0xff] %v14274_v28 }
  0xe7   : > { %3978 = vmatprep.subr.bf16.mxu0 %v14214_v39  ;;  %4060 = vmatprep.subr.bf16.mxu1 %v14226_v61  ;;  %v14260_v39 = vcombine.low %v678_v9, %v690_v54  ;;  %v725_v61 = vld [vmem:[%s19348_s1 + $0x9e0] sm:$0xff]  ;;  %v738_v9 = vld [vmem:[%s19348_s1 + $0xa48] sm:$0xff]  ;;  %v14280_v54 = vcombine.low %v701_v7, %v713_v21 }
  0xe8   : > { %20041 = vst [vmem:[#allocation196_spill] sm:$0xff] %v14262_v60  ;;  %v750_v21 = vld [vmem:[%s19348_s1 + $0xaa8] sm:$0xff]  ;;  %v14298_v7 = vcombine.high %v726_v41, %v738_v9 }
  0xe9   : > { %20040 = vst [vmem:[#allocation195_spill] sm:$0xff] %v14260_v39  ;;  %20043 = vst [vmem:[#allocation198_spill] sm:$0xff] %v14280_v54 }
  0xea   : > { %3979 = vmatpush1.bf16.msra.mxu0 %v14232_v31  ;;  %4061 = vmatpush1.bf16.msra.mxu1 %v14236_v19  ;;  %v14286_v31 = vcombine.high %v725_v61, %v737_v49  ;;  %v761_v19 = vld [vmem:[%s19348_s1 + $0xb00] sm:$0xff]  ;;  %20046 = vst [vmem:[#allocation201_spill] sm:$0xff] %v14298_v7 }
  0xeb   : > { %3980 = vmatprep.subr.bf16.mxu0 %v14238_v14  ;;  %4062 = vmatprep.subr.bf16.mxu1 %v14250_v58  ;;  %v14284_v14 = vcombine.low %v702_v8, %v714_v51  ;;  %v749_v58 = vld [vmem:[%s19348_s1 + $0xaa0] sm:$0xff]  ;;  %v762_v8 = vld [vmem:[%s19348_s1 + $0xb08] sm:$0xff]  ;;  %v14304_v51 = vcombine.low %v725_v61, %v737_v49 }
  0xec   : > { %20045 = vst [vmem:[#allocation200_spill] sm:$0xff] %v14286_v31  ;;  %v774_v49 = vld [vmem:[%s19348_s1 + $0xb68] sm:$0xff]  ;;  %v14322_v61 = vcombine.high %v750_v21, %v762_v8 }
  0xed   : > { %20044 = vst [vmem:[#allocation199_spill] sm:$0xff] %v14284_v14  ;;  %20047 = vst [vmem:[#allocation202_spill] sm:$0xff] %v14304_v51 }
  0xee   : > { %3981 = vmatpush1.bf16.msra.mxu0 %v14256_v1  ;;  %4063 = vmatpush1.bf16.msra.mxu1 %v14260_v39  ;;  %v14310_v1 = vcombine.high %v749_v58, %v761_v19  ;;  %v785_v39 = vld [vmem:[%s19348_s1 + $0xbc0] sm:$0xff]  ;;  %20050 = vst [vmem:[#allocation205_spill] sm:$0xff] %v14322_v61 }
  0xef   : > { %3982 = vmatprep.subr.bf16.mxu0 %v14262_v60  ;;  %4064 = vmatprep.subr.bf16.mxu1 %v14274_v28  ;;  %v14308_v60 = vcombine.low %v726_v41, %v738_v9  ;;  %v773_v28 = vld [vmem:[%s19348_s1 + $0xb60] sm:$0xff]  ;;  %v786_v41 = vld [vmem:[%s19348_s1 + $0xbc8] sm:$0xff]  ;;  %v14328_v9 = vcombine.low %v749_v58, %v761_v19 }
  0xf0   : > { %20049 = vst [vmem:[#allocation204_spill] sm:$0xff] %v14310_v1  ;;  %v798_v19 = vld [vmem:[%s19348_s1 + $0xc28] sm:$0xff]  ;;  %v14346_v58 = vcombine.high %v774_v49, %v786_v41 }
  0xf1   : > { %20048 = vst [vmem:[#allocation203_spill] sm:$0xff] %v14308_v60  ;;  %20051 = vst [vmem:[#allocation206_spill] sm:$0xff] %v14328_v9 }
  0xf2   : > { %3983 = vmatpush1.bf16.msra.mxu0 %v14280_v54  ;;  %4065 = vmatpush1.bf16.msra.mxu1 %v14284_v14  ;;  %v14334_v54 = vcombine.high %v773_v28, %v785_v39  ;;  %v809_v14 = vld [vmem:[%s19348_s1 + $0xc80] sm:$0xff]  ;;  %20054 = vst [vmem:[#allocation209_spill] sm:$0xff] %v14346_v58 }
  0xf3   : > { %3984 = vmatprep.subr.bf16.mxu0 %v14286_v31  ;;  %4066 = vmatprep.subr.bf16.mxu1 %v14298_v7  ;;  %v14332_v31 = vcombine.low %v750_v21, %v762_v8  ;;  %v797_v7 = vld [vmem:[%s19348_s1 + $0xc20] sm:$0xff]  ;;  %v810_v21 = vld [vmem:[%s19348_s1 + $0xc88] sm:$0xff]  ;;  %v14352_v8 = vcombine.low %v773_v28, %v785_v39 }
  0xf4   : > { %20053 = vst [vmem:[#allocation208_spill] sm:$0xff] %v14334_v54  ;;  %v822_v39 = vld [vmem:[%s19348_s1 + $0xce8] sm:$0xff]  ;;  %v14370_v28 = vcombine.high %v798_v19, %v810_v21 }
  0xf5   : > { %20052 = vst [vmem:[#allocation207_spill] sm:$0xff] %v14332_v31  ;;  %20055 = vst [vmem:[#allocation210_spill] sm:$0xff] %v14352_v8 }
  0xf6   : > { %3985 = vmatpush1.bf16.msra.mxu0 %v14304_v51  ;;  %4067 = vmatpush1.bf16.msra.mxu1 %v14308_v60  ;;  %v14358_v51 = vcombine.high %v797_v7, %v809_v14  ;;  %v833_v60 = vld [vmem:[%s19348_s1 + $0xd40] sm:$0xff]  ;;  %20058 = vst [vmem:[#allocation213_spill] sm:$0xff] %v14370_v28 }
  0xf7   : > { %3986 = vmatprep.subr.bf16.mxu0 %v14310_v1  ;;  %4068 = vmatprep.subr.bf16.mxu1 %v14322_v61  ;;  %v14356_v1 = vcombine.low %v774_v49, %v786_v41  ;;  %v821_v61 = vld [vmem:[%s19348_s1 + $0xce0] sm:$0xff]  ;;  %v834_v49 = vld [vmem:[%s19348_s1 + $0xd48] sm:$0xff]  ;;  %v14376_v41 = vcombine.low %v797_v7, %v809_v14 }
  0xf8   : > { %20057 = vst [vmem:[#allocation212_spill] sm:$0xff] %v14358_v51  ;;  %v846_v14 = vld [vmem:[%s19348_s1 + $0xda8] sm:$0xff]  ;;  %v14394_v7 = vcombine.high %v822_v39, %v834_v49 }
  0xf9   : > { %20056 = vst [vmem:[#allocation211_spill] sm:$0xff] %v14356_v1  ;;  %20059 = vst [vmem:[#allocation214_spill] sm:$0xff] %v14376_v41 }
  0xfa   : > { %3987 = vmatpush1.bf16.msra.mxu0 %v14328_v9  ;;  %4069 = vmatpush1.bf16.msra.mxu1 %v14332_v31  ;;  %v14382_v9 = vcombine.high %v821_v61, %v833_v60  ;;  %v857_v31 = vld [vmem:[%s19348_s1 + $0xe00] sm:$0xff]  ;;  %20062 = vst [vmem:[#allocation217_spill] sm:$0xff] %v14394_v7 }
  0xfb   : > { %3988 = vmatprep.subr.bf16.mxu0 %v14334_v54  ;;  %4070 = vmatprep.subr.bf16.mxu1 %v14346_v58  ;;  %v14380_v54 = vcombine.low %v798_v19, %v810_v21  ;;  %v845_v58 = vld [vmem:[%s19348_s1 + $0xda0] sm:$0xff]  ;;  %v858_v19 = vld [vmem:[%s19348_s1 + $0xe08] sm:$0xff]  ;;  %v14402_v21 = vcombine.low %v821_v61, %v833_v60 }
  0xfc   : > { %20061 = vst [vmem:[#allocation216_spill] sm:$0xff] %v14382_v9  ;;  %v870_v60 = vld [vmem:[%s19348_s1 + $0xe68] sm:$0xff]  ;;  %v14420_v61 = vcombine.high %v846_v14, %v858_v19 }
  0xfd   : > { %20060 = vst [vmem:[#allocation215_spill] sm:$0xff] %v14380_v54  ;;  %20063 = vst [vmem:[#allocation218_spill] sm:$0xff] %v14402_v21 }
  0xfe   : > { %3989 = vmatpush1.bf16.msra.mxu0 %v14352_v8  ;;  %4071 = vmatpush1.bf16.msra.mxu1 %v14356_v1  ;;  %v14408_v8 = vcombine.high %v845_v58, %v857_v31  ;;  %20066 = vst [vmem:[#allocation221_spill] sm:$0xff] %v14420_v61  ;;  %v905_v1 = vld [vmem:[%s19348_s1 + $0xf80] sm:$0xff] }
  0xff   : > { %3999 = vmatprep.subr.bf16.mxu0 %v14358_v51  ;;  %4081 = vmatprep.subr.bf16.mxu1 %v14370_v28  ;;  %v14406_v51 = vcombine.low %v822_v39, %v834_v49  ;;  %v869_v28 = vld [vmem:[%s19348_s1 + $0xe60] sm:$0xff]  ;;  %v882_v39 = vld [vmem:[%s19348_s1 + $0xec8] sm:$0xff]  ;;  %v14428_v49 = vcombine.low %v845_v58, %v857_v31 }
 0x100   : > { %20065 = vst [vmem:[#allocation220_spill] sm:$0xff] %v14408_v8  ;;  %v894_v31 = vld [vmem:[%s19348_s1 + $0xf28] sm:$0xff]  ;;  %v14446_v58 = vcombine.high %v870_v60, %v882_v39 }
 0x101   : > { %3991 = vmatmul.mubr.bf16.vlgmr.msra.gmra.mrb[8].mxu0 %v13274_v26  ;;  %4073 = vmatmul.mubr.bf16.vlgmr.msra.gmra.mrb[8].mxu1 %v13274_v26  ;;  %20064 = vst [vmem:[#allocation219_spill] sm:$0xff] %v14406_v51  ;;  %20067 = vst [vmem:[#allocation222_spill] sm:$0xff] %v14428_v49 }
 0x102   : > { %4000 = vmatpush1.bf16.msra.mxu0 %v14376_v41  ;;  %4082 = vmatpush1.bf16.msra.mxu1 %v14380_v54  ;;  %v881_v41 = vld [vmem:[%s19348_s1 + $0xec0] sm:$0xff]  ;;  %20070 = vst [vmem:[#allocation225_spill] sm:$0xff] %v14446_v58 }
 0x103   : > { %4001 = vmatprep.subr.bf16.mxu0 %v14382_v9  ;;  %4083 = vmatprep.subr.bf16.mxu1 %v14394_v7  ;;  %v14432_v9 = vcombine.low %v846_v14, %v858_v19  ;;  %v14434_v7 = vcombine.high %v869_v28, %v881_v41  ;;  %v893_v54 = vld [vmem:[%s19348_s1 + $0xf20] sm:$0xff]  ;;  %v906_v14 = vld [vmem:[%s19348_s1 + $0xf88] sm:$0xff]  ;;  %v14452_v19 = vcombine.low %v869_v28, %v881_v41 }
 0x104   : > { %4031 = vmatprep.mubr.bf16.mxu0 %v19890_v2  ;;  %4113 = vmatprep.mubr.bf16.mxu1 %v19890_v2  ;;  %v918_v28 = vld [vmem:[%s19348_s1 + $0xfe8] sm:$0xff]  ;;  %v14470_v41 = vcombine.high %v894_v31, %v906_v14 }
 0x105   : > { %20068 = vst [vmem:[#allocation223_spill] sm:$0xff] %v14432_v9  ;;  %20069 = vst [vmem:[#allocation224_spill] sm:$0xff] %v14434_v7 }
 0x106   : > { %4002 = vmatpush1.bf16.msra.mxu0 %v14402_v21  ;;  %4084 = vmatpush1.bf16.msra.mxu1 %v14406_v51  ;;  %20071 = vst [vmem:[#allocation226_spill] sm:$0xff] %v14452_v19  ;;  %v14458_v21 = vcombine.high %v893_v54, %v905_v1  ;;  %v929_v51 = vld [vmem:[%s19348_s1 + $0x1040] sm:$0x77]  ;;  %20074 = vst [vmem:[#allocation229_spill] sm:$0xff] %v14470_v41 }
 0x107   : > { %4003 = vmatprep.subr.bf16.mxu0 %v14408_v8  ;;  %4085 = vmatprep.subr.bf16.mxu1 %v14420_v61  ;;  %v14456_v8 = vcombine.low %v870_v60, %v882_v39  ;;  %v917_v61 = vld [vmem:[%s19348_s1 + $0xfe0] sm:$0xff]  ;;  %v930_v60 = vld [vmem:[%s19348_s1 + $0x1048] sm:$0x77]  ;;  %v14476_v39 = vcombine.low %v893_v54, %v905_v1  ;;  %v416_v1 = vld [vmem:[%s19348_s1 + $0x38] sm:$0xff] }
 0x108   : > { %20073 = vst [vmem:[#allocation228_spill] sm:$0xff] %v14458_v21  ;;  %v14494_v54 = vcombine.high %v918_v28, %v930_v60 }
 0x109   : > { %20072 = vst [vmem:[#allocation227_spill] sm:$0xff] %v14456_v8  ;;  %20075 = vst [vmem:[#allocation230_spill] sm:$0xff] %v14476_v39 }
 0x10a   : > { %4004 = vmatpush1.bf16.msra.mxu0 %v14428_v49  ;;  %4086 = vmatpush1.bf16.msra.mxu1 %v14432_v9  ;;  %v14482_v49 = vcombine.high %v917_v61, %v929_v51  ;;  %v11110_v9 = vcombine.low %v917_v61, %v929_v51  ;;  %20078 = vst [vmem:[#allocation233_spill] sm:$0xff] %v14494_v54  ;;  %v428_v51 = vld [vmem:[%s19348_s1 + $0x98] sm:$0xff] }
 0x10b   : > { %4005 = vmatprep.subr.bf16.mxu0 %v14434_v7  ;;  %4087 = vmatprep.subr.bf16.mxu1 %v14446_v58  ;;  %v14480_v7 = vcombine.low %v894_v31, %v906_v14  ;;  %v415_v58 = vld [vmem:[%s19348_s1 + $0x30] sm:$0xff]  ;;  %v11112_v31 = vcombine.low %v918_v28, %v930_v60 }
 0x10c   : > { %20077 = vst [vmem:[#allocation232_spill] sm:$0xff] %v14482_v49  ;;  %v14504_v61 = vsel %vm19843_vm0, %v11110_v9, 0  ;;  %v14506_v14 = vcombine.high %v415_v58, %v427_v12  ;;  %v439_v28 = vld [vmem:[%s19348_s1 + $0xf0] sm:$0xff] }
 0x10d   : > { %20076 = vst [vmem:[#allocation231_spill] sm:$0xff] %v14480_v7  ;;  %20079 = vst [vmem:[#allocation234_spill] sm:$0xff] %v14504_v61  ;;  %v451_v60 = vld [vmem:[%s19348_s1 + $0x150] sm:$0xff]  ;;  %v14520_v9 = vsel %vm19843_vm0, %v11112_v31, 0 }
 0x10e   : > { %4006 = vmatpush1.bf16.msra.mxu0 %v14452_v19  ;;  %4088 = vmatpush1.bf16.msra.mxu1 %v14456_v8  ;;  %20080 = vst [vmem:[#allocation235_spill] sm:$0xff] %v14506_v14  ;;  %20081 = vst [vmem:[#allocation236_spill] sm:$0xff] %v14520_v9  ;;  %v14528_v19 = vcombine.low %v415_v58, %v427_v12  ;;  %v463_v31 = vld [vmem:[%s19348_s1 + $0x1b0] sm:$0xff]  ;;  %v464_v12 = vld [vmem:[%s19348_s1 + $0x1b8] sm:$0xff] }
 0x10f   : > { %4007 = vmatprep.subr.bf16.mxu0 %v14458_v21  ;;  %4089 = vmatprep.subr.bf16.mxu1 %v14470_v41  ;;  %v452_v21 = vld [vmem:[%s19348_s1 + $0x158] sm:$0xff]  ;;  %v475_v41 = vld [vmem:[%s19348_s1 + $0x210] sm:$0xff] }
 0x110   : > { %20083 = vst [vmem:[#allocation238_spill] sm:$0xff] %v14528_v19 }
 0x112   : > { %4008 = vmatpush1.bf16.msra.mxu0 %v14476_v39  ;;  %4090 = vmatpush1.bf16.msra.mxu1 %v14480_v7  ;;  %v440_v39 = vld [vmem:[%s19348_s1 + $0xf8] sm:$0xff]  ;;  %v14532_v7 = vcombine.low %v416_v1, %v428_v51 }
 0x113   : > { %11134 = vmatprep.subr.msk.bf16.mxu0 %vm19843_vm0, %v14482_v49  ;;  %11136 = vmatprep.subr.msk.bf16.mxu1 %vm19843_vm0, %v14494_v54  ;;  %v14522_v49 = vcombine.high %v416_v1, %v428_v51  ;;  %v14534_v54 = vcombine.high %v439_v28, %v451_v60  ;;  %v14546_v58 = vcombine.high %v440_v39, %v452_v21  ;;  %v476_v1 = vld [vmem:[%s19348_s1 + $0x218] sm:$0xff] }
 0x114   : > { %20084 = vst [vmem:[#allocation239_spill] sm:$0xff] %v14532_v7  ;;  %v14556_v51 = vcombine.low %v439_v28, %v451_v60  ;;  %v488_v28 = vld [vmem:[%s19348_s1 + $0x278] sm:$0xff]  ;;  %v14574_v60 = vcombine.high %v464_v12, %v476_v1 }
 0x115   : > { %20082 = vst [vmem:[#allocation237_spill] sm:$0xff] %v14522_v49  ;;  %20085 = vst [vmem:[#allocation240_spill] sm:$0xff] %v14534_v54 }
 0x116   : > { %4010 = vmatpush1.bf16.msra.mxu0 %v14504_v61  ;;  %4092 = vmatpush1.bf16.msra.mxu1 %v14520_v9  ;;  %20086 = vst [vmem:[#allocation241_spill] sm:$0xff] %v14546_v58  ;;  %20087 = vst [vmem:[#allocation242_spill] sm:$0xff] %v14556_v51  ;;  %v14562_v61 = vcombine.high %v463_v31, %v475_v41  ;;  %v499_v9 = vld [vmem:[%s19348_s1 + $0x2d0] sm:$0xff] }
 0x117   : > { %4122 = vmatprep.subr.bf16.mxu0 %v14506_v14  ;;  %4204 = vmatprep.subr.bf16.mxu1 %v14522_v49  ;;  %v14560_v14 = vcombine.low %v440_v39, %v452_v21  ;;  %v487_v49 = vld [vmem:[%s19348_s1 + $0x270] sm:$0xff]  ;;  %20090 = vst [vmem:[#allocation245_spill] sm:$0xff] %v14574_v60  ;;  %v500_v21 = vld [vmem:[%s19348_s1 + $0x2d8] sm:$0xff]  ;;  %v14582_v39 = vcombine.low %v463_v31, %v475_v41 }
 0x118   : > { %20089 = vst [vmem:[#allocation244_spill] sm:$0xff] %v14562_v61  ;;  %v512_v41 = vld [vmem:[%s19348_s1 + $0x338] sm:$0xff]  ;;  %v14600_v31 = vcombine.high %v488_v28, %v500_v21 }
 0x119   : > { %11135 = vmatmul.mubr.msk.bf16.vlgmr.msra.gmra.mrb[8].mxu0 %vm3553_vm1, %v13441_v56  ;;  %11137 = vmatmul.mubr.msk.bf16.vlgmr.msra.gmra.mrb[8].mxu1 %vm3553_vm1, %v13441_v56  ;;  %20088 = vst [vmem:[#allocation243_spill] sm:$0xff] %v14560_v14  ;;  %20091 = vst [vmem:[#allocation246_spill] sm:$0xff] %v14582_v39 }
 0x11a   : > { %4123 = vmatpush1.bf16.msra.mxu0 %v14528_v19  ;;  %4205 = vmatpush1.bf16.msra.mxu1 %v14532_v7  ;;  %v14588_v19 = vcombine.high %v487_v49, %v499_v9  ;;  %v523_v7 = vld [vmem:[%s19348_s1 + $0x390] sm:$0xff]  ;;  %20094 = vst [vmem:[#allocation249_spill] sm:$0xff] %v14600_v31 }
 0x11b   : > { %4124 = vmatprep.subr.bf16.mxu0 %v14534_v54  ;;  %4206 = vmatprep.subr.bf16.mxu1 %v14546_v58  ;;  %v14586_v54 = vcombine.low %v464_v12, %v476_v1  ;;  %v511_v58 = vld [vmem:[%s19348_s1 + $0x330] sm:$0xff]  ;;  %v524_v12 = vld [vmem:[%s19348_s1 + $0x398] sm:$0xff]  ;;  %v14606_v1 = vcombine.low %v487_v49, %v499_v9 }
 0x11c   : > { %4154 = vmatprep.mubr.bf16.mxu0 %v13052_v16  ;;  %4236 = vmatprep.mubr.bf16.mxu1 %v13052_v16  ;;  %20093 = vst [vmem:[#allocation248_spill] sm:$0xff] %v14588_v19  ;;  %v536_v49 = vld [vmem:[%s19348_s1 + $0x3f8] sm:$0xff]  ;;  %v14624_v9 = vcombine.high %v512_v41, %v524_v12 }
 0x11d   : > { %20092 = vst [vmem:[#allocation247_spill] sm:$0xff] %v14586_v54  ;;  %20095 = vst [vmem:[#allocation250_spill] sm:$0xff] %v14606_v1 }
 0x11e   : > { %4125 = vmatpush1.bf16.msra.mxu0 %v14556_v51  ;;  %4207 = vmatpush1.bf16.msra.mxu1 %v14560_v14  ;;  %v14612_v51 = vcombine.high %v511_v58, %v523_v7  ;;  %v547_v14 = vld [vmem:[%s19348_s1 + $0x450] sm:$0xff]  ;;  %20098 = vst [vmem:[#allocation253_spill] sm:$0xff] %v14624_v9 }
 0x11f   : > { %4126 = vmatprep.subr.bf16.mxu0 %v14562_v61  ;;  %4208 = vmatprep.subr.bf16.mxu1 %v14574_v60  ;;  %v14610_v61 = vcombine.low %v488_v28, %v500_v21  ;;  %v535_v60 = vld [vmem:[%s19348_s1 + $0x3f0] sm:$0xff]  ;;  %v548_v28 = vld [vmem:[%s19348_s1 + $0x458] sm:$0xff]  ;;  %v14630_v21 = vcombine.low %v511_v58, %v523_v7 }
 0x120   : > { %20097 = vst [vmem:[#allocation252_spill] sm:$0xff] %v14612_v51  ;;  %v560_v7 = vld [vmem:[%s19348_s1 + $0x4b8] sm:$0xff]  ;;  %v14648_v58 = vcombine.high %v536_v49, %v548_v28 }
 0x121   : > { %20096 = vst [vmem:[#allocation251_spill] sm:$0xff] %v14610_v61  ;;  %20099 = vst [vmem:[#allocation254_spill] sm:$0xff] %v14630_v21 }
 0x122   : > { %4127 = vmatpush1.bf16.msra.mxu0 %v14582_v39  ;;  %4209 = vmatpush1.bf16.msra.mxu1 %v14586_v54  ;;  %v14636_v39 = vcombine.high %v535_v60, %v547_v14  ;;  %v571_v54 = vld [vmem:[%s19348_s1 + $0x510] sm:$0xff]  ;;  %20102 = vst [vmem:[#allocation257_spill] sm:$0xff] %v14648_v58 }
 0x123   : > { %4128 = vmatprep.subr.bf16.mxu0 %v14588_v19  ;;  %4210 = vmatprep.subr.bf16.mxu1 %v14600_v31  ;;  %v14634_v19 = vcombine.low %v512_v41, %v524_v12  ;;  %v559_v31 = vld [vmem:[%s19348_s1 + $0x4b0] sm:$0xff]  ;;  %v572_v41 = vld [vmem:[%s19348_s1 + $0x518] sm:$0xff]  ;;  %v14654_v12 = vcombine.low %v535_v60, %v547_v14 }
 0x124   : > { %20101 = vst [vmem:[#allocation256_spill] sm:$0xff] %v14636_v39  ;;  %v584_v14 = vld [vmem:[%s19348_s1 + $0x578] sm:$0xff]  ;;  %v14672_v60 = vcombine.high %v560_v7, %v572_v41 }
 0x125   : > { %20100 = vst [vmem:[#allocation255_spill] sm:$0xff] %v14634_v19  ;;  %20103 = vst [vmem:[#allocation258_spill] sm:$0xff] %v14654_v12 }
 0x126   : > { %4129 = vmatpush1.bf16.msra.mxu0 %v14606_v1  ;;  %4211 = vmatpush1.bf16.msra.mxu1 %v14610_v61  ;;  %v14660_v1 = vcombine.high %v559_v31, %v571_v54  ;;  %v595_v61 = vld [vmem:[%s19348_s1 + $0x5d0] sm:$0xff]  ;;  %20106 = vst [vmem:[#allocation261_spill] sm:$0xff] %v14672_v60 }
 0x127   : > { %4130 = vmatprep.subr.bf16.mxu0 %v14612_v51  ;;  %4212 = vmatprep.subr.bf16.mxu1 %v14624_v9  ;;  %v14658_v51 = vcombine.low %v536_v49, %v548_v28  ;;  %v583_v9 = vld [vmem:[%s19348_s1 + $0x570] sm:$0xff]  ;;  %v596_v49 = vld [vmem:[%s19348_s1 + $0x5d8] sm:$0xff]  ;;  %v14678_v28 = vcombine.low %v559_v31, %v571_v54 }
 0x128   : > { %20105 = vst [vmem:[#allocation260_spill] sm:$0xff] %v14660_v1  ;;  %v608_v54 = vld [vmem:[%s19348_s1 + $0x638] sm:$0xff]  ;;  %v14696_v31 = vcombine.high %v584_v14, %v596_v49 }
 0x129   : > { %20104 = vst [vmem:[#allocation259_spill] sm:$0xff] %v14658_v51  ;;  %20107 = vst [vmem:[#allocation262_spill] sm:$0xff] %v14678_v28 }
 0x12a   : > { %4131 = vmatpush1.bf16.msra.mxu0 %v14630_v21  ;;  %4213 = vmatpush1.bf16.msra.mxu1 %v14634_v19  ;;  %v14684_v21 = vcombine.high %v583_v9, %v595_v61  ;;  %v619_v19 = vld [vmem:[%s19348_s1 + $0x690] sm:$0xff]  ;;  %20110 = vst [vmem:[#allocation265_spill] sm:$0xff] %v14696_v31 }
 0x12b   : > { %4132 = vmatprep.subr.bf16.mxu0 %v14636_v39  ;;  %4214 = vmatprep.subr.bf16.mxu1 %v14648_v58  ;;  %v14682_v39 = vcombine.low %v560_v7, %v572_v41  ;;  %v607_v58 = vld [vmem:[%s19348_s1 + $0x630] sm:$0xff]  ;;  %v620_v7 = vld [vmem:[%s19348_s1 + $0x698] sm:$0xff]  ;;  %v14702_v41 = vcombine.low %v583_v9, %v595_v61 }
 0x12c   : > { %20109 = vst [vmem:[#allocation264_spill] sm:$0xff] %v14684_v21  ;;  %v632_v61 = vld [vmem:[%s19348_s1 + $0x6f8] sm:$0xff]  ;;  %v14720_v9 = vcombine.high %v608_v54, %v620_v7 }
 0x12d   : > { %20108 = vst [vmem:[#allocation263_spill] sm:$0xff] %v14682_v39  ;;  %20111 = vst [vmem:[#allocation266_spill] sm:$0xff] %v14702_v41 }
 0x12e   : > { %4133 = vmatpush1.bf16.msra.mxu0 %v14654_v12  ;;  %4215 = vmatpush1.bf16.msra.mxu1 %v14658_v51  ;;  %v14708_v12 = vcombine.high %v607_v58, %v619_v19  ;;  %v643_v51 = vld [vmem:[%s19348_s1 + $0x750] sm:$0xff]  ;;  %20114 = vst [vmem:[#allocation269_spill] sm:$0xff] %v14720_v9 }
 0x12f   : > { %4134 = vmatprep.subr.bf16.mxu0 %v14660_v1  ;;  %4216 = vmatprep.subr.bf16.mxu1 %v14672_v60  ;;  %v14706_v1 = vcombine.low %v584_v14, %v596_v49  ;;  %v631_v60 = vld [vmem:[%s19348_s1 + $0x6f0] sm:$0xff]  ;;  %v644_v14 = vld [vmem:[%s19348_s1 + $0x758] sm:$0xff]  ;;  %v14726_v49 = vcombine.low %v607_v58, %v619_v19 }
 0x130   : > { %20113 = vst [vmem:[#allocation268_spill] sm:$0xff] %v14708_v12  ;;  %v656_v19 = vld [vmem:[%s19348_s1 + $0x7b8] sm:$0xff]  ;;  %v14744_v58 = vcombine.high %v632_v61, %v644_v14 }
 0x131   : > { %20112 = vst [vmem:[#allocation267_spill] sm:$0xff] %v14706_v1  ;;  %20115 = vst [vmem:[#allocation270_spill] sm:$0xff] %v14726_v49 }
 0x132   : > { %4135 = vmatpush1.bf16.msra.mxu0 %v14678_v28  ;;  %4217 = vmatpush1.bf16.msra.mxu1 %v14682_v39  ;;  %v14732_v28 = vcombine.high %v631_v60, %v643_v51  ;;  %v667_v39 = vld [vmem:[%s19348_s1 + $0x810] sm:$0xff]  ;;  %20118 = vst [vmem:[#allocation273_spill] sm:$0xff] %v14744_v58 }
 0x133   : > { %4136 = vmatprep.subr.bf16.mxu0 %v14684_v21  ;;  %4218 = vmatprep.subr.bf16.mxu1 %v14696_v31  ;;  %v14730_v21 = vcombine.low %v608_v54, %v620_v7  ;;  %v655_v31 = vld [vmem:[%s19348_s1 + $0x7b0] sm:$0xff]  ;;  %v668_v54 = vld [vmem:[%s19348_s1 + $0x818] sm:$0xff]  ;;  %v14750_v7 = vcombine.low %v631_v60, %v643_v51 }
 0x134   : > { %20117 = vst [vmem:[#allocation272_spill] sm:$0xff] %v14732_v28  ;;  %v680_v51 = vld [vmem:[%s19348_s1 + $0x878] sm:$0xff]  ;;  %v14778_v30 = vcombine.low %v655_v31, %v667_v39  ;;  %v14782_v17 = vcombine.low %v656_v19, %v668_v54 }
 0x135   : > { %20116 = vst [vmem:[#allocation271_spill] sm:$0xff] %v14730_v21  ;;  %20119 = vst [vmem:[#allocation274_spill] sm:$0xff] %v14750_v7 }
 0x136   : > { %4137 = vmatpush1.bf16.msra.mxu0 %v14702_v41  ;;  %4219 = vmatpush1.bf16.msra.mxu1 %v14706_v1  ;;  %v14756_v41 = vcombine.high %v655_v31, %v667_v39  ;;  %v691_v1 = vld [vmem:[%s19348_s1 + $0x8d0] sm:$0xff]  ;;  %20123 = vst [vmem:[#allocation278_spill] sm:$0xff] %v14778_v30  ;;  %20124 = vst [vmem:[#allocation279_spill] sm:$0xff] %v14782_v17  ;;  %v716_v31 = vld [vmem:[%s19348_s1 + $0x998] sm:$0xff] }
 0x137   : > { %4138 = vmatprep.subr.bf16.mxu0 %v14708_v12  ;;  %4220 = vmatprep.subr.bf16.mxu1 %v14720_v9  ;;  %v14754_v12 = vcombine.low %v632_v61, %v644_v14  ;;  %v679_v9 = vld [vmem:[%s19348_s1 + $0x870] sm:$0xff]  ;;  %v692_v61 = vld [vmem:[%s19348_s1 + $0x8d8] sm:$0xff] }
 0x138   : > { %20121 = vst [vmem:[#allocation276_spill] sm:$0xff] %v14756_v41  ;;  %v14784_v24 = vcombine.high %v679_v9, %v691_v1 }
 0x139   : > { %20120 = vst [vmem:[#allocation275_spill] sm:$0xff] %v14754_v12 }
 0x13a   : > { %4139 = vmatpush1.bf16.msra.mxu0 %v14726_v49  ;;  %4221 = vmatpush1.bf16.msra.mxu1 %v14730_v21  ;;  %20125 = vst [vmem:[#allocation280_spill] sm:$0xff] %v14784_v24 }
 0x13b   : > { %4140 = vmatprep.subr.bf16.mxu0 %v14732_v28  ;;  %4222 = vmatprep.subr.bf16.mxu1 %v14744_v58  ;;  %v14768_v28 = vcombine.high %v656_v19, %v668_v54  ;;  %v14809_v54 = vcombine.low %v680_v51, %v692_v61 }
 0x13c   : > { %v3705_v60 = vpop.f32.mrb[0].mxu0  ;;  %v14773_v14 = vpop.f32.mrb[0].mxu1 }
 0x13d   : > { %20122 = vst [vmem:[#allocation277_spill] sm:$0xff] %v14768_v28  ;;  %v14775_v49 = vpop.f32.mrb[1].mxu0  ;;  %v3789_v21 = vpop.f32.mrb[1].mxu1  ;;  %20128 = vst [vmem:[#allocation283_spill] sm:$0xff] %v14809_v54 }
 0x13e   : > { %v3709_v8 = vpop.f32.mrb[2].mxu0  ;;  %4141 = vmatpush1.bf16.msra.mxu0 %v14750_v7  ;;  %v4617_v33 = vrot.slane %v3789_v21, 6  ;;  %v3791_v63 = vpop.f32.mrb[2].mxu1  ;;  %4223 = vmatpush1.bf16.msra.mxu1 %v14754_v12  ;;  %v14796_v21 = vcombine.high %v680_v51, %v692_v61  ;;  %v740_v51 = vld [vmem:[%s19348_s1 + $0xa58] sm:$0xff]  ;;  %v763_v7 = vld [vmem:[%s19348_s1 + $0xb10] sm:$0xff] }
 0x13f   : > { %v3710_v58 = vpop.f32.mrb[3].mxu0  ;;  %4142 = vmatprep.subr.bf16.mxu0 %v14756_v41  ;;  %v715_v8 = vld [vmem:[%s19348_s1 + $0x990] sm:$0xff]  ;;  %v704_v63 = vld [vmem:[%s19348_s1 + $0x938] sm:$0xff]  ;;  %v3792_v39 = vpop.f32.mrb[3].mxu1  ;;  %4224 = vmatprep.subr.bf16.mxu1 %v14768_v28 }
 0x140   : > { %20126 = vst [vmem:[#allocation281_spill] sm:$0xff] %v14796_v21  ;;  %v14802_v19 = vsel %vm4668_vm2, %v3705_v60, %v4617_v33  ;;  %v14805_v58 = vcombine.low %v679_v9, %v691_v1  ;;  %v14811_v39 = vcombine.high %v703_v34, %v715_v8  ;;  %v727_v41 = vld [vmem:[%s19348_s1 + $0x9f0] sm:$0xff]  ;;  %v728_v1 = vld [vmem:[%s19348_s1 + $0x9f8] sm:$0xff]  ;;  %v14823_v9 = vcombine.high %v704_v63, %v716_v31 }
 0x141   : > { %v739_v33 = vld [vmem:[%s19348_s1 + $0xa50] sm:$0xff]  ;;  %v14829_v60 = vcombine.low %v703_v34, %v715_v8  ;;  %v14833_v61 = vcombine.low %v704_v63, %v716_v31  ;;  %v752_v34 = vld [vmem:[%s19348_s1 + $0xab8] sm:$0xff]  ;;  %v14847_v8 = vcombine.high %v728_v1, %v740_v51 }
 0x142   : > { %4143 = vmatpush1.bf16.msra.mxu0 %v14778_v30  ;;  %20127 = vst [vmem:[#allocation282_spill] sm:$0xff] %v14805_v58  ;;  %4225 = vmatpush1.bf16.msra.mxu1 %v14782_v17  ;;  %20129 = vst [vmem:[#allocation284_spill] sm:$0xff] %v14811_v39  ;;  %v751_v30 = vld [vmem:[%s19348_s1 + $0xab0] sm:$0xff]  ;;  %v764_v63 = vld [vmem:[%s19348_s1 + $0xb18] sm:$0xff]  ;;  %v14853_v31 = vcombine.low %v727_v41, %v739_v33 }
 0x143   : > { %4144 = vmatprep.subr.bf16.mxu0 %v14784_v24  ;;  %4226 = vmatprep.subr.bf16.mxu1 %v14796_v21  ;;  %20130 = vst [vmem:[#allocation285_spill] sm:$0xff] %v14823_v9  ;;  %20131 = vst [vmem:[#allocation286_spill] sm:$0xff] %v14829_v60  ;;  %v14835_v24 = vcombine.high %v727_v41, %v739_v33  ;;  %v776_v41 = vld [vmem:[%s19348_s1 + $0xb78] sm:$0xff]  ;;  %v14871_v33 = vcombine.high %v752_v34, %v764_v63 }
 0x144   : > { %20132 = vst [vmem:[#allocation287_spill] sm:$0xff] %v14833_v61  ;;  %20134 = vst [vmem:[#allocation289_spill] sm:$0xff] %v14847_v8 }
 0x145   : > { %20133 = vst [vmem:[#allocation288_spill] sm:$0xff] %v14835_v24  ;;  %20135 = vst [vmem:[#allocation290_spill] sm:$0xff] %v14853_v31 }
 0x146   : > { %4145 = vmatpush1.bf16.msra.mxu0 %v14805_v58  ;;  %4227 = vmatpush1.bf16.msra.mxu1 %v14809_v54  ;;  %v14859_v58 = vcombine.high %v751_v30, %v763_v7  ;;  %v787_v54 = vld [vmem:[%s19348_s1 + $0xbd0] sm:$0xff]  ;;  %20138 = vst [vmem:[#allocation293_spill] sm:$0xff] %v14871_v33 }
 0x147   : > { %4146 = vmatprep.subr.bf16.mxu0 %v14811_v39  ;;  %4228 = vmatprep.subr.bf16.mxu1 %v14823_v9  ;;  %v14857_v39 = vcombine.low %v728_v1, %v740_v51  ;;  %v775_v9 = vld [vmem:[%s19348_s1 + $0xb70] sm:$0xff]  ;;  %v788_v1 = vld [vmem:[%s19348_s1 + $0xbd8] sm:$0xff]  ;;  %v14877_v51 = vcombine.low %v751_v30, %v763_v7 }
 0x148   : > { %20137 = vst [vmem:[#allocation292_spill] sm:$0xff] %v14859_v58  ;;  %v800_v30 = vld [vmem:[%s19348_s1 + $0xc38] sm:$0xff]  ;;  %v14895_v7 = vcombine.high %v776_v41, %v788_v1 }
 0x149   : > { %20136 = vst [vmem:[#allocation291_spill] sm:$0xff] %v14857_v39  ;;  %20139 = vst [vmem:[#allocation294_spill] sm:$0xff] %v14877_v51 }
 0x14a   : > { %4147 = vmatpush1.bf16.msra.mxu0 %v14829_v60  ;;  %4229 = vmatpush1.bf16.msra.mxu1 %v14833_v61  ;;  %v14883_v60 = vcombine.high %v775_v9, %v787_v54  ;;  %v811_v61 = vld [vmem:[%s19348_s1 + $0xc90] sm:$0xff]  ;;  %20142 = vst [vmem:[#allocation297_spill] sm:$0xff] %v14895_v7 }
 0x14b   : > { %4148 = vmatprep.subr.bf16.mxu0 %v14835_v24  ;;  %4230 = vmatprep.subr.bf16.mxu1 %v14847_v8  ;;  %v14881_v24 = vcombine.low %v752_v34, %v764_v63  ;;  %v799_v8 = vld [vmem:[%s19348_s1 + $0xc30] sm:$0xff]  ;;  %v812_v34 = vld [vmem:[%s19348_s1 + $0xc98] sm:$0xff]  ;;  %v14901_v63 = vcombine.low %v775_v9, %v787_v54 }
 0x14c   : > { %20141 = vst [vmem:[#allocation296_spill] sm:$0xff] %v14883_v60  ;;  %v824_v54 = vld [vmem:[%s19348_s1 + $0xcf8] sm:$0xff]  ;;  %v14919_v9 = vcombine.high %v800_v30, %v812_v34 }
 0x14d   : > { %20140 = vst [vmem:[#allocation295_spill] sm:$0xff] %v14881_v24  ;;  %20143 = vst [vmem:[#allocation298_spill] sm:$0xff] %v14901_v63 }
 0x14e   : > { %4149 = vmatpush1.bf16.msra.mxu0 %v14853_v31  ;;  %4231 = vmatpush1.bf16.msra.mxu1 %v14857_v39  ;;  %v14907_v31 = vcombine.high %v799_v8, %v811_v61  ;;  %v835_v39 = vld [vmem:[%s19348_s1 + $0xd50] sm:$0xff]  ;;  %20146 = vst [vmem:[#allocation301_spill] sm:$0xff] %v14919_v9 }
 0x14f   : > { %4150 = vmatprep.subr.bf16.mxu0 %v14859_v58  ;;  %4232 = vmatprep.subr.bf16.mxu1 %v14871_v33  ;;  %v14905_v58 = vcombine.low %v776_v41, %v788_v1  ;;  %v823_v33 = vld [vmem:[%s19348_s1 + $0xcf0] sm:$0xff]  ;;  %v836_v41 = vld [vmem:[%s19348_s1 + $0xd58] sm:$0xff]  ;;  %v14925_v1 = vcombine.low %v799_v8, %v811_v61 }
 0x150   : > { %20145 = vst [vmem:[#allocation300_spill] sm:$0xff] %v14907_v31  ;;  %v848_v61 = vld [vmem:[%s19348_s1 + $0xdb8] sm:$0xff]  ;;  %v14943_v8 = vcombine.high %v824_v54, %v836_v41 }
 0x151   : > { %20144 = vst [vmem:[#allocation299_spill] sm:$0xff] %v14905_v58  ;;  %20147 = vst [vmem:[#allocation302_spill] sm:$0xff] %v14925_v1 }
 0x152   : > { %4151 = vmatpush1.bf16.msra.mxu0 %v14877_v51  ;;  %4233 = vmatpush1.bf16.msra.mxu1 %v14881_v24  ;;  %v14931_v51 = vcombine.high %v823_v33, %v835_v39  ;;  %v859_v24 = vld [vmem:[%s19348_s1 + $0xe10] sm:$0xff]  ;;  %20150 = vst [vmem:[#allocation305_spill] sm:$0xff] %v14943_v8 }
 0x153   : > { %4152 = vmatprep.subr.bf16.mxu0 %v14883_v60  ;;  %4234 = vmatprep.subr.bf16.mxu1 %v14895_v7  ;;  %v14929_v60 = vcombine.low %v800_v30, %v812_v34  ;;  %v847_v7 = vld [vmem:[%s19348_s1 + $0xdb0] sm:$0xff]  ;;  %v860_v30 = vld [vmem:[%s19348_s1 + $0xe18] sm:$0xff]  ;;  %v14951_v34 = vcombine.low %v823_v33, %v835_v39 }
 0x154   : > { %20149 = vst [vmem:[#allocation304_spill] sm:$0xff] %v14931_v51  ;;  %v872_v39 = vld [vmem:[%s19348_s1 + $0xe78] sm:$0xff]  ;;  %v14969_v33 = vcombine.high %v848_v61, %v860_v30 }
 0x155   : > { %20148 = vst [vmem:[#allocation303_spill] sm:$0xff] %v14929_v60  ;;  %20151 = vst [vmem:[#allocation306_spill] sm:$0xff] %v14951_v34 }
 0x156   : > { %4153 = vmatpush1.bf16.msra.mxu0 %v14901_v63  ;;  %4235 = vmatpush1.bf16.msra.mxu1 %v14905_v58  ;;  %v14957_v63 = vcombine.high %v847_v7, %v859_v24  ;;  %20154 = vst [vmem:[#allocation309_spill] sm:$0xff] %v14969_v33 }
 0x157   : > { %4163 = vmatprep.subr.bf16.mxu0 %v14907_v31  ;;  %4245 = vmatprep.subr.bf16.mxu1 %v14919_v9  ;;  %v14955_v31 = vcombine.low %v824_v54, %v836_v41  ;;  %v871_v9 = vld [vmem:[%s19348_s1 + $0xe70] sm:$0xff]  ;;  %v884_v54 = vld [vmem:[%s19348_s1 + $0xed8] sm:$0xff]  ;;  %v14977_v41 = vcombine.low %v847_v7, %v859_v24 }
 0x158   : > { %20153 = vst [vmem:[#allocation308_spill] sm:$0xff] %v14957_v63  ;;  %v896_v24 = vld [vmem:[%s19348_s1 + $0xf38] sm:$0xff] }
 0x159   : > { %4155 = vmatmul.mubr.bf16.vlgmr.msra.gmra.mrb[12].mxu0 %v13274_v26  ;;  %4237 = vmatmul.mubr.bf16.vlgmr.msra.gmra.mrb[12].mxu1 %v13274_v26  ;;  %20152 = vst [vmem:[#allocation307_spill] sm:$0xff] %v14955_v31  ;;  %20155 = vst [vmem:[#allocation310_spill] sm:$0xff] %v14977_v41  ;;  %v908_v7 = vld [vmem:[%s19348_s1 + $0xf98] sm:$0xff] }
 0x15a   : > { %4164 = vmatpush1.bf16.msra.mxu0 %v14925_v1  ;;  %4246 = vmatpush1.bf16.msra.mxu1 %v14929_v60  ;;  %v883_v1 = vld [vmem:[%s19348_s1 + $0xed0] sm:$0xff]  ;;  %v14987_v60 = vcombine.low %v848_v61, %v860_v30  ;;  %v15019_v17 = vcombine.high %v896_v24, %v908_v7 }
 0x15b   : > { %4165 = vmatprep.subr.bf16.mxu0 %v14931_v51  ;;  %4247 = vmatprep.subr.bf16.mxu1 %v14943_v8  ;;  %v895_v51 = vld [vmem:[%s19348_s1 + $0xf30] sm:$0xff]  ;;  %v14989_v58 = vcombine.high %v871_v9, %v883_v1  ;;  %v15007_v30 = vcombine.low %v871_v9, %v883_v1  ;;  %v932_v9 = vld [vmem:[%s19348_s1 + $0x1058] sm:$0x77] }
 0x15c   : > { %4195 = vmatprep.mubr.bf16.mxu0 %v19890_v2  ;;  %4277 = vmatprep.mubr.bf16.mxu1 %v19890_v2  ;;  %v907_v8 = vld [vmem:[%s19348_s1 + $0xf90] sm:$0xff]  ;;  %20156 = vst [vmem:[#allocation311_spill] sm:$0xff] %v14987_v60  ;;  %20162 = vst [vmem:[#allocation317_spill] sm:$0xff] %v15019_v17 }
 0x15d   : > { %20157 = vst [vmem:[#allocation312_spill] sm:$0xff] %v14989_v58  ;;  %v931_v61 = vld [vmem:[%s19348_s1 + $0x1050] sm:$0x77]  ;;  %20159 = vst [vmem:[#allocation314_spill] sm:$0xff] %v15007_v30  ;;  %v15013_v21 = vcombine.high %v895_v51, %v907_v8 }
 0x15e   : > { %4166 = vmatpush1.bf16.msra.mxu0 %v14951_v34  ;;  %4248 = vmatpush1.bf16.msra.mxu1 %v14955_v31  ;;  %v919_v34 = vld [vmem:[%s19348_s1 + $0xff0] sm:$0xff]  ;;  %v15001_v31 = vcombine.high %v872_v39, %v884_v54 }
 0x15f   : > { %4167 = vmatprep.subr.bf16.mxu0 %v14957_v63  ;;  %4249 = vmatprep.subr.bf16.mxu1 %v14969_v33  ;;  %v15011_v63 = vcombine.low %v872_v39, %v884_v54  ;;  %20161 = vst [vmem:[#allocation316_spill] sm:$0xff] %v15013_v21  ;;  %v920_v33 = vld [vmem:[%s19348_s1 + $0xff8] sm:$0xff]  ;;  %v11114_v1 = vcombine.low %v919_v34, %v931_v61 }
 0x160   : > { %20158 = vst [vmem:[#allocation313_spill] sm:$0xff] %v15001_v31  ;;  %v15029_v39 = vcombine.low %v896_v24, %v908_v7  ;;  %v15031_v54 = vcombine.high %v919_v34, %v931_v61  ;;  %v11116_v34 = vcombine.low %v920_v33, %v932_v9  ;;  %v430_v7 = vld [vmem:[%s19348_s1 + $0xa8] sm:$0xff] }
 0x161   : > { %20160 = vst [vmem:[#allocation315_spill] sm:$0xff] %v15011_v63  ;;  %v15046_v24 = vsel %vm19843_vm0, %v11114_v1, 0 }
 0x162   : > { %4168 = vmatpush1.bf16.msra.mxu0 %v14977_v41  ;;  %4250 = vmatpush1.bf16.msra.mxu1 %v14987_v60  ;;  %20164 = vst [vmem:[#allocation319_spill] sm:$0xff] %v15029_v39  ;;  %20165 = vst [vmem:[#allocation320_spill] sm:$0xff] %v15031_v54  ;;  %v417_v41 = vld [vmem:[%s19348_s1 + $0x40] sm:$0xff]  ;;  %v15060_v1 = vsel %vm19843_vm0, %v11116_v34, 0 }
 0x163   : > { %4169 = vmatprep.subr.bf16.mxu0 %v14989_v58  ;;  %4251 = vmatprep.subr.bf16.mxu1 %v15001_v31  ;;  %v15025_v58 = vcombine.low %v895_v51, %v907_v8  ;;  %v429_v31 = vld [vmem:[%s19348_s1 + $0xa0] sm:$0xff]  ;;  %v418_v51 = vld [vmem:[%s19348_s1 + $0x48] sm:$0xff]  ;;  %v15043_v8 = vcombine.high %v920_v33, %v932_v9  ;;  %20167 = vst [vmem:[#allocation322_spill] sm:$0xff] %v15046_v24  ;;  %20169 = vst [vmem:[#allocation324_spill] sm:$0xff] %v15060_v1 }
 0x164   : > { %v15055_v61 = vcombine.high %v417_v41, %v429_v31  ;;  %v15062_v33 = vcombine.high %v418_v51, %v430_v7  ;;  %v441_v9 = vld [vmem:[%s19348_s1 + $0x100] sm:$0xff]  ;;  %v15077_v34 = vcombine.low %v417_v41, %v429_v31  ;;  %v466_v41 = vld [vmem:[%s19348_s1 + $0x1c8] sm:$0xff] }
 0x165   : > { %20163 = vst [vmem:[#allocation318_spill] sm:$0xff] %v15025_v58  ;;  %20166 = vst [vmem:[#allocation321_spill] sm:$0xff] %v15043_v8  ;;  %v477_v31 = vld [vmem:[%s19348_s1 + $0x220] sm:$0xff] }
 0x166   : > { %4170 = vmatpush1.bf16.msra.mxu0 %v15007_v30  ;;  %4252 = vmatpush1.bf16.msra.mxu1 %v15011_v63  ;;  %20168 = vst [vmem:[#allocation323_spill] sm:$0xff] %v15055_v61  ;;  %20170 = vst [vmem:[#allocation325_spill] sm:$0xff] %v15062_v33  ;;  %v15081_v30 = vcombine.low %v418_v51, %v430_v7  ;;  %v478_v51 = vld [vmem:[%s19348_s1 + $0x228] sm:$0xff]  ;;  %v681_v63 = vld [vmem:[%s19348_s1 + $0x880] sm:$0xff] }
 0x167   : > { %4171 = vmatprep.subr.bf16.mxu0 %v15013_v21  ;;  %4253 = vmatprep.subr.bf16.mxu1 %v15019_v17  ;;  %v454_v21 = vld [vmem:[%s19348_s1 + $0x168] sm:$0xff]  ;;  %20171 = vst [vmem:[#allocation326_spill] sm:$0xff] %v15077_v34  ;;  %v465_v17 = vld [vmem:[%s19348_s1 + $0x1c0] sm:$0xff] }
 0x168   : > { %20172 = vst [vmem:[#allocation327_spill] sm:$0xff] %v15081_v30 }
 0x16a   : > { %4172 = vmatpush1.bf16.msra.mxu0 %v15025_v58  ;;  %4254 = vmatpush1.bf16.msra.mxu1 %v15029_v39  ;;  %v453_v58 = vld [vmem:[%s19348_s1 + $0x160] sm:$0xff] }
 0x16b   : > { %11138 = vmatprep.subr.msk.bf16.mxu0 %vm19843_vm0, %v15031_v54  ;;  %11140 = vmatprep.subr.msk.bf16.mxu1 %vm19843_vm0, %v15043_v8  ;;  %v442_v54 = vld [vmem:[%s19348_s1 + $0x108] sm:$0xff]  ;;  %v15083_v8 = vcombine.high %v441_v9, %v453_v58  ;;  %v15105_v7 = vcombine.low %v441_v9, %v453_v58  ;;  %v501_v58 = vld [vmem:[%s19348_s1 + $0x2e0] sm:$0xff]  ;;  %v15131_v9 = vcombine.low %v465_v17, %v477_v31 }
 0x16c   : > { %v15086_v39 = vcombine.high %v442_v54, %v454_v21 }
 0x16d   : > { %20173 = vst [vmem:[#allocation328_spill] sm:$0xff] %v15083_v8  ;;  %20175 = vst [vmem:[#allocation330_spill] sm:$0xff] %v15105_v7 }
 0x16e   : > { %4174 = vmatpush1.bf16.msra.mxu0 %v15046_v24  ;;  %4256 = vmatpush1.bf16.msra.mxu1 %v15060_v1  ;;  %20174 = vst [vmem:[#allocation329_spill] sm:$0xff] %v15086_v39  ;;  %v15111_v24 = vcombine.high %v465_v17, %v477_v31  ;;  %v489_v1 = vld [vmem:[%s19348_s1 + $0x280] sm:$0xff]  ;;  %20179 = vst [vmem:[#allocation334_spill] sm:$0xff] %v15131_v9  ;;  %v514_v31 = vld [vmem:[%s19348_s1 + $0x348] sm:$0xff] }
 0x16f   : > { %4286 = vmatprep.subr.bf16.mxu0 %v15055_v61  ;;  %4368 = vmatprep.subr.bf16.mxu1 %v15062_v33  ;;  %v15109_v61 = vcombine.low %v442_v54, %v454_v21  ;;  %v15114_v33 = vcombine.high %v466_v41, %v478_v51  ;;  %v490_v21 = vld [vmem:[%s19348_s1 + $0x288] sm:$0xff]  ;;  %v525_v17 = vld [vmem:[%s19348_s1 + $0x3a0] sm:$0xff] }
 0x170   : > { %20177 = vst [vmem:[#allocation332_spill] sm:$0xff] %v15111_v24  ;;  %v502_v54 = vld [vmem:[%s19348_s1 + $0x2e8] sm:$0xff] }
 0x171   : > { %11139 = vmatmul.mubr.msk.bf16.vlgmr.msra.gmra.mrb[12].mxu0 %vm3553_vm1, %v13441_v56  ;;  %11141 = vmatmul.mubr.msk.bf16.vlgmr.msra.gmra.mrb[12].mxu1 %vm3553_vm1, %v13441_v56  ;;  %20176 = vst [vmem:[#allocation331_spill] sm:$0xff] %v15109_v61  ;;  %20178 = vst [vmem:[#allocation333_spill] sm:$0xff] %v15114_v33 }
 0x172   : > { %4287 = vmatpush1.bf16.msra.mxu0 %v15077_v34  ;;  %4369 = vmatpush1.bf16.msra.mxu1 %v15081_v30  ;;  %v15137_v34 = vcombine.high %v489_v1, %v501_v58  ;;  %v513_v30 = vld [vmem:[%s19348_s1 + $0x340] sm:$0xff] }
 0x173   : > { %4288 = vmatprep.subr.bf16.mxu0 %v15083_v8  ;;  %4370 = vmatprep.subr.bf16.mxu1 %v15086_v39  ;;  %v15135_v8 = vcombine.low %v466_v41, %v478_v51  ;;  %v15140_v39 = vcombine.high %v490_v21, %v502_v54  ;;  %v526_v41 = vld [vmem:[%s19348_s1 + $0x3a8] sm:$0xff]  ;;  %v15155_v51 = vcombine.low %v489_v1, %v501_v58  ;;  %v549_v1 = vld [vmem:[%s19348_s1 + $0x460] sm:$0xff] }
 0x174   : > { %4318 = vmatprep.mubr.bf16.mxu0 %v13052_v16  ;;  %4400 = vmatprep.mubr.bf16.mxu1 %v13052_v16  ;;  %20181 = vst [vmem:[#allocation336_spill] sm:$0xff] %v15137_v34  ;;  %v538_v58 = vld [vmem:[%s19348_s1 + $0x408] sm:$0xff] }
 0x175   : > { %20180 = vst [vmem:[#allocation335_spill] sm:$0xff] %v15135_v8  ;;  %20182 = vst [vmem:[#allocation337_spill] sm:$0xff] %v15140_v39 }
 0x176   : > { %4289 = vmatpush1.bf16.msra.mxu0 %v15105_v7  ;;  %4371 = vmatpush1.bf16.msra.mxu1 %v15109_v61  ;;  %20183 = vst [vmem:[#allocation338_spill] sm:$0xff] %v15155_v51  ;;  %v15161_v7 = vcombine.high %v513_v30, %v525_v17  ;;  %v537_v61 = vld [vmem:[%s19348_s1 + $0x400] sm:$0xff] }
 0x177   : > { %4290 = vmatprep.subr.bf16.mxu0 %v15111_v24  ;;  %4372 = vmatprep.subr.bf16.mxu1 %v15114_v33  ;;  %v15159_v24 = vcombine.low %v490_v21, %v502_v54  ;;  %v15164_v33 = vcombine.high %v514_v31, %v526_v41  ;;  %v550_v21 = vld [vmem:[%s19348_s1 + $0x468] sm:$0xff]  ;;  %v15179_v54 = vcombine.low %v513_v30, %v525_v17  ;;  %v573_v30 = vld [vmem:[%s19348_s1 + $0x520] sm:$0xff] }
 0x178   : > { %20185 = vst [vmem:[#allocation340_spill] sm:$0xff] %v15161_v7  ;;  %v562_v17 = vld [vmem:[%s19348_s1 + $0x4c8] sm:$0xff] }
 0x179   : > { %20184 = vst [vmem:[#allocation339_spill] sm:$0xff] %v15159_v24  ;;  %20186 = vst [vmem:[#allocation341_spill] sm:$0xff] %v15164_v33 }
 0x17a   : > { %4291 = vmatpush1.bf16.msra.mxu0 %v15131_v9  ;;  %4373 = vmatpush1.bf16.msra.mxu1 %v15135_v8  ;;  %20187 = vst [vmem:[#allocation342_spill] sm:$0xff] %v15179_v54  ;;  %v15185_v9 = vcombine.high %v537_v61, %v549_v1  ;;  %v561_v8 = vld [vmem:[%s19348_s1 + $0x4c0] sm:$0xff] }
 0x17b   : > { %4292 = vmatprep.subr.bf16.mxu0 %v15137_v34  ;;  %4374 = vmatprep.subr.bf16.mxu1 %v15140_v39  ;;  %v15183_v34 = vcombine.low %v514_v31, %v526_v41  ;;  %v15188_v39 = vcombine.high %v538_v58, %v550_v21  ;;  %v574_v31 = vld [vmem:[%s19348_s1 + $0x528] sm:$0xff]  ;;  %v15203_v41 = vcombine.low %v537_v61, %v549_v1  ;;  %v597_v61 = vld [vmem:[%s19348_s1 + $0x5e0] sm:$0xff] }
 0x17c   : > { %20189 = vst [vmem:[#allocation344_spill] sm:$0xff] %v15185_v9  ;;  %v586_v1 = vld [vmem:[%s19348_s1 + $0x588] sm:$0xff] }
 0x17d   : > { %20188 = vst [vmem:[#allocation343_spill] sm:$0xff] %v15183_v34  ;;  %20190 = vst [vmem:[#allocation345_spill] sm:$0xff] %v15188_v39 }
 0x17e   : > { %4293 = vmatpush1.bf16.msra.mxu0 %v15155_v51  ;;  %4375 = vmatpush1.bf16.msra.mxu1 %v15159_v24  ;;  %20191 = vst [vmem:[#allocation346_spill] sm:$0xff] %v15203_v41  ;;  %v15209_v51 = vcombine.high %v561_v8, %v573_v30  ;;  %v585_v24 = vld [vmem:[%s19348_s1 + $0x580] sm:$0xff] }
 0x17f   : > { %4294 = vmatprep.subr.bf16.mxu0 %v15161_v7  ;;  %4376 = vmatprep.subr.bf16.mxu1 %v15164_v33  ;;  %v15207_v7 = vcombine.low %v538_v58, %v550_v21  ;;  %v15212_v33 = vcombine.high %v562_v17, %v574_v31  ;;  %v598_v58 = vld [vmem:[%s19348_s1 + $0x5e8] sm:$0xff]  ;;  %v15227_v21 = vcombine.low %v561_v8, %v573_v30  ;;  %v621_v8 = vld [vmem:[%s19348_s1 + $0x6a0] sm:$0xff] }
 0x180   : > { %20193 = vst [vmem:[#allocation348_spill] sm:$0xff] %v15209_v51  ;;  %v610_v30 = vld [vmem:[%s19348_s1 + $0x648] sm:$0xff] }
 0x181   : > { %20192 = vst [vmem:[#allocation347_spill] sm:$0xff] %v15207_v7  ;;  %20194 = vst [vmem:[#allocation349_spill] sm:$0xff] %v15212_v33 }
 0x182   : > { %4295 = vmatpush1.bf16.msra.mxu0 %v15179_v54  ;;  %4377 = vmatpush1.bf16.msra.mxu1 %v15183_v34  ;;  %20195 = vst [vmem:[#allocation350_spill] sm:$0xff] %v15227_v21  ;;  %v15233_v54 = vcombine.high %v585_v24, %v597_v61  ;;  %v609_v34 = vld [vmem:[%s19348_s1 + $0x640] sm:$0xff] }
 0x183   : > { %4296 = vmatprep.subr.bf16.mxu0 %v15185_v9  ;;  %4378 = vmatprep.subr.bf16.mxu1 %v15188_v39  ;;  %v15231_v9 = vcombine.low %v562_v17, %v574_v31  ;;  %v15236_v39 = vcombine.high %v586_v1, %v598_v58  ;;  %v622_v17 = vld [vmem:[%s19348_s1 + $0x6a8] sm:$0xff]  ;;  %v15251_v31 = vcombine.low %v585_v24, %v597_v61  ;;  %v645_v24 = vld [vmem:[%s19348_s1 + $0x760] sm:$0xff] }
 0x184   : > { %20197 = vst [vmem:[#allocation352_spill] sm:$0xff] %v15233_v54  ;;  %v634_v61 = vld [vmem:[%s19348_s1 + $0x708] sm:$0xff] }
 0x185   : > { %20196 = vst [vmem:[#allocation351_spill] sm:$0xff] %v15231_v9  ;;  %20198 = vst [vmem:[#allocation353_spill] sm:$0xff] %v15236_v39 }
 0x186   : > { %4297 = vmatpush1.bf16.msra.mxu0 %v15203_v41  ;;  %4379 = vmatpush1.bf16.msra.mxu1 %v15207_v7  ;;  %20199 = vst [vmem:[#allocation354_spill] sm:$0xff] %v15251_v31  ;;  %v15257_v41 = vcombine.high %v609_v34, %v621_v8  ;;  %v633_v7 = vld [vmem:[%s19348_s1 + $0x700] sm:$0xff] }
 0x187   : > { %4298 = vmatprep.subr.bf16.mxu0 %v15209_v51  ;;  %4380 = vmatprep.subr.bf16.mxu1 %v15212_v33  ;;  %v15255_v51 = vcombine.low %v586_v1, %v598_v58  ;;  %v15260_v33 = vcombine.high %v610_v30, %v622_v17  ;;  %v646_v1 = vld [vmem:[%s19348_s1 + $0x768] sm:$0xff]  ;;  %v15275_v58 = vcombine.low %v609_v34, %v621_v8  ;;  %v669_v34 = vld [vmem:[%s19348_s1 + $0x820] sm:$0xff] }
 0x188   : > { %20201 = vst [vmem:[#allocation356_spill] sm:$0xff] %v15257_v41  ;;  %v658_v8 = vld [vmem:[%s19348_s1 + $0x7c8] sm:$0xff] }
 0x189   : > { %20200 = vst [vmem:[#allocation355_spill] sm:$0xff] %v15255_v51  ;;  %20202 = vst [vmem:[#allocation357_spill] sm:$0xff] %v15260_v33 }
 0x18a   : > { %4299 = vmatpush1.bf16.msra.mxu0 %v15227_v21  ;;  %4381 = vmatpush1.bf16.msra.mxu1 %v15231_v9  ;;  %20203 = vst [vmem:[#allocation358_spill] sm:$0xff] %v15275_v58  ;;  %v15281_v21 = vcombine.high %v633_v7, %v645_v24  ;;  %v657_v9 = vld [vmem:[%s19348_s1 + $0x7c0] sm:$0xff] }
 0x18b   : > { %4300 = vmatprep.subr.bf16.mxu0 %v15233_v54  ;;  %4382 = vmatprep.subr.bf16.mxu1 %v15236_v39  ;;  %v15279_v54 = vcombine.low %v610_v30, %v622_v17  ;;  %v15284_v39 = vcombine.high %v634_v61, %v646_v1  ;;  %v670_v30 = vld [vmem:[%s19348_s1 + $0x828] sm:$0xff]  ;;  %v15299_v17 = vcombine.low %v633_v7, %v645_v24  ;;  %v693_v7 = vld [vmem:[%s19348_s1 + $0x8e0] sm:$0xff] }
 0x18c   : > { %20205 = vst [vmem:[#allocation360_spill] sm:$0xff] %v15281_v21  ;;  %v15323_v12 = vcombine.low %v657_v9, %v669_v34  ;;  %v15329_v36 = vcombine.low %v658_v8, %v670_v30 }
 0x18d   : > { %20204 = vst [vmem:[#allocation359_spill] sm:$0xff] %v15279_v54  ;;  %20206 = vst [vmem:[#allocation361_spill] sm:$0xff] %v15284_v39 }
 0x18e   : > { %4301 = vmatpush1.bf16.msra.mxu0 %v15251_v31  ;;  %4383 = vmatpush1.bf16.msra.mxu1 %v15255_v51  ;;  %20207 = vst [vmem:[#allocation362_spill] sm:$0xff] %v15299_v17  ;;  %v15305_v31 = vcombine.high %v657_v9, %v669_v34  ;;  %v15308_v51 = vcombine.high %v658_v8, %v670_v30  ;;  %20210 = vst [vmem:[#allocation365_spill] sm:$0xff] %v15323_v12  ;;  %v729_v30 = vld [vmem:[%s19348_s1 + $0xa00] sm:$0xff] }
 0x18f   : > { %4302 = vmatprep.subr.bf16.mxu0 %v15257_v41  ;;  %4384 = vmatprep.subr.bf16.mxu1 %v15260_v33  ;;  %v15303_v41 = vcombine.low %v634_v61, %v646_v1  ;;  %v682_v1 = vld [vmem:[%s19348_s1 + $0x888] sm:$0xff]  ;;  %20211 = vst [vmem:[#allocation366_spill] sm:$0xff] %v15329_v36 }
 0x190   : > { %20208 = vst [vmem:[#allocation363_spill] sm:$0xff] %v15305_v31  ;;  %20209 = vst [vmem:[#allocation364_spill] sm:$0xff] %v15308_v51 }
 0x192   : > { %4303 = vmatpush1.bf16.msra.mxu0 %v15275_v58  ;;  %4385 = vmatpush1.bf16.msra.mxu1 %v15279_v54 }
 0x193   : > { %4304 = vmatprep.subr.bf16.mxu0 %v15281_v21  ;;  %4386 = vmatprep.subr.bf16.mxu1 %v15284_v39  ;;  %v694_v21 = vld [vmem:[%s19348_s1 + $0x8e8] sm:$0xff] }
 0x194   : > { %v3869_v33 = vpop.f32.mrb[4].mxu0  ;;  %v3951_v58 = vpop.f32.mrb[4].mxu1  ;;  %v15364_v34 = vcombine.low %v682_v1, %v694_v21 }
 0x195   : > { %v4618_v24 = vrot.slane %v3869_v33, 6  ;;  %v3871_v61 = vpop.f32.mrb[5].mxu0  ;;  %v4626_v39 = vrot.slane %v3951_v58, 4  ;;  %v3953_v60 = vpop.f32.mrb[5].mxu1  ;;  %v15331_v58 = vcombine.high %v681_v63, %v693_v7 }
 0x196   : > { %v4619_v54 = vrot.slane %v3871_v61, 6  ;;  %v3873_v28 = vpop.f32.mrb[6].mxu0  ;;  %4305 = vmatpush1.bf16.msra.mxu0 %v15299_v17  ;;  %v4627_v0 = vrot.slane %v3953_v60, 4  ;;  %v3955_v42 = vpop.f32.mrb[6].mxu1  ;;  %4387 = vmatpush1.bf16.msra.mxu1 %v15303_v41  ;;  %v717_v60 = vld [vmem:[%s19348_s1 + $0x9a0] sm:$0xff]  ;;  %20215 = vst [vmem:[#allocation370_spill] sm:$0xff] %v15364_v34 }
 0x197   : > { %v4670_v33 = vsel %vm4668_vm2, %v14775_v49, %v4618_v24  ;;  %v3874_v35 = vpop.f32.mrb[7].mxu0  ;;  %4306 = vmatprep.subr.bf16.mxu0 %v15305_v31  ;;  %20212 = vst [vmem:[#allocation367_spill] sm:$0xff] %v15331_v58  ;;  %v15335_v28 = vsel %vm4672_vm3, %v14802_v19, %v4626_v39  ;;  %v3956_v49 = vpop.f32.mrb[7].mxu1  ;;  %4388 = vmatprep.subr.bf16.mxu1 %v15308_v51  ;;  %v718_v39 = vld [vmem:[%s19348_s1 + $0x9a8] sm:$0xff]  ;;  %v801_v17 = vld [vmem:[%s19348_s1 + $0xc40] sm:$0xff] }
 0x198   : > { %v15339_v9 = vsel %vm4668_vm2, %v14773_v14, %v4619_v54  ;;  %v15342_v42 = vcombine.high %v682_v1, %v694_v21  ;;  %v705_v35 = vld [vmem:[%s19348_s1 + $0x940] sm:$0xff]  ;;  %v15351_v19 = vsel %vm4672_vm3, %v4670_v33, %v4627_v0  ;;  %v706_v14 = vld [vmem:[%s19348_s1 + $0x948] sm:$0xff]  ;;  %v15360_v54 = vcombine.low %v681_v63, %v693_v7 }
 0x199   : > { %v15366_v0 = vcombine.high %v705_v35, %v717_v60  ;;  %v15369_v8 = vcombine.high %v706_v14, %v718_v39  ;;  %v741_v63 = vld [vmem:[%s19348_s1 + $0xa60] sm:$0xff]  ;;  %v730_v7 = vld [vmem:[%s19348_s1 + $0xa08] sm:$0xff]  ;;  %v15384_v24 = vcombine.low %v705_v35, %v717_v60  ;;  %v15388_v61 = vcombine.low %v706_v14, %v718_v39 }
 0x19a   : > { %20213 = vst [vmem:[#allocation368_spill] sm:$0xff] %v15342_v42  ;;  %4307 = vmatpush1.bf16.msra.mxu0 %v15323_v12  ;;  %20214 = vst [vmem:[#allocation369_spill] sm:$0xff] %v15360_v54  ;;  %4389 = vmatpush1.bf16.msra.mxu1 %v15329_v36  ;;  %v742_v21 = vld [vmem:[%s19348_s1 + $0xa68] sm:$0xff]  ;;  %v15390_v1 = vcombine.high %v729_v30, %v741_v63  ;;  %v753_v49 = vld [vmem:[%s19348_s1 + $0xac0] sm:$0xff]  ;;  %v15408_v39 = vcombine.low %v729_v30, %v741_v63 }
 0x19b   : > { %4308 = vmatprep.subr.bf16.mxu0 %v15331_v58  ;;  %20216 = vst [vmem:[#allocation371_spill] sm:$0xff] %v15366_v0  ;;  %4390 = vmatprep.subr.bf16.mxu1 %v15342_v42  ;;  %20217 = vst [vmem:[#allocation372_spill] sm:$0xff] %v15369_v8  ;;  %v15393_v33 = vcombine.high %v730_v7, %v742_v21  ;;  %v765_v35 = vld [vmem:[%s19348_s1 + $0xb20] sm:$0xff]  ;;  %v754_v60 = vld [vmem:[%s19348_s1 + $0xac8] sm:$0xff] }
 0x19c   : > { %20218 = vst [vmem:[#allocation373_spill] sm:$0xff] %v15384_v24  ;;  %20219 = vst [vmem:[#allocation374_spill] sm:$0xff] %v15388_v61  ;;  %v766_v14 = vld [vmem:[%s19348_s1 + $0xb28] sm:$0xff]  ;;  %v777_v12 = vld [vmem:[%s19348_s1 + $0xb80] sm:$0xff] }
 0x19d   : > { %20220 = vst [vmem:[#allocation375_spill] sm:$0xff] %v15390_v1  ;;  %20221 = vst [vmem:[#allocation376_spill] sm:$0xff] %v15393_v33  ;;  %v15417_v58 = vcombine.high %v754_v60, %v766_v14  ;;  %v789_v30 = vld [vmem:[%s19348_s1 + $0xbe0] sm:$0xff]  ;;  %v778_v63 = vld [vmem:[%s19348_s1 + $0xb88] sm:$0xff] }
 0x19e   : > { %4309 = vmatpush1.bf16.msra.mxu0 %v15360_v54  ;;  %4391 = vmatpush1.bf16.msra.mxu1 %v15364_v34  ;;  %20222 = vst [vmem:[#allocation377_spill] sm:$0xff] %v15408_v39  ;;  %v15414_v54 = vcombine.high %v753_v49, %v765_v35 }
 0x19f   : > { %4310 = vmatprep.subr.bf16.mxu0 %v15366_v0  ;;  %4392 = vmatprep.subr.bf16.mxu1 %v15369_v8  ;;  %v15412_v0 = vcombine.low %v730_v7, %v742_v21  ;;  %20225 = vst [vmem:[#allocation380_spill] sm:$0xff] %v15417_v58  ;;  %v790_v7 = vld [vmem:[%s19348_s1 + $0xbe8] sm:$0xff]  ;;  %v15432_v21 = vcombine.low %v753_v49, %v765_v35  ;;  %v813_v49 = vld [vmem:[%s19348_s1 + $0xca0] sm:$0xff] }
 0x1a0   : > { %20224 = vst [vmem:[#allocation379_spill] sm:$0xff] %v15414_v54  ;;  %v15441_v31 = vcombine.high %v778_v63, %v790_v7  ;;  %v802_v35 = vld [vmem:[%s19348_s1 + $0xc48] sm:$0xff] }
 0x1a1   : > { %20223 = vst [vmem:[#allocation378_spill] sm:$0xff] %v15412_v0  ;;  %20226 = vst [vmem:[#allocation381_spill] sm:$0xff] %v15432_v21 }
 0x1a2   : > { %4311 = vmatpush1.bf16.msra.mxu0 %v15384_v24  ;;  %4393 = vmatpush1.bf16.msra.mxu1 %v15388_v61  ;;  %v15438_v24 = vcombine.high %v777_v12, %v789_v30  ;;  %20229 = vst [vmem:[#allocation384_spill] sm:$0xff] %v15441_v31 }
 0x1a3   : > { %4312 = vmatprep.subr.bf16.mxu0 %v15390_v1  ;;  %4394 = vmatprep.subr.bf16.mxu1 %v15393_v33  ;;  %v15436_v1 = vcombine.low %v754_v60, %v766_v14  ;;  %v814_v60 = vld [vmem:[%s19348_s1 + $0xca8] sm:$0xff]  ;;  %v15456_v14 = vcombine.low %v777_v12, %v789_v30  ;;  %v837_v12 = vld [vmem:[%s19348_s1 + $0xd60] sm:$0xff] }
 0x1a4   : > { %20228 = vst [vmem:[#allocation383_spill] sm:$0xff] %v15438_v24  ;;  %v826_v30 = vld [vmem:[%s19348_s1 + $0xd08] sm:$0xff] }
 0x1a5   : > { %20227 = vst [vmem:[#allocation382_spill] sm:$0xff] %v15436_v1  ;;  %20230 = vst [vmem:[#allocation385_spill] sm:$0xff] %v15456_v14 }
 0x1a6   : > { %4313 = vmatpush1.bf16.msra.mxu0 %v15408_v39  ;;  %4395 = vmatpush1.bf16.msra.mxu1 %v15412_v0  ;;  %v15462_v39 = vcombine.high %v801_v17, %v813_v49  ;;  %v825_v0 = vld [vmem:[%s19348_s1 + $0xd00] sm:$0xff] }
 0x1a7   : > { %4314 = vmatprep.subr.bf16.mxu0 %v15414_v54  ;;  %4396 = vmatprep.subr.bf16.mxu1 %v15417_v58  ;;  %v15460_v54 = vcombine.low %v778_v63, %v790_v7  ;;  %v15465_v58 = vcombine.high %v802_v35, %v814_v60  ;;  %v838_v63 = vld [vmem:[%s19348_s1 + $0xd68] sm:$0xff]  ;;  %v15480_v7 = vcombine.low %v801_v17, %v813_v49  ;;  %v861_v17 = vld [vmem:[%s19348_s1 + $0xe20] sm:$0xff] }
 0x1a8   : > { %20232 = vst [vmem:[#allocation387_spill] sm:$0xff] %v15462_v39  ;;  %v850_v49 = vld [vmem:[%s19348_s1 + $0xdc8] sm:$0xff] }
 0x1a9   : > { %20231 = vst [vmem:[#allocation386_spill] sm:$0xff] %v15460_v54  ;;  %20233 = vst [vmem:[#allocation388_spill] sm:$0xff] %v15465_v58 }
 0x1aa   : > { %4315 = vmatpush1.bf16.msra.mxu0 %v15432_v21  ;;  %4397 = vmatpush1.bf16.msra.mxu1 %v15436_v1  ;;  %20234 = vst [vmem:[#allocation389_spill] sm:$0xff] %v15480_v7  ;;  %v15486_v21 = vcombine.high %v825_v0, %v837_v12  ;;  %v849_v1 = vld [vmem:[%s19348_s1 + $0xdc0] sm:$0xff] }
 0x1ab   : > { %4316 = vmatprep.subr.bf16.mxu0 %v15438_v24  ;;  %4398 = vmatprep.subr.bf16.mxu1 %v15441_v31  ;;  %v15484_v24 = vcombine.low %v802_v35, %v814_v60  ;;  %v15489_v31 = vcombine.high %v826_v30, %v838_v63  ;;  %v862_v35 = vld [vmem:[%s19348_s1 + $0xe28] sm:$0xff]  ;;  %v15506_v60 = vcombine.low %v825_v0, %v837_v12  ;;  %v885_v0 = vld [vmem:[%s19348_s1 + $0xee0] sm:$0xff] }
 0x1ac   : > { %20236 = vst [vmem:[#allocation391_spill] sm:$0xff] %v15486_v21  ;;  %v874_v12 = vld [vmem:[%s19348_s1 + $0xe88] sm:$0xff] }
 0x1ad   : > { %20235 = vst [vmem:[#allocation390_spill] sm:$0xff] %v15484_v24  ;;  %20237 = vst [vmem:[#allocation392_spill] sm:$0xff] %v15489_v31 }
 0x1ae   : > { %4317 = vmatpush1.bf16.msra.mxu0 %v15456_v14  ;;  %4399 = vmatpush1.bf16.msra.mxu1 %v15460_v54  ;;  %20238 = vst [vmem:[#allocation393_spill] sm:$0xff] %v15506_v60  ;;  %v15512_v14 = vcombine.high %v849_v1, %v861_v17  ;;  %v897_v54 = vld [vmem:[%s19348_s1 + $0xf40] sm:$0xff] }
 0x1af   : > { %4327 = vmatprep.subr.bf16.mxu0 %v15462_v39  ;;  %4409 = vmatprep.subr.bf16.mxu1 %v15465_v58  ;;  %v15510_v39 = vcombine.low %v826_v30, %v838_v63  ;;  %v15515_v58 = vcombine.high %v850_v49, %v862_v35  ;;  %v886_v30 = vld [vmem:[%s19348_s1 + $0xee8] sm:$0xff]  ;;  %v15532_v63 = vcombine.low %v849_v1, %v861_v17  ;;  %v909_v1 = vld [vmem:[%s19348_s1 + $0xfa0] sm:$0xff] }
 0x1b0   : > { %20240 = vst [vmem:[#allocation395_spill] sm:$0xff] %v15512_v14  ;;  %v898_v17 = vld [vmem:[%s19348_s1 + $0xf48] sm:$0xff] }
 0x1b1   : > { %4319 = vmatmul.mubr.bf16.vlgmr.msra.gmra.mrb[16].mxu0 %v13274_v26  ;;  %4401 = vmatmul.mubr.bf16.vlgmr.msra.gmra.mrb[16].mxu1 %v13274_v26  ;;  %20239 = vst [vmem:[#allocation394_spill] sm:$0xff] %v15510_v39  ;;  %20241 = vst [vmem:[#allocation396_spill] sm:$0xff] %v15515_v58 }
 0x1b2   : > { %4328 = vmatpush1.bf16.msra.mxu0 %v15480_v7  ;;  %4410 = vmatpush1.bf16.msra.mxu1 %v15484_v24  ;;  %v873_v7 = vld [vmem:[%s19348_s1 + $0xe80] sm:$0xff]  ;;  %20242 = vst [vmem:[#allocation397_spill] sm:$0xff] %v15532_v63  ;;  %v15541_v24 = vcombine.high %v874_v12, %v886_v30 }
 0x1b3   : > { %4329 = vmatprep.subr.bf16.mxu0 %v15486_v21  ;;  %4411 = vmatprep.subr.bf16.mxu1 %v15489_v31  ;;  %v15536_v21 = vcombine.low %v850_v49, %v862_v35  ;;  %v15538_v31 = vcombine.high %v873_v7, %v885_v0  ;;  %v910_v49 = vld [vmem:[%s19348_s1 + $0xfa8] sm:$0xff]  ;;  %v15556_v35 = vcombine.low %v873_v7, %v885_v0  ;;  %v933_v7 = vld [vmem:[%s19348_s1 + $0x1060] sm:$0x77] }
 0x1b4   : > { %4359 = vmatprep.mubr.bf16.mxu0 %v19890_v2  ;;  %4441 = vmatprep.mubr.bf16.mxu1 %v19890_v2  ;;  %20245 = vst [vmem:[#allocation400_spill] sm:$0xff] %v15541_v24  ;;  %v922_v0 = vld [vmem:[%s19348_s1 + $0x1008] sm:$0xff] }
 0x1b5   : > { %20243 = vst [vmem:[#allocation398_spill] sm:$0xff] %v15536_v21  ;;  %20244 = vst [vmem:[#allocation399_spill] sm:$0xff] %v15538_v31 }
 0x1b6   : > { %4330 = vmatpush1.bf16.msra.mxu0 %v15506_v60  ;;  %4412 = vmatpush1.bf16.msra.mxu1 %v15510_v39  ;;  %20246 = vst [vmem:[#allocation401_spill] sm:$0xff] %v15556_v35  ;;  %v15562_v60 = vcombine.high %v897_v54, %v909_v1  ;;  %v921_v39 = vld [vmem:[%s19348_s1 + $0x1000] sm:$0xff] }
 0x1b7   : > { %4331 = vmatprep.subr.bf16.mxu0 %v15512_v14  ;;  %4413 = vmatprep.subr.bf16.mxu1 %v15515_v58  ;;  %v15560_v14 = vcombine.low %v874_v12, %v886_v30  ;;  %v15565_v58 = vcombine.high %v898_v17, %v910_v49  ;;  %v934_v12 = vld [vmem:[%s19348_s1 + $0x1068] sm:$0x77]  ;;  %v15580_v30 = vcombine.low %v897_v54, %v909_v1  ;;  %v431_v54 = vld [vmem:[%s19348_s1 + $0xb0] sm:$0xff]  ;;  %v420_v1 = vld [vmem:[%s19348_s1 + $0x58] sm:$0xff] }
 0x1b8   : > { %20248 = vst [vmem:[#allocation403_spill] sm:$0xff] %v15562_v60  ;;  %v11120_v33 = vcombine.low %v922_v0, %v934_v12 }
 0x1b9   : > { %20247 = vst [vmem:[#allocation402_spill] sm:$0xff] %v15560_v14  ;;  %20249 = vst [vmem:[#allocation404_spill] sm:$0xff] %v15565_v58 }
 0x1ba   : > { %4332 = vmatpush1.bf16.msra.mxu0 %v15532_v63  ;;  %4414 = vmatpush1.bf16.msra.mxu1 %v15536_v21  ;;  %20250 = vst [vmem:[#allocation405_spill] sm:$0xff] %v15580_v30  ;;  %v15586_v63 = vcombine.high %v921_v39, %v933_v7  ;;  %v15589_v21 = vcombine.high %v922_v0, %v934_v12  ;;  %v443_v12 = vld [vmem:[%s19348_s1 + $0x110] sm:$0xff] }
 0x1bb   : > { %4333 = vmatprep.subr.bf16.mxu0 %v15538_v31  ;;  %4415 = vmatprep.subr.bf16.mxu1 %v15541_v24  ;;  %v15584_v31 = vcombine.low %v898_v17, %v910_v49  ;;  %v11118_v24 = vcombine.low %v921_v39, %v933_v7  ;;  %v432_v39 = vld [vmem:[%s19348_s1 + $0xb8] sm:$0xff]  ;;  %v15615_v7 = vsel %vm19843_vm0, %v11120_v33, 0 }
 0x1bc   : > { %20252 = vst [vmem:[#allocation407_spill] sm:$0xff] %v15586_v63  ;;  %20253 = vst [vmem:[#allocation408_spill] sm:$0xff] %v15589_v21  ;;  %v15617_v0 = vcombine.high %v420_v1, %v432_v39 }
 0x1bd   : > { %20251 = vst [vmem:[#allocation406_spill] sm:$0xff] %v15584_v31  ;;  %v15608_v17 = vsel %vm19843_vm0, %v11118_v24, 0  ;;  %20256 = vst [vmem:[#allocation411_spill] sm:$0xff] %v15615_v7  ;;  %v444_v24 = vld [vmem:[%s19348_s1 + $0x118] sm:$0xff] }
 0x1be   : > { %4334 = vmatpush1.bf16.msra.mxu0 %v15556_v35  ;;  %4416 = vmatpush1.bf16.msra.mxu1 %v15560_v14  ;;  %v419_v35 = vld [vmem:[%s19348_s1 + $0x50] sm:$0xff]  ;;  %20254 = vst [vmem:[#allocation409_spill] sm:$0xff] %v15608_v17  ;;  %20257 = vst [vmem:[#allocation412_spill] sm:$0xff] %v15617_v0 }
 0x1bf   : > { %4335 = vmatprep.subr.bf16.mxu0 %v15562_v60  ;;  %4417 = vmatprep.subr.bf16.mxu1 %v15565_v58  ;;  %v15610_v49 = vcombine.high %v419_v35, %v431_v54  ;;  %v15632_v33 = vcombine.low %v419_v35, %v431_v54  ;;  %v15636_v60 = vcombine.low %v420_v1, %v432_v39  ;;  %v467_v58 = vld [vmem:[%s19348_s1 + $0x1d0] sm:$0xff]  ;;  %v468_v54 = vld [vmem:[%s19348_s1 + $0x1d8] sm:$0xff] }
 0x1c0   : > { %v479_v35 = vld [vmem:[%s19348_s1 + $0x230] sm:$0xff]  ;;  %v480_v1 = vld [vmem:[%s19348_s1 + $0x238] sm:$0xff] }
 0x1c1   : > { %20255 = vst [vmem:[#allocation410_spill] sm:$0xff] %v15610_v49  ;;  %20258 = vst [vmem:[#allocation413_spill] sm:$0xff] %v15632_v33 }
 0x1c2   : > { %4336 = vmatpush1.bf16.msra.mxu0 %v15580_v30  ;;  %4418 = vmatpush1.bf16.msra.mxu1 %v15584_v31  ;;  %v456_v30 = vld [vmem:[%s19348_s1 + $0x178] sm:$0xff]  ;;  %20259 = vst [vmem:[#allocation414_spill] sm:$0xff] %v15636_v60 }
 0x1c3   : > { %11142 = vmatprep.subr.msk.bf16.mxu0 %vm19843_vm0, %v15586_v63  ;;  %11144 = vmatprep.subr.msk.bf16.mxu1 %vm19843_vm0, %v15589_v21  ;;  %v455_v63 = vld [vmem:[%s19348_s1 + $0x170] sm:$0xff]  ;;  %v15641_v31 = vcombine.high %v444_v24, %v456_v30 }
 0x1c4   : > { %v15638_v21 = vcombine.high %v443_v12, %v455_v63  ;;  %v15660_v39 = vcombine.low %v443_v12, %v455_v63  ;;  %v503_v63 = vld [vmem:[%s19348_s1 + $0x2f0] sm:$0xff]  ;;  %v504_v12 = vld [vmem:[%s19348_s1 + $0x2f8] sm:$0xff] }
 0x1c5   : > { %20261 = vst [vmem:[#allocation416_spill] sm:$0xff] %v15641_v31 }
 0x1c6   : > { %4338 = vmatpush1.bf16.msra.mxu0 %v15608_v17  ;;  %4420 = vmatpush1.bf16.msra.mxu1 %v15615_v7  ;;  %20260 = vst [vmem:[#allocation415_spill] sm:$0xff] %v15638_v21  ;;  %20262 = vst [vmem:[#allocation417_spill] sm:$0xff] %v15660_v39  ;;  %v15666_v17 = vcombine.high %v467_v58, %v479_v35  ;;  %v491_v7 = vld [vmem:[%s19348_s1 + $0x290] sm:$0xff] }
 0x1c7   : > { %4450 = vmatprep.subr.bf16.mxu0 %v15610_v49  ;;  %4532 = vmatprep.subr.bf16.mxu1 %v15617_v0  ;;  %v15664_v49 = vcombine.low %v444_v24, %v456_v30  ;;  %v15669_v0 = vcombine.high %v468_v54, %v480_v1  ;;  %v492_v30 = vld [vmem:[%s19348_s1 + $0x298] sm:$0xff]  ;;  %v15686_v24 = vcombine.low %v467_v58, %v479_v35  ;;  %v527_v58 = vld [vmem:[%s19348_s1 + $0x3b0] sm:$0xff] }
 0x1c8   : > { %20264 = vst [vmem:[#allocation419_spill] sm:$0xff] %v15666_v17  ;;  %v516_v35 = vld [vmem:[%s19348_s1 + $0x358] sm:$0xff] }
 0x1c9   : > { %11143 = vmatmul.mubr.msk.bf16.vlgmr.msra.gmra.mrb[16].mxu0 %vm3553_vm1, %v13441_v56  ;;  %11145 = vmatmul.mubr.msk.bf16.vlgmr.msra.gmra.mrb[16].mxu1 %vm3553_vm1, %v13441_v56  ;;  %20263 = vst [vmem:[#allocation418_spill] sm:$0xff] %v15664_v49  ;;  %20265 = vst [vmem:[#allocation420_spill] sm:$0xff] %v15669_v0 }
 0x1ca   : > { %4451 = vmatpush1.bf16.msra.mxu0 %v15632_v33  ;;  %4533 = vmatpush1.bf16.msra.mxu1 %v15636_v60  ;;  %20266 = vst [vmem:[#allocation421_spill] sm:$0xff] %v15686_v24  ;;  %v15692_v33 = vcombine.high %v491_v7, %v503_v63  ;;  %v683_v60 = vld [vmem:[%s19348_s1 + $0x890] sm:$0xff] }
 0x1cb   : > { %4452 = vmatprep.subr.bf16.mxu0 %v15638_v21  ;;  %4534 = vmatprep.subr.bf16.mxu1 %v15641_v31  ;;  %v15690_v21 = vcombine.low %v468_v54, %v480_v1  ;;  %v15695_v31 = vcombine.high %v492_v30, %v504_v12  ;;  %v528_v54 = vld [vmem:[%s19348_s1 + $0x3b8] sm:$0xff]  ;;  %v15710_v1 = vcombine.low %v491_v7, %v503_v63  ;;  %v551_v7 = vld [vmem:[%s19348_s1 + $0x470] sm:$0xff] }
 0x1cc   : > { %4482 = vmatprep.mubr.bf16.mxu0 %v13052_v16  ;;  %4564 = vmatprep.mubr.bf16.mxu1 %v13052_v16  ;;  %20268 = vst [vmem:[#allocation423_spill] sm:$0xff] %v15692_v33  ;;  %v515_v16 = vld [vmem:[%s19348_s1 + $0x350] sm:$0xff]  ;;  %v540_v63 = vld [vmem:[%s19348_s1 + $0x418] sm:$0xff] }
 0x1cd   : > { %20267 = vst [vmem:[#allocation422_spill] sm:$0xff] %v15690_v21  ;;  %20269 = vst [vmem:[#allocation424_spill] sm:$0xff] %v15695_v31 }
 0x1ce   : > { %4453 = vmatpush1.bf16.msra.mxu0 %v15660_v39  ;;  %4535 = vmatpush1.bf16.msra.mxu1 %v15664_v49  ;;  %20270 = vst [vmem:[#allocation425_spill] sm:$0xff] %v15710_v1  ;;  %v15716_v39 = vcombine.high %v515_v16, %v527_v58  ;;  %v539_v49 = vld [vmem:[%s19348_s1 + $0x410] sm:$0xff] }
 0x1cf   : > { %4454 = vmatprep.subr.bf16.mxu0 %v15666_v17  ;;  %4536 = vmatprep.subr.bf16.mxu1 %v15669_v0  ;;  %v15714_v17 = vcombine.low %v492_v30, %v504_v12  ;;  %v15719_v0 = vcombine.high %v516_v35, %v528_v54  ;;  %v552_v30 = vld [vmem:[%s19348_s1 + $0x478] sm:$0xff]  ;;  %v15734_v12 = vcombine.low %v515_v16, %v527_v58  ;;  %v575_v16 = vld [vmem:[%s19348_s1 + $0x530] sm:$0xff] }
 0x1d0   : > { %20272 = vst [vmem:[#allocation427_spill] sm:$0xff] %v15716_v39  ;;  %v564_v58 = vld [vmem:[%s19348_s1 + $0x4d8] sm:$0xff] }
 0x1d1   : > { %20271 = vst [vmem:[#allocation426_spill] sm:$0xff] %v15714_v17  ;;  %20273 = vst [vmem:[#allocation428_spill] sm:$0xff] %v15719_v0 }
 0x1d2   : > { %4455 = vmatpush1.bf16.msra.mxu0 %v15686_v24  ;;  %4537 = vmatpush1.bf16.msra.mxu1 %v15690_v21  ;;  %20274 = vst [vmem:[#allocation429_spill] sm:$0xff] %v15734_v12  ;;  %v15740_v24 = vcombine.high %v539_v49, %v551_v7  ;;  %v563_v21 = vld [vmem:[%s19348_s1 + $0x4d0] sm:$0xff] }
 0x1d3   : > { %4456 = vmatprep.subr.bf16.mxu0 %v15692_v33  ;;  %4538 = vmatprep.subr.bf16.mxu1 %v15695_v31  ;;  %v15738_v33 = vcombine.low %v516_v35, %v528_v54  ;;  %v15743_v31 = vcombine.high %v540_v63, %v552_v30  ;;  %v576_v35 = vld [vmem:[%s19348_s1 + $0x538] sm:$0xff]  ;;  %v15758_v54 = vcombine.low %v539_v49, %v551_v7  ;;  %v599_v49 = vld [vmem:[%s19348_s1 + $0x5f0] sm:$0xff] }
 0x1d4   : > { %20276 = vst [vmem:[#allocation431_spill] sm:$0xff] %v15740_v24  ;;  %v588_v7 = vld [vmem:[%s19348_s1 + $0x598] sm:$0xff] }
 0x1d5   : > { %20275 = vst [vmem:[#allocation430_spill] sm:$0xff] %v15738_v33  ;;  %20277 = vst [vmem:[#allocation432_spill] sm:$0xff] %v15743_v31 }
 0x1d6   : > { %4457 = vmatpush1.bf16.msra.mxu0 %v15710_v1  ;;  %4539 = vmatpush1.bf16.msra.mxu1 %v15714_v17  ;;  %20278 = vst [vmem:[#allocation433_spill] sm:$0xff] %v15758_v54  ;;  %v15764_v1 = vcombine.high %v563_v21, %v575_v16  ;;  %v587_v17 = vld [vmem:[%s19348_s1 + $0x590] sm:$0xff] }
 0x1d7   : > { %4458 = vmatprep.subr.bf16.mxu0 %v15716_v39  ;;  %4540 = vmatprep.subr.bf16.mxu1 %v15719_v0  ;;  %v15762_v39 = vcombine.low %v540_v63, %v552_v30  ;;  %v15767_v0 = vcombine.high %v564_v58, %v576_v35  ;;  %v600_v63 = vld [vmem:[%s19348_s1 + $0x5f8] sm:$0xff]  ;;  %v15782_v30 = vcombine.low %v563_v21, %v575_v16  ;;  %v623_v21 = vld [vmem:[%s19348_s1 + $0x6b0] sm:$0xff] }
 0x1d8   : > { %20280 = vst [vmem:[#allocation435_spill] sm:$0xff] %v15764_v1  ;;  %v612_v16 = vld [vmem:[%s19348_s1 + $0x658] sm:$0xff] }
 0x1d9   : > { %20279 = vst [vmem:[#allocation434_spill] sm:$0xff] %v15762_v39  ;;  %20281 = vst [vmem:[#allocation436_spill] sm:$0xff] %v15767_v0 }
 0x1da   : > { %4459 = vmatpush1.bf16.msra.mxu0 %v15734_v12  ;;  %4541 = vmatpush1.bf16.msra.mxu1 %v15738_v33  ;;  %20282 = vst [vmem:[#allocation437_spill] sm:$0xff] %v15782_v30  ;;  %v15788_v12 = vcombine.high %v587_v17, %v599_v49  ;;  %v611_v33 = vld [vmem:[%s19348_s1 + $0x650] sm:$0xff] }
 0x1db   : > { %4460 = vmatprep.subr.bf16.mxu0 %v15740_v24  ;;  %4542 = vmatprep.subr.bf16.mxu1 %v15743_v31  ;;  %v15786_v24 = vcombine.low %v564_v58, %v576_v35  ;;  %v15791_v31 = vcombine.high %v588_v7, %v600_v63  ;;  %v624_v58 = vld [vmem:[%s19348_s1 + $0x6b8] sm:$0xff]  ;;  %v15806_v35 = vcombine.low %v587_v17, %v599_v49  ;;  %v647_v17 = vld [vmem:[%s19348_s1 + $0x770] sm:$0xff] }
 0x1dc   : > { %20284 = vst [vmem:[#allocation439_spill] sm:$0xff] %v15788_v12  ;;  %v636_v49 = vld [vmem:[%s19348_s1 + $0x718] sm:$0xff] }
 0x1dd   : > { %20283 = vst [vmem:[#allocation438_spill] sm:$0xff] %v15786_v24  ;;  %20285 = vst [vmem:[#allocation440_spill] sm:$0xff] %v15791_v31 }
 0x1de   : > { %4461 = vmatpush1.bf16.msra.mxu0 %v15758_v54  ;;  %4543 = vmatpush1.bf16.msra.mxu1 %v15762_v39  ;;  %20286 = vst [vmem:[#allocation441_spill] sm:$0xff] %v15806_v35  ;;  %v15812_v54 = vcombine.high %v611_v33, %v623_v21  ;;  %v635_v39 = vld [vmem:[%s19348_s1 + $0x710] sm:$0xff] }
 0x1df   : > { %4462 = vmatprep.subr.bf16.mxu0 %v15764_v1  ;;  %4544 = vmatprep.subr.bf16.mxu1 %v15767_v0  ;;  %v15810_v1 = vcombine.low %v588_v7, %v600_v63  ;;  %v15815_v0 = vcombine.high %v612_v16, %v624_v58  ;;  %v648_v7 = vld [vmem:[%s19348_s1 + $0x778] sm:$0xff]  ;;  %v15830_v63 = vcombine.low %v611_v33, %v623_v21  ;;  %v671_v33 = vld [vmem:[%s19348_s1 + $0x830] sm:$0xff] }
 0x1e0   : > { %20288 = vst [vmem:[#allocation443_spill] sm:$0xff] %v15812_v54  ;;  %v660_v21 = vld [vmem:[%s19348_s1 + $0x7d8] sm:$0xff] }
 0x1e1   : > { %20287 = vst [vmem:[#allocation442_spill] sm:$0xff] %v15810_v1  ;;  %20289 = vst [vmem:[#allocation444_spill] sm:$0xff] %v15815_v0 }
 0x1e2   : > { %4463 = vmatpush1.bf16.msra.mxu0 %v15782_v30  ;;  %4545 = vmatpush1.bf16.msra.mxu1 %v15786_v24  ;;  %20290 = vst [vmem:[#allocation445_spill] sm:$0xff] %v15830_v63  ;;  %v15836_v30 = vcombine.high %v635_v39, %v647_v17  ;;  %v659_v24 = vld [vmem:[%s19348_s1 + $0x7d0] sm:$0xff] }
 0x1e3   : > { %4464 = vmatprep.subr.bf16.mxu0 %v15788_v12  ;;  %4546 = vmatprep.subr.bf16.mxu1 %v15791_v31  ;;  %v15834_v12 = vcombine.low %v612_v16, %v624_v58  ;;  %v15839_v31 = vcombine.high %v636_v49, %v648_v7  ;;  %v672_v16 = vld [vmem:[%s19348_s1 + $0x838] sm:$0xff]  ;;  %v15854_v58 = vcombine.low %v635_v39, %v647_v17  ;;  %v695_v39 = vld [vmem:[%s19348_s1 + $0x8f0] sm:$0xff] }
 0x1e4   : > { %20292 = vst [vmem:[#allocation447_spill] sm:$0xff] %v15836_v30  ;;  %v15878_v8 = vcombine.low %v659_v24, %v671_v33  ;;  %v15884_v51 = vcombine.low %v660_v21, %v672_v16 }
 0x1e5   : > { %20291 = vst [vmem:[#allocation446_spill] sm:$0xff] %v15834_v12  ;;  %20293 = vst [vmem:[#allocation448_spill] sm:$0xff] %v15839_v31 }
 0x1e6   : > { %4465 = vmatpush1.bf16.msra.mxu0 %v15806_v35  ;;  %4547 = vmatpush1.bf16.msra.mxu1 %v15810_v1  ;;  %20294 = vst [vmem:[#allocation449_spill] sm:$0xff] %v15854_v58  ;;  %v15860_v35 = vcombine.high %v659_v24, %v671_v33  ;;  %v15863_v1 = vcombine.high %v660_v21, %v672_v16  ;;  %20296 = vst [vmem:[#allocation451_spill] sm:$0xff] %v15878_v8  ;;  %v731_v16 = vld [vmem:[%s19348_s1 + $0xa10] sm:$0xff] }
 0x1e7   : > { %4466 = vmatprep.subr.bf16.mxu0 %v15812_v54  ;;  %4548 = vmatprep.subr.bf16.mxu1 %v15815_v0  ;;  %v15858_v54 = vcombine.low %v636_v49, %v648_v7  ;;  %v684_v7 = vld [vmem:[%s19348_s1 + $0x898] sm:$0xff] }
 0x1e8   : > { %20295 = vst [vmem:[#allocation450_spill] sm:$0xff] %v15860_v35 }
 0x1ea   : > { %4467 = vmatpush1.bf16.msra.mxu0 %v15830_v63  ;;  %4549 = vmatpush1.bf16.msra.mxu1 %v15834_v12 }
 0x1eb   : > { %4468 = vmatprep.subr.bf16.mxu0 %v15836_v30  ;;  %4550 = vmatprep.subr.bf16.mxu1 %v15839_v31  ;;  %v696_v30 = vld [vmem:[%s19348_s1 + $0x8f8] sm:$0xff] }
 0x1ec   : > { %v4033_v0 = vpop.f32.mrb[8].mxu0  ;;  %v4115_v63 = vpop.f32.mrb[8].mxu1  ;;  %v15919_v33 = vcombine.low %v684_v7, %v696_v30 }
 0x1ed   : > { %v4628_v17 = vrot.slane %v4033_v0, 4  ;;  %v4035_v49 = vpop.f32.mrb[9].mxu0  ;;  %v4636_v31 = vrot.slane %v4115_v63, 2  ;;  %v4117_v14 = vpop.f32.mrb[9].mxu1  ;;  %v15886_v63 = vcombine.high %v683_v60, %v695_v39 }
 0x1ee   : > { %v4635_v12 = vrot.slane %v4035_v49, 2  ;;  %v4037_v61 = vpop.f32.mrb[10].mxu0  ;;  %4469 = vmatpush1.bf16.msra.mxu0 %v15854_v58  ;;  %v4637_v34 = vrot.slane %v4117_v14, 2  ;;  %v4119_v42 = vpop.f32.mrb[10].mxu1  ;;  %4551 = vmatpush1.bf16.msra.mxu1 %v15858_v54  ;;  %v719_v14 = vld [vmem:[%s19348_s1 + $0x9b0] sm:$0xff] }
 0x1ef   : > { %v4675_v0 = vsel %vm4672_vm3, %v15339_v9, %v4628_v17  ;;  %v4038_v36 = vpop.f32.mrb[11].mxu0  ;;  %4470 = vmatprep.subr.bf16.mxu0 %v15860_v35  ;;  %20297 = vst [vmem:[#allocation452_spill] sm:$0xff] %v15886_v63  ;;  %v15890_v61 = vsel %vm4676_vm4, %v15351_v19, %v4636_v31  ;;  %v4120_v9 = vpop.f32.mrb[11].mxu1  ;;  %4552 = vmatprep.subr.bf16.mxu1 %v15863_v1  ;;  %v720_v19 = vld [vmem:[%s19348_s1 + $0x9b8] sm:$0xff]  ;;  %v803_v58 = vld [vmem:[%s19348_s1 + $0xc50] sm:$0xff] }
 0x1f0   : > { %v15894_v24 = vsel %vm4676_vm4, %v15335_v28, %v4635_v12  ;;  %v15897_v42 = vcombine.high %v684_v7, %v696_v30  ;;  %v707_v36 = vld [vmem:[%s19348_s1 + $0x950] sm:$0xff]  ;;  %v15906_v31 = vsel %vm4676_vm4, %v4675_v0, %v4637_v34  ;;  %v708_v28 = vld [vmem:[%s19348_s1 + $0x958] sm:$0xff]  ;;  %v15915_v12 = vcombine.low %v683_v60, %v695_v39 }
 0x1f1   : > { %v15921_v34 = vcombine.high %v707_v36, %v719_v14  ;;  %v15924_v21 = vcombine.high %v708_v28, %v720_v19  ;;  %v743_v60 = vld [vmem:[%s19348_s1 + $0xa70] sm:$0xff]  ;;  %v732_v39 = vld [vmem:[%s19348_s1 + $0xa18] sm:$0xff]  ;;  %v15939_v17 = vcombine.low %v707_v36, %v719_v14  ;;  %v15943_v49 = vcombine.low %v708_v28, %v720_v19 }
 0x1f2   : > { %4471 = vmatpush1.bf16.msra.mxu0 %v15878_v8  ;;  %20298 = vst [vmem:[#allocation453_spill] sm:$0xff] %v15915_v12  ;;  %4553 = vmatpush1.bf16.msra.mxu1 %v15884_v51  ;;  %v744_v30 = vld [vmem:[%s19348_s1 + $0xa78] sm:$0xff]  ;;  %v15945_v7 = vcombine.high %v731_v16, %v743_v60  ;;  %v755_v9 = vld [vmem:[%s19348_s1 + $0xad0] sm:$0xff]  ;;  %v15963_v19 = vcombine.low %v731_v16, %v743_v60 }
 0x1f3   : > { %4472 = vmatprep.subr.bf16.mxu0 %v15886_v63  ;;  %20299 = vst [vmem:[#allocation454_spill] sm:$0xff] %v15921_v34  ;;  %4554 = vmatprep.subr.bf16.mxu1 %v15897_v42  ;;  %20300 = vst [vmem:[#allocation455_spill] sm:$0xff] %v15939_v17  ;;  %v15948_v0 = vcombine.high %v732_v39, %v744_v30  ;;  %v767_v36 = vld [vmem:[%s19348_s1 + $0xb30] sm:$0xff]  ;;  %v756_v14 = vld [vmem:[%s19348_s1 + $0xad8] sm:$0xff] }
 0x1f4   : > { %20301 = vst [vmem:[#allocation456_spill] sm:$0xff] %v15945_v7  ;;  %v768_v28 = vld [vmem:[%s19348_s1 + $0xb38] sm:$0xff]  ;;  %20302 = vst [vmem:[#allocation457_spill] sm:$0xff] %v15963_v19  ;;  %v779_v8 = vld [vmem:[%s19348_s1 + $0xb90] sm:$0xff] }
 0x1f5   : > { %v15972_v63 = vcombine.high %v756_v14, %v768_v28  ;;  %v791_v16 = vld [vmem:[%s19348_s1 + $0xbf0] sm:$0xff]  ;;  %v780_v60 = vld [vmem:[%s19348_s1 + $0xb98] sm:$0xff] }
 0x1f6   : > { %4473 = vmatpush1.bf16.msra.mxu0 %v15915_v12  ;;  %4555 = vmatpush1.bf16.msra.mxu1 %v15919_v33  ;;  %v15969_v12 = vcombine.high %v755_v9, %v767_v36 }
 0x1f7   : > { %4474 = vmatprep.subr.bf16.mxu0 %v15921_v34  ;;  %4556 = vmatprep.subr.bf16.mxu1 %v15924_v21  ;;  %v15967_v34 = vcombine.low %v732_v39, %v744_v30  ;;  %20305 = vst [vmem:[#allocation460_spill] sm:$0xff] %v15972_v63  ;;  %v792_v39 = vld [vmem:[%s19348_s1 + $0xbf8] sm:$0xff]  ;;  %v15987_v30 = vcombine.low %v755_v9, %v767_v36  ;;  %v815_v9 = vld [vmem:[%s19348_s1 + $0xcb0] sm:$0xff] }
 0x1f8   : > { %20304 = vst [vmem:[#allocation459_spill] sm:$0xff] %v15969_v12  ;;  %v15996_v35 = vcombine.high %v780_v60, %v792_v39  ;;  %v804_v36 = vld [vmem:[%s19348_s1 + $0xc58] sm:$0xff] }
 0x1f9   : > { %20303 = vst [vmem:[#allocation458_spill] sm:$0xff] %v15967_v34  ;;  %20306 = vst [vmem:[#allocation461_spill] sm:$0xff] %v15987_v30 }
 0x1fa   : > { %4475 = vmatpush1.bf16.msra.mxu0 %v15939_v17  ;;  %4557 = vmatpush1.bf16.msra.mxu1 %v15943_v49  ;;  %v15993_v17 = vcombine.high %v779_v8, %v791_v16  ;;  %20309 = vst [vmem:[#allocation464_spill] sm:$0xff] %v15996_v35 }
 0x1fb   : > { %4476 = vmatprep.subr.bf16.mxu0 %v15945_v7  ;;  %4558 = vmatprep.subr.bf16.mxu1 %v15948_v0  ;;  %v15991_v7 = vcombine.low %v756_v14, %v768_v28  ;;  %v816_v14 = vld [vmem:[%s19348_s1 + $0xcb8] sm:$0xff]  ;;  %v16011_v28 = vcombine.low %v779_v8, %v791_v16  ;;  %v839_v8 = vld [vmem:[%s19348_s1 + $0xd70] sm:$0xff] }
 0x1fc   : > { %20308 = vst [vmem:[#allocation463_spill] sm:$0xff] %v15993_v17  ;;  %v828_v16 = vld [vmem:[%s19348_s1 + $0xd18] sm:$0xff] }
 0x1fd   : > { %20307 = vst [vmem:[#allocation462_spill] sm:$0xff] %v15991_v7  ;;  %20310 = vst [vmem:[#allocation465_spill] sm:$0xff] %v16011_v28 }
 0x1fe   : > { %4477 = vmatpush1.bf16.msra.mxu0 %v15963_v19  ;;  %4559 = vmatpush1.bf16.msra.mxu1 %v15967_v34  ;;  %v16017_v19 = vcombine.high %v803_v58, %v815_v9  ;;  %v827_v34 = vld [vmem:[%s19348_s1 + $0xd10] sm:$0xff] }
 0x1ff   : > { %4478 = vmatprep.subr.bf16.mxu0 %v15969_v12  ;;  %4560 = vmatprep.subr.bf16.mxu1 %v15972_v63  ;;  %v16015_v12 = vcombine.low %v780_v60, %v792_v39  ;;  %v16020_v63 = vcombine.high %v804_v36, %v816_v14  ;;  %v840_v60 = vld [vmem:[%s19348_s1 + $0xd78] sm:$0xff]  ;;  %v16035_v39 = vcombine.low %v803_v58, %v815_v9  ;;  %v863_v58 = vld [vmem:[%s19348_s1 + $0xe30] sm:$0xff] }
 0x200   : > { %20312 = vst [vmem:[#allocation467_spill] sm:$0xff] %v16017_v19  ;;  %v852_v9 = vld [vmem:[%s19348_s1 + $0xdd8] sm:$0xff] }
 0x201   : > { %20311 = vst [vmem:[#allocation466_spill] sm:$0xff] %v16015_v12  ;;  %20313 = vst [vmem:[#allocation468_spill] sm:$0xff] %v16020_v63 }
 0x202   : > { %4479 = vmatpush1.bf16.msra.mxu0 %v15987_v30  ;;  %4561 = vmatpush1.bf16.msra.mxu1 %v15991_v7  ;;  %20314 = vst [vmem:[#allocation469_spill] sm:$0xff] %v16035_v39  ;;  %v16041_v30 = vcombine.high %v827_v34, %v839_v8  ;;  %v851_v7 = vld [vmem:[%s19348_s1 + $0xdd0] sm:$0xff] }
 0x203   : > { %4480 = vmatprep.subr.bf16.mxu0 %v15993_v17  ;;  %4562 = vmatprep.subr.bf16.mxu1 %v15996_v35  ;;  %v16039_v17 = vcombine.low %v804_v36, %v816_v14  ;;  %v16044_v35 = vcombine.high %v828_v16, %v840_v60  ;;  %v864_v36 = vld [vmem:[%s19348_s1 + $0xe38] sm:$0xff]  ;;  %v16061_v14 = vcombine.low %v827_v34, %v839_v8 }
 0x204   : > { %20316 = vst [vmem:[#allocation471_spill] sm:$0xff] %v16041_v30  ;;  %v876_v34 = vld [vmem:[%s19348_s1 + $0xe98] sm:$0xff] }
 0x205   : > { %20315 = vst [vmem:[#allocation470_spill] sm:$0xff] %v16039_v17  ;;  %20317 = vst [vmem:[#allocation472_spill] sm:$0xff] %v16044_v35  ;;  %v888_v8 = vld [vmem:[%s19348_s1 + $0xef8] sm:$0xff] }
 0x206   : > { %4481 = vmatpush1.bf16.msra.mxu0 %v16011_v28  ;;  %4563 = vmatpush1.bf16.msra.mxu1 %v16015_v12  ;;  %20318 = vst [vmem:[#allocation473_spill] sm:$0xff] %v16061_v14  ;;  %v16067_v28 = vcombine.high %v851_v7, %v863_v58 }
 0x207   : > { %4491 = vmatprep.subr.bf16.mxu0 %v16017_v19  ;;  %4573 = vmatprep.subr.bf16.mxu1 %v16020_v63  ;;  %v16065_v19 = vcombine.low %v828_v16, %v840_v60  ;;  %v16070_v63 = vcombine.high %v852_v9, %v864_v36  ;;  %v16087_v16 = vcombine.low %v851_v7, %v863_v58  ;;  %v911_v7 = vld [vmem:[%s19348_s1 + $0xfb0] sm:$0xff]  ;;  %v900_v58 = vld [vmem:[%s19348_s1 + $0xf58] sm:$0xff] }
 0x208   : > { %20320 = vst [vmem:[#allocation475_spill] sm:$0xff] %v16067_v28  ;;  %v16091_v60 = vcombine.low %v852_v9, %v864_v36  ;;  %v912_v9 = vld [vmem:[%s19348_s1 + $0xfb8] sm:$0xff] }
 0x209   : > { %4483 = vmatmul.mubr.bf16.vlgmr.msra.gmra.mrb[20].mxu0 %v13274_v26  ;;  %4565 = vmatmul.mubr.bf16.vlgmr.msra.gmra.mrb[20].mxu1 %v13274_v26  ;;  %20319 = vst [vmem:[#allocation474_spill] sm:$0xff] %v16065_v19  ;;  %20321 = vst [vmem:[#allocation476_spill] sm:$0xff] %v16070_v63  ;;  %v887_v26 = vld [vmem:[%s19348_s1 + $0xef0] sm:$0xff] }
 0x20a   : > { %4492 = vmatpush1.bf16.msra.mxu0 %v16035_v39  ;;  %4574 = vmatpush1.bf16.msra.mxu1 %v16039_v17  ;;  %v875_v39 = vld [vmem:[%s19348_s1 + $0xe90] sm:$0xff]  ;;  %20322 = vst [vmem:[#allocation477_spill] sm:$0xff] %v16087_v16  ;;  %20323 = vst [vmem:[#allocation478_spill] sm:$0xff] %v16091_v60 }
 0x20b   : > { %4493 = vmatprep.subr.bf16.mxu0 %v16041_v30  ;;  %4575 = vmatprep.subr.bf16.mxu1 %v16044_v35  ;;  %v16093_v30 = vcombine.high %v875_v39, %v887_v26  ;;  %v16096_v35 = vcombine.high %v876_v34, %v888_v8  ;;  %v899_v17 = vld [vmem:[%s19348_s1 + $0xf50] sm:$0xff]  ;;  %v16111_v36 = vcombine.low %v875_v39, %v887_v26  ;;  %v924_v26 = vld [vmem:[%s19348_s1 + $0x1018] sm:$0xff] }
 0x20c   : > { %4523 = vmatprep.mubr.bf16.mxu0 %v19890_v2  ;;  %4605 = vmatprep.mubr.bf16.mxu1 %v19890_v2  ;;  %v935_v39 = vld [vmem:[%s19348_s1 + $0x1070] sm:$0x77] }
 0x20d   : > { %20324 = vst [vmem:[#allocation479_spill] sm:$0xff] %v16093_v30  ;;  %20325 = vst [vmem:[#allocation480_spill] sm:$0xff] %v16096_v35 }
 0x20e   : > { %4494 = vmatpush1.bf16.msra.mxu0 %v16061_v14  ;;  %4576 = vmatpush1.bf16.msra.mxu1 %v16065_v19  ;;  %v16117_v14 = vcombine.high %v899_v17, %v911_v7  ;;  %v923_v19 = vld [vmem:[%s19348_s1 + $0x1010] sm:$0xff] }
 0x20f   : > { %4495 = vmatprep.subr.bf16.mxu0 %v16067_v28  ;;  %4577 = vmatprep.subr.bf16.mxu1 %v16070_v63  ;;  %v16115_v28 = vcombine.low %v876_v34, %v888_v8  ;;  %v16120_v63 = vcombine.high %v900_v58, %v912_v9  ;;  %v936_v34 = vld [vmem:[%s19348_s1 + $0x1078] sm:$0x77]  ;;  %v16135_v8 = vcombine.low %v899_v17, %v911_v7 }
 0x210   : > { %v11124_v12 = vcombine.low %v924_v26, %v936_v34  ;;  %v5163_v7 = vcombine.high %v13409_v44, %v13409_v44  ;;  %v20335_v44 = vld [vmem:[#allocation52_spill] sm:$0xff] }
 0x212   : > { %4496 = vmatpush1.bf16.msra.mxu0 %v16087_v16  ;;  %4578 = vmatpush1.bf16.msra.mxu1 %v16091_v60  ;;  %v16141_v16 = vcombine.high %v923_v19, %v935_v39  ;;  %v16144_v60 = vcombine.high %v924_v26, %v936_v34  ;;  %v20337_v26 = vld [vmem:[#allocation56_spill] sm:$0xff] }
 0x213   : > { %4497 = vmatprep.subr.bf16.mxu0 %v16093_v30  ;;  %4579 = vmatprep.subr.bf16.mxu1 %v16096_v35  ;;  %v16139_v30 = vcombine.low %v900_v58, %v912_v9  ;;  %v11122_v35 = vcombine.low %v923_v19, %v935_v39  ;;  %v16158_v19 = vsel %vm19843_vm0, %v11124_v12, 0  ;;  %v16162_v58 = vpack.c.bf16 %v5163_v7, %v5163_v7  ;;  %v12284_v12 = vld [vmem:[%s19349_s2 + $0x64] ss:$8 sps:$4 sm:$0xff]   ;;  %v12287_v7 = vld [vmem:[%s19349_s2 + $0x74] ss:$8 sps:$4 sm:$0xff]  }
 0x214   : > { %v20336_v9 = vld [vmem:[#allocation54_spill] sm:$0xff] }
 0x215   : > { %v16151_v17 = vsel %vm19843_vm0, %v11122_v35, 0  ;;  %v12282_v35 = vld [vmem:[%s19349_s2 + $0x60] ss:$8 sps:$4 sm:$0xff]  }
 0x216   : > { %4498 = vmatpush1.bf16.msra.mxu0 %v16111_v36  ;;  %4580 = vmatpush1.bf16.msra.mxu1 %v16115_v28  ;;  %v11198_v39 = vld.sshfl [vmem:[%s12990_s24 + $0x8] sm:$0x3 pattern:$0x76325410] }
 0x217   : > { %4499 = vmatprep.subr.bf16.mxu0 %v16117_v14  ;;  %4581 = vmatprep.subr.bf16.mxu1 %v16120_v63  ;;  %v16265_v34 = vpack.c.bf16 %v11198_v39, %v11198_v39  ;;  %v12309_v39 = vld [vmem:[%s19349_s2 + $0xf0] ss:$8 sps:$4 sm:$0xff]  }
 0x21a   : > { %4500 = vmatpush1.bf16.msra.mxu0 %v16135_v8  ;;  %4582 = vmatpush1.bf16.msra.mxu1 %v16139_v30 }
 0x21b   : > { %11146 = vmatprep.subr.msk.bf16.mxu0 %vm19843_vm0, %v16141_v16  ;;  %11148 = vmatprep.subr.msk.bf16.mxu1 %vm19843_vm0, %v16144_v60 }
 0x21e   : > { %4502 = vmatpush1.bf16.msra.mxu0 %v16151_v17  ;;  %4584 = vmatpush1.bf16.msra.mxu1 %v16158_v19 }
 0x21f   : > { %5178 = vmatprep.subr.bf16.mxu1 %v12838_v3 }
 0x221   : > { %11147 = vmatmul.mubr.msk.bf16.vlgmr.msra.gmra.mrb[20].mxu0 %vm3553_vm1, %v13441_v56  ;;  %11149 = vmatmul.mubr.msk.bf16.vlgmr.msra.gmra.mrb[20].mxu1 %vm3553_vm1, %v13441_v56 }
 0x222   : > { %5179 = vmatpush1.bf16.msra.mxu1 %v12843_v5  ;;  %5210 = vmatprep.mubr.bf16.mxu1 %v16162_v58 }
 0x223   : > { %5180 = vmatprep.subr.bf16.mxu1 %v12855_v10 }
 0x226   : > { %5181 = vmatpush1.bf16.msra.mxu1 %v12880_v18 }
 0x227   : > { %5182 = vmatprep.subr.bf16.mxu1 %v12886_v20 }
 0x22a   : > { %5183 = vmatpush1.bf16.msra.mxu1 %v12912_v27 }
 0x22b   : > { %5184 = vmatprep.subr.bf16.mxu1 %v12918_v29 }
 0x22e   : > { %5185 = vmatpush1.bf16.msra.mxu1 %v12942_v38 }
 0x22f   : > { %5186 = vmatprep.subr.bf16.mxu1 %v12948_v40 }
 0x232   : > { %5187 = vmatpush1.bf16.msra.mxu1 %v12970_v48 }
 0x233   : > { %5188 = vmatprep.subr.bf16.mxu1 %v12976_v50  ;;  %v12264_v50 = vld [vmem:[%s19349_s2] ss:$8 sps:$4 sm:$0xff]  }
 0x236   : > { %5189 = vmatpush1.bf16.msra.mxu1 %v13002_v57  ;;  %v12266_v57 = vld [vmem:[%s19349_s2 + $0x4] ss:$8 sps:$4 sm:$0xff]  }
 0x237   : > { %5190 = vmatprep.subr.bf16.mxu1 %v13008_v59  ;;  %5022 = vmatprep.subr.bf16.mxu0 %v12266_v57  ;;  %v12267_v59 = vld [vmem:[%s19349_s2 + $0x10] ss:$8 sps:$4 sm:$0xff]   ;;  %v20342_v57 = vld [vmem:[#allocation5_spill] sm:$0xff] }
 0x238   : > { %5023 = vmatpush1.bf16.msra.mxu0 %v12264_v50  ;;  %v12293_v50 = vld [vmem:[%s19349_s2 + $0x94] ss:$8 sps:$4 sm:$0xff]  }
 0x23a   : > { %5191 = vmatpush1.bf16.msra.mxu1 %v13033_v4  ;;  %v12269_v4 = vld [vmem:[%s19349_s2 + $0x14] ss:$8 sps:$4 sm:$0xff]  }
 0x23b   : > { %5192 = vmatprep.subr.bf16.mxu1 %v13041_v11  ;;  %5024 = vmatprep.subr.bf16.mxu0 %v12269_v4  ;;  %v20326_v11 = vld [vmem:[#allocation34_spill] sm:$0xff] }
 0x23c   : > { %5025 = vmatpush1.bf16.msra.mxu0 %v12267_v59  ;;  %v12291_v59 = vld [vmem:[%s19349_s2 + $0x90] ss:$8 sps:$4 sm:$0xff]   ;;  %v20343_v4 = vld [vmem:[#allocation6_spill] sm:$0xff] }
 0x23e   : > { %5193 = vmatpush1.bf16.msra.mxu1 %v13061_v23  ;;  %v20327_v23 = vld [vmem:[#allocation36_spill] sm:$0xff] }
 0x23f   : > { %5194 = vmatprep.subr.bf16.mxu1 %v13068_v25  ;;  %v12270_v25 = vld [vmem:[%s19349_s2 + $0x20] ss:$8 sps:$4 sm:$0xff]  }
 0x242   : > { %5195 = vmatpush1.bf16.msra.mxu1 %v13087_v37  ;;  %v20328_v37 = vld [vmem:[#allocation38_spill] sm:$0xff] }
 0x243   : > { %5196 = vmatprep.subr.bf16.mxu1 %v13093_v43  ;;  %v20329_v43 = vld [vmem:[#allocation40_spill] sm:$0xff] }
 0x244   : > { %v4197_v3 = vpop.f32.mrb[12].mxu0  ;;  %v16188_v5 = vpop.f32.mrb[12].mxu1 }
 0x245   : > { %v16190_v10 = vpop.f32.mrb[13].mxu0  ;;  %v4281_v18 = vpop.f32.mrb[13].mxu1 }
 0x246   : > { %v4201_v20 = vpop.f32.mrb[14].mxu0  ;;  %v4644_v27 = vrot.slane %v4281_v18, 6  ;;  %v4283_v29 = vpop.f32.mrb[14].mxu1  ;;  %5197 = vmatpush1.bf16.msra.mxu1 %v13111_v55  ;;  %v12273_v55 = vld [vmem:[%s19349_s2 + $0x30] ss:$8 sps:$4 sm:$0xff]  }
 0x247   : > { %v4202_v38 = vpop.f32.mrb[15].mxu0  ;;  %v4284_v40 = vpop.f32.mrb[15].mxu1  ;;  %5198 = vmatprep.subr.bf16.mxu1 %v13117_v62  ;;  %v12275_v62 = vld [vmem:[%s19349_s2 + $0x34] ss:$8 sps:$4 sm:$0xff]   ;;  %v12285_v18 = vld [vmem:[%s19349_s2 + $0x70] ss:$8 sps:$4 sm:$0xff]  }
 0x248   : > { %v16195_v48 = vsel %vm4668_vm2, %v4197_v3, %v4644_v27  ;;  %v20338_v3 = vld [vmem:[#allocation58_spill] sm:$0xff]  ;;  %v20340_v29 = vld [vmem:[#allocation3_spill] sm:$0xff]  ;;  %v20341_v40 = vld [vmem:[#allocation4_spill] sm:$0xff] }
 0x249   : > { %v20339_v20 = vld [vmem:[#allocation2_spill] sm:$0xff] }
 0x24a   : > { %5199 = vmatpush1.bf16.msra.mxu1 %v13135_v15  ;;  %v20330_v15 = vld [vmem:[#allocation42_spill] sm:$0xff] }
 0x24b   : > { %5200 = vmatprep.subr.bf16.mxu1 %v13141_v22  ;;  %v20331_v22 = vld [vmem:[#allocation44_spill] sm:$0xff]  ;;  %v12290_v27 = vld [vmem:[%s19349_s2 + $0x84] ss:$8 sps:$4 sm:$0xff]   ;;  %v12288_v38 = vld [vmem:[%s19349_s2 + $0x80] ss:$8 sps:$4 sm:$0xff]  }
 0x24e   : > { %5201 = vmatpush1.bf16.msra.mxu1 %v13159_v47  ;;  %v12278_v47 = vld [vmem:[%s19349_s2 + $0x44] ss:$8 sps:$4 sm:$0xff]  }
 0x24f   : > { %5202 = vmatprep.subr.bf16.mxu1 %v13165_v53  ;;  %v20333_v53 = vld [vmem:[#allocation48_spill] sm:$0xff] }
 0x252   : > { %5203 = vmatpush1.bf16.msra.mxu1 %v13183_v13  ;;  %v12279_v13 = vld [vmem:[%s19349_s2 + $0x50] ss:$8 sps:$4 sm:$0xff]  }
 0x253   : > { %5204 = vmatprep.subr.bf16.mxu1 %v13189_v32  ;;  %v12276_v32 = vld [vmem:[%s19349_s2 + $0x40] ss:$8 sps:$4 sm:$0xff]  }
 0x256   : > { %5205 = vmatpush1.bf16.msra.mxu1 %v13207_v46  ;;  %v12281_v46 = vld [vmem:[%s19349_s2 + $0x54] ss:$8 sps:$4 sm:$0xff]  }
 0x257   : > { %5206 = vmatprep.subr.bf16.mxu1 %v13213_v52  ;;  %v20332_v52 = vld [vmem:[#allocation46_spill] sm:$0xff] }
 0x25a   : > { %5207 = vmatpush1.bf16.msra.mxu1 %v13231_v6  ;;  %v20334_v6 = vld [vmem:[#allocation50_spill] sm:$0xff] }
 0x25b   : > { %5208 = vmatprep.subr.bf16.mxu1 %v13237_v45  ;;  %v12272_v45 = vld [vmem:[%s19349_s2 + $0x24] ss:$8 sps:$4 sm:$0xff]  }
 0x25c   : > { %5026 = vmatprep.subr.bf16.mxu0 %v12272_v45  ;;  %v20345_v45 = vld [vmem:[#allocation8_spill] sm:$0xff] }
 0x25d   : > { %5027 = vmatpush1.bf16.msra.mxu0 %v12270_v25  ;;  %v12294_v25 = vld [vmem:[%s19349_s2 + $0xa0] ss:$8 sps:$4 sm:$0xff]  }
 0x25e   : > { %5209 = vmatpush1.bf16.msra.mxu1 %v20326_v11  ;;  %5028 = vmatprep.subr.bf16.mxu0 %v12275_v62  ;;  %v12296_v11 = vld [vmem:[%s19349_s2 + $0xa4] ss:$8 sps:$4 sm:$0xff]  }
 0x25f   : > { %5219 = vmatprep.subr.bf16.mxu1 %v20327_v23  ;;  %v20344_v23 = vld [vmem:[#allocation7_spill] sm:$0xff]  ;;  %v20347_v62 = vld [vmem:[#allocation10_spill] sm:$0xff] }
 0x261   : > { %5211 = vmatmul.mubr.bf16.vlgmr.msra.gmra.mrb[24].mxu1 %v13441_v56  ;;  %5029 = vmatpush1.bf16.msra.mxu0 %v12273_v55  ;;  %v12297_v55 = vld [vmem:[%s19349_s2 + $0xb0] ss:$8 sps:$4 sm:$0xff]  }
 0x262   : > { %5220 = vmatpush1.bf16.msra.mxu1 %v20328_v37  ;;  %5251 = vmatprep.mubr.bf16.mxu1 %v19890_v2  ;;  %v12299_v37 = vld [vmem:[%s19349_s2 + $0xb4] ss:$8 sps:$4 sm:$0xff]  }
 0x263   : > { %5221 = vmatprep.subr.bf16.mxu1 %v20329_v43  ;;  %5030 = vmatprep.subr.bf16.mxu0 %v12278_v47  ;;  %v20346_v43 = vld [vmem:[#allocation9_spill] sm:$0xff] }
 0x264   : > { %v20349_v47 = vld [vmem:[#allocation13_spill] sm:$0xff] }
 0x265   : > { %5031 = vmatpush1.bf16.msra.mxu0 %v12276_v32  ;;  %v12300_v32 = vld [vmem:[%s19349_s2 + $0xc0] ss:$8 sps:$4 sm:$0xff]  }
 0x266   : > { %5222 = vmatpush1.bf16.msra.mxu1 %v20330_v15  ;;  %5032 = vmatprep.subr.bf16.mxu0 %v12281_v46  ;;  %v12302_v15 = vld [vmem:[%s19349_s2 + $0xc4] ss:$8 sps:$4 sm:$0xff]   ;;  %v20351_v46 = vld [vmem:[#allocation15_spill] sm:$0xff] }
 0x267   : > { %5223 = vmatprep.subr.bf16.mxu1 %v20331_v22  ;;  %v20348_v22 = vld [vmem:[#allocation12_spill] sm:$0xff] }
 0x269   : > { %5033 = vmatpush1.bf16.msra.mxu0 %v12279_v13  ;;  %v12303_v13 = vld [vmem:[%s19349_s2 + $0xd0] ss:$8 sps:$4 sm:$0xff]  }
 0x26a   : > { %5224 = vmatpush1.bf16.msra.mxu1 %v20332_v52  ;;  %5034 = vmatprep.subr.bf16.mxu0 %v12284_v12  ;;  %v12305_v52 = vld [vmem:[%s19349_s2 + $0xd4] ss:$8 sps:$4 sm:$0xff]   ;;  %v20353_v12 = vld [vmem:[#allocation17_spill] sm:$0xff] }
 0x26b   : > { %5225 = vmatprep.subr.bf16.mxu1 %v20333_v53  ;;  %v20350_v53 = vld [vmem:[#allocation14_spill] sm:$0xff] }
 0x26d   : > { %5035 = vmatpush1.bf16.msra.mxu0 %v12282_v35  ;;  %v20352_v35 = vld [vmem:[#allocation16_spill] sm:$0xff] }
 0x26e   : > { %5226 = vmatpush1.bf16.msra.mxu1 %v20334_v6  ;;  %5036 = vmatprep.subr.bf16.mxu0 %v12287_v7  ;;  %v12308_v6 = vld [vmem:[%s19349_s2 + $0xe4] ss:$8 sps:$4 sm:$0xff]   ;;  %v20355_v7 = vld [vmem:[#allocation19_spill] sm:$0xff] }
 0x26f   : > { %5227 = vmatprep.subr.bf16.mxu1 %v20335_v44  ;;  %v12306_v44 = vld [vmem:[%s19349_s2 + $0xe0] ss:$8 sps:$4 sm:$0xff]  }
 0x271   : > { %5037 = vmatpush1.bf16.msra.mxu0 %v12285_v18  ;;  %v20356_v18 = vld [vmem:[#allocation20_spill] sm:$0xff] }
 0x272   : > { %5228 = vmatpush1.bf16.msra.mxu1 %v20336_v9  ;;  %5038 = vmatprep.subr.bf16.mxu0 %v12290_v27  ;;  %v12311_v9 = vld [vmem:[%s19349_s2 + $0xf4] ss:$8 sps:$4 sm:$0xff]   ;;  %v20357_v27 = vld [vmem:[#allocation21_spill] sm:$0xff] }
 0x273   : > { %11199 = vmatprep.subr.msk.bf16.mxu1 %vm19843_vm0, %v20337_v26  ;;  %v20354_v26 = vld [vmem:[#allocation18_spill] sm:$0xff] }
 0x275   : > { %5039 = vmatpush1.bf16.msra.mxu0 %v12288_v38 }
 0x276   : > { %5230 = vmatpush1.bf16.msra.mxu1 %v20338_v3  ;;  %5040 = vmatprep.subr.bf16.mxu0 %v12293_v50  ;;  %v12314_v3 = vld [vmem:[%s19349_s2 + $0x104] ss:$8 sps:$4 sm:$0xff]  }
 0x277   : > { %5260 = vmatprep.subr.bf16.mxu1 %v20339_v20 }
 0x279   : > { %11200 = vmatmul.mubr.msk.bf16.vlgmr.msra.gmra.mrb[24].mxu1 %vm3553_vm1, %v16265_v34  ;;  %5041 = vmatpush1.bf16.msra.mxu0 %v12291_v59 }
 0x27a   : > { %5261 = vmatpush1.bf16.msra.mxu1 %v20340_v29  ;;  %5292 = vmatprep.mubr.bf16.mxu1 %v16162_v58 }
 0x27b   : > { %5262 = vmatprep.subr.bf16.mxu1 %v20341_v40  ;;  %5042 = vmatprep.subr.bf16.mxu0 %v12296_v11 }
 0x27d   : > { %5043 = vmatpush1.bf16.msra.mxu0 %v12294_v25 }
 0x27e   : > { %5263 = vmatpush1.bf16.msra.mxu1 %v20342_v57  ;;  %5044 = vmatprep.subr.bf16.mxu0 %v12299_v37 }
 0x27f   : > { %5264 = vmatprep.subr.bf16.mxu1 %v20343_v4 }
 0x281   : > { %5045 = vmatpush1.bf16.msra.mxu0 %v12297_v55 }
 0x282   : > { %5265 = vmatpush1.bf16.msra.mxu1 %v20344_v23  ;;  %5046 = vmatprep.subr.bf16.mxu0 %v12302_v15  ;;  %v20359_v15 = vld [vmem:[#allocation23_spill] sm:$0xff] }
 0x283   : > { %5266 = vmatprep.subr.bf16.mxu1 %v20345_v45  ;;  %v20358_v45 = vld [vmem:[#allocation22_spill] sm:$0xff] }
 0x285   : > { %5047 = vmatpush1.bf16.msra.mxu0 %v12300_v32  ;;  %v20361_v32 = vld [vmem:[#allocation25_spill] sm:$0xff] }
 0x286   : > { %5267 = vmatpush1.bf16.msra.mxu1 %v20346_v43  ;;  %5048 = vmatprep.subr.bf16.mxu0 %v12305_v52  ;;  %v20363_v52 = vld [vmem:[#allocation27_spill] sm:$0xff] }
 0x287   : > { %5268 = vmatprep.subr.bf16.mxu1 %v20347_v62 }
 0x289   : > { %5049 = vmatpush1.bf16.msra.mxu0 %v12303_v13  ;;  %v20367_v13 = vld [vmem:[#allocation31_spill] sm:$0xff] }
 0x28a   : > { %5269 = vmatpush1.bf16.msra.mxu1 %v20348_v22  ;;  %5050 = vmatprep.subr.bf16.mxu0 %v12308_v6  ;;  %v20369_v6 = vld [vmem:[#allocation33_spill] sm:$0xff] }
 0x28b   : > { %5270 = vmatprep.subr.bf16.mxu1 %v20349_v47  ;;  %v20362_v47 = vld [vmem:[#allocation26_spill] sm:$0xff] }
 0x28d   : > { %5051 = vmatpush1.bf16.msra.mxu0 %v12306_v44  ;;  %v20370_v44 = vld [vmem:[#allocation35_spill] sm:$0xff] }
 0x28e   : > { %5271 = vmatpush1.bf16.msra.mxu1 %v20350_v53  ;;  %5052 = vmatprep.subr.bf16.mxu0 %v12311_v9  ;;  %v20365_v53 = vld [vmem:[#allocation29_spill] sm:$0xff] }
 0x28f   : > { %5272 = vmatprep.subr.bf16.mxu1 %v20351_v46  ;;  %v20368_v46 = vld [vmem:[#allocation32_spill] sm:$0xff]  ;;  %v20373_v9 = vld [vmem:[#allocation41_spill] sm:$0xff] }
 0x291   : > { %5053 = vmatpush1.bf16.msra.mxu0 %v12309_v39  ;;  %v20374_v39 = vld [vmem:[#allocation43_spill] sm:$0xff] }
 0x292   : > { %5273 = vmatpush1.bf16.msra.mxu1 %v20352_v35  ;;  %5065 = vmatprep.subr.bf16.mxu0 %v12314_v3  ;;  %v20371_v35 = vld [vmem:[#allocation37_spill] sm:$0xff] }
 0x293   : > { %5274 = vmatprep.subr.bf16.mxu1 %v20353_v12  ;;  %v20372_v12 = vld [vmem:[#allocation39_spill] sm:$0xff]  ;;  %v20377_v3 = vld [vmem:[#allocation49_spill] sm:$0xff] }
 0x296   : > { %5275 = vmatpush1.bf16.msra.mxu1 %v20354_v26  ;;  %v20375_v26 = vld [vmem:[#allocation45_spill] sm:$0xff] }
 0x297   : > { %5276 = vmatprep.subr.bf16.mxu1 %v20355_v7  ;;  %v20376_v7 = vld [vmem:[#allocation47_spill] sm:$0xff] }
 0x29a   : > { %5277 = vmatpush1.bf16.msra.mxu1 %v20356_v18  ;;  %v20378_v18 = vld [vmem:[#allocation51_spill] sm:$0xff] }
 0x29b   : > { %5278 = vmatprep.subr.bf16.mxu1 %v20357_v27  ;;  %v20380_v27 = vld [vmem:[#allocation55_spill] sm:$0xff] }
 0x29c   : > { %v4361_v20 = vpop.f32.mrb[16].mxu0  ;;  %v4443_v38 = vpop.f32.mrb[16].mxu1 }
 0x29d   : > { %v4645_v29 = vrot.slane %v4361_v20, 6  ;;  %v4363_v40 = vpop.f32.mrb[17].mxu0  ;;  %v4653_v50 = vrot.slane %v4443_v38, 4  ;;  %v4445_v59 = vpop.f32.mrb[17].mxu1  ;;  %v20379_v20 = vld [vmem:[#allocation53_spill] sm:$0xff]  ;;  %v20382_v38 = vld [vmem:[#allocation60_spill] sm:$0xff] }
 0x29e   : > { %v4646_v57 = vrot.slane %v4363_v40, 6  ;;  %v4365_v4 = vpop.f32.mrb[18].mxu0  ;;  %v4654_v23 = vrot.slane %v4445_v59, 4  ;;  %v4447_v25 = vpop.f32.mrb[18].mxu1  ;;  %5279 = vmatpush1.bf16.msra.mxu1 %v20358_v45  ;;  %v20383_v40 = vld [vmem:[#allocation61_spill] sm:$0xff]  ;;  %v20386_v59 = vld [vmem:[#allocation67_spill] sm:$0xff] }
 0x29f   : > { %v4681_v11 = vsel %vm4668_vm2, %v16190_v10, %v4645_v29  ;;  %v4366_v37 = vpop.f32.mrb[19].mxu0  ;;  %v16352_v43 = vsel %vm4672_vm3, %v16195_v48, %v4653_v50  ;;  %v4448_v62 = vpop.f32.mrb[19].mxu1  ;;  %5280 = vmatprep.subr.bf16.mxu1 %v20359_v15  ;;  %v20360_v10 = vld [vmem:[#allocation24_spill] sm:$0xff]  ;;  %v20381_v29 = vld [vmem:[#allocation57_spill] sm:$0xff]  ;;  %v20384_v50 = vld [vmem:[#allocation63_spill] sm:$0xff] }
 0x2a0   : > { %v16356_v55 = vsel %vm4668_vm2, %v16188_v5, %v4646_v57  ;;  %v16360_v22 = vsel %vm4672_vm3, %v4681_v11, %v4654_v23  ;;  %v20364_v48 = vld [vmem:[#allocation28_spill] sm:$0xff]  ;;  %v20366_v5 = vld [vmem:[#allocation30_spill] sm:$0xff]  ;;  %v20385_v57 = vld [vmem:[#allocation65_spill] sm:$0xff] }
 0x2a1   : > { %v20387_v4 = vld [vmem:[#allocation69_spill] sm:$0xff]  ;;  %v20388_v11 = vld [vmem:[#allocation71_spill] sm:$0xff] }
 0x2a2   : > { %5281 = vmatpush1.bf16.msra.mxu1 %v20360_v10  ;;  %v20389_v23 = vld [vmem:[#allocation73_spill] sm:$0xff]  ;;  %v20390_v25 = vld [vmem:[#allocation75_spill] sm:$0xff] }
 0x2a3   : > { %5282 = vmatprep.subr.bf16.mxu1 %v20361_v32  ;;  %v20391_v45 = vld [vmem:[#allocation77_spill] sm:$0xff]  ;;  %v20392_v37 = vld [vmem:[#allocation79_spill] sm:$0xff]  ;;  %v4690_v32 = vmax.f32 %v15890_v61, 0.0 }
 0x2a4   : > { %v20393_v62 = vld [vmem:[#allocation81_spill] sm:$0xff]  ;;  %v20394_v15 = vld [vmem:[#allocation83_spill] sm:$0xff] }
 0x2a5   : > { %v20395_v10 = vld [vmem:[#allocation85_spill] sm:$0xff] }
 0x2a6   : > { %5283 = vmatpush1.bf16.msra.mxu1 %v20362_v47  ;;  %v4689_v47 = vmax.f32 %v15894_v24, 0.0  ;;  %v20401_v24 = vld [vmem:[#allocation97_spill] sm:$0xff] }
 0x2a7   : > { %5284 = vmatprep.subr.bf16.mxu1 %v20363_v52  ;;  %v20396_v52 = vld [vmem:[#allocation87_spill] sm:$0xff] }
 0x2aa   : > { %5285 = vmatpush1.bf16.msra.mxu1 %v20364_v48  ;;  %v4691_v48 = vmax.f32 %v15906_v31, 0.0 }
 0x2ab   : > { %5286 = vmatprep.subr.bf16.mxu1 %v20365_v53  ;;  %v20397_v53 = vld [vmem:[#allocation89_spill] sm:$0xff] }
 0x2ae   : > { %5287 = vmatpush1.bf16.msra.mxu1 %v20366_v5  ;;  %v4696_v5 = vadd.f32 1e-07, %v4690_v32 }
 0x2af   : > { %5288 = vmatprep.subr.bf16.mxu1 %v20367_v13  ;;  %v4695_v13 = vadd.f32 1e-07, %v4689_v47  ;;  %v20406_v47 = vld [vmem:[#allocation107_spill] sm:$0xff] }
 0x2b0   : > { %12602 = vlog2.f32 %v4696_v5 }
 0x2b1   : > { %12604 = vlog2.f32 %v4695_v13  ;;  %v20408_v13 = vld [vmem:[#allocation111_spill] sm:$0xff] }
 0x2b2   : > { %5289 = vmatpush1.bf16.msra.mxu1 %v20368_v46  ;;  %v20398_v46 = vld [vmem:[#allocation91_spill] sm:$0xff] }
 0x2b3   : > { %5290 = vmatprep.subr.bf16.mxu1 %v20369_v6  ;;  %v4697_v6 = vadd.f32 1e-07, %v4691_v48  ;;  %v20407_v48 = vld [vmem:[#allocation109_spill] sm:$0xff] }
 0x2b5   : > { %12606 = vlog2.f32 %v4697_v6  ;;  %v20409_v6 = vld [vmem:[#allocation113_spill] sm:$0xff] }
 0x2b6   : > { %5291 = vmatpush1.bf16.msra.mxu1 %v20370_v44  ;;  %v20399_v44 = vld [vmem:[#allocation93_spill] sm:$0xff] }
 0x2b7   : > { %5301 = vmatprep.subr.bf16.mxu1 %v20371_v35  ;;  %v20400_v35 = vld [vmem:[#allocation95_spill] sm:$0xff] }
 0x2b9   : > { %5293 = vmatmul.mubr.bf16.vlgmr.msra.gmra.mrb[28].mxu1 %v13441_v56 }
 0x2ba   : > { %5302 = vmatpush1.bf16.msra.mxu1 %v20372_v12  ;;  %5333 = vmatprep.mubr.bf16.mxu1 %v19890_v2 }
 0x2bb   : > { %5303 = vmatprep.subr.bf16.mxu1 %v20373_v9 }
 0x2be   : > { %5304 = vmatpush1.bf16.msra.mxu1 %v20374_v39 }
 0x2bf   : > { %5305 = vmatprep.subr.bf16.mxu1 %v20375_v26 }
 0x2c2   : > { %5306 = vmatpush1.bf16.msra.mxu1 %v20376_v7 }
 0x2c3   : > { %5307 = vmatprep.subr.bf16.mxu1 %v20377_v3 }
 0x2c6   : > { %5308 = vmatpush1.bf16.msra.mxu1 %v20378_v18 }
 0x2c7   : > { %5309 = vmatprep.subr.bf16.mxu1 %v20379_v20 }
 0x2ca   : > { %5310 = vmatpush1.bf16.msra.mxu1 %v20380_v27 }
 0x2cb   : > { %11201 = vmatprep.subr.msk.bf16.mxu1 %vm19843_vm0, %v20381_v29  ;;  %v20402_v29 = vld [vmem:[#allocation99_spill] sm:$0xff] }
 0x2ce   : > { %5312 = vmatpush1.bf16.msra.mxu1 %v20382_v38 }
 0x2cf   : > { %5424 = vmatprep.subr.bf16.mxu1 %v20383_v40 }
 0x2d1   : > { %11202 = vmatmul.mubr.msk.bf16.vlgmr.msra.gmra.mrb[28].mxu1 %vm3553_vm1, %v16265_v34 }
 0x2d2   : > { %5425 = vmatpush1.bf16.msra.mxu1 %v20384_v50  ;;  %5456 = vmatprep.mubr.bf16.mxu1 %v16162_v58 }
 0x2d3   : > { %5426 = vmatprep.subr.bf16.mxu1 %v20385_v57 }
 0x2d6   : > { %5427 = vmatpush1.bf16.msra.mxu1 %v20386_v59  ;;  %v20403_v59 = vld [vmem:[#allocation101_spill] sm:$0xff] }
 0x2d7   : > { %5428 = vmatprep.subr.bf16.mxu1 %v20387_v4 }
 0x2da   : > { %5429 = vmatpush1.bf16.msra.mxu1 %v20388_v11 }
 0x2db   : > { %5430 = vmatprep.subr.bf16.mxu1 %v20389_v23 }
 0x2de   : > { %5431 = vmatpush1.bf16.msra.mxu1 %v20390_v25 }
 0x2df   : > { %5432 = vmatprep.subr.bf16.mxu1 %v20391_v45 }
 0x2e2   : > { %5433 = vmatpush1.bf16.msra.mxu1 %v20392_v37  ;;  %v20404_v37 = vld [vmem:[#allocation103_spill] sm:$0xff] }
 0x2e3   : > { %5434 = vmatprep.subr.bf16.mxu1 %v20393_v62  ;;  %v12603_v62 = vpop.eup %12602 }
 0x2e6   : > { %5435 = vmatpush1.bf16.msra.mxu1 %v20394_v15 }
 0x2e7   : > { %5436 = vmatprep.subr.bf16.mxu1 %v20395_v10  ;;  %v20405_v10 = vld [vmem:[#allocation105_spill] sm:$0xff] }
 0x2ea   : > { %5437 = vmatpush1.bf16.msra.mxu1 %v20396_v52 }
 0x2eb   : > { %5438 = vmatprep.subr.bf16.mxu1 %v20397_v53 }
 0x2ee   : > { %5439 = vmatpush1.bf16.msra.mxu1 %v20398_v46 }
 0x2ef   : > { %5440 = vmatprep.subr.bf16.mxu1 %v20399_v44 }
 0x2f2   : > { %5441 = vmatpush1.bf16.msra.mxu1 %v20400_v35 }
 0x2f3   : > { %5442 = vmatprep.subr.bf16.mxu1 %v20401_v24  ;;  %v20410_v24 = vld [vmem:[#allocation115_spill] sm:$0xff] }
 0x2f4   : > { %v4525_v61 = vpop.f32.mrb[20].mxu0  ;;  %v4607_v9 = vpop.f32.mrb[20].mxu1 }
 0x2f5   : > { %v4655_v12 = vrot.slane %v4525_v61, 4  ;;  %v4527_v31 = vpop.f32.mrb[21].mxu0  ;;  %v4663_v39 = vrot.slane %v4607_v9, 2  ;;  %v4609_v7 = vpop.f32.mrb[21].mxu1 }
 0x2f6   : > { %v4662_v26 = vrot.slane %v4527_v31, 2  ;;  %v4529_v3 = vpop.f32.mrb[22].mxu0  ;;  %v4664_v20 = vrot.slane %v4609_v7, 2  ;;  %v4611_v27 = vpop.f32.mrb[22].mxu1  ;;  %5443 = vmatpush1.bf16.msra.mxu1 %v20402_v29  ;;  %v20412_v29 = vld [vmem:[#allocation119_spill] sm:$0xff] }
 0x2f7   : > { %v4685_v18 = vsel %vm4672_vm3, %v16356_v55, %v4655_v12  ;;  %v4530_v38 = vpop.f32.mrb[23].mxu0  ;;  %v4687_v40 = vsel %vm4676_vm4, %v16360_v22, %v4663_v39  ;;  %v4612_v57 = vpop.f32.mrb[23].mxu1  ;;  %5444 = vmatprep.subr.bf16.mxu1 %v20403_v59  ;;  %v20411_v39 = vld [vmem:[#allocation117_spill] sm:$0xff] }
 0x2f8   : > { %v4686_v50 = vsel %vm4676_vm4, %v16352_v43, %v4662_v26  ;;  %v4693_v4 = vmax.f32 %v4687_v40, 0.0  ;;  %v4688_v23 = vsel %vm4676_vm4, %v4685_v18, %v4664_v20  ;;  %v12605_v22 = vpop.eup %12604  ;;  %v4704_v43 = vmul.f32 0.6931472, %v12603_v62  ;;  %v20418_v62 = vld [vmem:[#allocation131_spill] sm:$0xff] }
 0x2f9   : > { %v4692_v11 = vmax.f32 %v4686_v50, 0.0  ;;  %v4694_v25 = vmax.f32 %v4688_v23, 0.0  ;;  %v12607_v32 = vpop.eup %12606  ;;  %v4702_v52 = vmul.f32 0.6931472, %v12605_v22  ;;  %v20413_v50 = vld [vmem:[#allocation121_spill] sm:$0xff]  ;;  %v20416_v23 = vld [vmem:[#allocation127_spill] sm:$0xff] }
 0x2fa   : > { %v4699_v55 = vadd.f32 1e-07, %v4693_v4  ;;  %5445 = vmatpush1.bf16.msra.mxu1 %v20404_v37  ;;  %v4706_v53 = vmul.f32 0.6931472, %v12607_v32  ;;  %v4714_v5 = vmul.f32 0.3, %v4704_v43 }
 0x2fb   : > { %v4698_v45 = vadd.f32 1e-07, %v4692_v11  ;;  %v4700_v15 = vadd.f32 1e-07, %v4694_v25  ;;  %5446 = vmatprep.subr.bf16.mxu1 %v20405_v10  ;;  %v4713_v46 = vmul.f32 0.3, %v4702_v52 }
 0x2fc   : > { %12608 = vlog2.f32 %v4699_v55  ;;  %v4715_v44 = vmul.f32 0.3, %v4706_v53  ;;  %v4721_v61 = vmul.f32 1.442695, %v4714_v5  ;;  %v20414_v4 = vld [vmem:[#allocation123_spill] sm:$0xff]  ;;  %v20415_v11 = vld [vmem:[#allocation125_spill] sm:$0xff] }
 0x2fd   : > { %12610 = vlog2.f32 %v4698_v45  ;;  %v4719_v9 = vmul.f32 1.442695, %v4713_v46  ;;  %v20417_v25 = vld [vmem:[#allocation129_spill] sm:$0xff]  ;;  %v20420_v53 = vld [vmem:[#allocation135_spill] sm:$0xff] }
 0x2fe   : > { %12612 = vlog2.f32 %v4700_v15  ;;  %5447 = vmatpush1.bf16.msra.mxu1 %v20406_v47  ;;  %v4723_v7 = vmul.f32 1.442695, %v4715_v44  ;;  %v20419_v10 = vld [vmem:[#allocation133_spill] sm:$0xff]  ;;  %v12315_v46 = vld [vmem:[%s19349_s2 + $0x110] ss:$8 sps:$4 sm:$0xff]  }
 0x2ff   : > { %5448 = vmatprep.subr.bf16.mxu1 %v20407_v48  ;;  %12614 = vpow2.f32 %v4721_v61  ;;  %v12312_v43 = vld [vmem:[%s19349_s2 + $0x100] ss:$8 sps:$4 sm:$0xff]   ;;  %v12317_v48 = vld [vmem:[%s19349_s2 + $0x114] ss:$8 sps:$4 sm:$0xff]  }
 0x300   : > { %12616 = vpow2.f32 %v4719_v9  ;;  %v20422_v44 = vld [vmem:[#allocation139_spill] sm:$0xff]  ;;  %v12318_v61 = vld [vmem:[%s19349_s2 + $0x120] ss:$8 sps:$4 sm:$0xff]  }
 0x301   : > { %12618 = vpow2.f32 %v4723_v7  ;;  %v20425_v9 = vld [vmem:[#allocation145_spill] sm:$0xff] }
 0x302   : > { %5449 = vmatpush1.bf16.msra.mxu1 %v20408_v13  ;;  %v20421_v13 = vld [vmem:[#allocation137_spill] sm:$0xff] }
 0x303   : > { %5450 = vmatprep.subr.bf16.mxu1 %v20409_v6  ;;  %v12320_v6 = vld [vmem:[%s19349_s2 + $0x124] ss:$8 sps:$4 sm:$0xff]  }
 0x304   : > { %v20427_v7 = vld [vmem:[#allocation149_spill] sm:$0xff] }
 0x306   : > { %v12609_v35 = vpop.eup %12608  ;;  %5451 = vmatpush1.bf16.msra.mxu1 %v20410_v24  ;;  %v12323_v24 = vld [vmem:[%s19349_s2 + $0x134] ss:$8 sps:$4 sm:$0xff]  }
 0x307   : > { %v12611_v12 = vpop.eup %12610  ;;  %v4710_v31 = vmul.f32 0.6931472, %v12609_v35  ;;  %5452 = vmatprep.subr.bf16.mxu1 %v20411_v39  ;;  %v20423_v35 = vld [vmem:[#allocation141_spill] sm:$0xff] }
 0x308   : > { %v12613_v26 = vpop.eup %12612  ;;  %v4708_v3 = vmul.f32 0.6931472, %v12611_v12  ;;  %v20424_v12 = vld [vmem:[#allocation143_spill] sm:$0xff]  ;;  %v12326_v39 = vld [vmem:[%s19349_s2 + $0x144] ss:$8 sps:$4 sm:$0xff]  }
 0x309   : > { %v4717_v18 = vmul.f32 0.3, %v4710_v31  ;;  %v4712_v20 = vmul.f32 0.6931472, %v12613_v26  ;;  %v12615_v55 = vpop.eup %12614  ;;  %v12321_v31 = vld [vmem:[%s19349_s2 + $0x130] ss:$8 sps:$4 sm:$0xff]  }
 0x30a   : > { %v4716_v27 = vmul.f32 0.3, %v4708_v3  ;;  %5453 = vmatpush1.bf16.msra.mxu1 %v20412_v29  ;;  %v12617_v45 = vpop.eup %12616  ;;  %v20426_v26 = vld [vmem:[#allocation148_spill] sm:$0xff]  ;;  %v12324_v3 = vld [vmem:[%s19349_s2 + $0x140] ss:$8 sps:$4 sm:$0xff]  }
 0x30b   : > { %v4727_v38 = vmul.f32 1.442695, %v4717_v18  ;;  %v4718_v40 = vmul.f32 0.3, %v4712_v20  ;;  %5454 = vmatprep.subr.bf16.mxu1 %v20413_v50  ;;  %v12619_v37 = vpop.eup %12618  ;;  %v12329_v18 = vld [vmem:[%s19349_s2 + $0x154] ss:$8 sps:$4 sm:$0xff]  }
 0x30c   : > { %v4725_v57 = vmul.f32 1.442695, %v4716_v27  ;;  %v20428_v20 = vld [vmem:[#allocation151_spill] sm:$0xff]  ;;  %v20429_v27 = vld [vmem:[#allocation153_spill] sm:$0xff] }
 0x30d   : > { %12620 = vpow2.f32 %v4727_v38  ;;  %v4729_v59 = vmul.f32 1.442695, %v4718_v40  ;;  %v12327_v29 = vld [vmem:[%s19349_s2 + $0x150] ss:$8 sps:$4 sm:$0xff]   ;;  %v12332_v38 = vld [vmem:[%s19349_s2 + $0x164] ss:$8 sps:$4 sm:$0xff]  }
 0x30e   : > { %12622 = vpow2.f32 %v4725_v57  ;;  %5455 = vmatpush1.bf16.msra.mxu1 %v20414_v4  ;;  %v20430_v40 = vld [vmem:[#allocation155_spill] sm:$0xff]  ;;  %v20431_v50 = vld [vmem:[#allocation157_spill] sm:$0xff] }
 0x30f   : > { %12624 = vpow2.f32 %v4729_v59  ;;  %5465 = vmatprep.subr.bf16.mxu1 %v20415_v11  ;;  %v12330_v57 = vld [vmem:[%s19349_s2 + $0x160] ss:$8 sps:$4 sm:$0xff]   ;;  %v12335_v59 = vld [vmem:[%s19349_s2 + $0x174] ss:$8 sps:$4 sm:$0xff]  }
 0x310   : > { %v20432_v4 = vld [vmem:[#allocation159_spill] sm:$0xff]  ;;  %v20433_v11 = vld [vmem:[#allocation161_spill] sm:$0xff] }
 0x311   : > { %5457 = vmatmul.mubr.bf16.vlgmr.msra.gmra.mrb[32].mxu1 %v13441_v56 }
 0x312   : > { %5466 = vmatpush1.bf16.msra.mxu1 %v20416_v23  ;;  %5497 = vmatprep.mubr.bf16.mxu1 %v19890_v2  ;;  %v12333_v23 = vld [vmem:[%s19349_s2 + $0x170] ss:$8 sps:$4 sm:$0xff]  }
 0x313   : > { %5467 = vmatprep.subr.bf16.mxu1 %v20417_v25  ;;  %v20434_v25 = vld [vmem:[#allocation163_spill] sm:$0xff] }
 0x316   : > { %5468 = vmatpush1.bf16.msra.mxu1 %v20418_v62  ;;  %v20438_v62 = vld [vmem:[#allocation169_spill] sm:$0xff] }
 0x317   : > { %v12621_v15 = vpop.eup %12620  ;;  %5469 = vmatprep.subr.bf16.mxu1 %v20419_v10  ;;  %v20440_v10 = vld [vmem:[#allocation64_spill] sm:$0xff] }
 0x318   : > { %v12623_v22 = vpop.eup %12622  ;;  %v4732_v32 = vpack.c.bf16 %v12621_v15, %v12615_v55  ;;  %v20435_v55 = vld [vmem:[#allocation165_spill] sm:$0xff]  ;;  %v20439_v15 = vld [vmem:[#allocation62_spill] sm:$0xff] }
 0x319   : > { %v12625_v47 = vpop.eup %12624  ;;  %v4731_v52 = vpack.c.bf16 %v12623_v22, %v12617_v45  ;;  %v20436_v45 = vld [vmem:[#allocation59_spill] sm:$0xff] }
 0x31a   : > { %5054 = vmatprep.mubr.bf16.mxu0 %v4732_v32  ;;  %5470 = vmatpush1.bf16.msra.mxu1 %v20420_v53  ;;  %v4733_v5 = vpack.c.bf16 %v12625_v47, %v12619_v37  ;;  %v20437_v37 = vld [vmem:[#allocation167_spill] sm:$0xff]  ;;  %v20442_v32 = vld [vmem:[#allocation173_spill] sm:$0xff]  ;;  %v20444_v47 = vld [vmem:[#allocation68_spill] sm:$0xff] }
 0x31b   : > { %5055 = vmatmul.mubr.bf16.vlgmr.msra.gmra.mrb[24].mxu0 %v4731_v52  ;;  %5471 = vmatprep.subr.bf16.mxu1 %v20421_v13  ;;  %v20441_v22 = vld [vmem:[#allocation171_spill] sm:$0xff]  ;;  %v20447_v53 = vld [vmem:[#allocation70_spill] sm:$0xff] }
 0x31c   : > { %5066 = vmatpush1.bf16.msra.mxu0 %v12312_v43  ;;  %5097 = vmatprep.mubr.bf16.mxu0 %v19890_v2  ;;  %v20443_v43 = vld [vmem:[#allocation66_spill] sm:$0xff]  ;;  %v20445_v52 = vld [vmem:[#allocation175_spill] sm:$0xff] }
 0x31d   : > { %5067 = vmatprep.subr.bf16.mxu0 %v12317_v48  ;;  %v20446_v48 = vld [vmem:[#allocation177_spill] sm:$0xff]  ;;  %v20449_v13 = vld [vmem:[#allocation179_spill] sm:$0xff] }
 0x31e   : > { %5472 = vmatpush1.bf16.msra.mxu1 %v20422_v44  ;;  %v20452_v44 = vld [vmem:[#allocation76_spill] sm:$0xff] }
 0x31f   : > { %5473 = vmatprep.subr.bf16.mxu1 %v20423_v35  ;;  %v20453_v35 = vld [vmem:[#allocation183_spill] sm:$0xff] }
 0x320   : > { %5068 = vmatpush1.bf16.msra.mxu0 %v12315_v46  ;;  %v20450_v46 = vld [vmem:[#allocation181_spill] sm:$0xff] }
 0x321   : > { %5069 = vmatprep.subr.bf16.mxu0 %v12320_v6  ;;  %v20451_v6 = vld [vmem:[#allocation74_spill] sm:$0xff] }
 0x322   : > { %5474 = vmatpush1.bf16.msra.mxu1 %v20424_v12 }
 0x323   : > { %11205 = vmatprep.subr.msk.bf16.mxu1 %vm19843_vm0, %v20425_v9  ;;  %v20456_v9 = vld [vmem:[#allocation80_spill] sm:$0xff] }
 0x324   : > { %5070 = vmatpush1.bf16.msra.mxu0 %v12318_v61  ;;  %v20454_v61 = vld [vmem:[#allocation185_spill] sm:$0xff] }
 0x325   : > { %5071 = vmatprep.subr.bf16.mxu0 %v12323_v24  ;;  %v20455_v24 = vld [vmem:[#allocation78_spill] sm:$0xff] }
 0x326   : > { %5476 = vmatpush1.bf16.msra.mxu1 %v20426_v26 }
 0x327   : > { %5588 = vmatprep.subr.bf16.mxu1 %v20427_v7  ;;  %v20458_v7 = vld [vmem:[#allocation189_spill] sm:$0xff] }
 0x328   : > { %5072 = vmatpush1.bf16.msra.mxu0 %v12321_v31 }
 0x329   : > { %11206 = vmatmul.mubr.msk.bf16.vlgmr.msra.gmra.mrb[32].mxu1 %vm3553_vm1, %v16265_v34  ;;  %5073 = vmatprep.subr.bf16.mxu0 %v12326_v39  ;;  %v20457_v39 = vld [vmem:[#allocation187_spill] sm:$0xff] }
 0x32a   : > { %5589 = vmatpush1.bf16.msra.mxu1 %v20428_v20  ;;  %5620 = vmatprep.mubr.bf16.mxu1 %v16162_v58  ;;  %v20460_v20 = vld [vmem:[#allocation84_spill] sm:$0xff] }
 0x32b   : > { %5590 = vmatprep.subr.bf16.mxu1 %v20429_v27  ;;  %v20461_v27 = vld [vmem:[#allocation191_spill] sm:$0xff] }
 0x32c   : > { %5074 = vmatpush1.bf16.msra.mxu0 %v12324_v3 }
 0x32d   : > { %5075 = vmatprep.subr.bf16.mxu0 %v12329_v18  ;;  %v20459_v18 = vld [vmem:[#allocation82_spill] sm:$0xff] }
 0x32e   : > { %5591 = vmatpush1.bf16.msra.mxu1 %v20430_v40  ;;  %v20464_v40 = vld [vmem:[#allocation88_spill] sm:$0xff] }
 0x32f   : > { %5592 = vmatprep.subr.bf16.mxu1 %v20431_v50  ;;  %v20465_v50 = vld [vmem:[#allocation195_spill] sm:$0xff] }
 0x330   : > { %5076 = vmatpush1.bf16.msra.mxu0 %v12327_v29  ;;  %v20462_v29 = vld [vmem:[#allocation193_spill] sm:$0xff] }
 0x331   : > { %5077 = vmatprep.subr.bf16.mxu0 %v12332_v38  ;;  %v20463_v38 = vld [vmem:[#allocation86_spill] sm:$0xff] }
 0x332   : > { %5593 = vmatpush1.bf16.msra.mxu1 %v20432_v4  ;;  %v20468_v4 = vld [vmem:[#allocation92_spill] sm:$0xff] }
 0x333   : > { %5594 = vmatprep.subr.bf16.mxu1 %v20433_v11  ;;  %v20469_v11 = vld [vmem:[#allocation199_spill] sm:$0xff] }
 0x334   : > { %5078 = vmatpush1.bf16.msra.mxu0 %v12330_v57  ;;  %v20466_v57 = vld [vmem:[#allocation197_spill] sm:$0xff] }
 0x335   : > { %5079 = vmatprep.subr.bf16.mxu0 %v12335_v59  ;;  %v20467_v59 = vld [vmem:[#allocation90_spill] sm:$0xff] }
 0x336   : > { %5595 = vmatpush1.bf16.msra.mxu1 %v20434_v25  ;;  %v20471_v25 = vld [vmem:[#allocation94_spill] sm:$0xff] }
 0x337   : > { %5596 = vmatprep.subr.bf16.mxu1 %v20435_v55  ;;  %v20472_v55 = vld [vmem:[#allocation96_spill] sm:$0xff] }
 0x338   : > { %5080 = vmatpush1.bf16.msra.mxu0 %v12333_v23  ;;  %v20470_v23 = vld [vmem:[#allocation201_spill] sm:$0xff] }
 0x339   : > { %5342 = vmatprep.subr.bf16.mxu0 %v20436_v45  ;;  %v20473_v45 = vld [vmem:[#allocation203_spill] sm:$0xff] }
 0x33a   : > { %5597 = vmatpush1.bf16.msra.mxu1 %v20437_v37  ;;  %v20474_v37 = vld [vmem:[#allocation205_spill] sm:$0xff] }
 0x33b   : > { %5098 = vmatmul.mubr.bf16.vlgmr.msra.gmra.mrb[24].mxu0 %v4733_v5  ;;  %5598 = vmatprep.subr.bf16.mxu1 %v20438_v62  ;;  %v20448_v5 = vld [vmem:[#allocation72_spill] sm:$0xff]  ;;  %v20475_v62 = vld [vmem:[#allocation98_spill] sm:$0xff] }
 0x33c   : > { %5343 = vmatpush1.bf16.msra.mxu0 %v20439_v15  ;;  %5374 = vmatprep.mubr.bf16.mxu0 %v16162_v58  ;;  %v20476_v15 = vld [vmem:[#allocation100_spill] sm:$0xff] }
 0x33d   : > { %5344 = vmatprep.subr.bf16.mxu0 %v20440_v10  ;;  %v20477_v10 = vld [vmem:[#allocation207_spill] sm:$0xff] }
 0x33e   : > { %5599 = vmatpush1.bf16.msra.mxu1 %v20441_v22  ;;  %v20478_v22 = vld [vmem:[#allocation209_spill] sm:$0xff] }
 0x33f   : > { %5600 = vmatprep.subr.bf16.mxu1 %v20442_v32  ;;  %v20479_v32 = vld [vmem:[#allocation102_spill] sm:$0xff] }
 0x340   : > { %5345 = vmatpush1.bf16.msra.mxu0 %v20443_v43  ;;  %v20480_v43 = vld [vmem:[#allocation104_spill] sm:$0xff] }
 0x341   : > { %5346 = vmatprep.subr.bf16.mxu0 %v20444_v47  ;;  %v20481_v47 = vld [vmem:[#allocation211_spill] sm:$0xff] }
 0x342   : > { %5601 = vmatpush1.bf16.msra.mxu1 %v20445_v52  ;;  %v20482_v52 = vld [vmem:[#allocation213_spill] sm:$0xff] }
 0x343   : > { %5602 = vmatprep.subr.bf16.mxu1 %v20446_v48  ;;  %v20483_v48 = vld [vmem:[#allocation106_spill] sm:$0xff] }
 0x344   : > { %5347 = vmatpush1.bf16.msra.mxu0 %v20447_v53  ;;  %v20484_v53 = vld [vmem:[#allocation108_spill] sm:$0xff] }
 0x345   : > { %5348 = vmatprep.subr.bf16.mxu0 %v20448_v5  ;;  %v20485_v5 = vld [vmem:[#allocation215_spill] sm:$0xff] }
 0x346   : > { %5603 = vmatpush1.bf16.msra.mxu1 %v20449_v13  ;;  %v20486_v13 = vld [vmem:[#allocation217_spill] sm:$0xff] }
 0x347   : > { %5604 = vmatprep.subr.bf16.mxu1 %v20450_v46  ;;  %v20487_v46 = vld [vmem:[#allocation110_spill] sm:$0xff] }
 0x348   : > { %5349 = vmatpush1.bf16.msra.mxu0 %v20451_v6  ;;  %v20488_v6 = vld [vmem:[#allocation112_spill] sm:$0xff] }
 0x349   : > { %5350 = vmatprep.subr.bf16.mxu0 %v20452_v44  ;;  %v20489_v44 = vld [vmem:[#allocation219_spill] sm:$0xff] }
 0x34a   : > { %5605 = vmatpush1.bf16.msra.mxu1 %v20453_v35  ;;  %v20490_v35 = vld [vmem:[#allocation221_spill] sm:$0xff] }
 0x34b   : > { %5606 = vmatprep.subr.bf16.mxu1 %v20454_v61  ;;  %v20491_v61 = vld [vmem:[#allocation114_spill] sm:$0xff] }
 0x34c   : > { %5351 = vmatpush1.bf16.msra.mxu0 %v20455_v24  ;;  %v16527_v12 = vpop.f32.mrb[24].mxu1  ;;  %v20492_v24 = vld [vmem:[#allocation116_spill] sm:$0xff] }
 0x34d   : > { %5352 = vmatprep.subr.bf16.mxu0 %v20456_v9  ;;  %v16530_v31 = vpop.f32.mrb[25].mxu1  ;;  %v20493_v9 = vld [vmem:[#allocation223_spill] sm:$0xff] }
 0x34e   : > { %5607 = vmatpush1.bf16.msra.mxu1 %v20457_v39  ;;  %v5257_v26 = vpop.f32.mrb[26].mxu1  ;;  %v20494_v39 = vld [vmem:[#allocation225_spill] sm:$0xff] }
 0x34f   : > { %5608 = vmatprep.subr.bf16.mxu1 %v20458_v7  ;;  %v5258_v3 = vpop.f32.mrb[27].mxu1  ;;  %v20495_v26 = vld [vmem:[#allocation118_spill] sm:$0xff]  ;;  %v20496_v7 = vld [vmem:[#allocation120_spill] sm:$0xff] }
 0x350   : > { %5353 = vmatpush1.bf16.msra.mxu0 %v20459_v18  ;;  %v20497_v3 = vld [vmem:[#allocation227_spill] sm:$0xff]  ;;  %v20498_v18 = vld [vmem:[#allocation229_spill] sm:$0xff] }
 0x351   : > { %5354 = vmatprep.subr.bf16.mxu0 %v20460_v20  ;;  %v20499_v20 = vld [vmem:[#allocation122_spill] sm:$0xff] }
 0x352   : > { %5609 = vmatpush1.bf16.msra.mxu1 %v20461_v27  ;;  %v20500_v27 = vld [vmem:[#allocation124_spill] sm:$0xff] }
 0x353   : > { %5610 = vmatprep.subr.bf16.mxu1 %v20462_v29  ;;  %v20501_v29 = vld [vmem:[#allocation231_spill] sm:$0xff] }
 0x354   : > { %5355 = vmatpush1.bf16.msra.mxu0 %v20463_v38  ;;  %v20502_v38 = vld [vmem:[#allocation233_spill] sm:$0xff] }
 0x355   : > { %5356 = vmatprep.subr.bf16.mxu0 %v20464_v40  ;;  %v20503_v40 = vld [vmem:[#allocation126_spill] sm:$0xff] }
 0x356   : > { %5611 = vmatpush1.bf16.msra.mxu1 %v20465_v50  ;;  %v20504_v50 = vld [vmem:[#allocation128_spill] sm:$0xff] }
 0x357   : > { %5612 = vmatprep.subr.bf16.mxu1 %v20466_v57  ;;  %v20505_v57 = vld [vmem:[#allocation236_spill] sm:$0xff] }
 0x358   : > { %5357 = vmatpush1.bf16.msra.mxu0 %v20467_v59  ;;  %v20506_v59 = vld [vmem:[#allocation237_spill] sm:$0xff] }
 0x359   : > { %5358 = vmatprep.subr.bf16.mxu0 %v20468_v4  ;;  %v20507_v4 = vld [vmem:[#allocation130_spill] sm:$0xff] }
 0x35a   : > { %5613 = vmatpush1.bf16.msra.mxu1 %v20469_v11  ;;  %v20508_v11 = vld [vmem:[#allocation132_spill] sm:$0xff] }
 0x35b   : > { %5614 = vmatprep.subr.bf16.mxu1 %v20470_v23  ;;  %v20509_v23 = vld [vmem:[#allocation239_spill] sm:$0xff] }
 0x35c   : > { %5359 = vmatpush1.bf16.msra.mxu0 %v20471_v25  ;;  %v20510_v25 = vld [vmem:[#allocation241_spill] sm:$0xff] }
 0x35d   : > { %5360 = vmatprep.subr.bf16.mxu0 %v20472_v55  ;;  %v20511_v55 = vld [vmem:[#allocation134_spill] sm:$0xff] }
 0x35e   : > { %5615 = vmatpush1.bf16.msra.mxu1 %v20473_v45  ;;  %v20512_v45 = vld [vmem:[#allocation136_spill] sm:$0xff] }
 0x35f   : > { %5616 = vmatprep.subr.bf16.mxu1 %v20474_v37  ;;  %v20513_v37 = vld [vmem:[#allocation243_spill] sm:$0xff] }
 0x360   : > { %5361 = vmatpush1.bf16.msra.mxu0 %v20475_v62  ;;  %v20514_v62 = vld [vmem:[#allocation245_spill] sm:$0xff] }
 0x361   : > { %5362 = vmatprep.subr.bf16.mxu0 %v20476_v15  ;;  %v20515_v15 = vld [vmem:[#allocation138_spill] sm:$0xff] }
 0x362   : > { %5617 = vmatpush1.bf16.msra.mxu1 %v20477_v10  ;;  %v20516_v10 = vld [vmem:[#allocation140_spill] sm:$0xff] }
 0x363   : > { %5618 = vmatprep.subr.bf16.mxu1 %v20478_v22  ;;  %v20517_v22 = vld [vmem:[#allocation247_spill] sm:$0xff] }
 0x364   : > { %5363 = vmatpush1.bf16.msra.mxu0 %v20479_v32  ;;  %v20518_v32 = vld [vmem:[#allocation249_spill] sm:$0xff] }
 0x365   : > { %5364 = vmatprep.subr.bf16.mxu0 %v20480_v43  ;;  %v20519_v43 = vld [vmem:[#allocation142_spill] sm:$0xff] }
 0x366   : > { %5619 = vmatpush1.bf16.msra.mxu1 %v20481_v47  ;;  %v20520_v47 = vld [vmem:[#allocation144_spill] sm:$0xff] }
 0x367   : > { %5629 = vmatprep.subr.bf16.mxu1 %v20482_v52  ;;  %v20521_v52 = vld [vmem:[#allocation251_spill] sm:$0xff] }
 0x368   : > { %5365 = vmatpush1.bf16.msra.mxu0 %v20483_v48  ;;  %v20522_v48 = vld [vmem:[#allocation253_spill] sm:$0xff] }
 0x369   : > { %5366 = vmatprep.subr.bf16.mxu0 %v20484_v53  ;;  %5621 = vmatmul.mubr.bf16.vlgmr.msra.gmra.mrb[36].mxu1 %v13441_v56  ;;  %v20523_v53 = vld [vmem:[#allocation146_spill] sm:$0xff] }
 0x36a   : > { %5630 = vmatpush1.bf16.msra.mxu1 %v20485_v5  ;;  %5661 = vmatprep.mubr.bf16.mxu1 %v19890_v2  ;;  %v20524_v5 = vld [vmem:[#allocation147_spill] sm:$0xff] }
 0x36b   : > { %5631 = vmatprep.subr.bf16.mxu1 %v20486_v13  ;;  %v20525_v13 = vld [vmem:[#allocation255_spill] sm:$0xff] }
 0x36c   : > { %5367 = vmatpush1.bf16.msra.mxu0 %v20487_v46  ;;  %v20526_v46 = vld [vmem:[#allocation257_spill] sm:$0xff] }
 0x36d   : > { %5368 = vmatprep.subr.bf16.mxu0 %v20488_v6  ;;  %v20527_v6 = vld [vmem:[#allocation150_spill] sm:$0xff] }
 0x36e   : > { %5632 = vmatpush1.bf16.msra.mxu1 %v20489_v44  ;;  %v20528_v44 = vld [vmem:[#allocation152_spill] sm:$0xff] }
 0x36f   : > { %5633 = vmatprep.subr.bf16.mxu1 %v20490_v35  ;;  %v20529_v35 = vld [vmem:[#allocation259_spill] sm:$0xff] }
 0x370   : > { %5369 = vmatpush1.bf16.msra.mxu0 %v20491_v61  ;;  %v20530_v61 = vld [vmem:[#allocation261_spill] sm:$0xff] }
 0x371   : > { %5370 = vmatprep.subr.bf16.mxu0 %v20492_v24  ;;  %v20531_v24 = vld [vmem:[#allocation154_spill] sm:$0xff] }
 0x372   : > { %5634 = vmatpush1.bf16.msra.mxu1 %v20493_v9  ;;  %v20532_v9 = vld [vmem:[#allocation156_spill] sm:$0xff] }
 0x373   : > { %5635 = vmatprep.subr.bf16.mxu1 %v20494_v39  ;;  %v20533_v39 = vld [vmem:[#allocation263_spill] sm:$0xff] }
 0x374   : > { %5371 = vmatpush1.bf16.msra.mxu0 %v20495_v26  ;;  %v20534_v26 = vld [vmem:[#allocation265_spill] sm:$0xff] }
 0x375   : > { %5372 = vmatprep.subr.bf16.mxu0 %v20496_v7  ;;  %v20535_v7 = vld [vmem:[#allocation158_spill] sm:$0xff] }
 0x376   : > { %5636 = vmatpush1.bf16.msra.mxu1 %v20497_v3  ;;  %v20536_v3 = vld [vmem:[#allocation160_spill] sm:$0xff] }
 0x377   : > { %5637 = vmatprep.subr.bf16.mxu1 %v20498_v18  ;;  %v20537_v18 = vld [vmem:[#allocation267_spill] sm:$0xff] }
 0x378   : > { %5373 = vmatpush1.bf16.msra.mxu0 %v20499_v20  ;;  %v20538_v20 = vld [vmem:[#allocation269_spill] sm:$0xff] }
 0x379   : > { %5383 = vmatprep.subr.bf16.mxu0 %v20500_v27  ;;  %v20539_v27 = vld [vmem:[#allocation162_spill] sm:$0xff] }
 0x37a   : > { %5638 = vmatpush1.bf16.msra.mxu1 %v20501_v29  ;;  %v20540_v29 = vld [vmem:[#allocation164_spill] sm:$0xff] }
 0x37b   : > { %5375 = vmatmul.mubr.bf16.vlgmr.msra.gmra.mrb[28].mxu0 %v13441_v56  ;;  %11209 = vmatprep.subr.msk.bf16.mxu1 %vm19843_vm0, %v20502_v38  ;;  %v20541_v38 = vld [vmem:[#allocation271_spill] sm:$0xff] }
 0x37c   : > { %5384 = vmatpush1.bf16.msra.mxu0 %v20503_v40  ;;  %5415 = vmatprep.mubr.bf16.mxu0 %v19890_v2  ;;  %v20542_v40 = vld [vmem:[#allocation273_spill] sm:$0xff] }
 0x37d   : > { %5385 = vmatprep.subr.bf16.mxu0 %v20504_v50  ;;  %v20543_v50 = vld [vmem:[#allocation166_spill] sm:$0xff] }
 0x37e   : > { %5640 = vmatpush1.bf16.msra.mxu1 %v20505_v57 }
 0x37f   : > { %5752 = vmatprep.subr.bf16.mxu1 %v20506_v59 }
 0x380   : > { %5386 = vmatpush1.bf16.msra.mxu0 %v20507_v4  ;;  %v20544_v4 = vld [vmem:[#allocation168_spill] sm:$0xff] }
 0x381   : > { %5387 = vmatprep.subr.bf16.mxu0 %v20508_v11  ;;  %11210 = vmatmul.mubr.msk.bf16.vlgmr.msra.gmra.mrb[36].mxu1 %vm3553_vm1, %v16265_v34 }
 0x382   : > { %5753 = vmatpush1.bf16.msra.mxu1 %v20509_v23  ;;  %5784 = vmatprep.mubr.bf16.mxu1 %v16162_v58  ;;  %v20545_v23 = vld [vmem:[#allocation275_spill] sm:$0xff] }
 0x383   : > { %5754 = vmatprep.subr.bf16.mxu1 %v20510_v25 }
 0x384   : > { %5388 = vmatpush1.bf16.msra.mxu0 %v20511_v55  ;;  %v20546_v55 = vld [vmem:[#allocation277_spill] sm:$0xff] }
 0x385   : > { %5389 = vmatprep.subr.bf16.mxu0 %v20512_v45 }
 0x386   : > { %5755 = vmatpush1.bf16.msra.mxu1 %v20513_v37 }
 0x387   : > { %5756 = vmatprep.subr.bf16.mxu1 %v20514_v62  ;;  %v20547_v62 = vld [vmem:[#allocation170_spill] sm:$0xff] }
 0x388   : > { %5390 = vmatpush1.bf16.msra.mxu0 %v20515_v15  ;;  %v20548_v15 = vld [vmem:[#allocation172_spill] sm:$0xff] }
 0x389   : > { %5391 = vmatprep.subr.bf16.mxu0 %v20516_v10  ;;  %v20549_v10 = vld [vmem:[#allocation279_spill] sm:$0xff] }
 0x38a   : > { %5757 = vmatpush1.bf16.msra.mxu1 %v20517_v22  ;;  %v20550_v22 = vld [vmem:[#allocation281_spill] sm:$0xff] }
 0x38b   : > { %5758 = vmatprep.subr.bf16.mxu1 %v20518_v32  ;;  %v20551_v32 = vld [vmem:[#allocation174_spill] sm:$0xff] }
 0x38c   : > { %5392 = vmatpush1.bf16.msra.mxu0 %v20519_v43  ;;  %v20552_v43 = vld [vmem:[#allocation176_spill] sm:$0xff] }
 0x38d   : > { %11203 = vmatprep.subr.msk.bf16.mxu0 %vm19843_vm0, %v20520_v47  ;;  %v20553_v47 = vld [vmem:[#allocation283_spill] sm:$0xff] }
 0x38e   : > { %5759 = vmatpush1.bf16.msra.mxu1 %v20521_v52  ;;  %v20554_v52 = vld [vmem:[#allocation285_spill] sm:$0xff] }
 0x38f   : > { %5760 = vmatprep.subr.bf16.mxu1 %v20522_v48  ;;  %v20555_v48 = vld [vmem:[#allocation178_spill] sm:$0xff] }
 0x390   : > { %5394 = vmatpush1.bf16.msra.mxu0 %v20523_v53  ;;  %v20557_v53 = vld [vmem:[#allocation287_spill] sm:$0xff] }
 0x391   : > { %5506 = vmatprep.subr.bf16.mxu0 %v20524_v5  ;;  %v20558_v5 = vld [vmem:[#allocation289_spill] sm:$0xff] }
 0x392   : > { %5761 = vmatpush1.bf16.msra.mxu1 %v20525_v13  ;;  %v20559_v13 = vld [vmem:[#allocation182_spill] sm:$0xff] }
 0x393   : > { %11204 = vmatmul.mubr.msk.bf16.vlgmr.msra.gmra.mrb[28].mxu0 %vm3553_vm1, %v16265_v34  ;;  %5762 = vmatprep.subr.bf16.mxu1 %v20526_v46  ;;  %v20560_v46 = vld [vmem:[#allocation184_spill] sm:$0xff] }
 0x394   : > { %5507 = vmatpush1.bf16.msra.mxu0 %v20527_v6  ;;  %5538 = vmatprep.mubr.bf16.mxu0 %v16162_v58  ;;  %v20561_v6 = vld [vmem:[#allocation291_spill] sm:$0xff] }
 0x395   : > { %5508 = vmatprep.subr.bf16.mxu0 %v20528_v44  ;;  %v20562_v44 = vld [vmem:[#allocation293_spill] sm:$0xff] }
 0x396   : > { %5763 = vmatpush1.bf16.msra.mxu1 %v20529_v35  ;;  %v20563_v35 = vld [vmem:[#allocation186_spill] sm:$0xff] }
 0x397   : > { %5764 = vmatprep.subr.bf16.mxu1 %v20530_v61  ;;  %v20564_v61 = vld [vmem:[#allocation188_spill] sm:$0xff] }
 0x398   : > { %5509 = vmatpush1.bf16.msra.mxu0 %v20531_v24  ;;  %v20565_v24 = vld [vmem:[#allocation295_spill] sm:$0xff] }
 0x399   : > { %5510 = vmatprep.subr.bf16.mxu0 %v20532_v9  ;;  %v20566_v9 = vld [vmem:[#allocation297_spill] sm:$0xff] }
 0x39a   : > { %5765 = vmatpush1.bf16.msra.mxu1 %v20533_v39  ;;  %v20567_v39 = vld [vmem:[#allocation190_spill] sm:$0xff] }
 0x39b   : > { %5766 = vmatprep.subr.bf16.mxu1 %v20534_v26  ;;  %v20568_v26 = vld [vmem:[#allocation192_spill] sm:$0xff] }
 0x39c   : > { %5511 = vmatpush1.bf16.msra.mxu0 %v20535_v7  ;;  %v20569_v7 = vld [vmem:[#allocation299_spill] sm:$0xff] }
 0x39d   : > { %5512 = vmatprep.subr.bf16.mxu0 %v20536_v3  ;;  %v20570_v3 = vld [vmem:[#allocation301_spill] sm:$0xff] }
 0x39e   : > { %5767 = vmatpush1.bf16.msra.mxu1 %v20537_v18  ;;  %v20571_v18 = vld [vmem:[#allocation194_spill] sm:$0xff] }
 0x39f   : > { %5768 = vmatprep.subr.bf16.mxu1 %v20538_v20  ;;  %v20572_v20 = vld [vmem:[#allocation196_spill] sm:$0xff] }
 0x3a0   : > { %5513 = vmatpush1.bf16.msra.mxu0 %v20539_v27  ;;  %v20573_v27 = vld [vmem:[#allocation303_spill] sm:$0xff] }
 0x3a1   : > { %5514 = vmatprep.subr.bf16.mxu0 %v20540_v29  ;;  %v20574_v29 = vld [vmem:[#allocation305_spill] sm:$0xff] }
 0x3a2   : > { %5769 = vmatpush1.bf16.msra.mxu1 %v20541_v38  ;;  %v20575_v38 = vld [vmem:[#allocation198_spill] sm:$0xff] }
 0x3a3   : > { %5770 = vmatprep.subr.bf16.mxu1 %v20542_v40  ;;  %v20576_v40 = vld [vmem:[#allocation200_spill] sm:$0xff] }
 0x3a4   : > { %5515 = vmatpush1.bf16.msra.mxu0 %v20543_v50  ;;  %v16631_v57 = vpop.f32.mrb[28].mxu1  ;;  %v20577_v50 = vld [vmem:[#allocation307_spill] sm:$0xff] }
 0x3a5   : > { %v5337_v59 = vpop.f32.mrb[29].mxu1  ;;  %5516 = vmatprep.subr.bf16.mxu0 %v20544_v4  ;;  %v20579_v4 = vld [vmem:[#allocation202_spill] sm:$0xff] }
 0x3a6   : > { %v6165_v11 = vrot.slane %v5337_v59, 6  ;;  %5771 = vmatpush1.bf16.msra.mxu1 %v20545_v23  ;;  %v5339_v25 = vpop.f32.mrb[30].mxu1  ;;  %v20578_v59 = vld [vmem:[#allocation309_spill] sm:$0xff]  ;;  %v20581_v23 = vld [vmem:[#allocation311_spill] sm:$0xff] }
 0x3a7   : > { %5772 = vmatprep.subr.bf16.mxu1 %v20546_v55  ;;  %v5340_v45 = vpop.f32.mrb[31].mxu1  ;;  %v20582_v25 = vld [vmem:[#allocation313_spill] sm:$0xff]  ;;  %v20583_v55 = vld [vmem:[#allocation206_spill] sm:$0xff] }
 0x3a8   : > { %v16638_v37 = vsel %vm4668_vm2, %v16527_v12, %v6165_v11  ;;  %5517 = vmatpush1.bf16.msra.mxu0 %v20547_v62  ;;  %v20556_v12 = vld [vmem:[#allocation180_spill] sm:$0xff]  ;;  %v20585_v62 = vld [vmem:[#allocation315_spill] sm:$0xff] }
 0x3a9   : > { %5518 = vmatprep.subr.bf16.mxu0 %v20548_v15  ;;  %v20580_v11 = vld [vmem:[#allocation204_spill] sm:$0xff]  ;;  %v20586_v15 = vld [vmem:[#allocation317_spill] sm:$0xff] }
 0x3aa   : > { %5773 = vmatpush1.bf16.msra.mxu1 %v20549_v10  ;;  %v20584_v45 = vld [vmem:[#allocation208_spill] sm:$0xff]  ;;  %v20587_v10 = vld [vmem:[#allocation210_spill] sm:$0xff] }
 0x3ab   : > { %5774 = vmatprep.subr.bf16.mxu1 %v20550_v22  ;;  %v20588_v22 = vld [vmem:[#allocation212_spill] sm:$0xff] }
 0x3ac   : > { %5519 = vmatpush1.bf16.msra.mxu0 %v20551_v32  ;;  %v20589_v32 = vld [vmem:[#allocation319_spill] sm:$0xff] }
 0x3ad   : > { %5520 = vmatprep.subr.bf16.mxu0 %v20552_v43  ;;  %v20590_v43 = vld [vmem:[#allocation321_spill] sm:$0xff] }
 0x3ae   : > { %5775 = vmatpush1.bf16.msra.mxu1 %v20553_v47  ;;  %v20591_v47 = vld [vmem:[#allocation214_spill] sm:$0xff] }
 0x3af   : > { %5776 = vmatprep.subr.bf16.mxu1 %v20554_v52  ;;  %v20592_v52 = vld [vmem:[#allocation216_spill] sm:$0xff] }
 0x3b0   : > { %5521 = vmatpush1.bf16.msra.mxu0 %v20555_v48  ;;  %v20593_v48 = vld [vmem:[#allocation324_spill] sm:$0xff] }
 0x3b1   : > { %5522 = vmatprep.subr.bf16.mxu0 %v20556_v12  ;;  %v20594_v12 = vld [vmem:[#allocation325_spill] sm:$0xff] }
 0x3b2   : > { %5777 = vmatpush1.bf16.msra.mxu1 %v20557_v53  ;;  %v20595_v53 = vld [vmem:[#allocation218_spill] sm:$0xff] }
 0x3b3   : > { %5778 = vmatprep.subr.bf16.mxu1 %v20558_v5  ;;  %v20596_v5 = vld [vmem:[#allocation220_spill] sm:$0xff] }
 0x3b4   : > { %5523 = vmatpush1.bf16.msra.mxu0 %v20559_v13  ;;  %v20597_v13 = vld [vmem:[#allocation327_spill] sm:$0xff] }
 0x3b5   : > { %5524 = vmatprep.subr.bf16.mxu0 %v20560_v46  ;;  %v20598_v46 = vld [vmem:[#allocation329_spill] sm:$0xff] }
 0x3b6   : > { %5779 = vmatpush1.bf16.msra.mxu1 %v20561_v6  ;;  %v20599_v6 = vld [vmem:[#allocation222_spill] sm:$0xff] }
 0x3b7   : > { %5780 = vmatprep.subr.bf16.mxu1 %v20562_v44  ;;  %v20600_v44 = vld [vmem:[#allocation224_spill] sm:$0xff] }
 0x3b8   : > { %5525 = vmatpush1.bf16.msra.mxu0 %v20563_v35  ;;  %v20601_v35 = vld [vmem:[#allocation331_spill] sm:$0xff] }
 0x3b9   : > { %5526 = vmatprep.subr.bf16.mxu0 %v20564_v61  ;;  %v20602_v61 = vld [vmem:[#allocation333_spill] sm:$0xff] }
 0x3ba   : > { %5781 = vmatpush1.bf16.msra.mxu1 %v20565_v24  ;;  %v20603_v24 = vld [vmem:[#allocation226_spill] sm:$0xff] }
 0x3bb   : > { %5782 = vmatprep.subr.bf16.mxu1 %v20566_v9  ;;  %v20604_v9 = vld [vmem:[#allocation228_spill] sm:$0xff] }
 0x3bc   : > { %5527 = vmatpush1.bf16.msra.mxu0 %v20567_v39  ;;  %v20605_v39 = vld [vmem:[#allocation335_spill] sm:$0xff] }
 0x3bd   : > { %5528 = vmatprep.subr.bf16.mxu0 %v20568_v26  ;;  %v20606_v26 = vld [vmem:[#allocation337_spill] sm:$0xff] }
 0x3be   : > { %5783 = vmatpush1.bf16.msra.mxu1 %v20569_v7  ;;  %v20607_v7 = vld [vmem:[#allocation230_spill] sm:$0xff] }
 0x3bf   : > { %5793 = vmatprep.subr.bf16.mxu1 %v20570_v3  ;;  %v20608_v3 = vld [vmem:[#allocation232_spill] sm:$0xff] }
 0x3c0   : > { %5529 = vmatpush1.bf16.msra.mxu0 %v20571_v18  ;;  %v20609_v18 = vld [vmem:[#allocation339_spill] sm:$0xff] }
 0x3c1   : > { %5530 = vmatprep.subr.bf16.mxu0 %v20572_v20  ;;  %5785 = vmatmul.mubr.bf16.vlgmr.msra.gmra.mrb[40].mxu1 %v13441_v56  ;;  %v20610_v20 = vld [vmem:[#allocation341_spill] sm:$0xff] }
 0x3c2   : > { %5794 = vmatpush1.bf16.msra.mxu1 %v20573_v27  ;;  %5825 = vmatprep.mubr.bf16.mxu1 %v19890_v2  ;;  %v20611_v27 = vld [vmem:[#allocation234_spill] sm:$0xff] }
 0x3c3   : > { %5795 = vmatprep.subr.bf16.mxu1 %v20574_v29  ;;  %v20612_v29 = vld [vmem:[#allocation235_spill] sm:$0xff] }
 0x3c4   : > { %5531 = vmatpush1.bf16.msra.mxu0 %v20575_v38  ;;  %v20613_v38 = vld [vmem:[#allocation343_spill] sm:$0xff] }
 0x3c5   : > { %5532 = vmatprep.subr.bf16.mxu0 %v20576_v40  ;;  %v20614_v40 = vld [vmem:[#allocation345_spill] sm:$0xff] }
 0x3c6   : > { %5796 = vmatpush1.bf16.msra.mxu1 %v20577_v50  ;;  %v20615_v50 = vld [vmem:[#allocation238_spill] sm:$0xff] }
 0x3c7   : > { %5797 = vmatprep.subr.bf16.mxu1 %v20578_v59  ;;  %v20616_v59 = vld [vmem:[#allocation240_spill] sm:$0xff] }
 0x3c8   : > { %5533 = vmatpush1.bf16.msra.mxu0 %v20579_v4  ;;  %v20617_v4 = vld [vmem:[#allocation347_spill] sm:$0xff] }
 0x3c9   : > { %5534 = vmatprep.subr.bf16.mxu0 %v20580_v11  ;;  %v20618_v11 = vld [vmem:[#allocation349_spill] sm:$0xff] }
 0x3ca   : > { %5798 = vmatpush1.bf16.msra.mxu1 %v20581_v23  ;;  %v20619_v23 = vld [vmem:[#allocation242_spill] sm:$0xff] }
 0x3cb   : > { %5799 = vmatprep.subr.bf16.mxu1 %v20582_v25  ;;  %v20620_v25 = vld [vmem:[#allocation244_spill] sm:$0xff] }
 0x3cc   : > { %5535 = vmatpush1.bf16.msra.mxu0 %v20583_v55  ;;  %v20621_v55 = vld [vmem:[#allocation351_spill] sm:$0xff] }
 0x3cd   : > { %5536 = vmatprep.subr.bf16.mxu0 %v20584_v45  ;;  %v20622_v45 = vld [vmem:[#allocation353_spill] sm:$0xff] }
 0x3ce   : > { %5800 = vmatpush1.bf16.msra.mxu1 %v20585_v62  ;;  %v20623_v62 = vld [vmem:[#allocation246_spill] sm:$0xff] }
 0x3cf   : > { %5801 = vmatprep.subr.bf16.mxu1 %v20586_v15  ;;  %v20624_v15 = vld [vmem:[#allocation248_spill] sm:$0xff] }
 0x3d0   : > { %5537 = vmatpush1.bf16.msra.mxu0 %v20587_v10  ;;  %v20625_v10 = vld [vmem:[#allocation355_spill] sm:$0xff] }
 0x3d1   : > { %5547 = vmatprep.subr.bf16.mxu0 %v20588_v22  ;;  %v20626_v22 = vld [vmem:[#allocation357_spill] sm:$0xff] }
 0x3d2   : > { %5802 = vmatpush1.bf16.msra.mxu1 %v20589_v32  ;;  %v20627_v32 = vld [vmem:[#allocation250_spill] sm:$0xff] }
 0x3d3   : > { %5539 = vmatmul.mubr.bf16.vlgmr.msra.gmra.mrb[32].mxu0 %v13441_v56  ;;  %11213 = vmatprep.subr.msk.bf16.mxu1 %vm19843_vm0, %v20590_v43  ;;  %v20628_v43 = vld [vmem:[#allocation252_spill] sm:$0xff] }
 0x3d4   : > { %5548 = vmatpush1.bf16.msra.mxu0 %v20591_v47  ;;  %5579 = vmatprep.mubr.bf16.mxu0 %v19890_v2  ;;  %v20629_v47 = vld [vmem:[#allocation359_spill] sm:$0xff] }
 0x3d5   : > { %5549 = vmatprep.subr.bf16.mxu0 %v20592_v52  ;;  %v20630_v52 = vld [vmem:[#allocation361_spill] sm:$0xff] }
 0x3d6   : > { %5804 = vmatpush1.bf16.msra.mxu1 %v20593_v48  ;;  %v20631_v48 = vld [vmem:[#allocation254_spill] sm:$0xff] }
 0x3d7   : > { %5916 = vmatprep.subr.bf16.mxu1 %v20594_v12 }
 0x3d8   : > { %5550 = vmatpush1.bf16.msra.mxu0 %v20595_v53 }
 0x3d9   : > { %5551 = vmatprep.subr.bf16.mxu0 %v20596_v5  ;;  %11214 = vmatmul.mubr.msk.bf16.vlgmr.msra.gmra.mrb[40].mxu1 %vm3553_vm1, %v16265_v34  ;;  %v20632_v5 = vld [vmem:[#allocation256_spill] sm:$0xff] }
 0x3da   : > { %5917 = vmatpush1.bf16.msra.mxu1 %v20597_v13  ;;  %5948 = vmatprep.mubr.bf16.mxu1 %v16162_v58 }
 0x3db   : > { %5918 = vmatprep.subr.bf16.mxu1 %v20598_v46 }
 0x3dc   : > { %5552 = vmatpush1.bf16.msra.mxu0 %v20599_v6 }
 0x3dd   : > { %5553 = vmatprep.subr.bf16.mxu0 %v20600_v44  ;;  %v20633_v44 = vld [vmem:[#allocation364_spill] sm:$0xff] }
 0x3de   : > { %5919 = vmatpush1.bf16.msra.mxu1 %v20601_v35 }
 0x3df   : > { %5920 = vmatprep.subr.bf16.mxu1 %v20602_v61  ;;  %v20634_v61 = vld [vmem:[#allocation258_spill] sm:$0xff] }
 0x3e0   : > { %5554 = vmatpush1.bf16.msra.mxu0 %v20603_v24  ;;  %v20635_v24 = vld [vmem:[#allocation260_spill] sm:$0xff] }
 0x3e1   : > { %5555 = vmatprep.subr.bf16.mxu0 %v20604_v9  ;;  %v20636_v9 = vld [vmem:[#allocation366_spill] sm:$0xff] }
 0x3e2   : > { %5921 = vmatpush1.bf16.msra.mxu1 %v20605_v39  ;;  %v20637_v39 = vld [vmem:[#allocation368_spill] sm:$0xff] }
 0x3e3   : > { %5922 = vmatprep.subr.bf16.mxu1 %v20606_v26  ;;  %v20638_v26 = vld [vmem:[#allocation262_spill] sm:$0xff] }
 0x3e4   : > { %5556 = vmatpush1.bf16.msra.mxu0 %v20607_v7  ;;  %v20639_v7 = vld [vmem:[#allocation264_spill] sm:$0xff] }
 0x3e5   : > { %11207 = vmatprep.subr.msk.bf16.mxu0 %vm19843_vm0, %v20608_v3  ;;  %v20641_v3 = vld [vmem:[#allocation372_spill] sm:$0xff] }
 0x3e6   : > { %5923 = vmatpush1.bf16.msra.mxu1 %v20609_v18  ;;  %v20643_v18 = vld [vmem:[#allocation268_spill] sm:$0xff] }
 0x3e7   : > { %5924 = vmatprep.subr.bf16.mxu1 %v20610_v20  ;;  %v20644_v20 = vld [vmem:[#allocation374_spill] sm:$0xff] }
 0x3e8   : > { %5558 = vmatpush1.bf16.msra.mxu0 %v20611_v27  ;;  %v20645_v27 = vld [vmem:[#allocation376_spill] sm:$0xff] }
 0x3e9   : > { %5670 = vmatprep.subr.bf16.mxu0 %v20612_v29  ;;  %v20646_v29 = vld [vmem:[#allocation270_spill] sm:$0xff] }
 0x3ea   : > { %5925 = vmatpush1.bf16.msra.mxu1 %v20613_v38  ;;  %v20647_v38 = vld [vmem:[#allocation272_spill] sm:$0xff] }
 0x3eb   : > { %11208 = vmatmul.mubr.msk.bf16.vlgmr.msra.gmra.mrb[32].mxu0 %vm3553_vm1, %v16265_v34  ;;  %5926 = vmatprep.subr.bf16.mxu1 %v20614_v40 }
 0x3ec   : > { %5671 = vmatpush1.bf16.msra.mxu0 %v20615_v50  ;;  %5702 = vmatprep.mubr.bf16.mxu0 %v16162_v58  ;;  %v20648_v50 = vld [vmem:[#allocation378_spill] sm:$0xff] }
 0x3ed   : > { %5672 = vmatprep.subr.bf16.mxu0 %v20616_v59 }
 0x3ee   : > { %5927 = vmatpush1.bf16.msra.mxu1 %v20617_v4 }
 0x3ef   : > { %5928 = vmatprep.subr.bf16.mxu1 %v20618_v11  ;;  %v20649_v11 = vld [vmem:[#allocation380_spill] sm:$0xff] }
 0x3f0   : > { %5673 = vmatpush1.bf16.msra.mxu0 %v20619_v23 }
 0x3f1   : > { %5674 = vmatprep.subr.bf16.mxu0 %v20620_v25 }
 0x3f2   : > { %5929 = vmatpush1.bf16.msra.mxu1 %v20621_v55  ;;  %v20650_v55 = vld [vmem:[#allocation274_spill] sm:$0xff] }
 0x3f3   : > { %5930 = vmatprep.subr.bf16.mxu1 %v20622_v45 }
 0x3f4   : > { %5675 = vmatpush1.bf16.msra.mxu0 %v20623_v62 }
 0x3f5   : > { %5676 = vmatprep.subr.bf16.mxu0 %v20624_v15 }
 0x3f6   : > { %5931 = vmatpush1.bf16.msra.mxu1 %v20625_v10  ;;  %v20651_v10 = vld [vmem:[#allocation276_spill] sm:$0xff] }
 0x3f7   : > { %5932 = vmatprep.subr.bf16.mxu1 %v20626_v22 }
 0x3f8   : > { %5677 = vmatpush1.bf16.msra.mxu0 %v20627_v32 }
 0x3f9   : > { %5678 = vmatprep.subr.bf16.mxu0 %v20628_v43  ;;  %v20652_v43 = vld [vmem:[#allocation382_spill] sm:$0xff] }
 0x3fa   : > { %5933 = vmatpush1.bf16.msra.mxu1 %v20629_v47 }
 0x3fb   : > { %5934 = vmatprep.subr.bf16.mxu1 %v20630_v52  ;;  %v20653_v52 = vld [vmem:[#allocation384_spill] sm:$0xff] }
 0x3fc   : > { %5679 = vmatpush1.bf16.msra.mxu0 %v20631_v48  ;;  %v5499_v12 = vpop.f32.mrb[32].mxu1 }
 0x3fd   : > { %v6174_v53 = vrot.slane %v5499_v12, 4  ;;  %5680 = vmatprep.subr.bf16.mxu0 %v20632_v5  ;;  %v16738_v13 = vpop.f32.mrb[33].mxu1  ;;  %v20654_v12 = vld [vmem:[#allocation278_spill] sm:$0xff] }
 0x3fe   : > { %5935 = vmatpush1.bf16.msra.mxu1 %v15303_v41  ;;  %v5503_v46 = vpop.f32.mrb[34].mxu1  ;;  %v20640_v41 = vld [vmem:[#allocation370_spill] sm:$0xff] }
 0x3ff   : > { %v16743_v6 = vsel %vm4672_vm3, %v16638_v37, %v6174_v53  ;;  %5936 = vmatprep.subr.bf16.mxu1 %v20633_v44  ;;  %v5504_v35 = vpop.f32.mrb[35].mxu1  ;;  %v20642_v37 = vld [vmem:[#allocation266_spill] sm:$0xff]  ;;  %v20655_v53 = vld [vmem:[#allocation280_spill] sm:$0xff] }
 0x400   : > { %5681 = vmatpush1.bf16.msra.mxu0 %v20634_v61  ;;  %v20656_v5 = vld [vmem:[#allocation386_spill] sm:$0xff]  ;;  %v20657_v46 = vld [vmem:[#allocation388_spill] sm:$0xff] }
 0x401   : > { %5682 = vmatprep.subr.bf16.mxu0 %v20635_v24  ;;  %v20658_v44 = vld [vmem:[#allocation282_spill] sm:$0xff]  ;;  %v20659_v35 = vld [vmem:[#allocation284_spill] sm:$0xff] }
 0x402   : > { %5937 = vmatpush1.bf16.msra.mxu1 %v20636_v9  ;;  %v20660_v61 = vld [vmem:[#allocation390_spill] sm:$0xff]  ;;  %v20661_v24 = vld [vmem:[#allocation392_spill] sm:$0xff] }
 0x403   : > { %5938 = vmatprep.subr.bf16.mxu1 %v20637_v39  ;;  %v20662_v9 = vld [vmem:[#allocation286_spill] sm:$0xff] }
 0x404   : > { %5683 = vmatpush1.bf16.msra.mxu0 %v20638_v26  ;;  %v20663_v26 = vld [vmem:[#allocation288_spill] sm:$0xff] }
 0x405   : > { %5684 = vmatprep.subr.bf16.mxu0 %v20639_v7 }
 0x406   : > { %5939 = vmatpush1.bf16.msra.mxu1 %v20640_v41 }
 0x407   : > { %5940 = vmatprep.subr.bf16.mxu1 %v20641_v3  ;;  %v20664_v3 = vld [vmem:[#allocation394_spill] sm:$0xff] }
 0x408   : > { %5685 = vmatpush1.bf16.msra.mxu0 %v20642_v37 }
 0x409   : > { %5686 = vmatprep.subr.bf16.mxu0 %v20643_v18 }
 0x40a   : > { %5941 = vmatpush1.bf16.msra.mxu1 %v20644_v20  ;;  %v20665_v20 = vld [vmem:[#allocation396_spill] sm:$0xff] }
 0x40b   : > { %5942 = vmatprep.subr.bf16.mxu1 %v20645_v27 }
 0x40c   : > { %5687 = vmatpush1.bf16.msra.mxu0 %v20646_v29 }
 0x40d   : > { %5688 = vmatprep.subr.bf16.mxu0 %v20647_v38 }
 0x40e   : > { %v5099_v40 = vpop.f32.mrb[24].mxu0  ;;  %5943 = vmatpush1.bf16.msra.mxu1 %v20648_v50 }
 0x40f   : > { %v5108_v59 = vand.u32 2147483647, %v5099_v40  ;;  %v5101_v4 = vpop.f32.mrb[25].mxu0  ;;  %5944 = vmatprep.subr.bf16.mxu1 %v20649_v11  ;;  %v20666_v40 = vld [vmem:[#allocation290_spill] sm:$0xff] }
 0x410   : > { %v5109_v23 = vand.u32 2147483647, %v5101_v4  ;;  %v5103_v25 = vpop.f32.mrb[26].mxu0  ;;  %5689 = vmatpush1.bf16.msra.mxu0 %v20650_v55  ;;  %v20667_v4 = vld [vmem:[#allocation292_spill] sm:$0xff] }
 0x411   : > { %v5112_v45 = vadd.f32 1e-07, %v5108_v59  ;;  %v5110_v62 = vand.u32 2147483647, %v5103_v25  ;;  %v5105_v15 = vpop.f32.mrb[27].mxu0  ;;  %5690 = vmatprep.subr.bf16.mxu0 %v20651_v10  ;;  %v20668_v25 = vld [vmem:[#allocation398_spill] sm:$0xff] }
 0x412   : > { %v5113_v22 = vadd.f32 1e-07, %v5109_v23  ;;  %v5111_v32 = vand.u32 2147483647, %v5105_v15  ;;  %5945 = vmatpush1.bf16.msra.mxu1 %v20652_v43 }
 0x413   : > { %12626 = vlog2.f32 %v5112_v45  ;;  %v5114_v47 = vadd.f32 1e-07, %v5110_v62  ;;  %5946 = vmatprep.subr.bf16.mxu1 %v20653_v52  ;;  %v20669_v62 = vld [vmem:[#allocation400_spill] sm:$0xff] }
 0x414   : > { %12628 = vlog2.f32 %v5113_v22  ;;  %v5115_v48 = vadd.f32 1e-07, %v5111_v32  ;;  %5691 = vmatpush1.bf16.msra.mxu0 %v20654_v12  ;;  %v20670_v22 = vld [vmem:[#allocation294_spill] sm:$0xff] }
 0x415   : > { %12630 = vlog2.f32 %v5114_v47  ;;  %5692 = vmatprep.subr.bf16.mxu0 %v20655_v53  ;;  %v20671_v47 = vld [vmem:[#allocation296_spill] sm:$0xff]  ;;  %v20672_v12 = vld [vmem:[#allocation402_spill] sm:$0xff] }
 0x416   : > { %12632 = vlog2.f32 %v5115_v48  ;;  %5947 = vmatpush1.bf16.msra.mxu1 %v20656_v5 }
 0x417   : > { %5957 = vmatprep.subr.bf16.mxu1 %v20657_v46  ;;  %v20673_v46 = vld [vmem:[#allocation404_spill] sm:$0xff] }
 0x418   : > { %5693 = vmatpush1.bf16.msra.mxu0 %v20658_v44 }
 0x419   : > { %5694 = vmatprep.subr.bf16.mxu0 %v20659_v35  ;;  %5949 = vmatmul.mubr.bf16.vlgmr.msra.gmra.mrb[44].mxu1 %v13441_v56  ;;  %v20674_v35 = vld [vmem:[#allocation298_spill] sm:$0xff] }
 0x41a   : > { %5958 = vmatpush1.bf16.msra.mxu1 %v20660_v61  ;;  %5989 = vmatprep.mubr.bf16.mxu1 %v19890_v2 }
 0x41b   : > { %5959 = vmatprep.subr.bf16.mxu1 %v20661_v24  ;;  %v20675_v24 = vld [vmem:[#allocation300_spill] sm:$0xff] }
 0x41c   : > { %5695 = vmatpush1.bf16.msra.mxu0 %v20662_v9  ;;  %v20676_v9 = vld [vmem:[#allocation406_spill] sm:$0xff] }
 0x41d   : > { %v12627_v39 = vpop.eup %12626  ;;  %5696 = vmatprep.subr.bf16.mxu0 %v20663_v26  ;;  %v20678_v26 = vld [vmem:[#allocation302_spill] sm:$0xff] }
 0x41e   : > { %v12629_v7 = vpop.eup %12628  ;;  %v5117_v41 = vmul.f32 0.6931472, %v12627_v39  ;;  %5960 = vmatpush1.bf16.msra.mxu1 %v20664_v3  ;;  %v20677_v39 = vld [vmem:[#allocation408_spill] sm:$0xff] }
 0x41f   : > { %v12631_v37 = vpop.eup %12630  ;;  %v5119_v18 = vmul.f32 0.6931472, %v12629_v7  ;;  %5961 = vmatprep.subr.bf16.mxu1 %v20665_v20  ;;  %v20679_v7 = vld [vmem:[#allocation304_spill] sm:$0xff] }
 0x420   : > { %v12633_v27 = vpop.eup %12632  ;;  %v5124_v29 = vmul.f32 8.685889, %v5117_v41  ;;  %v5121_v38 = vmul.f32 0.6931472, %v12631_v37  ;;  %5697 = vmatpush1.bf16.msra.mxu0 %v20666_v40  ;;  %v20680_v41 = vld [vmem:[#allocation411_spill] sm:$0xff]  ;;  %v20681_v3 = vld [vmem:[#allocation412_spill] sm:$0xff] }
 0x421   : > { %v5125_v50 = vmul.f32 8.685889, %v5119_v18  ;;  %v5123_v59 = vmul.f32 0.6931472, %v12633_v27  ;;  %5698 = vmatprep.subr.bf16.mxu0 %v20667_v4  ;;  %v20682_v37 = vld [vmem:[#allocation306_spill] sm:$0xff]  ;;  %v20683_v18 = vld [vmem:[#allocation308_spill] sm:$0xff] }
 0x422   : > { %v5128_v11 = vsub.f32 10.0, %v5124_v29  ;;  %v5126_v23 = vmul.f32 8.685889, %v5121_v38  ;;  %5962 = vmatpush1.bf16.msra.mxu1 %v20668_v25  ;;  %v20684_v27 = vld [vmem:[#allocation414_spill] sm:$0xff]  ;;  %v20685_v40 = vld [vmem:[#allocation416_spill] sm:$0xff] }
 0x423   : > { %v5129_v55 = vsub.f32 10.0, %v5125_v50  ;;  %v5127_v45 = vmul.f32 8.685889, %v5123_v59  ;;  %5963 = vmatprep.subr.bf16.mxu1 %v20669_v62  ;;  %v20686_v4 = vld [vmem:[#allocation310_spill] sm:$0xff]  ;;  %v20687_v25 = vld [vmem:[#allocation312_spill] sm:$0xff] }
 0x424   : > { %v5132_v15 = vmul.f32 0.1, %v5128_v11  ;;  %v5130_v10 = vsub.f32 10.0, %v5126_v23  ;;  %5699 = vmatpush1.bf16.msra.mxu0 %v20670_v22  ;;  %v20689_v62 = vld [vmem:[#allocation420_spill] sm:$0xff]  ;;  %v20692_v22 = vld [vmem:[#allocation422_spill] sm:$0xff] }
 0x425   : > { %v5133_v32 = vmul.f32 0.1, %v5129_v55  ;;  %v5131_v43 = vsub.f32 10.0, %v5127_v45  ;;  %5700 = vmatprep.subr.bf16.mxu0 %v20671_v47  ;;  %v20688_v45 = vld [vmem:[#allocation418_spill] sm:$0xff]  ;;  %v20695_v47 = vld [vmem:[#allocation320_spill] sm:$0xff] }
 0x426   : > { %v5136_v52 = vmul.f32 1.442695, %v5132_v15  ;;  %v5134_v48 = vmul.f32 0.1, %v5130_v10  ;;  %5964 = vmatpush1.bf16.msra.mxu1 %v20672_v12  ;;  %v20690_v15 = vld [vmem:[#allocation314_spill] sm:$0xff]  ;;  %v20691_v10 = vld [vmem:[#allocation316_spill] sm:$0xff] }
 0x427   : > { %v5138_v53 = vmul.f32 1.442695, %v5133_v32  ;;  %v5135_v5 = vmul.f32 0.1, %v5131_v43  ;;  %5965 = vmatprep.subr.bf16.mxu1 %v20673_v46  ;;  %v20693_v32 = vld [vmem:[#allocation424_spill] sm:$0xff]  ;;  %v20694_v43 = vld [vmem:[#allocation318_spill] sm:$0xff] }
 0x428   : > { %12634 = vpow2.f32 %v5136_v52  ;;  %v5140_v44 = vmul.f32 1.442695, %v5134_v48  ;;  %5701 = vmatpush1.bf16.msra.mxu0 %v20674_v35  ;;  %v20696_v52 = vld [vmem:[#allocation426_spill] sm:$0xff]  ;;  %v20697_v12 = vld [vmem:[#allocation428_spill] sm:$0xff]  ;;  %v20699_v35 = vld [vmem:[#allocation323_spill] sm:$0xff] }
 0x429   : > { %12636 = vpow2.f32 %v5138_v53  ;;  %v5142_v61 = vmul.f32 1.442695, %v5135_v5  ;;  %5711 = vmatprep.subr.bf16.mxu0 %v20675_v24  ;;  %v20698_v5 = vld [vmem:[#allocation322_spill] sm:$0xff] }
 0x42a   : > { %12638 = vpow2.f32 %v5140_v44  ;;  %5966 = vmatpush1.bf16.msra.mxu1 %v20676_v9  ;;  %v20700_v9 = vld [vmem:[#allocation430_spill] sm:$0xff] }
 0x42b   : > { %12640 = vpow2.f32 %v5142_v61  ;;  %5703 = vmatmul.mubr.bf16.vlgmr.msra.gmra.mrb[36].mxu0 %v13441_v56  ;;  %11217 = vmatprep.subr.msk.bf16.mxu1 %vm19843_vm0, %v20677_v39 }
 0x42c   : > { %5712 = vmatpush1.bf16.msra.mxu0 %v20678_v26  ;;  %5743 = vmatprep.mubr.bf16.mxu0 %v19890_v2  ;;  %v20701_v26 = vld [vmem:[#allocation432_spill] sm:$0xff] }
 0x42d   : > { %5713 = vmatprep.subr.bf16.mxu0 %v20679_v7 }
 0x42e   : > { %5968 = vmatpush1.bf16.msra.mxu1 %v20680_v41  ;;  %v20702_v41 = vld [vmem:[#allocation326_spill] sm:$0xff] }
 0x42f   : > { %6080 = vmatprep.subr.bf16.mxu1 %v20681_v3 }
 0x430   : > { %5714 = vmatpush1.bf16.msra.mxu0 %v20682_v37 }
 0x431   : > { %5715 = vmatprep.subr.bf16.mxu0 %v20683_v18  ;;  %11218 = vmatmul.mubr.msk.bf16.vlgmr.msra.gmra.mrb[44].mxu1 %vm3553_vm1, %v16265_v34  ;;  %v20703_v18 = vld [vmem:[#allocation328_spill] sm:$0xff] }
 0x432   : > { %v12635_v20 = vpop.eup %12634  ;;  %6081 = vmatpush1.bf16.msra.mxu1 %v20684_v27  ;;  %6112 = vmatprep.mubr.bf16.mxu1 %v16162_v58 }
 0x433   : > { %v12637_v29 = vpop.eup %12636  ;;  %v5144_v38 = vadd.f32 1.0, %v12635_v20  ;;  %6082 = vmatprep.subr.bf16.mxu1 %v20685_v40 }
 0x434   : > { %v12639_v50 = vpop.eup %12638  ;;  %v5145_v59 = vadd.f32 1.0, %v12637_v29  ;;  %5716 = vmatpush1.bf16.msra.mxu0 %v20686_v4  ;;  %v20704_v29 = vld [vmem:[#allocation434_spill] sm:$0xff]  ;;  %v20707_v4 = vld [vmem:[#allocation332_spill] sm:$0xff] }
 0x435   : > { %v12641_v11 = vpop.eup %12640  ;;  %v5146_v23 = vadd.f32 1.0, %v12639_v50  ;;  %5717 = vmatprep.subr.bf16.mxu0 %v20687_v25  ;;  %12642 = vrcp.f32 %v5144_v38  ;;  %v20705_v50 = vld [vmem:[#allocation436_spill] sm:$0xff]  ;;  %v20710_v25 = vld [vmem:[#allocation334_spill] sm:$0xff] }
 0x436   : > { %v5147_v55 = vadd.f32 1.0, %v12641_v11  ;;  %6083 = vmatpush1.bf16.msra.mxu1 %v20688_v45  ;;  %12644 = vrcp.f32 %v5145_v59  ;;  %v20706_v59 = vld [vmem:[#allocation330_spill] sm:$0xff] }
 0x437   : > { %6084 = vmatprep.subr.bf16.mxu1 %v20689_v62  ;;  %12646 = vrcp.f32 %v5146_v23  ;;  %v20708_v11 = vld [vmem:[#allocation438_spill] sm:$0xff]  ;;  %v20709_v23 = vld [vmem:[#allocation440_spill] sm:$0xff] }
 0x438   : > { %5718 = vmatpush1.bf16.msra.mxu0 %v20690_v15  ;;  %12648 = vrcp.f32 %v5147_v55  ;;  %v20711_v55 = vld [vmem:[#allocation336_spill] sm:$0xff]  ;;  %v20712_v45 = vld [vmem:[#allocation442_spill] sm:$0xff] }
 0x439   : > { %5719 = vmatprep.subr.bf16.mxu0 %v20691_v10  ;;  %v20713_v62 = vld [vmem:[#allocation444_spill] sm:$0xff]  ;;  %v20714_v15 = vld [vmem:[#allocation338_spill] sm:$0xff] }
 0x43a   : > { %6085 = vmatpush1.bf16.msra.mxu1 %v20692_v22  ;;  %v20715_v10 = vld [vmem:[#allocation340_spill] sm:$0xff]  ;;  %v20716_v22 = vld [vmem:[#allocation446_spill] sm:$0xff] }
 0x43b   : > { %6086 = vmatprep.subr.bf16.mxu1 %v20693_v32  ;;  %v20717_v32 = vld [vmem:[#allocation448_spill] sm:$0xff] }
 0x43c   : > { %5720 = vmatpush1.bf16.msra.mxu0 %v20694_v43  ;;  %v20718_v43 = vld [vmem:[#allocation342_spill] sm:$0xff] }
 0x43d   : > { %11211 = vmatprep.subr.msk.bf16.mxu0 %vm19843_vm0, %v20695_v47 }
 0x43e   : > { %6087 = vmatpush1.bf16.msra.mxu1 %v20696_v52  ;;  %v20719_v52 = vld [vmem:[#allocation344_spill] sm:$0xff] }
 0x43f   : > { %v12643_v48 = vpop.eup %12642  ;;  %6088 = vmatprep.subr.bf16.mxu1 %v20697_v12 }
 0x440   : > { %v12645_v53 = vpop.eup %12644  ;;  %5722 = vmatpush1.bf16.msra.mxu0 %v20698_v5  ;;  %v5152_v46 = vmul.f32 180.0, %v12643_v48  ;;  %v20720_v5 = vld [vmem:[#allocation346_spill] sm:$0xff] }
 0x441   : > { %v12647_v44 = vpop.eup %12646  ;;  %5834 = vmatprep.subr.bf16.mxu0 %v20699_v35  ;;  %v5153_v61 = vmul.f32 180.0, %v12645_v53  ;;  %v20723_v35 = vld [vmem:[#allocation352_spill] sm:$0xff] }
 0x442   : > { %v12649_v24 = vpop.eup %12648  ;;  %6089 = vmatpush1.bf16.msra.mxu1 %v20700_v9  ;;  %v5154_v39 = vmul.f32 180.0, %v12647_v44  ;;  %v5156_v3 = vadd.f32 70.0, %v5152_v46  ;;  %v20721_v46 = vld [vmem:[#allocation348_spill] sm:$0xff]  ;;  %v20722_v44 = vld [vmem:[#allocation350_spill] sm:$0xff] }
 0x443   : > { %11212 = vmatmul.mubr.msk.bf16.vlgmr.msra.gmra.mrb[36].mxu0 %vm3553_vm1, %v16265_v34  ;;  %6090 = vmatprep.subr.bf16.mxu1 %v20701_v26  ;;  %v5155_v7 = vmul.f32 180.0, %v12649_v24  ;;  %v5157_v20 = vadd.f32 70.0, %v5153_v61  ;;  %v20726_v61 = vld [vmem:[#allocation358_spill] sm:$0xff]  ;;  %v20729_v26 = vld [vmem:[#allocation460_spill] sm:$0xff] }
 0x444   : > { %5835 = vmatpush1.bf16.msra.mxu0 %v20702_v41  ;;  %v5158_v37 = vadd.f32 70.0, %v5154_v39  ;;  %5866 = vmatprep.mubr.bf16.mxu0 %v16162_v58  ;;  %v20728_v24 = vld [vmem:[#allocation458_spill] sm:$0xff] }
 0x445   : > { %5836 = vmatprep.subr.bf16.mxu0 %v20703_v18  ;;  %v5159_v27 = vadd.f32 70.0, %v5155_v7 }
 0x446   : > { %6091 = vmatpush1.bf16.msra.mxu1 %v20704_v29  ;;  %v16829_v38 = vpack.c.bf16 %v5158_v37, %v5156_v3  ;;  %v20730_v3 = vld [vmem:[#allocation362_spill] sm:$0xff]  ;;  %v20731_v37 = vld [vmem:[#allocation363_spill] sm:$0xff]  ;;  %v20733_v29 = vld [vmem:[#allocation464_spill] sm:$0xff] }
 0x447   : > { %v16831_v40 = vpack.c.bf16 %v5159_v27, %v5157_v20  ;;  %6092 = vmatprep.subr.bf16.mxu1 %v20705_v50  ;;  %v20732_v27 = vld [vmem:[#allocation462_spill] sm:$0xff]  ;;  %v20734_v50 = vld [vmem:[#allocation365_spill] sm:$0xff] }
 0x448   : > { %5837 = vmatpush1.bf16.msra.mxu0 %v20706_v59  ;;  %6423 = vrot.lane.b32.xlu1 %v16829_v38, %s12756_s14  ;;  %v20735_v59 = vld [vmem:[#allocation367_spill] sm:$0xff] }
 0x449   : > { %6425 = vrot.lane.b32.xlu0 %v16831_v40, %s12756_s14  ;;  %5838 = vmatprep.subr.bf16.mxu0 %v20707_v4  ;;  %v20737_v4 = vld [vmem:[#allocation468_spill] sm:$0xff] }
 0x44a   : > { %6093 = vmatpush1.bf16.msra.mxu1 %v20708_v11  ;;  %v20738_v11 = vld [vmem:[#allocation369_spill] sm:$0xff] }
 0x44b   : > { %6094 = vmatprep.subr.bf16.mxu1 %v20709_v23  ;;  %v20740_v23 = vld [vmem:[#allocation470_spill] sm:$0xff] }
 0x44c   : > { %5839 = vmatpush1.bf16.msra.mxu0 %v20710_v25  ;;  %6441 = vrot.lane.b32.xlu1 %v16831_v40, %s12757_s15  ;;  %v20741_v25 = vld [vmem:[#allocation472_spill] sm:$0xff] }
 0x44d   : > { %5840 = vmatprep.subr.bf16.mxu0 %v20711_v55  ;;  %v20742_v55 = vld [vmem:[#allocation373_spill] sm:$0xff] }
 0x44e   : > { %6095 = vmatpush1.bf16.msra.mxu1 %v20712_v45  ;;  %v20743_v45 = vld [vmem:[#allocation375_spill] sm:$0xff] }
 0x44f   : > { %6096 = vmatprep.subr.bf16.mxu1 %v20713_v62  ;;  %v20744_v62 = vld [vmem:[#allocation474_spill] sm:$0xff] }
 0x450   : > { %5841 = vmatpush1.bf16.msra.mxu0 %v20714_v15  ;;  %6439 = vrot.lane.b32.xlu1 %v16829_v38, %s12757_s15  ;;  %v20745_v15 = vld [vmem:[#allocation476_spill] sm:$0xff] }
 0x451   : > { %5842 = vmatprep.subr.bf16.mxu0 %v20715_v10  ;;  %v20746_v10 = vld [vmem:[#allocation377_spill] sm:$0xff] }
 0x452   : > { %6097 = vmatpush1.bf16.msra.mxu1 %v20716_v22  ;;  %v20747_v22 = vld [vmem:[#allocation379_spill] sm:$0xff] }
 0x453   : > { %6098 = vmatprep.subr.bf16.mxu1 %v20717_v32  ;;  %v20748_v32 = vld [vmem:[#allocation478_spill] sm:$0xff] }
 0x454   : > { %5843 = vmatpush1.bf16.msra.mxu0 %v20718_v43  ;;  %v5663_v47 = vpop.f32.mrb[36].mxu1  ;;  %v20749_v43 = vld [vmem:[#allocation480_spill] sm:$0xff] }
 0x455   : > { %5844 = vmatprep.subr.bf16.mxu0 %v20719_v52  ;;  %v16856_v48 = vpop.f32.mrb[37].mxu1  ;;  %v20751_v52 = vld [vmem:[#allocation383_spill] sm:$0xff] }
 0x456   : > { %6099 = vmatpush1.bf16.msra.mxu1 %v15858_v54  ;;  %v5667_v12 = vpop.f32.mrb[38].mxu1  ;;  %v20724_v54 = vld [vmem:[#allocation354_spill] sm:$0xff] }
 0x457   : > { %6100 = vmatprep.subr.bf16.mxu1 %v15863_v1  ;;  %v5668_v53 = vpop.f32.mrb[39].mxu1  ;;  %v20725_v1 = vld [vmem:[#allocation356_spill] sm:$0xff]  ;;  %v20752_v12 = vld [vmem:[#allocation385_spill] sm:$0xff] }
 0x458   : > { %5845 = vmatpush1.bf16.msra.mxu0 %v20720_v5  ;;  %v20753_v53 = vld [vmem:[#allocation387_spill] sm:$0xff]  ;;  %v20754_v5 = vld [vmem:[#allocation389_spill] sm:$0xff] }
 0x459   : > { %5846 = vmatprep.subr.bf16.mxu0 %v20721_v46  ;;  %v20755_v46 = vld [vmem:[#allocation391_spill] sm:$0xff] }
 0x45a   : > { %6101 = vmatpush1.bf16.msra.mxu1 %v15884_v51  ;;  %v20727_v51 = vld [vmem:[#allocation360_spill] sm:$0xff] }
 0x45b   : > { %6102 = vmatprep.subr.bf16.mxu1 %v15897_v42 }
 0x45c   : > { %5847 = vmatpush1.bf16.msra.mxu0 %v20722_v44  ;;  %v20760_v44 = vld [vmem:[#allocation401_spill] sm:$0xff] }
 0x45d   : > { %5848 = vmatprep.subr.bf16.mxu0 %v20723_v35  ;;  %v20763_v35 = vld [vmem:[#allocation407_spill] sm:$0xff] }
 0x45e   : > { %6103 = vmatpush1.bf16.msra.mxu1 %v15919_v33  ;;  %v6184_v33 = vrot.slane %v5663_v47, 2  ;;  %v20750_v47 = vld [vmem:[#allocation381_spill] sm:$0xff] }
 0x45f   : > { %6104 = vmatprep.subr.bf16.mxu1 %v15924_v21  ;;  %v6175_v21 = vrot.slane %v16738_v13, 4 }
 0x460   : > { %5849 = vmatpush1.bf16.msra.mxu0 %v20724_v54  ;;  %v20764_v54 = vld [vmem:[#allocation409_spill] sm:$0xff] }
 0x461   : > { %5850 = vmatprep.subr.bf16.mxu0 %v20725_v1  ;;  %v20765_v1 = vld [vmem:[#allocation410_spill] sm:$0xff] }
 0x462   : > { %6105 = vmatpush1.bf16.msra.mxu1 %v15943_v49 }
 0x463   : > { %6106 = vmatprep.subr.bf16.mxu1 %v15948_v0 }
 0x464   : > { %5851 = vmatpush1.bf16.msra.mxu0 %v20726_v61  ;;  %v20767_v61 = vld [vmem:[#allocation415_spill] sm:$0xff] }
 0x465   : > { %5852 = vmatprep.subr.bf16.mxu0 %v20727_v51  ;;  %v20768_v51 = vld [vmem:[#allocation417_spill] sm:$0xff] }
 0x466   : > { %v5417_v42 = vpop.f32.mrb[28].mxu0  ;;  %6107 = vmatpush1.bf16.msra.mxu1 %v20728_v24  ;;  %v20770_v24 = vld [vmem:[#allocation421_spill] sm:$0xff] }
 0x467   : > { %v6166_v9 = vrot.slane %v5417_v42, 6  ;;  %v5419_v39 = vpop.f32.mrb[29].mxu0  ;;  %6108 = vmatprep.subr.bf16.mxu1 %v20729_v26  ;;  %v20769_v42 = vld [vmem:[#allocation419_spill] sm:$0xff]  ;;  %v20774_v26 = vld [vmem:[#allocation429_spill] sm:$0xff] }
 0x468   : > { %v6167_v7 = vrot.slane %v5419_v39, 6  ;;  %v5421_v41 = vpop.f32.mrb[30].mxu0  ;;  %5853 = vmatpush1.bf16.msra.mxu0 %v20730_v3  ;;  %v20772_v39 = vld [vmem:[#allocation425_spill] sm:$0xff] }
 0x469   : > { %v6217_v49 = vsel %vm4668_vm2, %v16530_v31, %v6166_v9  ;;  %v5422_v0 = vpop.f32.mrb[31].mxu0  ;;  %5854 = vmatprep.subr.bf16.mxu0 %v20731_v37  ;;  %v20736_v31 = vld [vmem:[#allocation466_spill] sm:$0xff]  ;;  %v20771_v9 = vld [vmem:[#allocation423_spill] sm:$0xff]  ;;  %v20778_v37 = vld [vmem:[#allocation437_spill] sm:$0xff] }
 0x46a   : > { %v16883_v18 = vsel %vm4668_vm2, %v16631_v57, %v6167_v7  ;;  %v6220_v20 = vsel %vm4672_vm3, %v6217_v49, %v6175_v21  ;;  %6109 = vmatpush1.bf16.msra.mxu1 %v20732_v27  ;;  %v20739_v57 = vld [vmem:[#allocation371_spill] sm:$0xff]  ;;  %v20776_v49 = vld [vmem:[#allocation433_spill] sm:$0xff] }
 0x46b   : > { %v16888_v13 = vsel %vm4676_vm4, %v6220_v20, %v6184_v33  ;;  %6110 = vmatprep.subr.bf16.mxu1 %v20733_v29  ;;  %v20773_v33 = vld [vmem:[#allocation427_spill] sm:$0xff]  ;;  %v20780_v27 = vld [vmem:[#allocation441_spill] sm:$0xff] }
 0x46c   : > { %5855 = vmatpush1.bf16.msra.mxu0 %v20734_v50  ;;  %v20775_v7 = vld [vmem:[#allocation431_spill] sm:$0xff]  ;;  %v20782_v50 = vld [vmem:[#allocation445_spill] sm:$0xff] }
 0x46d   : > { %5856 = vmatprep.subr.bf16.mxu0 %v20735_v59  ;;  %v20777_v0 = vld [vmem:[#allocation435_spill] sm:$0xff] }
 0x46e   : > { %6111 = vmatpush1.bf16.msra.mxu1 %v20736_v31  ;;  %v20779_v20 = vld [vmem:[#allocation439_spill] sm:$0xff] }
 0x46f   : > { %6121 = vmatprep.subr.bf16.mxu1 %v20737_v4  ;;  %v20781_v29 = vld [vmem:[#allocation443_spill] sm:$0xff] }
 0x470   : > { %5857 = vmatpush1.bf16.msra.mxu0 %v20738_v11  ;;  %v20783_v59 = vld [vmem:[#allocation447_spill] sm:$0xff] }
 0x471   : > { %5858 = vmatprep.subr.bf16.mxu0 %v20739_v57  ;;  %6113 = vmatmul.mubr.bf16.vlgmr.msra.gmra.mrb[48].mxu1 %v13441_v56  ;;  %v6185_v57 = vrot.slane %v16856_v48, 2  ;;  %v20787_v48 = vld [vmem:[#allocation452_spill] sm:$0xff] }
 0x472   : > { %6122 = vmatpush1.bf16.msra.mxu1 %v20740_v23  ;;  %6153 = vmatprep.mubr.bf16.mxu1 %v19890_v2 }
 0x473   : > { %6123 = vmatprep.subr.bf16.mxu1 %v20741_v25 }
 0x474   : > { %5859 = vmatpush1.bf16.msra.mxu0 %v20742_v55  ;;  %v20784_v55 = vld [vmem:[#allocation449_spill] sm:$0xff] }
 0x475   : > { %5860 = vmatprep.subr.bf16.mxu0 %v20743_v45 }
 0x476   : > { %6124 = vmatpush1.bf16.msra.mxu1 %v20744_v62 }
 0x477   : > { %6125 = vmatprep.subr.bf16.mxu1 %v20745_v15  ;;  %v20785_v15 = vld [vmem:[#allocation450_spill] sm:$0xff] }
 0x478   : > { %5861 = vmatpush1.bf16.msra.mxu0 %v20746_v10 }
 0x479   : > { %5862 = vmatprep.subr.bf16.mxu0 %v20747_v22 }
 0x47a   : > { %6126 = vmatpush1.bf16.msra.mxu1 %v20748_v32  ;;  %v20786_v32 = vld [vmem:[#allocation451_spill] sm:$0xff] }
 0x47b   : > { %6127 = vmatprep.subr.bf16.mxu1 %v20749_v43  ;;  %v20788_v43 = vld [vmem:[#allocation453_spill] sm:$0xff] }
 0x47c   : > { %5863 = vmatpush1.bf16.msra.mxu0 %v20750_v47  ;;  %v20789_v47 = vld [vmem:[#allocation454_spill] sm:$0xff] }
 0x47d   : > { %5864 = vmatprep.subr.bf16.mxu0 %v20751_v52  ;;  %v20790_v52 = vld [vmem:[#allocation455_spill] sm:$0xff] }
 0x47e   : > { %6128 = vmatpush1.bf16.msra.mxu1 %v16115_v28  ;;  %v20757_v28 = vld [vmem:[#allocation395_spill] sm:$0xff] }
 0x47f   : > { %6129 = vmatprep.subr.bf16.mxu1 %v16120_v63  ;;  %v20756_v63 = vld [vmem:[#allocation393_spill] sm:$0xff] }
 0x480   : > { %5865 = vmatpush1.bf16.msra.mxu0 %v20752_v12  ;;  %v20792_v12 = vld [vmem:[#allocation457_spill] sm:$0xff] }
 0x481   : > { %5875 = vmatprep.subr.bf16.mxu0 %v20753_v53  ;;  %v20793_v53 = vld [vmem:[#allocation459_spill] sm:$0xff] }
 0x482   : > { %6130 = vmatpush1.bf16.msra.mxu1 %v16139_v30  ;;  %v20758_v30 = vld [vmem:[#allocation397_spill] sm:$0xff] }
 0x483   : > { %5867 = vmatmul.mubr.bf16.vlgmr.msra.gmra.mrb[40].mxu0 %v13441_v56  ;;  %11221 = vmatprep.subr.msk.bf16.mxu1 %vm19843_vm0, %v16144_v60  ;;  %v20759_v60 = vld [vmem:[#allocation399_spill] sm:$0xff] }
 0x484   : > { %5876 = vmatpush1.bf16.msra.mxu0 %v20754_v5  ;;  %5907 = vmatprep.mubr.bf16.mxu0 %v19890_v2  ;;  %v20794_v5 = vld [vmem:[#allocation461_spill] sm:$0xff] }
 0x485   : > { %5877 = vmatprep.subr.bf16.mxu0 %v20755_v46  ;;  %v20796_v46 = vld [vmem:[#allocation465_spill] sm:$0xff] }
 0x486   : > { %6132 = vmatpush1.bf16.msra.mxu1 %v16158_v19  ;;  %v20761_v19 = vld [vmem:[#allocation403_spill] sm:$0xff] }
 0x487   : > { %6522 = vmatprep.subr.bf16.mxu1 %v16831_v40  ;;  %v20762_v40 = vld [vmem:[#allocation405_spill] sm:$0xff] }
 0x488   : > { %5878 = vmatpush1.bf16.msra.mxu0 %v20756_v63  ;;  %v20797_v63 = vld [vmem:[#allocation467_spill] sm:$0xff] }
 0x489   : > { %5879 = vmatprep.subr.bf16.mxu0 %v20757_v28  ;;  %11222 = vmatmul.mubr.msk.bf16.vlgmr.msra.gmra.mrb[48].mxu1 %vm3553_vm1, %v16265_v34  ;;  %v20798_v28 = vld [vmem:[#allocation469_spill] sm:$0xff] }
 0x48a   : > { %6523 = vmatpush1.bf16.msra.mxu1 %v16829_v38  ;;  %6554 = vmatprep.mubr.bf16.mxu1 %v19890_v2  ;;  %v20766_v38 = vld [vmem:[#allocation413_spill] sm:$0xff] }
 0x48c   : > { %5880 = vmatpush1.bf16.msra.mxu0 %v20758_v30  ;;  %v20799_v30 = vld [vmem:[#allocation471_spill] sm:$0xff] }
 0x48d   : > { %5881 = vmatprep.subr.bf16.mxu0 %v20759_v60  ;;  %v20800_v60 = vld [vmem:[#allocation473_spill] sm:$0xff] }
 0x490   : > { %5882 = vmatpush1.bf16.msra.mxu0 %v20760_v44  ;;  %v20801_v44 = vld [vmem:[#allocation475_spill] sm:$0xff] }
 0x491   : > { %5883 = vmatprep.subr.bf16.mxu0 %v20761_v19  ;;  %v20802_v19 = vld [vmem:[#allocation477_spill] sm:$0xff] }
 0x494   : > { %5884 = vmatpush1.bf16.msra.mxu0 %v20762_v40  ;;  %v20803_v40 = vld [vmem:[#allocation479_spill] sm:$0xff] }
 0x495   : > { %11215 = vmatprep.subr.msk.bf16.mxu0 %vm19843_vm0, %v20763_v35  ;;  %v12705_v35 = vld [vmem:[%s19349_s2 + $0x30] ss:$8 sps:$4 sm:$0xff]  }
 0x498   : > { %5886 = vmatpush1.bf16.msra.mxu0 %v20764_v54  ;;  %v12706_v54 = vld [vmem:[%s19349_s2 + $0x44] ss:$8 sps:$4 sm:$0xff]  }
 0x499   : > { %5998 = vmatprep.subr.bf16.mxu0 %v20765_v1 }
 0x49b   : > { %11216 = vmatmul.mubr.msk.bf16.vlgmr.msra.gmra.mrb[40].mxu0 %vm3553_vm1, %v16265_v34 }
 0x49c   : > { %5999 = vmatpush1.bf16.msra.mxu0 %v20766_v38  ;;  %6030 = vmatprep.mubr.bf16.mxu0 %v16162_v58  ;;  %v12707_v38 = vld [vmem:[%s19349_s2 + $0x40] ss:$8 sps:$4 sm:$0xff]  }
 0x49d   : > { %6000 = vmatprep.subr.bf16.mxu0 %v20767_v61 }
 0x4a0   : > { %6001 = vmatpush1.bf16.msra.mxu0 %v20768_v51  ;;  %v12708_v51 = vld [vmem:[%s19349_s2 + $0x54] ss:$8 sps:$4 sm:$0xff]  }
 0x4a1   : > { %6002 = vmatprep.subr.bf16.mxu0 %v20769_v42 }
 0x4a4   : > { %6003 = vmatpush1.bf16.msra.mxu0 %v20770_v24 }
 0x4a5   : > { %6004 = vmatprep.subr.bf16.mxu0 %v20771_v9  ;;  %v12709_v9 = vld [vmem:[%s19349_s2 + $0x50] ss:$8 sps:$4 sm:$0xff]  }
 0x4a8   : > { %6005 = vmatpush1.bf16.msra.mxu0 %v20772_v39  ;;  %v12710_v39 = vld [vmem:[%s19349_s2 + $0x64] ss:$8 sps:$4 sm:$0xff]  }
 0x4a9   : > { %6006 = vmatprep.subr.bf16.mxu0 %v20773_v33  ;;  %v12711_v33 = vld [vmem:[%s19349_s2 + $0x60] ss:$8 sps:$4 sm:$0xff]  }
 0x4ac   : > { %6007 = vmatpush1.bf16.msra.mxu0 %v20774_v26  ;;  %v16951_v21 = vpop.f32.mrb[40].mxu1  ;;  %v12712_v26 = vld [vmem:[%s19349_s2 + $0x74] ss:$8 sps:$4 sm:$0xff]  }
 0x4ad   : > { %6008 = vmatprep.subr.bf16.mxu0 %v20775_v7  ;;  %v16954_v58 = vpop.f32.mrb[41].mxu1  ;;  %v12713_v7 = vld [vmem:[%s19349_s2 + $0x70] ss:$8 sps:$4 sm:$0xff]  }
 0x4ae   : > { %v5831_v41 = vpop.f32.mrb[42].mxu1 }
 0x4af   : > { %v5832_v3 = vpop.f32.mrb[43].mxu1  ;;  %v12714_v41 = vld [vmem:[%s19349_s2 + $0x84] ss:$8 sps:$4 sm:$0xff]  }
 0x4b0   : > { %6009 = vmatpush1.bf16.msra.mxu0 %v20776_v49  ;;  %v12715_v49 = vld [vmem:[%s19349_s2 + $0x80] ss:$8 sps:$4 sm:$0xff]  }
 0x4b1   : > { %6010 = vmatprep.subr.bf16.mxu0 %v20777_v0  ;;  %v6192_v0 = vrot.slane %v16954_v58, 6  ;;  %v12718_v58 = vld [vmem:[%s19349_s2 + $0xa4] ss:$8 sps:$4 sm:$0xff]  }
 0x4b4   : > { %6011 = vmatpush1.bf16.msra.mxu0 %v20778_v37  ;;  %v12716_v37 = vld [vmem:[%s19349_s2 + $0x94] ss:$8 sps:$4 sm:$0xff]  }
 0x4b5   : > { %6012 = vmatprep.subr.bf16.mxu0 %v20779_v20 }
 0x4b8   : > { %6013 = vmatpush1.bf16.msra.mxu0 %v20780_v27 }
 0x4b9   : > { %6014 = vmatprep.subr.bf16.mxu0 %v20781_v29 }
 0x4bc   : > { %6015 = vmatpush1.bf16.msra.mxu0 %v20782_v50 }
 0x4bd   : > { %6016 = vmatprep.subr.bf16.mxu0 %v20783_v59 }
 0x4be   : > { %v5581_v31 = vpop.f32.mrb[32].mxu0 }
 0x4bf   : > { %v6176_v4 = vrot.slane %v5581_v31, 4  ;;  %v5583_v11 = vpop.f32.mrb[33].mxu0  ;;  %v12717_v31 = vld [vmem:[%s19349_s2 + $0x90] ss:$8 sps:$4 sm:$0xff]  }
 0x4c0   : > { %v6183_v23 = vrot.slane %v5583_v11, 2  ;;  %v5585_v25 = vpop.f32.mrb[34].mxu0  ;;  %6017 = vmatpush1.bf16.msra.mxu0 %v20784_v55  ;;  %v12719_v11 = vld [vmem:[%s19349_s2 + $0xa0] ss:$8 sps:$4 sm:$0xff]  }
 0x4c1   : > { %v6221_v45 = vsel %vm4672_vm3, %v16883_v18, %v6176_v4  ;;  %v5586_v62 = vpop.f32.mrb[35].mxu0  ;;  %6018 = vmatprep.subr.bf16.mxu0 %v20785_v15  ;;  %v20791_v18 = vld [vmem:[#allocation456_spill] sm:$0xff]  ;;  %v12722_v25 = vld [vmem:[%s19349_s2 + $0xc4] ss:$8 sps:$4 sm:$0xff]   ;;  %v12723_v55 = vld [vmem:[%s19349_s2 + $0xc0] ss:$8 sps:$4 sm:$0xff]  }
 0x4c2   : > { %v16970_v10 = vsel %vm4676_vm4, %v6221_v45, %v6185_v57  ;;  %v16974_v22 = vsel %vm4676_vm4, %v16743_v6, %v6183_v23  ;;  %v20795_v6 = vld [vmem:[#allocation463_spill] sm:$0xff]  ;;  %v12726_v15 = vld [vmem:[%s19349_s2 + $0xe4] ss:$8 sps:$4 sm:$0xff]  }
 0x4c3   : > { %v12720_v57 = vld [vmem:[%s19349_s2 + $0xb4] ss:$8 sps:$4 sm:$0xff]   ;;  %v12721_v23 = vld [vmem:[%s19349_s2 + $0xb0] ss:$8 sps:$4 sm:$0xff]  }
 0x4c4   : > { %6019 = vmatpush1.bf16.msra.mxu0 %v20786_v32  ;;  %v12724_v45 = vld [vmem:[%s19349_s2 + $0xd4] ss:$8 sps:$4 sm:$0xff]   ;;  %v12725_v62 = vld [vmem:[%s19349_s2 + $0xd0] ss:$8 sps:$4 sm:$0xff]   ;;  %v12727_v32 = vld [vmem:[%s19349_s2 + $0xe0] ss:$8 sps:$4 sm:$0xff]  }
 0x4c5   : > { %6020 = vmatprep.subr.bf16.mxu0 %v20787_v48  ;;  %v12728_v48 = vld [vmem:[%s19349_s2 + $0xf4] ss:$8 sps:$4 sm:$0xff]  }
 0x4c8   : > { %6021 = vmatpush1.bf16.msra.mxu0 %v20788_v43  ;;  %v12729_v43 = vld [vmem:[%s19349_s2 + $0xf0] ss:$8 sps:$4 sm:$0xff]  }
 0x4c9   : > { %6022 = vmatprep.subr.bf16.mxu0 %v20789_v47  ;;  %v12730_v47 = vld [vmem:[%s19349_s2 + $0x104] ss:$8 sps:$4 sm:$0xff]  }
 0x4cc   : > { %6023 = vmatpush1.bf16.msra.mxu0 %v20790_v52 }
 0x4cd   : > { %6024 = vmatprep.subr.bf16.mxu0 %v20791_v18 }
 0x4d0   : > { %6025 = vmatpush1.bf16.msra.mxu0 %v20792_v12 }
 0x4d1   : > { %6026 = vmatprep.subr.bf16.mxu0 %v20793_v53 }
 0x4d4   : > { %6027 = vmatpush1.bf16.msra.mxu0 %v20794_v5  ;;  %v6235_v5 = vmax.f32 %v16888_v13, 0.0 }
 0x4d5   : > { %6028 = vmatprep.subr.bf16.mxu0 %v20795_v6 }
 0x4d6   : > { %v6241_v6 = vadd.f32 1e-07, %v6235_v5 }
 0x4d8   : > { %6029 = vmatpush1.bf16.msra.mxu0 %v20796_v46  ;;  %12650 = vlog2.f32 %v6241_v6 }
 0x4d9   : > { %6039 = vmatprep.subr.bf16.mxu0 %v20797_v63 }
 0x4db   : > { %6031 = vmatmul.mubr.bf16.vlgmr.msra.gmra.mrb[44].mxu0 %v13441_v56  ;;  %v12698_v56 = vld [vmem:[%s19349_s2 + $0x4] ss:$8 sps:$4 sm:$0xff]  }
 0x4dc   : > { %6040 = vmatpush1.bf16.msra.mxu0 %v20798_v28  ;;  %6071 = vmatprep.mubr.bf16.mxu0 %v19890_v2 }
 0x4dd   : > { %6041 = vmatprep.subr.bf16.mxu0 %v20799_v30 }
 0x4e0   : > { %6042 = vmatpush1.bf16.msra.mxu0 %v20800_v60 }
 0x4e1   : > { %6043 = vmatprep.subr.bf16.mxu0 %v20801_v44 }
 0x4e4   : > { %6044 = vmatpush1.bf16.msra.mxu0 %v20802_v19 }
 0x4e5   : > { %6045 = vmatprep.subr.bf16.mxu0 %v20803_v40 }
 0x4e8   : > { %6046 = vmatpush1.bf16.msra.mxu0 %v16111_v36  ;;  %v12699_v36 = vld [vmem:[%s19349_s2] ss:$8 sps:$4 sm:$0xff]  }
 0x4e9   : > { %6047 = vmatprep.subr.bf16.mxu0 %v16117_v14  ;;  %v12700_v14 = vld [vmem:[%s19349_s2 + $0x14] ss:$8 sps:$4 sm:$0xff]  }
 0x4ec   : > { %6048 = vmatpush1.bf16.msra.mxu0 %v16135_v8  ;;  %v12702_v8 = vld [vmem:[%s19349_s2 + $0x24] ss:$8 sps:$4 sm:$0xff]  }
 0x4ed   : > { %11219 = vmatprep.subr.msk.bf16.mxu0 %vm19843_vm0, %v16141_v16  ;;  %v12701_v16 = vld [vmem:[%s19349_s2 + $0x10] ss:$8 sps:$4 sm:$0xff]  }
 0x4f0   : > { %6050 = vmatpush1.bf16.msra.mxu0 %v16151_v17  ;;  %v12703_v17 = vld [vmem:[%s19349_s2 + $0x20] ss:$8 sps:$4 sm:$0xff]  }
 0x4f1   : > { %6279 = vmatprep.subr.bf16.mxu0 %v12698_v56 }
 0x4f3   : > { %11220 = vmatmul.mubr.msk.bf16.vlgmr.msra.gmra.mrb[44].mxu0 %vm3553_vm1, %v16265_v34  ;;  %v12704_v34 = vld [vmem:[%s19349_s2 + $0x34] ss:$8 sps:$4 sm:$0xff]  }
 0x4f4   : > { %6280 = vmatpush1.bf16.msra.mxu0 %v12699_v36 }
 0x4f5   : > { %6281 = vmatprep.subr.bf16.mxu0 %v12700_v14 }
 0x4f8   : > { %6282 = vmatpush1.bf16.msra.mxu0 %v12701_v16 }
 0x4f9   : > { %6283 = vmatprep.subr.bf16.mxu0 %v12702_v8 }
 0x4fc   : > { %6284 = vmatpush1.bf16.msra.mxu0 %v12703_v17  ;;  %v12651_v17 = vpop.eup %12650 }
 0x4fd   : > { %6285 = vmatprep.subr.bf16.mxu0 %v12704_v34  ;;  %v6249_v34 = vmul.f32 0.6931472, %v12651_v17  ;;  %v12743_v17 = vld [vmem:[%s19349_s2 + $0x160] ss:$8 sps:$4 sm:$0xff]  }
 0x500   : > { %6286 = vmatpush1.bf16.msra.mxu0 %v12705_v35  ;;  %v6259_v35 = vmul.f32 0.3, %v6249_v34  ;;  %v12744_v34 = vld [vmem:[%s19349_s2 + $0x174] ss:$8 sps:$4 sm:$0xff]  }
 0x501   : > { %6287 = vmatprep.subr.bf16.mxu0 %v12706_v54 }
 0x504   : > { %v5991_v1 = vpop.f32.mrb[44].mxu1  ;;  %6288 = vmatpush1.bf16.msra.mxu0 %v12707_v38  ;;  %v6266_v38 = vmul.f32 1.442695, %v6259_v35  ;;  %v12745_v35 = vld [vmem:[%s19349_s2 + $0x170] ss:$8 sps:$4 sm:$0xff]  }
 0x505   : > { %v17034_v61 = vpop.f32.mrb[45].mxu1  ;;  %6289 = vmatprep.subr.bf16.mxu0 %v12708_v51  ;;  %v6201_v3 = vrot.slane %v5991_v1, 4 }
 0x506   : > { %v5995_v42 = vpop.f32.mrb[46].mxu1  ;;  %v6202_v60 = vrot.slane %v17034_v61, 4 }
 0x507   : > { %v5996_v24 = vpop.f32.mrb[47].mxu1 }
 0x508   : > { %6290 = vmatpush1.bf16.msra.mxu0 %v12709_v9  ;;  %v6236_v9 = vmax.f32 %v16970_v10, 0.0 }
 0x509   : > { %6291 = vmatprep.subr.bf16.mxu0 %v12710_v39  ;;  %v6234_v39 = vmax.f32 %v16974_v22, 0.0 }
 0x50c   : > { %6292 = vmatpush1.bf16.msra.mxu0 %v12711_v33  ;;  %v6242_v33 = vadd.f32 1e-07, %v6236_v9 }
 0x50d   : > { %6293 = vmatprep.subr.bf16.mxu0 %v12712_v26  ;;  %v6240_v26 = vadd.f32 1e-07, %v6234_v39 }
 0x510   : > { %6294 = vmatpush1.bf16.msra.mxu0 %v12713_v7 }
 0x511   : > { %6295 = vmatprep.subr.bf16.mxu0 %v12714_v41 }
 0x514   : > { %6296 = vmatpush1.bf16.msra.mxu0 %v12715_v49 }
 0x515   : > { %6297 = vmatprep.subr.bf16.mxu0 %v12716_v37 }
 0x516   : > { %v5745_v20 = vpop.f32.mrb[36].mxu0 }
 0x517   : > { %v6225_v27 = vsel %vm4668_vm2, %v5745_v20, %v6192_v0  ;;  %v5747_v29 = vpop.f32.mrb[37].mxu0 }
 0x518   : > { %v17066_v50 = vsel %vm4672_vm3, %v6225_v27, %v6201_v3  ;;  %v5749_v59 = vpop.f32.mrb[38].mxu0  ;;  %6298 = vmatpush1.bf16.msra.mxu0 %v12717_v31 }
 0x519   : > { %v5750_v4 = vpop.f32.mrb[39].mxu0  ;;  %6299 = vmatprep.subr.bf16.mxu0 %v12718_v58 }
 0x51c   : > { %6300 = vmatpush1.bf16.msra.mxu0 %v12719_v11 }
 0x51d   : > { %6301 = vmatprep.subr.bf16.mxu0 %v12720_v57 }
 0x520   : > { %6302 = vmatpush1.bf16.msra.mxu0 %v12721_v23 }
 0x521   : > { %6303 = vmatprep.subr.bf16.mxu0 %v12722_v25 }
 0x524   : > { %6304 = vmatpush1.bf16.msra.mxu0 %v12723_v55 }
 0x525   : > { %6305 = vmatprep.subr.bf16.mxu0 %v12724_v45 }
 0x528   : > { %6306 = vmatpush1.bf16.msra.mxu0 %v12725_v62 }
 0x529   : > { %6307 = vmatprep.subr.bf16.mxu0 %v12726_v15 }
 0x52c   : > { %6308 = vmatpush1.bf16.msra.mxu0 %v12727_v32 }
 0x52d   : > { %6309 = vmatprep.subr.bf16.mxu0 %v12728_v48 }
 0x530   : > { %6310 = vmatpush1.bf16.msra.mxu0 %v12729_v43 }
 0x531   : > { %6322 = vmatprep.subr.bf16.mxu0 %v12730_v47 }
 0x55c   : > { %v6155_v52 = vpop.f32.mrb[48].mxu1 }
 0x55d   : > { %v6157_v18 = vpop.f32.mrb[49].mxu1  ;;  %v6211_v30 = vrot.slane %v6155_v52, 2 }
 0x55e   : > { %v6159_v12 = vpop.f32.mrb[50].mxu1  ;;  %v6212_v49 = vrot.slane %v6157_v18, 2 }
 0x55f   : > { %v6160_v53 = vpop.f32.mrb[51].mxu1 }
 0x56e   : > { %v5909_v46 = vpop.f32.mrb[40].mxu0 }
 0x56f   : > { %v6193_v63 = vrot.slane %v5909_v46, 6  ;;  %v5911_v28 = vpop.f32.mrb[41].mxu0 }
 0x570   : > { %v6194_v44 = vrot.slane %v5911_v28, 6  ;;  %v5913_v19 = vpop.f32.mrb[42].mxu0  ;;  %v12731_v28 = vld [vmem:[%s19349_s2 + $0x100] ss:$8 sps:$4 sm:$0xff]  }
 0x571   : > { %v6226_v40 = vsel %vm4668_vm2, %v5747_v29, %v6193_v63  ;;  %v5914_v56 = vpop.f32.mrb[43].mxu0  ;;  %v12735_v19 = vld [vmem:[%s19349_s2 + $0x120] ss:$8 sps:$4 sm:$0xff]  }
 0x572   : > { %v6227_v36 = vsel %vm4668_vm2, %v16951_v21, %v6194_v44  ;;  %v6229_v14 = vsel %vm4672_vm3, %v6226_v40, %v6202_v60  ;;  %v12733_v60 = vld [vmem:[%s19349_s2 + $0x110] ss:$8 sps:$4 sm:$0xff]   ;;  %v12734_v44 = vld [vmem:[%s19349_s2 + $0x124] ss:$8 sps:$4 sm:$0xff]   ;;  %v12736_v40 = vld [vmem:[%s19349_s2 + $0x134] ss:$8 sps:$4 sm:$0xff]  }
 0x573   : > { %v6232_v13 = vsel %vm4676_vm4, %v6229_v14, %v6211_v30  ;;  %v12732_v30 = vld [vmem:[%s19349_s2 + $0x114] ss:$8 sps:$4 sm:$0xff]   ;;  %v12737_v56 = vld [vmem:[%s19349_s2 + $0x130] ss:$8 sps:$4 sm:$0xff]   ;;  %v12739_v14 = vld [vmem:[%s19349_s2 + $0x140] ss:$8 sps:$4 sm:$0xff]  }
 0x574   : > { %v6238_v16 = vmax.f32 %v6232_v13, 0.0  ;;  %v12740_v13 = vld [vmem:[%s19349_s2 + $0x154] ss:$8 sps:$4 sm:$0xff]  }
 0x576   : > { %v6244_v8 = vadd.f32 1e-07, %v6238_v16  ;;  %v12741_v16 = vld [vmem:[%s19349_s2 + $0x150] ss:$8 sps:$4 sm:$0xff]  }
 0x578   : > { %12652 = vlog2.f32 %v6244_v8  ;;  %v12742_v8 = vld [vmem:[%s19349_s2 + $0x164] ss:$8 sps:$4 sm:$0xff]  }
 0x579   : > { %12654 = vpow2.f32 %v6266_v38 }
 0x582   : > { %v12653_v54 = vpop.eup %12652 }
 0x583   : > { %v6255_v1 = vmul.f32 0.6931472, %v12653_v54  ;;  %v12655_v42 = vpop.eup %12654 }
 0x585   : > { %v6262_v61 = vmul.f32 0.3, %v6255_v1 }
 0x587   : > { %v6272_v51 = vmul.f32 1.442695, %v6262_v61 }
 0x589   : > { %12656 = vpow2.f32 %v6272_v51 }
 0x58a   : > { %12658 = vlog2.f32 %v6242_v33 }
 0x58b   : > { %12660 = vlog2.f32 %v6240_v26 }
 0x593   : > { %v12657_v24 = vpop.eup %12656 }
 0x594   : > { %v6277_v21 = vpack.c.bf16 %v12657_v24, %v12655_v42  ;;  %v12659_v58 = vpop.eup %12658 }
 0x595   : > { %v12661_v11 = vpop.eup %12660  ;;  %v6251_v57 = vmul.f32 0.6931472, %v12659_v58 }
 0x596   : > { %6311 = vmatprep.mubr.bf16.mxu0 %v6277_v21  ;;  %v6247_v23 = vmul.f32 0.6931472, %v12661_v11 }
 0x597   : > { %v6260_v25 = vmul.f32 0.3, %v6251_v57 }
 0x598   : > { %v6258_v55 = vmul.f32 0.3, %v6247_v23 }
 0x599   : > { %v6268_v15 = vmul.f32 1.442695, %v6260_v25 }
 0x59a   : > { %v6264_v48 = vmul.f32 1.442695, %v6258_v55 }
 0x5c6   : > { %v6073_v7 = vpop.f32.mrb[44].mxu0 }
 0x5c7   : > { %v6203_v41 = vrot.slane %v6073_v7, 4  ;;  %v6075_v3 = vpop.f32.mrb[45].mxu0 }
 0x5c8   : > { %v6210_v0 = vrot.slane %v6075_v3, 2  ;;  %v6077_v37 = vpop.f32.mrb[46].mxu0 }
 0x5c9   : > { %v6230_v20 = vsel %vm4672_vm3, %v6227_v36, %v6203_v41  ;;  %v6078_v27 = vpop.f32.mrb[47].mxu0  ;;  %v12738_v36 = vld [vmem:[%s19349_s2 + $0x144] ss:$8 sps:$4 sm:$0xff]  }
 0x5ca   : > { %v6233_v29 = vsel %vm4676_vm4, %v6230_v20, %v6212_v49  ;;  %v6231_v10 = vsel %vm4676_vm4, %v17066_v50, %v6210_v0 }
 0x5cb   : > { %v6239_v59 = vmax.f32 %v6233_v29, 0.0  ;;  %v6237_v22 = vmax.f32 %v6231_v10, 0.0 }
 0x5cd   : > { %v6245_v31 = vadd.f32 1e-07, %v6239_v59  ;;  %v6243_v4 = vadd.f32 1e-07, %v6237_v22 }
 0x5cf   : > { %12662 = vlog2.f32 %v6245_v31 }
 0x5d0   : > { %12664 = vlog2.f32 %v6243_v4 }
 0x5d1   : > { %12666 = vpow2.f32 %v6268_v15 }
 0x5d2   : > { %12668 = vpow2.f32 %v6264_v48 }
 0x5d9   : > { %v12663_v45 = vpop.eup %12662 }
 0x5da   : > { %v12665_v62 = vpop.eup %12664  ;;  %v6257_v32 = vmul.f32 0.6931472, %v12663_v45 }
 0x5db   : > { %v6253_v43 = vmul.f32 0.6931472, %v12665_v62  ;;  %v12667_v12 = vpop.eup %12666 }
 0x5dc   : > { %v6263_v47 = vmul.f32 0.3, %v6257_v32  ;;  %v12669_v53 = vpop.eup %12668 }
 0x5dd   : > { %v6261_v50 = vmul.f32 0.3, %v6253_v43 }
 0x5de   : > { %v6274_v52 = vmul.f32 1.442695, %v6263_v47 }
 0x5df   : > { %v6270_v18 = vmul.f32 1.442695, %v6261_v50 }
 0x5e0   : > { %12670 = vpow2.f32 %v6274_v52 }
 0x5e1   : > { %12672 = vpow2.f32 %v6270_v18 }
 0x5ea   : > { %v12671_v5 = vpop.eup %12670 }
 0x5eb   : > { %v12673_v6 = vpop.eup %12672  ;;  %v6278_v46 = vpack.c.bf16 %v12671_v5, %v12667_v12 }
 0x5ec   : > { %v6276_v63 = vpack.c.bf16 %v12673_v6, %v12669_v53 }
 0x5ee   : > { %6312 = vmatmul.mubr.bf16.vlgmr.msra.gmra.mrb[48].mxu0 %v6276_v63 }
 0x5ef   : > { %6323 = vmatpush1.bf16.msra.mxu0 %v12731_v28  ;;  %6354 = vmatprep.mubr.bf16.mxu0 %v19890_v2 }
 0x5f0   : > { %6324 = vmatprep.subr.bf16.mxu0 %v12732_v30 }
 0x5f3   : > { %6325 = vmatpush1.bf16.msra.mxu0 %v12733_v60 }
 0x5f4   : > { %6326 = vmatprep.subr.bf16.mxu0 %v12734_v44 }
 0x5f7   : > { %6327 = vmatpush1.bf16.msra.mxu0 %v12735_v19 }
 0x5f8   : > { %6328 = vmatprep.subr.bf16.mxu0 %v12736_v40 }
 0x5fb   : > { %6329 = vmatpush1.bf16.msra.mxu0 %v12737_v56 }
 0x5fc   : > { %6330 = vmatprep.subr.bf16.mxu0 %v12738_v36 }
 0x5ff   : > { %6331 = vmatpush1.bf16.msra.mxu0 %v12739_v14 }
 0x600   : > { %6332 = vmatprep.subr.bf16.mxu0 %v12740_v13 }
 0x603   : > { %6333 = vmatpush1.bf16.msra.mxu0 %v12741_v16  ;;  %v6462_v16 = vld [vmem:[%s19351_s4 + $0x8] sm:$0xff] }
 0x604   : > { %6334 = vmatprep.subr.bf16.mxu0 %v12742_v8  ;;  %v6461_v8 = vld [vmem:[%s19351_s4] sm:$0xff] }
 0x607   : > { %6335 = vmatpush1.bf16.msra.mxu0 %v12743_v17  ;;  %v6463_v17 = vld [vmem:[%s19351_s4 + $0x10] sm:$0xff] }
 0x608   : > { %6336 = vmatprep.subr.bf16.mxu0 %v12744_v34  ;;  %v6464_v34 = vld [vmem:[%s19351_s4 + $0x18] sm:$0xff] }
 0x60b   : > { %6337 = vmatpush1.bf16.msra.mxu0 %v12745_v35  ;;  %v6465_v35 = vld [vmem:[%s19351_s4 + $0x20] sm:$0xff] }
 0x60e   : > { %6355 = vmatmul.mubr.bf16.vlgmr.msra.gmra.mrb[48].mxu0 %v6278_v46 }
 0x60f   : > { %6617 = vmatprep.mubr.bf16.mxu0 %v19890_v2 }
 0x6e1   : > { %v6356_v54 = vpop.f32.mrb[48].mxu0 }
 0x6e2   : > { %v6365_v1 = vand.u32 2147483647, %v6356_v54  ;;  %v6358_v38 = vpop.f32.mrb[49].mxu0  ;;  %v6466_v54 = vld [vmem:[%s19351_s4 + $0x28] sm:$0xff] }
 0x6e3   : > { %v6366_v61 = vand.u32 2147483647, %v6358_v38  ;;  %v6360_v51 = vpop.f32.mrb[50].mxu0  ;;  %v20804_v38 = vlaneseq }
 0x6e4   : > { %v6369_v42 = vadd.f32 1e-07, %v6365_v1  ;;  %v6367_v24 = vand.u32 2147483647, %v6360_v51  ;;  %v6362_v21 = vpop.f32.mrb[51].mxu0  ;;  %v6424_v1 = vpop.permute.xlu1 %6423 }
 0x6e5   : > { %v6370_v9 = vadd.f32 1e-07, %v6366_v61  ;;  %v6368_v39 = vand.u32 2147483647, %v6362_v21  ;;  %v17193_v61 = vand.u32 127, %v20804_v38  ;;  %v6426_v21 = vpop.permute.xlu0 %6425 }
 0x6e6   : > { %12674 = vlog2.f32 %v6369_v42  ;;  %v6371_v33 = vadd.f32 1e-07, %v6367_v24  ;;  %v20805_v42 = vld [vmem:[#allocation11_spill] sm:$0xff] }
 0x6e7   : > { %12676 = vlog2.f32 %v6370_v9  ;;  %v6372_v26 = vadd.f32 1e-07, %v6368_v39  ;;  %v6686_v24 = vadd.s32 8, %v20805_v42  ;;  %v17197_v9 = vadd.s32 128, %v17193_v61 }
 0x6e8   : > { %12678 = vlog2.f32 %v6371_v33  ;;  %v6442_v51 = vpop.permute.xlu1 %6441  ;;  %v17200_v39 = vshra.s32 %v20805_v42, 1  ;;  %v6697_v38 = vadd.s32 96, %v20805_v42 }
 0x6e9   : > { %12680 = vlog2.f32 %v6372_v26  ;;  %v17202_v33 = vshra.s32 %v6686_v24, 1  ;;  %v6687_v26 = vadd.s32 16, %v20805_v42  ;;  %v6722_v24 = vadd.s32 296, %v20805_v42 }
 0x6ea   : > { %vm6818_vm7 = vcmp.eq.s32.totalorder %v17200_v39, %v17197_v9  ;;  %vm6817_vm10 = vcmp.eq.s32.totalorder %v17200_v39, %v17193_v61 }
 0x6eb   : > { %vm6821_vm8 = vcmp.eq.s32.totalorder %v17202_v33, %v17197_v9  ;;  %vm6820_vm11 = vcmp.eq.s32.totalorder %v17202_v33, %v17193_v61 }
 0x6ec   : > { %vm17226_vm9 = vmpackc.low %vm6821_vm8, %vm6818_vm7 }
 0x6ed   : > { %vm17272_vm2 = vmpackc.low %vm6820_vm11, %vm6817_vm10 }
 0x6f0   : > { %v12675_v7 = vpop.eup %12674 }
 0x6f1   : > { %v12677_v41 = vpop.eup %12676  ;;  %v6374_v3 = vmul.f32 0.6931472, %v12675_v7  ;;  %v6688_v7 = vadd.s32 24, %v20805_v42 }
 0x6f2   : > { %v12679_v49 = vpop.eup %12678  ;;  %v6376_v0 = vmul.f32 0.6931472, %v12677_v41  ;;  %v6440_v41 = vpop.permute.xlu1 %6439 }
 0x6f3   : > { %v12681_v37 = vpop.eup %12680  ;;  %v6381_v20 = vmul.f32 8.685889, %v6374_v3  ;;  %v6378_v27 = vmul.f32 0.6931472, %v12679_v49  ;;  %v6689_v49 = vadd.s32 32, %v20805_v42 }
 0x6f4   : > { %v6382_v29 = vmul.f32 8.685889, %v6376_v0  ;;  %v6380_v10 = vmul.f32 0.6931472, %v12681_v37  ;;  %v6701_v37 = vadd.s32 128, %v20805_v42 }
 0x6f5   : > { %v6385_v59 = vsub.f32 10.0, %v6381_v20  ;;  %v6383_v22 = vmul.f32 8.685889, %v6378_v27  ;;  %v6702_v20 = vadd.s32 136, %v20805_v42  ;;  %v6432_v27 = vsel %vm19842_vm5, %v6424_v1, %v6426_v21 }
 0x6f6   : > { %v6386_v31 = vsub.f32 10.0, %v6382_v29  ;;  %v6384_v4 = vmul.f32 8.685889, %v6380_v10  ;;  %v6448_v29 = vsel %vm19844_vm6, %v6440_v41, %v6442_v51  ;;  %v17216_v10 = vshra.s32 %v6687_v26, 1 }
 0x6f7   : > { %v6389_v58 = vmul.f32 0.1, %v6385_v59  ;;  %v6387_v11 = vsub.f32 10.0, %v6383_v22  ;;  %v17218_v59 = vshra.s32 %v6688_v7, 1  ;;  %v6690_v22 = vadd.s32 40, %v20805_v42 }
 0x6f8   : > { %v6390_v57 = vmul.f32 0.1, %v6386_v31  ;;  %v6388_v23 = vsub.f32 10.0, %v6384_v4  ;;  %v17221_v4 = vshra.s32 %v6689_v49, 1  ;;  %vm6824_vm13 = vcmp.eq.s32.totalorder %v17216_v10, %v17197_v9 }
 0x6f9   : > { %v6393_v25 = vmul.f32 1.442695, %v6389_v58  ;;  %v6391_v55 = vmul.f32 0.1, %v6387_v11  ;;  %v6691_v58 = vadd.s32 48, %v20805_v42  ;;  %v6692_v11 = vadd.s32 56, %v20805_v42 }
 0x6fa   : > { %v6395_v45 = vmul.f32 1.442695, %v6390_v57  ;;  %v6392_v62 = vmul.f32 0.1, %v6388_v23  ;;  %vm6827_vm14 = vcmp.eq.s32.totalorder %v17218_v59, %v17197_v9  ;;  %vm6823_vm15 = vcmp.eq.s32.totalorder %v17216_v10, %v17193_v61 }
 0x6fb   : > { %12682 = vpow2.f32 %v6393_v25  ;;  %v6397_v15 = vmul.f32 1.442695, %v6391_v55  ;;  %v17230_v25 = vshra.s32 %v6701_v37, 1  ;;  %v17232_v55 = vshra.s32 %v6702_v20, 1  ;;  %vm17290_vm8 = vmpackc.low %vm6827_vm14, %vm6824_vm13 }
 0x6fc   : > { %12684 = vpow2.f32 %v6395_v45  ;;  %v6399_v32 = vmul.f32 1.442695, %v6392_v62  ;;  %v17235_v45 = vadd.s32 256, %v17193_v61  ;;  %v17240_v62 = vld [vmem:[%s19350_s3] sm:$0xff]   ;;  %vm6826_vm1 = vcmp.eq.s32.totalorder %v17218_v59, %v17193_v61 }
 0x6fd   : > { %12686 = vpow2.f32 %v6397_v15  ;;  %v6703_v15 = vadd.s32 144, %v20805_v42  ;;  %vm6830_vm3 = vcmp.eq.s32.totalorder %v17221_v4, %v17197_v9  ;;  %vm6829_vm10 = vcmp.eq.s32.totalorder %v17221_v4, %v17193_v61  ;;  %vm17338_vm0 = vmpackc.low %vm6826_vm1, %vm6823_vm15 }
 0x6fe   : > { %12688 = vpow2.f32 %v6399_v32  ;;  %v6704_v32 = vadd.s32 152, %v20805_v42  ;;  %vm6867_vm4 = vcmp.eq.s32.totalorder %v17230_v25, %v17235_v45  ;;  %vm6870_vm7 = vcmp.eq.s32.totalorder %v17232_v55, %v17235_v45 }
 0x6ff   : > { %v6696_v1 = vadd.s32 88, %v20805_v42  ;;  %v6709_v7 = vadd.s32 192, %v20805_v42  ;;  %v6710_v41 = vadd.s32 200, %v20805_v42  ;;  %v6699_v37 = vadd.s32 112, %v20805_v42 }
 0x700   : > { %v6700_v20 = vadd.s32 120, %v20805_v42  ;;  %v17547_v23 = vshra.s32 %v6697_v38, 1  ;;  %v6738_v26 = vadd.s32 424, %v20805_v42 }
 0x705   : > { %v12683_v48 = vpop.eup %12682 }
 0x706   : > { %v12685_v43 = vpop.eup %12684  ;;  %v6401_v47 = vadd.f32 1.0, %v12683_v48  ;;  %v17252_v48 = vshra.s32 %v6690_v22, 1  ;;  %v17527_v22 = vshra.s32 %v6709_v7, 1 }
 0x707   : > { %v12687_v50 = vpop.eup %12686  ;;  %v6402_v52 = vadd.f32 1.0, %v12685_v43 }
 0x708   : > { %v12689_v18 = vpop.eup %12688  ;;  %v6403_v12 = vadd.f32 1.0, %v12687_v50  ;;  %12690 = vrcp.f32 %v6401_v47  ;;  %v12758_v47 = vmov 0.25|0.25   ;;  %v17261_v50 = vshra.s32 %v6691_v58, 1 }
 0x709   : > { %v6404_v53 = vadd.f32 1.0, %v12689_v18  ;;  %12692 = vrcp.f32 %v6402_v52  ;;  %v17263_v52 = vshra.s32 %v6692_v11, 1  ;;  %vm6832_vm11 = vcmp.eq.s32.totalorder %v17252_v48, %v17193_v61 }
 0x70a   : > { %12694 = vrcp.f32 %v6403_v12  ;;  %vm6836_vm13 = vcmp.eq.s32.totalorder %v17261_v50, %v17197_v9  ;;  %v6711_v58 = vadd.s32 208, %v20805_v42  ;;  %v6712_v11 = vadd.s32 216, %v20805_v42 }
 0x70b   : > { %12696 = vrcp.f32 %v6404_v53  ;;  %vm6839_vm14 = vcmp.eq.s32.totalorder %v17263_v52, %v17197_v9  ;;  %v17629_v12 = vshra.s32 %v6700_v20, 1 }
 0x712   : > { %v12691_v5 = vpop.eup %12690 }
 0x713   : > { %v12693_v6 = vpop.eup %12692  ;;  %v6409_v46 = vmul.f32 180.0, %v12691_v5  ;;  %v6715_v5 = vadd.s32 240, %v20805_v42 }
 0x714   : > { %v12695_v63 = vpop.eup %12694  ;;  %v6410_v28 = vmul.f32 180.0, %v12693_v6  ;;  %v17294_v6 = vshra.s32 %v6703_v15, 1 }
 0x715   : > { %v12697_v30 = vpop.eup %12696  ;;  %v6411_v60 = vmul.f32 180.0, %v12695_v63  ;;  %v6413_v19 = vadd.f32 70.0, %v6409_v46  ;;  %v17296_v46 = vshra.s32 %v6704_v32, 1  ;;  %v6705_v63 = vadd.s32 160, %v20805_v42 }
 0x716   : > { %v6412_v44 = vmul.f32 180.0, %v12697_v30  ;;  %v6414_v56 = vadd.f32 70.0, %v6410_v28  ;;  %v6706_v28 = vadd.s32 168, %v20805_v42  ;;  %v6693_v30 = vadd.s32 64, %v20805_v42 }
 0x717   : > { %v6415_v40 = vadd.f32 70.0, %v6411_v60  ;;  %v6694_v60 = vadd.s32 72, %v20805_v42  ;;  %vm6873_vm1 = vcmp.eq.s32.totalorder %v17294_v6, %v17235_v45 }
 0x718   : > { %v6416_v36 = vadd.f32 70.0, %v6412_v44  ;;  %v6734_v44 = vadd.s32 392, %v20805_v42 }
 0x719   : > { %v6417_v14 = vpack.c.bf16 %v6415_v40, %v6413_v19 }
 0x71a   : > { %v6418_v13 = vpack.c.bf16 %v6416_v36, %v6414_v56  ;;  %v6707_v56 = vadd.s32 176, %v20805_v42  ;;  %v6708_v36 = vadd.s32 184, %v20805_v42 }
 0x71b   : > { %6427 = vrot.lane.b32.xlu0 %v6417_v14, %s12756_s14 }
 0x71c   : > { %6585 = vmatprep.subr.bf16.mxu0 %v6418_v13  ;;  %6445 = vrot.lane.b32.xlu1 %v6418_v13, %s12757_s15 }
 0x71d   : > { %6586 = vmatpush1.bf16.msra.mxu0 %v6417_v14 }
 0x71f   : > { %6443 = vrot.lane.b32.xlu0 %v6417_v14, %s12757_s15  ;;  %v17349_v14 = vld [vmem:[%s19350_s3 + $0x8] sm:$0xff]  }
 0x720   : > { %6474 = vperm.xlu1 %12262, %v6462_v16   ;;  %v17365_v16 = vshra.s32 %v6705_v63, 1 }
 0x723   : > { %6429 = vrot.lane.b32.xlu0 %v6418_v13, %s12756_s14  ;;  %v6730_v13 = vadd.s32 360, %v20805_v42 }
 0x724   : > { %6479 = vperm.xlu1 %12262, %v6463_v17  }
 0x727   : > { %6469 = vperm.xlu0 %12261, %v6461_v8   ;;  %v17367_v8 = vshra.s32 %v6706_v28, 1  ;;  %v6717_v28 = vadd.s32 256, %v20805_v42 }
 0x728   : > { %6489 = vperm.xlu1 %12262, %v6465_v35   ;;  %v17381_v35 = vshra.s32 %v6694_v60, 1  ;;  %v6733_v60 = vadd.s32 384, %v20805_v42 }
 0x729   : > { %v6785_v40 = vshra.s32 %v6717_v28, 1  ;;  %v6728_v28 = vadd.s32 344, %v20805_v42 }
 0x72b   : > { %6484 = vperm.xlu0 %12261, %v6464_v34   ;;  %v17379_v34 = vshra.s32 %v6693_v30, 1  ;;  %v6718_v30 = vadd.s32 264, %v20805_v42 }
 0x72f   : > { %6494 = vperm.xlu0 %12261, %v6466_v54   ;;  %v6695_v54 = vadd.s32 80, %v20805_v42 }
 0x731   : > { %v17464_v49 = vshra.s32 %v6695_v54, 1  ;;  %v6735_v54 = vadd.s32 400, %v20805_v42 }
 0x78d   : > { %v6428_v3 = vpop.permute.xlu0 %6427 }
 0x78e   : > { %v6433_v0 = vsel %vm19842_vm5, %v6426_v21, %v6428_v3  ;;  %v6446_v53 = vpop.permute.xlu1 %6445 }
 0x78f   : > { %6524 = vmatprep.subr.bf16.mxu1 %v6433_v0  ;;  %v17466_v0 = vshra.s32 %v6696_v1, 1  ;;  %v6736_v1 = vadd.s32 408, %v20805_v42 }
 0x790   : > { %6525 = vmatpush1.bf16.msra.mxu1 %v6432_v27  ;;  %v17862_v27 = vshra.s32 %v6738_v26, 1  ;;  %v6745_v26 = vadd.s32 480, %v20805_v42 }
 0x791   : > { %v6444_v31 = vpop.permute.xlu0 %6443  ;;  %v17844_v7 = vshra.s32 %v6736_v1, 1 }
 0x792   : > { %v6449_v57 = vsel %vm19844_vm6, %v6442_v51, %v6444_v31  ;;  %v6450_v19 = vsel %vm19844_vm6, %v6444_v31, %v6446_v53  ;;  %v6698_v51 = vadd.s32 104, %v20805_v42  ;;  %v17529_v31 = vshra.s32 %v6710_v41, 1 }
 0x793   : > { %6526 = vmatprep.subr.bf16.mxu1 %v6449_v57  ;;  %v6726_v57 = vadd.s32 328, %v20805_v42 }
 0x794   : > { %6527 = vmatpush1.bf16.msra.mxu1 %v6448_v29 }
 0x795   : > { %v6430_v43 = vpop.permute.xlu0 %6429  ;;  %11233 = vmatprep.subr.msk.bf16.mxu1 %vm17226_vm9, %v12758_v47  ;;  %vm6833_vm9 = vcmp.eq.s32.totalorder %v17252_v48, %v17197_v9 }
 0x796   : > { %v6434_v18 = vsel %vm19842_vm5, %v6428_v3, %v6430_v43  ;;  %6587 = vmatprep.subr.bf16.mxu0 %v6430_v43  ;;  %vm17322_vm5 = vmpackc.low %vm6870_vm7, %vm6867_vm4  ;;  %vm6822_vm4 = vcmp.eq.s32.totalorder %v17202_v33, %v17235_v45  ;;  %vm6876_vm7 = vcmp.eq.s32.totalorder %v17296_v46, %v17235_v45  ;;  %v17428_v33 = vshra.s32 %v6708_v36, 1 }
 0x797   : > { %11226 = vmatmul.mubr.msk.bf16.vlgmr.msra.gmra.mrb[52].mxu1 %vm6512_vm12, %v17240_v62  ;;  %6588 = vmatpush1.bf16.msra.mxu0 %v6434_v18  ;;  %vm17357_vm15 = vmpackc.low %vm6833_vm9, %vm6830_vm3  ;;  %vm6838_vm9 = vcmp.eq.s32.totalorder %v17263_v52, %v17193_v61  ;;  %v17611_v43 = vshra.s32 %v6712_v11, 1  ;;  %v17627_v18 = vshra.s32 %v6699_v37, 1  ;;  %v6801_v36 = vshra.s32 %v6733_v60, 1 }
 0x798   : > { %6589 = vmatprep.subr.bf16.mxu0 %v6446_v53  ;;  %6564 = vmatprep.mubr.bf16.mxu1 %v19890_v2  ;;  %vm17375_vm3 = vmpackc.low %vm6832_vm11, %vm6829_vm10  ;;  %vm6825_vm10 = vcmp.eq.s32.totalorder %v17216_v10, %v17235_v45  ;;  %vm6828_vm11 = vcmp.eq.s32.totalorder %v17218_v59, %v17235_v45  ;;  %v12338_v10 = vld [vmem:[%s19350_s3 + $0x10] sm:$0xff]   ;;  %v17850_v3 = vshra.s32 %v6722_v24, 1  ;;  %v6739_v59 = vadd.s32 432, %v20805_v42 }
 0x799   : > { %11235 = vmatpush1.bf16.msk.msra.mxu1 %vm17272_vm2, %v12758_v47  ;;  %vm6819_vm2 = vcmp.eq.s32.totalorder %v17200_v39, %v17235_v45  ;;  %v17426_v39 = vshra.s32 %v6707_v56, 1  ;;  %v6786_v56 = vshra.s32 %v6718_v30, 1  ;;  %v6743_v30 = vadd.s32 464, %v20805_v42 }
 0x79a   : > { %11237 = vmatprep.subr.msk.bf16.mxu1 %vm17290_vm8, %v12758_v47  ;;  %vm6835_vm8 = vcmp.eq.s32.totalorder %v17261_v50, %v17193_v61 }
 0x79b   : > { %6590 = vmatpush1.bf16.msra.mxu0 %v6450_v19 }
 0x79c   : > { %11691 = vmatprep.subr.msk.bf16.mxu0 %vm17322_vm5, %v12758_v47  ;;  %vm17403_vm5 = vmpackc.low %vm6822_vm4, %vm6819_vm2  ;;  %vm6879_vm4 = vcmp.eq.s32.totalorder %v17365_v16, %v17235_v45 }
 0x79d   : > { %11239 = vmatpush1.bf16.msk.msra.mxu1 %vm17338_vm0, %v12758_v47  ;;  %vm17418_vm0 = vmpackc.low %vm6876_vm7, %vm6873_vm1  ;;  %vm6845_vm1 = vcmp.eq.s32.totalorder %v17381_v35, %v17197_v9  ;;  %vm6841_vm7 = vcmp.eq.s32.totalorder %v17379_v34, %v17193_v61 }
 0x79e   : > { %11229 = vmatmul.mubr.msk.bf16.vlgmr.msra.gmra.mrb[52].mxu0 %vm6512_vm12, %v17240_v62  ;;  %11241 = vmatprep.subr.msk.bf16.mxu1 %vm17357_vm15, %v12758_v47  ;;  %vm17439_vm2 = vmpackc.low %vm6839_vm14, %vm6836_vm13  ;;  %vm6882_vm15 = vcmp.eq.s32.totalorder %v17367_v8, %v17235_v45  ;;  %vm6842_vm14 = vcmp.eq.s32.totalorder %v17379_v34, %v17197_v9  ;;  %v17549_v62 = vshra.s32 %v6698_v51, 1  ;;  %v6721_v51 = vadd.s32 288, %v20805_v42 }
 0x79f   : > { %11227 = vmatmul.mubr.msk.bf16.gmra.mrb[56].mxu1 %vm6512_vm12, %v17349_v14  ;;  %6627 = vmatprep.mubr.bf16.mxu0 %v19890_v2  ;;  %vm17456_vm13 = vmpackc.low %vm6838_vm9, %vm6835_vm8  ;;  %vm6844_vm8 = vcmp.eq.s32.totalorder %v17381_v35, %v17193_v61  ;;  %v17854_v37 = vpop.permute.xlu1 %6474 }
 0x7a0   : > { %6574 = vmatprep.mubr.bf16.mxu1 %v19890_v2  ;;  %11692 = vmatpush3.bf16.msk.msra.mxu0 %vm17403_vm5, %v12758_v47  ;;  %vm17502_vm9 = vmpackc.low %vm6882_vm15, %vm6879_vm4  ;;  %vm6831_vm5 = vcmp.eq.s32.totalorder %v17221_v4, %v17235_v45  ;;  %vm6848_vm15 = vcmp.eq.s32.totalorder %v17464_v49, %v17197_v9  ;;  %v17848_v41 = vshra.s32 %v6721_v51, 1 }
 0x7a1   : > { %11243 = vmatpush1.bf16.msk.msra.mxu1 %vm17375_vm3, %v12758_v47  ;;  %11693 = vmatprep.subr.msk.bf16.mxu0 %vm17418_vm0, %v12758_v47  ;;  %vm17489_vm3 = vmpackc.low %vm6828_vm11, %vm6825_vm10  ;;  %vm6834_vm0 = vcmp.eq.s32.totalorder %v17252_v48, %v17235_v45  ;;  %vm6885_vm10 = vcmp.eq.s32.totalorder %v17426_v39, %v17235_v45  ;;  %vm6888_vm11 = vcmp.eq.s32.totalorder %v17428_v33, %v17235_v45  ;;  %v17609_v48 = vshra.s32 %v6711_v58, 1 }
 0x7a2   : > { %11245 = vmatprep.subr.msk.bf16.mxu1 %vm17439_vm2, %v12758_v47  ;;  %vm17523_vm2 = vmpackc.low %vm6845_vm1, %vm6842_vm14  ;;  %vm6851_vm14 = vcmp.eq.s32.totalorder %v17466_v0, %v17197_v9  ;;  %vm6847_vm1 = vcmp.eq.s32.totalorder %v17464_v49, %v17193_v61 }
 0x7a3   : > { %vm17539_vm4 = vmpackc.low %vm6844_vm8, %vm6841_vm7  ;;  %vm6850_vm7 = vcmp.eq.s32.totalorder %v17466_v0, %v17193_v61 }
 0x7a4   : > { %11694 = vmatpush3.bf16.msk.msra.mxu0 %vm17489_vm3, %v12758_v47  ;;  %vm17570_vm8 = vmpackc.low %vm6834_vm0, %vm6831_vm5  ;;  %vm6837_vm3 = vcmp.eq.s32.totalorder %v17261_v50, %v17235_v45  ;;  %vm6891_vm0 = vcmp.eq.s32.totalorder %v17527_v22, %v17235_v45  ;;  %v20844_v50 = vmov 0 }
 0x7a5   : > { %11247 = vmatpush1.bf16.msk.msra.mxu1 %vm17456_vm13, %v12758_v47  ;;  %11695 = vmatprep.subr.msk.bf16.mxu0 %vm17502_vm9, %v12758_v47  ;;  %vm17585_vm13 = vmpackc.low %vm6888_vm11, %vm6885_vm10  ;;  %vm6840_vm9 = vcmp.eq.s32.totalorder %v17263_v52, %v17235_v45  ;;  %vm6894_vm10 = vcmp.eq.s32.totalorder %v17529_v31, %v17235_v45 }
 0x7a6   : > { %11230 = vmatmul.mubr.msk.bf16.gmra.mrb[56].mxu0 %vm6512_vm12, %v17349_v14  ;;  %11249 = vmatprep.subr.msk.bf16.mxu1 %vm17523_vm2, %v12758_v47  ;;  %vm17601_vm5 = vmpackc.low %vm6851_vm14, %vm6848_vm15  ;;  %vm6854_vm2 = vcmp.eq.s32.totalorder %v17547_v23, %v17197_v9  ;;  %vm6857_vm15 = vcmp.eq.s32.totalorder %v17549_v62, %v17197_v9  ;;  %vm6853_vm14 = vcmp.eq.s32.totalorder %v17547_v23, %v17193_v61  ;;  %v6802_v14 = vshra.s32 %v6734_v44, 1  ;;  %v6470_v29 = vpop.permute.xlu0 %6469 }
 0x7a7   : > { %11228 = vmatmul.mubr.msk.bf16.gmra.mrb[60].mxu1 %vm6512_vm12, %v12338_v10  ;;  %6637 = vmatprep.mubr.bf16.mxu0 %v19890_v2  ;;  %vm17619_vm11 = vmpackc.low %vm6850_vm7, %vm6847_vm1  ;;  %vm6856_vm1 = vcmp.eq.s32.totalorder %v17549_v62, %v17193_v61  ;;  %v6742_v2 = vadd.s32 456, %v20805_v42 }
 0x7a8   : > { %11696 = vmatpush3.bf16.msk.msra.mxu0 %vm17570_vm8, %v12758_v47  ;;  %vm11366_vm7 = vmpackc.low %vm6840_vm9, %vm6837_vm3  ;;  %vm6843_vm8 = vcmp.eq.s32.totalorder %v17379_v34, %v17235_v45  ;;  %vm6897_vm3 = vcmp.eq.s32.totalorder %v17609_v48, %v17235_v45  ;;  %vm6900_vm9 = vcmp.eq.s32.totalorder %v17611_v43, %v17235_v45  ;;  %v6719_v34 = vadd.s32 272, %v20805_v42 }
 0x7a9   : > { %11251 = vmatpush1.bf16.msk.msra.mxu1 %vm17539_vm4, %v12758_v47  ;;  %11697 = vmatprep.subr.msk.bf16.mxu0 %vm17585_vm13, %v12758_v47  ;;  %vm11384_vm4 = vmpackc.low %vm6894_vm10, %vm6891_vm0  ;;  %vm6846_vm13 = vcmp.eq.s32.totalorder %v17381_v35, %v17235_v45  ;;  %vm6860_vm0 = vcmp.eq.s32.totalorder %v17627_v18, %v17197_v9  ;;  %vm6863_vm10 = vcmp.eq.s32.totalorder %v17629_v12, %v17197_v9  ;;  %v6720_v35 = vadd.s32 280, %v20805_v42 }
 0x7aa   : > { %11253 = vmatprep.subr.msk.bf16.mxu1 %vm17601_vm5, %v12758_v47  ;;  %vm11256_vm6 = vmpackc.low %vm6857_vm15, %vm6854_vm2  ;;  %v17834_v38 = vshra.s32 %v6719_v34, 1  ;;  %v17919_v60 = vpop.permute.xlu0 %6484 }
 0x7ab   : > { %vm17667_vm5 = vmpackc.low %vm6856_vm1, %vm6853_vm14  ;;  %vm6849_vm14 = vcmp.eq.s32.totalorder %v17464_v49, %v17235_v45  ;;  %vm6852_vm1 = vcmp.eq.s32.totalorder %v17466_v0, %v17235_v45  ;;  %v17838_v21 = vshra.s32 %v6720_v35, 1  ;;  %v6723_v49 = vadd.s32 304, %v20805_v42 }
 0x7ac   : > { %v20845_v50 = vsel %vm17667_vm5, 4294967295, %v20844_v50  ;;  %11698 = vmatpush3.bf16.msk.msra.mxu0 %vm11366_vm7, %v12758_v47  ;;  %vm11368_vm2 = vmpackc.low %vm6846_vm13, %vm6843_vm8  ;;  %vm6859_vm7 = vcmp.eq.s32.totalorder %v17627_v18, %v17193_v61  ;;  %v6724_v0 = vadd.s32 312, %v20805_v42 }
 0x7ad   : > { %11255 = vmatpush1.bf16.msk.msra.mxu1 %vm17619_vm11, %v12758_v47  ;;  %11699 = vmatprep.subr.msk.bf16.mxu0 %vm11384_vm4, %v12758_v47  ;;  %vm11386_vm15 = vmpackc.low %vm6900_vm9, %vm6897_vm3  ;;  %vm6862_vm11 = vcmp.eq.s32.totalorder %v17629_v12, %v17193_v61  ;;  %vm6866_vm4 = vcmp.eq.s32.totalorder %v17230_v25, %v17197_v9  ;;  %vm6865_vm9 = vcmp.eq.s32.totalorder %v17230_v25, %v17193_v61  ;;  %v6713_v25 = vadd.s32 224, %v20805_v42 }
 0x7ae   : > { %11231 = vmatmul.mubr.msk.bf16.gmra.mrb[60].mxu0 %vm6512_vm12, %v12338_v10  ;;  %11257 = vmatprep.subr.msk.bf16.mxu1 %vm11256_vm6, %v12758_v47  ;;  %vm11260_vm5 = vmpackc.low %vm6863_vm10, %vm6860_vm0  ;;  %vm6869_vm6 = vcmp.eq.s32.totalorder %v17232_v55, %v17197_v9  ;;  %vm20846_vm12 = vnez %v20845_v50  ;;  %vm6868_vm0 = vcmp.eq.s32.totalorder %v17232_v55, %v17193_v61  ;;  %vm6872_vm10 = vcmp.eq.s32.totalorder %v17294_v6, %v17197_v9 }
 0x7af   : > { %vm11370_vm8 = vmpackc.low %vm6852_vm1, %vm6849_vm14  ;;  %vm6871_vm14 = vcmp.eq.s32.totalorder %v17294_v6, %v17193_v61  ;;  %vm6874_vm1 = vcmp.eq.s32.totalorder %v17296_v46, %v17193_v61  ;;  %v6714_v55 = vadd.s32 232, %v20805_v42  ;;  %v6781_v52 = vshra.s32 %v6713_v25, 1 }
 0x7b0   : > { %11700 = vmatpush3.bf16.msk.msra.mxu0 %vm11368_vm2, %v12758_v47  ;;  %vm11262_vm13 = vmpackc.low %vm6862_vm11, %vm6859_vm7  ;;  %vm6875_vm2 = vcmp.eq.s32.totalorder %v17296_v46, %v17197_v9  ;;  %vm6878_vm7 = vcmp.eq.s32.totalorder %v17365_v16, %v17197_v9  ;;  %vm6881_vm11 = vcmp.eq.s32.totalorder %v17367_v8, %v17197_v9  ;;  %v6716_v6 = vadd.s32 248, %v20805_v42 }
 0x7b1   : > { %11259 = vmatpush1.bf16.msk.msra.mxu1 %vm20846_vm12, %v12758_v47  ;;  %11701 = vmatprep.subr.msk.bf16.mxu0 %vm11386_vm15, %v12758_v47  ;;  %vm11264_vm3 = vmpackc.low %vm6869_vm6, %vm6866_vm4  ;;  %vm6877_vm12 = vcmp.eq.s32.totalorder %v17365_v16, %v17193_v61  ;;  %v6782_v53 = vshra.s32 %v6714_v55, 1  ;;  %v6783_v46 = vshra.s32 %v6715_v5, 1  ;;  %v17882_v15 = vshra.s32 %v6723_v49, 1 }
 0x7b2   : > { %11261 = vmatprep.subr.msk.bf16.mxu1 %vm11260_vm5, %v12758_v47  ;;  %vm11266_vm5 = vmpackc.low %vm6868_vm0, %vm6865_vm9  ;;  %v6784_v63 = vshra.s32 %v6716_v6, 1  ;;  %v17884_v4 = vshra.s32 %v6724_v0, 1  ;;  %v6727_v5 = vadd.s32 336, %v20805_v42  ;;  %v17911_v6 = vpop.permute.xlu1 %6479 }
 0x7b3   : > { %vm11268_vm15 = vmpackc.low %vm6875_vm2, %vm6872_vm10  ;;  %vm6883_vm10 = vcmp.eq.s32.totalorder %v17426_v39, %v17193_v61  ;;  %vm6886_vm2 = vcmp.eq.s32.totalorder %v17428_v33, %v17193_v61 }
 0x7b4   : > { %11702 = vmatpush3.bf16.msk.msra.mxu0 %vm11370_vm8, %v12758_v47  ;;  %vm11270_vm4 = vmpackc.low %vm6874_vm1, %vm6871_vm14  ;;  %vm6880_vm8 = vcmp.eq.s32.totalorder %v17367_v8, %v17193_v61  ;;  %v17949_v49 = vshra.s32 %v6727_v5, 1 }
 0x7b5   : > { %11263 = vmatpush1.bf16.msk.msra.mxu1 %vm11262_vm13, %v12758_v47  ;;  %vm11272_vm6 = vmpackc.low %vm6881_vm11, %vm6878_vm7  ;;  %vm6884_vm13 = vcmp.eq.s32.totalorder %v17426_v39, %v17197_v9  ;;  %vm6889_vm7 = vcmp.eq.s32.totalorder %v17527_v22, %v17193_v61  ;;  %vm6892_vm11 = vcmp.eq.s32.totalorder %v17529_v31, %v17193_v61  ;;  %v17840_v39 = vshra.s32 %v6735_v54, 1 }
 0x7b6   : > { %11265 = vmatprep.subr.msk.bf16.mxu1 %vm11264_vm3, %v12758_v47  ;;  %vm6887_vm3 = vcmp.eq.s32.totalorder %v17428_v33, %v17197_v9  ;;  %vm11274_vm9 = vmpackc.low %vm6880_vm8, %vm6877_vm12  ;;  %v6737_v33 = vadd.s32 416, %v20805_v42 }
 0x7b7   : > { %vm11276_vm0 = vmpackc.low %vm6887_vm3, %vm6884_vm13  ;;  %vm6895_vm13 = vcmp.eq.s32.totalorder %v17609_v48, %v17193_v61  ;;  %vm6898_vm3 = vcmp.eq.s32.totalorder %v17611_v43, %v17193_v61 }
 0x7b8   : > { %vm11278_vm14 = vmpackc.low %vm6886_vm2, %vm6883_vm10  ;;  %vm6905_vm10 = vcmp.eq.s32.totalorder %v6782_v53, %v17197_v9  ;;  %vm6903_vm2 = vcmp.eq.s32.totalorder %v6781_v52, %v17235_v45  ;;  %v17860_v20 = vshra.s32 %v6737_v33, 1 }
 0x7b9   : > { %11267 = vmatpush1.bf16.msk.msra.mxu1 %vm11266_vm5, %v12758_v47  ;;  %vm6890_vm5 = vcmp.eq.s32.totalorder %v17527_v22, %v17197_v9  ;;  %vm11282_vm12 = vmpackc.low %vm6892_vm11, %vm6889_vm7  ;;  %vm6901_vm7 = vcmp.eq.s32.totalorder %v6781_v52, %v17193_v61  ;;  %vm6904_vm11 = vcmp.eq.s32.totalorder %v6782_v53, %v17193_v61  ;;  %v6740_v22 = vadd.s32 440, %v20805_v42 }
 0x7ba   : > { %11269 = vmatprep.subr.msk.bf16.mxu1 %vm11268_vm15, %v12758_v47  ;;  %vm6893_vm15 = vcmp.eq.s32.totalorder %v17529_v31, %v17197_v9  ;;  %v6725_v31 = vadd.s32 320, %v20805_v42 }
 0x7bb   : > { %vm11280_vm1 = vmpackc.low %vm6893_vm15, %vm6890_vm5  ;;  %vm6906_vm5 = vcmp.eq.s32.totalorder %v6782_v53, %v17235_v45  ;;  %v17900_v50 = vshra.s32 %v6740_v22, 1  ;;  %v17908_v53 = vshra.s32 %v6726_v57, 1 }
 0x7bc   : > { %v17902_v25 = vshra.s32 %v6725_v31, 1  ;;  %v17967_v31 = vshra.s32 %v6728_v28, 1 }
 0x7bd   : > { %11271 = vmatpush1.bf16.msk.msra.mxu1 %vm11270_vm4, %v12758_v47  ;;  %vm6896_vm4 = vcmp.eq.s32.totalorder %v17609_v48, %v17197_v9 }
 0x7be   : > { %11273 = vmatprep.subr.msk.bf16.mxu1 %vm11272_vm6, %v12758_v47  ;;  %vm6899_vm6 = vcmp.eq.s32.totalorder %v17611_v43, %v17197_v9  ;;  %v6741_v43 = vadd.s32 448, %v20805_v42 }
 0x7bf   : > { %vm11284_vm8 = vmpackc.low %vm6899_vm6, %vm6896_vm4 }
 0x7c0   : > { %vm11388_vm4 = vmpackc.low %vm6906_vm5, %vm6903_vm2 }
 0x7c1   : > { %11275 = vmatpush1.bf16.msk.msra.mxu1 %vm11274_vm9, %v12758_v47  ;;  %vm11286_vm9 = vmpackc.low %vm6898_vm3, %vm6895_vm13  ;;  %11703 = vmatprep.subr.msk.bf16.mxu0 %vm11388_vm4, %v12758_v47  ;;  %vm6864_vm13 = vcmp.eq.s32.totalorder %v17629_v12, %v17235_v45  ;;  %vm6908_vm3 = vcmp.eq.s32.totalorder %v6783_v46, %v17197_v9  ;;  %vm6917_vm4 = vcmp.eq.s32.totalorder %v6786_v56, %v17197_v9  ;;  %v17898_v12 = vshra.s32 %v6739_v59, 1 }
 0x7c2   : > { %11277 = vmatprep.subr.msk.bf16.mxu1 %vm11276_vm0, %v12758_v47  ;;  %vm6902_vm0 = vcmp.eq.s32.totalorder %v6781_v52, %v17197_v9 }
 0x7c3   : > { %vm11288_vm15 = vmpackc.low %vm6905_vm10, %vm6902_vm0  ;;  %vm6909_vm0 = vcmp.eq.s32.totalorder %v6783_v46, %v17235_v45  ;;  %vm6912_vm10 = vcmp.eq.s32.totalorder %v6784_v63, %v17235_v45 }
 0x7c5   : > { %11279 = vmatpush1.bf16.msk.msra.mxu1 %vm11278_vm14, %v12758_v47  ;;  %vm6855_vm14 = vcmp.eq.s32.totalorder %v17547_v23, %v17235_v45 }
 0x7c6   : > { %11281 = vmatprep.subr.msk.bf16.mxu1 %vm11280_vm1, %v12758_v47  ;;  %vm6858_vm1 = vcmp.eq.s32.totalorder %v17549_v62, %v17235_v45 }
 0x7c7   : > { %vm11372_vm6 = vmpackc.low %vm6858_vm1, %vm6855_vm14  ;;  %vm6910_vm14 = vcmp.eq.s32.totalorder %v6784_v63, %v17193_v61 }
 0x7c8   : > { %11704 = vmatpush3.bf16.msk.msra.mxu0 %vm11372_vm6, %v12758_v47  ;;  %vm11390_vm1 = vmpackc.low %vm6912_vm10, %vm6909_vm0  ;;  %vm6913_vm6 = vcmp.eq.s32.totalorder %v6785_v40, %v17193_v61  ;;  %vm6918_vm10 = vcmp.eq.s32.totalorder %v6786_v56, %v17235_v45 }
 0x7c9   : > { %11283 = vmatpush1.bf16.msk.msra.mxu1 %vm11282_vm12, %v12758_v47  ;;  %vm11290_vm12 = vmpackc.low %vm6904_vm11, %vm6901_vm7  ;;  %11705 = vmatprep.subr.msk.bf16.mxu0 %vm11390_vm1, %v12758_v47  ;;  %vm6914_vm11 = vcmp.eq.s32.totalorder %v6785_v40, %v17197_v9  ;;  %vm6961_vm1 = vcmp.eq.s32.totalorder %v6801_v36, %v17193_v61 }
 0x7ca   : > { %11285 = vmatprep.subr.msk.bf16.mxu1 %vm11284_vm8, %v12758_v47  ;;  %vm6861_vm8 = vcmp.eq.s32.totalorder %v17627_v18, %v17235_v45 }
 0x7cb   : > { %vm17788_vm2 = vmpackc.low %vm6864_vm13, %vm6861_vm8  ;;  %vm6963_vm13 = vcmp.eq.s32.totalorder %v6801_v36, %v17235_v45 }
 0x7cc   : > { %11706 = vmatpush3.bf16.msk.msra.mxu0 %vm17788_vm2, %v12758_v47  ;;  %vm11296_vm8 = vmpackc.low %vm6917_vm4, %vm6914_vm11  ;;  %vm6962_vm2 = vcmp.eq.s32.totalorder %v6801_v36, %v17197_v9  ;;  %v6744_v36 = vadd.s32 472, %v20805_v42 }
 0x7cd   : > { %11287 = vmatpush1.bf16.msk.msra.mxu1 %vm11286_vm9, %v12758_v47  ;;  %vm6911_vm9 = vcmp.eq.s32.totalorder %v6784_v63, %v17197_v9 }
 0x7ce   : > { %11289 = vmatprep.subr.msk.bf16.mxu1 %vm11288_vm15, %v12758_v47  ;;  %vm11292_vm5 = vmpackc.low %vm6911_vm9, %vm6908_vm3  ;;  %vm6907_vm15 = vcmp.eq.s32.totalorder %v6783_v46, %v17193_v61  ;;  %vm6966_vm3 = vcmp.eq.s32.totalorder %v6802_v14, %v17235_v45  ;;  %vm6915_vm9 = vcmp.eq.s32.totalorder %v6785_v40, %v17235_v45  ;;  %v17921_v40 = vshra.s32 %v6741_v43, 1 }
 0x7cf   : > { %vm11294_vm7 = vmpackc.low %vm6910_vm14, %vm6907_vm15  ;;  %vm6965_vm14 = vcmp.eq.s32.totalorder %v6802_v14, %v17197_v9 }
 0x7d0   : > { %vm11408_vm0 = vmpackc.low %vm6966_vm3, %vm6963_vm13  ;;  %vm6972_vm13 = vcmp.eq.s32.totalorder %v17844_v7, %v17235_v45  ;;  %vm6919_vm3 = vcmp.eq.s32.totalorder %v17834_v38, %v17193_v61 }
 0x7d1   : > { %11291 = vmatpush1.bf16.msk.msra.mxu1 %vm11290_vm12, %v12758_v47  ;;  %vm6916_vm12 = vcmp.eq.s32.totalorder %v6786_v56, %v17193_v61  ;;  %11725 = vmatprep.subr.msk.bf16.mxu0 %vm11408_vm0, %v12758_v47  ;;  %vm17814_vm15 = vmpackc.low %vm6918_vm10, %vm6915_vm9  ;;  %vm6922_vm9 = vcmp.eq.s32.totalorder %v17838_v21, %v17193_v61  ;;  %vm6921_vm0 = vcmp.eq.s32.totalorder %v17834_v38, %v17235_v45  ;;  %v17923_v56 = vshra.s32 %v6742_v2, 1 }
 0x7d2   : > { %11293 = vmatprep.subr.msk.bf16.mxu1 %vm11292_vm5, %v12758_v47  ;;  %vm17810_vm5 = vmpackc.low %vm6916_vm12, %vm6913_vm6  ;;  %vm6920_vm6 = vcmp.eq.s32.totalorder %v17834_v38, %v17197_v9  ;;  %vm6923_vm12 = vcmp.eq.s32.totalorder %v17838_v21, %v17197_v9  ;;  %vm6924_vm10 = vcmp.eq.s32.totalorder %v17838_v21, %v17235_v45  ;;  %v18032_v21 = vpop.permute.xlu1 %6489  ;;  %v18162_v38 = vshra.s32 %v6745_v26, 1 }
 0x7d3   : > { %vm17822_vm11 = vmpackc.low %vm6965_vm14, %vm6962_vm2  ;;  %vm6984_vm2 = vcmp.eq.s32.totalorder %v17900_v50, %v17235_v45  ;;  %vm6990_vm14 = vcmp.eq.s32.totalorder %v17923_v56, %v17235_v45 }
 0x7d5   : > { %11295 = vmatpush1.bf16.msk.msra.mxu1 %vm11294_vm7, %v12758_v47  ;;  %vm6964_vm7 = vcmp.eq.s32.totalorder %v6802_v14, %v17193_v61 }
 0x7d6   : > { %11297 = vmatprep.subr.msk.bf16.mxu1 %vm11296_vm8, %v12758_v47  ;;  %vm17826_vm4 = vmpackc.low %vm6964_vm7, %vm6961_vm1  ;;  %vm6969_vm8 = vcmp.eq.s32.totalorder %v17840_v39, %v17235_v45  ;;  %vm6933_vm1 = vcmp.eq.s32.totalorder %v17882_v15, %v17235_v45 }
 0x7d7   : > { %vm17939_vm7 = vmpackc.low %vm6923_vm12, %vm6920_vm6  ;;  %vm6938_vm12 = vcmp.eq.s32.totalorder %v17902_v25, %v17197_v9 }
 0x7d8   : > { %vm17959_vm6 = vmpackc.low %vm6972_vm13, %vm6969_vm8  ;;  %vm6987_vm13 = vcmp.eq.s32.totalorder %v17921_v40, %v17235_v45 }
 0x7d9   : > { %vm17979_vm8 = vmpackc.low %vm6922_vm9, %vm6919_vm3  ;;  %vm20873_vm9 = vcmp.eq.s32.totalorder %v17848_v41, %v17193_v61 }
 0x7da   : > { %vm18003_vm3 = vmpackc.low %vm6924_vm10, %vm6921_vm0  ;;  %vm20866_vm0 = vcmp.eq.s32.totalorder %v17850_v3, %v17197_v9 }
 0x86a   : > { %v6556_v10 = vpop.f32.mrb[52].mxu1 }
 0x86b   : > { %v6557_v58 = vadd.f32 %v6556_v10, %v6470_v29  ;;  %v6558_v11 = vpop.f32.mrb[53].mxu1 }
 0x86c   : > { %v6559_v23 = vadd.f32 %v6558_v11, %v6470_v29  ;;  %v6560_v62 = vpop.f32.mrb[54].mxu1 }
 0x86d   : > { %v6561_v32 = vadd.f32 %v6560_v62, %v17854_v37  ;;  %v6562_v48 = vpop.f32.mrb[55].mxu1  ;;  %v6648_v55 = vmax.f32 %v6557_v58, 0.0  ;;  %v17969_v58 = vshra.s32 %v6743_v30, 1 }
 0x86e   : > { %v6563_v18 = vadd.f32 %v6562_v48, %v17854_v37  ;;  %v6649_v46 = vmax.f32 %v6559_v23, 0.0 }
 0x86f   : > { %v6652_v52 = vmax.f32 %v6561_v32, 0.0  ;;  %v6729_v32 = vadd.s32 352, %v20805_v42 }
 0x870   : > { %v6653_v63 = vmax.f32 %v6563_v18, 0.0 }
 0x871   : > { %v6672_v44 = vpack.c.bf16 %v6652_v52, %v6648_v55  ;;  %v6619_v19 = vpop.f32.mrb[52].mxu0 }
 0x872   : > { %v6673_v14 = vpack.c.bf16 %v6653_v63, %v6649_v46  ;;  %v6620_v34 = vadd.f32 %v6619_v19, %v6470_v29  ;;  %v6566_v35 = vpop.f32.mrb[56].mxu1  ;;  %v6621_v54 = vpop.f32.mrb[53].mxu0 }
 0x873   : > { %v6567_v1 = vadd.f32 %v6566_v35, %v17911_v6  ;;  %v6622_v51 = vadd.f32 %v6621_v54, %v6470_v29  ;;  %v6568_v24 = vpop.f32.mrb[57].mxu1  ;;  %v6623_v33 = vpop.f32.mrb[54].mxu0 }
 0x874   : > { %v6569_v0 = vadd.f32 %v6568_v24, %v17911_v6  ;;  %v6624_v29 = vadd.f32 %v6623_v33, %v17854_v37  ;;  %v6570_v10 = vpop.f32.mrb[58].mxu1  ;;  %v6625_v59 = vpop.f32.mrb[55].mxu0  ;;  %7348 = vmatprep.mubr.bf16.mxu1 %v6673_v14  ;;  %7474 = vmatprep.mubr.bf16.mxu0 %v6673_v14  ;;  %v6650_v48 = vmax.f32 %v6620_v34, 0.0  ;;  %v18089_v33 = vshra.s32 %v6729_v32, 1 }
 0x875   : > { %v6571_v11 = vadd.f32 %v6570_v10, %v17919_v60  ;;  %v6626_v57 = vadd.f32 %v6625_v59, %v17854_v37  ;;  %v6572_v23 = vpop.f32.mrb[59].mxu1  ;;  %7349 = vmatmul.mubr.bf16.vlgmr.msra.gmra.mrb[64].mxu1 %v6672_v44  ;;  %7475 = vmatmul.mubr.bf16.vlgmr.msra.gmra.mrb[64].mxu0 %v6672_v44  ;;  %v17987_v37 = vshra.s32 %v6744_v36, 1  ;;  %v6656_v16 = vmax.f32 %v6567_v1, 0.0  ;;  %v18050_v44 = vpop.permute.xlu0 %6494 }
 0x876   : > { %v6654_v43 = vmax.f32 %v6624_v29, 0.0  ;;  %v6573_v2 = vadd.f32 %v6572_v23, %v17919_v60  ;;  %11299 = vmatpush1.bf16.msk.msra.mxu1 %vm17810_vm5, %v12758_v47  ;;  %11726 = vmatpush3.bf16.msk.msra.mxu0 %vm17814_vm15, %v12758_v47  ;;  %v6651_v55 = vmax.f32 %v6622_v51, 0.0  ;;  %vm20865_vm15 = vcmp.eq.s32.totalorder %v17848_v41, %v17197_v9 }
 0x877   : > { %v6660_v52 = vmax.f32 %v6571_v11, 0.0  ;;  %v6655_v5 = vmax.f32 %v6626_v57, 0.0  ;;  %11301 = vmatprep.subr.msk.bf16.mxu1 %vm17939_vm7, %v12758_v47  ;;  %11727 = vmatprep.subr.msk.bf16.mxu0 %vm17959_vm6, %v12758_v47  ;;  %vm18024_vm10 = vmpackc.low %vm20866_vm0, %vm20865_vm15  ;;  %v6657_v46 = vmax.f32 %v6569_v0, 0.0  ;;  %vm20869_vm6 = vcmp.eq.s32.totalorder %v17860_v20, %v17235_v45 }
 0x878   : > { %v18034_v63 = vpack.c.bf16 %v6654_v43, %v6650_v48  ;;  %v6661_v28 = vmax.f32 %v6573_v2, 0.0  ;;  %vm20870_vm15 = vcmp.eq.s32.totalorder %v17862_v27, %v17235_v45  ;;  %vm6943_vm5 = vcmp.eq.s32.totalorder %v17949_v49, %v17193_v61 }
 0x879   : > { %vm18042_vm0 = vmpackc.low %vm20870_vm15, %vm20869_vm6  ;;  %v6676_v19 = vpack.c.bf16 %v6660_v52, %v6656_v16  ;;  %v18052_v36 = vpack.c.bf16 %v6655_v5, %v6651_v55  ;;  %v6629_v14 = vpop.f32.mrb[56].mxu0  ;;  %vm20874_vm6 = vcmp.eq.s32.totalorder %v17850_v3, %v17193_v61  ;;  %v6746_v59 = vadd.s32 488, %v20805_v42 }
 0x87a   : > { %vm18060_vm15 = vmpackc.low %vm20874_vm6, %vm20873_vm9  ;;  %v6677_v35 = vpack.c.bf16 %v6661_v28, %v6657_v46  ;;  %v6630_v54 = vadd.f32 %v6629_v14, %v17911_v6  ;;  %11303 = vmatpush1.bf16.msk.msra.mxu1 %vm17979_vm8, %v12758_v47  ;;  %11728 = vmatpush3.bf16.msk.msra.mxu0 %vm18003_vm3, %v12758_v47  ;;  %v6576_v1 = vpop.f32.mrb[60].mxu1  ;;  %v6631_v51 = vpop.f32.mrb[57].mxu0  ;;  %vm20877_vm9 = vcmp.eq.s32.totalorder %v17848_v41, %v17235_v45  ;;  %v6731_v32 = vadd.s32 368, %v20805_v42 }
 0x87b   : > { %vm20878_vm6 = vcmp.eq.s32.totalorder %v17850_v3, %v17235_v45  ;;  %v6577_v0 = vadd.f32 %v6576_v1, %v18032_v21  ;;  %v6632_v41 = vadd.f32 %v6631_v51, %v17911_v6  ;;  %v6578_v29 = vpop.f32.mrb[61].mxu1  ;;  %v6633_v3 = vpop.f32.mrb[58].mxu0  ;;  %11305 = vmatprep.subr.msk.bf16.mxu1 %vm18024_vm10, %v12758_v47  ;;  %11729 = vmatprep.subr.msk.bf16.mxu0 %vm18042_vm0, %v12758_v47  ;;  %v18114_v6 = vshra.s32 %v6730_v13, 1 }
 0x87c   : > { %vm18081_vm7 = vmpackc.low %vm20878_vm6, %vm20877_vm9  ;;  %vm20881_vm3 = vcmp.eq.s32.totalorder %v17882_v15, %v17197_v9  ;;  %vm20882_vm9 = vcmp.eq.s32.totalorder %v17884_v4, %v17197_v9  ;;  %vm6945_vm8 = vcmp.eq.s32.totalorder %v17949_v49, %v17235_v45  ;;  %vm6948_vm10 = vcmp.eq.s32.totalorder %v17967_v31, %v17235_v45  ;;  %v6580_v57 = vpop.f32.mrb[62].mxu1  ;;  %v6635_v23 = vpop.f32.mrb[59].mxu0  ;;  %7358 = vmatprep.mubr.bf16.mxu1 %v6677_v35 }
 0x87d   : > { %vm18106_vm6 = vmpackc.low %vm20882_vm9, %vm20881_vm3  ;;  %v6579_v22 = vadd.f32 %v6578_v29, %v18032_v21  ;;  %v6634_v11 = vadd.f32 %v6633_v3, %v17919_v60  ;;  %7482 = vmatprep.mubr.bf16.mxu0 %v6677_v35  ;;  %vm20885_vm0 = vcmp.eq.s32.totalorder %v17898_v12, %v17235_v45  ;;  %v6732_v48 = vadd.s32 376, %v20805_v42  ;;  %v6582_v18 = vpop.f32.mrb[63].mxu1  ;;  %7359 = vmatmul.mubr.bf16.gmra.mrb[68].mxu1 %v6676_v19 }
 0x87e   : > { %vm18125_vm3 = vmpackc.low %vm6984_vm2, %vm20885_vm0  ;;  %v6581_v43 = vadd.f32 %v6580_v57, %v18050_v44  ;;  %v6636_v2 = vadd.f32 %v6635_v23, %v17919_v60  ;;  %7483 = vmatmul.mubr.bf16.gmra.mrb[68].mxu0 %v6676_v19  ;;  %vm20888_vm9 = vcmp.eq.s32.totalorder %v17882_v15, %v17193_v61  ;;  %vm20889_vm2 = vcmp.eq.s32.totalorder %v17884_v4, %v17193_v61 }
 0x87f   : > { %vm18139_vm0 = vmpackc.low %vm20889_vm2, %vm20888_vm9  ;;  %v6747_v16 = vadd.s32 496, %v20805_v42  ;;  %v6748_v55 = vadd.s32 504, %v20805_v42  ;;  %v6658_v52 = vmax.f32 %v6630_v54, 0.0  ;;  %v6662_v5 = vmax.f32 %v6634_v11, 0.0  ;;  %11307 = vmatpush1.bf16.msk.msra.mxu1 %vm18060_vm15, %v12758_v47  ;;  %11730 = vmatpush3.bf16.msk.msra.mxu0 %vm18081_vm7, %v12758_v47 }
 0x880   : > { %v6583_v60 = vadd.f32 %v6582_v18, %v18050_v44  ;;  %vm20892_vm9 = vcmp.eq.s32.totalorder %v17884_v4, %v17235_v45  ;;  %v6664_v46 = vmax.f32 %v6577_v0, 0.0  ;;  %v6659_v28 = vmax.f32 %v6632_v41, 0.0  ;;  %11309 = vmatprep.subr.msk.bf16.mxu1 %vm18106_vm6, %v12758_v47  ;;  %11731 = vmatprep.subr.msk.bf16.mxu0 %vm18125_vm3, %v12758_v47  ;;  %vm18188_vm15 = vmpackc.low %vm6990_vm14, %vm6987_vm13 }
 0x881   : > { %vm18158_vm2 = vmpackc.low %vm20892_vm9, %vm6933_vm1  ;;  %v6668_v30 = vmax.f32 %v6581_v43, 0.0  ;;  %v6663_v19 = vmax.f32 %v6636_v2, 0.0  ;;  %vm20895_vm1 = vcmp.eq.s32.totalorder %v17908_v53, %v17197_v9  ;;  %v6665_v4 = vmax.f32 %v6579_v22, 0.0  ;;  %v6639_v24 = vpop.f32.mrb[60].mxu0 }
 0x882   : > { %vm18176_vm7 = vmpackc.low %vm20895_vm1, %vm6938_vm12  ;;  %v18180_v14 = vpack.c.bf16 %v6662_v5, %v6658_v52  ;;  %v6669_v34 = vmax.f32 %v6583_v60, 0.0  ;;  %v18192_v54 = vshra.s32 %v6746_v59, 1  ;;  %vm20900_vm12 = vcmp.eq.s32.totalorder %v17902_v25, %v17193_v61  ;;  %v6641_v10 = vpop.f32.mrb[61].mxu0 }
 0x883   : > { %v6680_v1 = vpack.c.bf16 %v6668_v30, %v6664_v46  ;;  %v18194_v51 = vpack.c.bf16 %v6663_v19, %v6659_v28  ;;  %vm20901_vm6 = vcmp.eq.s32.totalorder %v17908_v53, %v17193_v61  ;;  %v18206_v0 = vshra.s32 %v6747_v16, 1  ;;  %11311 = vmatpush1.bf16.msk.msra.mxu1 %vm18139_vm0, %v12758_v47  ;;  %11732 = vmatpush3.bf16.msk.msra.mxu0 %vm18158_vm2, %v12758_v47  ;;  %v6643_v11 = vpop.f32.mrb[62].mxu0 }
 0x884   : > { %vm18202_vm3 = vmpackc.low %vm20901_vm6, %vm20900_vm12  ;;  %v18208_v41 = vshra.s32 %v6748_v55, 1  ;;  %v6681_v29 = vpack.c.bf16 %v6669_v34, %v6665_v4  ;;  %v6640_v3 = vadd.f32 %v6639_v24, %v18032_v21  ;;  %vm20904_vm14 = vcmp.eq.s32.totalorder %v17902_v25, %v17235_v45  ;;  %11313 = vmatprep.subr.msk.bf16.mxu1 %vm18176_vm7, %v12758_v47  ;;  %11733 = vmatprep.subr.msk.bf16.mxu0 %vm18188_vm15, %v12758_v47 }
 0x885   : > { %vm20905_vm13 = vcmp.eq.s32.totalorder %v17908_v53, %v17235_v45  ;;  %vm6950_vm1 = vcmp.eq.s32.totalorder %v18089_v33, %v17197_v9  ;;  %v6642_v22 = vadd.f32 %v6641_v10, %v18032_v21  ;;  %vm20908_vm0 = vcmp.eq.s32.totalorder %v17949_v49, %v17197_v9  ;;  %v6645_v21 = vpop.f32.mrb[63].mxu0 }
 0x886   : > { %vm18223_vm9 = vmpackc.low %vm20905_vm13, %vm20904_vm14  ;;  %vm20909_vm2 = vcmp.eq.s32.totalorder %v17967_v31, %v17197_v9  ;;  %vm6953_vm6 = vcmp.eq.s32.totalorder %v18114_v6, %v17197_v9  ;;  %v6644_v53 = vadd.f32 %v6643_v11, %v18050_v44  ;;  %7368 = vmatprep.mubr.bf16.mxu1 %v6681_v29  ;;  %7490 = vmatprep.mubr.bf16.mxu0 %v6681_v29  ;;  %v6799_v23 = vshra.s32 %v6731_v32, 1 }
 0x887   : > { %vm18242_vm12 = vmpackc.low %vm20909_vm2, %vm20908_vm0  ;;  %vm20912_vm15 = vcmp.eq.s32.totalorder %v17969_v58, %v17235_v45  ;;  %vm20913_vm14 = vcmp.eq.s32.totalorder %v17987_v37, %v17235_v45  ;;  %vm7002_vm0 = vcmp.eq.s32.totalorder %v18192_v54, %v17235_v45  ;;  %v6800_v62 = vshra.s32 %v6732_v48, 1  ;;  %7369 = vmatmul.mubr.bf16.gmra.mrb[72].mxu1 %v6680_v1  ;;  %7491 = vmatmul.mubr.bf16.gmra.mrb[72].mxu0 %v6680_v1 }
 0x888   : > { %vm18257_vm13 = vmpackc.low %vm20913_vm14, %vm20912_vm15  ;;  %v6646_v43 = vadd.f32 %v6645_v21, %v18050_v44  ;;  %vm20916_vm2 = vcmp.eq.s32.totalorder %v17967_v31, %v17193_v61  ;;  %vm7005_vm15 = vcmp.eq.s32.totalorder %v18206_v0, %v17235_v45  ;;  %vm7008_vm14 = vcmp.eq.s32.totalorder %v18208_v41, %v17235_v45  ;;  %11315 = vmatpush1.bf16.msk.msra.mxu1 %vm18202_vm3, %v12758_v47 }
 0x889   : > { %vm18270_vm7 = vmpackc.low %vm20916_vm2, %vm6943_vm5  ;;  %v6666_v32 = vmax.f32 %v6640_v3, 0.0  ;;  %v6670_v44 = vmax.f32 %v6644_v53, 0.0  ;;  %11734 = vmatpush3.bf16.msk.msra.mxu0 %vm18223_vm9, %v12758_v47  ;;  %v6667_v18 = vmax.f32 %v6642_v22, 0.0  ;;  %vm20921_vm3 = vcmask 1031168   ;;  %11317 = vmatprep.subr.msk.bf16.mxu1 %vm18242_vm12, %v12758_v47 }
 0x88a   : > { %vm18290_vm5 = vmpackc.low %vm6948_vm10, %vm6945_vm8  ;;  %v6671_v13 = vmax.f32 %v6646_v43, 0.0  ;;  %11357 = vmatprep.mubr.msk.bf16.mxu1 %vm20921_vm3, %v18052_v36  ;;  %vm6952_vm10 = vcmp.eq.s32.totalorder %v18114_v6, %v17193_v61  ;;  %vm6951_vm2 = vcmp.eq.s32.totalorder %v18089_v33, %v17235_v45  ;;  %11735 = vmatprep.subr.msk.bf16.mxu0 %vm18257_vm13, %v12758_v47  ;;  %vm6956_vm12 = vcmp.eq.s32.totalorder %v6799_v23, %v17197_v9 }
 0x88b   : > { %vm20922_vm9 = vmmov %vm20921_vm3  ;;  %v18314_v31 = vpack.c.bf16 %v6670_v44, %v6666_v32  ;;  %vm6954_vm3 = vcmp.eq.s32.totalorder %v18114_v6, %v17235_v45  ;;  %vm6959_vm13 = vcmp.eq.s32.totalorder %v6800_v62, %v17197_v9 }
 0x88c   : > { %11422 = vmatprep.mubr.msk.bf16.mxu0 %vm20922_vm9, %v18052_v36  ;;  %vm18306_vm8 = vmpackc.low %vm6953_vm6, %vm6950_vm1  ;;  %vm20925_vm1 = vcmp.eq.s32.totalorder %v18162_v38, %v17235_v45  ;;  %v12759_v36 = vmov 0.0   ;;  %v18338_v52 = vpack.c.bf16 %v6671_v13, %v6667_v18  ;;  %11319 = vmatpush1.bf16.msk.msra.mxu1 %vm18270_vm7, %v12758_v47 }
 0x88d   : > { %vm11420_vm6 = vmpackc.low %vm7002_vm0, %vm20925_vm1  ;;  %v7197_v16 = vsel %vm7005_vm15, 0.25, %v12759_v36  ;;  %v7200_v55 = vsel %vm7008_vm14, 0.25, %v12759_v36  ;;  %11736 = vmatpush3.bf16.msk.msra.mxu0 %vm18290_vm5, %v12758_v47  ;;  %vm20926_vm0 = vcmp.eq.s32.totalorder %v18089_v33, %v17193_v61  ;;  %11321 = vmatprep.subr.msk.bf16.mxu1 %vm18306_vm8, %v12758_v47  ;;  %vm6955_vm14 = vcmp.eq.s32.totalorder %v6799_v23, %v17193_v61 }
 0x88e   : > { %vm11322_vm15 = vmpackc.low %vm6952_vm10, %vm20926_vm0  ;;  %11737 = vmatprep.subr.msk.bf16.mxu0 %vm11420_vm6, %v12758_v47  ;;  %v7296_v5 = vpack.c.bf16 %v7200_v55, %v7197_v16  ;;  %vm6958_vm5 = vcmp.eq.s32.totalorder %v6800_v62, %v17193_v61  ;;  %vm6957_vm1 = vcmp.eq.s32.totalorder %v6799_v23, %v17235_v45  ;;  %vm6960_vm10 = vcmp.eq.s32.totalorder %v6800_v62, %v17235_v45 }
 0x88f   : > { %vm11404_vm7 = vmpackc.low %vm6954_vm3, %vm6951_vm2  ;;  %vm20927_vm6 = vcmask 1046528   ;;  %vm6968_vm3 = vcmp.eq.s32.totalorder %v17840_v39, %v17197_v9  ;;  %vm6967_vm0 = vcmp.eq.s32.totalorder %v17840_v39, %v17193_v61 }
 0x890   : > { %vm11324_vm9 = vmpackc.low %vm6959_vm13, %vm6956_vm12  ;;  %11323 = vmatpush1.bf16.msk.msra.mxu1 %vm11322_vm15, %v12758_v47  ;;  %vm6971_vm12 = vcmp.eq.s32.totalorder %v17844_v7, %v17197_v9  ;;  %vm6970_vm15 = vcmp.eq.s32.totalorder %v17844_v7, %v17193_v61 }
 0x891   : > { %11738 = vmatpush3.bf16.msk.msra.mxu0 %vm11404_vm7, %v12758_v47  ;;  %vm11326_vm8 = vmpackc.low %vm6958_vm5, %vm6955_vm14  ;;  %11325 = vmatprep.subr.msk.bf16.mxu1 %vm11324_vm9, %v12758_v47  ;;  %vm6974_vm7 = vcmp.eq.s32.totalorder %v17860_v20, %v17197_v9  ;;  %vm6977_vm14 = vcmp.eq.s32.totalorder %v17862_v27, %v17197_v9 }
 0x892   : > { %12244 = vmatprep.subr.msk.bf16.mxu0 %vm20927_vm6, %v7296_v5  ;;  %vm11406_vm2 = vmpackc.low %vm6960_vm10, %vm6957_vm1  ;;  %vm6973_vm1 = vcmp.eq.s32.totalorder %v17860_v20, %v17193_v61  ;;  %vm6976_vm10 = vcmp.eq.s32.totalorder %v17862_v27, %v17193_v61  ;;  %vm6983_vm6 = vcmp.eq.s32.totalorder %v17900_v50, %v17197_v9 }
 0x893   : > { %vm11332_vm13 = vmpackc.low %vm6971_vm12, %vm6968_vm3  ;;  %vm6979_vm3 = vcmp.eq.s32.totalorder %v17898_v12, %v17193_v61  ;;  %vm6982_vm12 = vcmp.eq.s32.totalorder %v17900_v50, %v17193_v61 }
 0x894   : > { %11327 = vmatpush1.bf16.msk.msra.mxu1 %vm11326_vm8, %v12758_v47  ;;  %vm11334_vm5 = vmpackc.low %vm6970_vm15, %vm6967_vm0  ;;  %vm6980_vm8 = vcmp.eq.s32.totalorder %v17898_v12, %v17197_v9  ;;  %vm6989_vm0 = vcmp.eq.s32.totalorder %v17923_v56, %v17197_v9 }
 0x895   : > { %11740 = vmatpush3.bf16.msk.msra.mxu0 %vm11406_vm2, %v12758_v47  ;;  %11329 = vmatprep.subr.msk.bf16.mxu1 %vm17822_vm11, %v12758_v47  ;;  %vm20928_vm11 = vcmask 1031168   ;;  %vm11336_vm9 = vmpackc.low %vm6977_vm14, %vm6974_vm7 }
 0x896   : > { %vm11340_vm2 = vmpackc.low %vm6983_vm6, %vm6980_vm8  ;;  %vm6991_vm6 = vcmp.eq.s32.totalorder %v17969_v58, %v17193_v61 }
 0x897   : > { %vm20929_vm15 = vmmov %vm20928_vm11 }
 0x898   : > { %7532 = vmatmul.mubr.bf16.vlgmr.msra.gmra.mrb[76].mxu0 %v18034_v63  ;;  %11331 = vmatpush1.bf16.msk.msra.mxu1 %vm17826_vm4, %v12758_v47  ;;  %vm11338_vm4 = vmpackc.low %vm6976_vm10, %vm6973_vm1  ;;  %vm6995_vm1 = vcmp.eq.s32.totalorder %v17987_v37, %v17197_v9 }
 0x899   : > { %11423 = vmatprep.mubr.msk.bf16.mxu0 %vm20928_vm11, %v18194_v51  ;;  %11333 = vmatprep.subr.msk.bf16.mxu1 %vm11332_vm13, %v12758_v47  ;;  %vm6986_vm13 = vcmp.eq.s32.totalorder %v17921_v40, %v17197_v9  ;;  %vm11342_vm7 = vmpackc.low %vm6982_vm12, %vm6979_vm3  ;;  %vm6985_vm11 = vcmp.eq.s32.totalorder %v17921_v40, %v17193_v61  ;;  %vm7001_vm3 = vcmp.eq.s32.totalorder %v18192_v54, %v17197_v9 }
 0x89a   : > { %vm11344_vm14 = vmpackc.low %vm6989_vm0, %vm6986_vm13  ;;  %vm7004_vm12 = vcmp.eq.s32.totalorder %v18206_v0, %v17197_v9  ;;  %vm7007_vm13 = vcmp.eq.s32.totalorder %v18208_v41, %v17197_v9  ;;  %vm7003_vm0 = vcmp.eq.s32.totalorder %v18206_v0, %v17193_v61 }
 0x89b   : > { %v7199_v45 = vsel %vm7007_vm13, 0.25, %v12759_v36  ;;  %v7195_v8 = vsel %vm7003_vm0, 0.25, %v12759_v36 }
 0x89c   : > { %11335 = vmatpush1.bf16.msk.msra.mxu1 %vm11334_vm5, %v12758_v47  ;;  %vm6988_vm5 = vcmp.eq.s32.totalorder %v17923_v56, %v17193_v61 }
 0x89d   : > { %11337 = vmatprep.subr.msk.bf16.mxu1 %vm11336_vm9, %v12758_v47  ;;  %vm6992_vm9 = vcmp.eq.s32.totalorder %v17969_v58, %v17197_v9  ;;  %vm11346_vm10 = vmpackc.low %vm6988_vm5, %vm6985_vm11  ;;  %vm7000_vm11 = vcmp.eq.s32.totalorder %v18192_v54, %v17193_v61 }
 0x89e   : > { %vm11348_vm8 = vmpackc.low %vm6995_vm1, %vm6992_vm9  ;;  %vm20930_vm1 = vcmask 1046528  }
 0x8a0   : > { %7540 = vmatmul.mubr.bf16.gmra.mrb[80].mxu0 %v18180_v14  ;;  %11339 = vmatpush1.bf16.msk.msra.mxu1 %vm11338_vm4, %v12758_v47  ;;  %vm6994_vm4 = vcmp.eq.s32.totalorder %v17987_v37, %v17193_v61 }
 0x8a1   : > { %11424 = vmatprep.mubr.msk.bf16.mxu0 %vm20929_vm15, %v18338_v52  ;;  %11341 = vmatprep.subr.msk.bf16.mxu1 %vm11340_vm2, %v12758_v47  ;;  %vm6998_vm2 = vcmp.eq.s32.totalorder %v18162_v38, %v17197_v9  ;;  %vm7006_vm15 = vcmp.eq.s32.totalorder %v18208_v41, %v17193_v61  ;;  %v7196_v9 = vsel %vm7004_vm12, 0.25, %v12759_v36 }
 0x8a2   : > { %vm11352_vm5 = vmpackc.low %vm7001_vm3, %vm6998_vm2  ;;  %v7198_v17 = vsel %vm7006_vm15, 0.25, %v12759_v36  ;;  %v7295_v39 = vpack.c.bf16 %v7199_v45, %v7196_v9  ;;  %vm20934_vm2 = vcmask 1039360  }
 0x8a3   : > { %v7294_v7 = vpack.c.bf16 %v7198_v17, %v7195_v8  ;;  %vm20935_vm3 = vmmov %vm20934_vm2 }
 0x8a4   : > { %11343 = vmatpush1.bf16.msk.msra.mxu1 %vm11342_vm7, %v12758_v47  ;;  %vm11350_vm7 = vmpackc.low %vm6994_vm4, %vm6991_vm6  ;;  %vm7657_vm4 = vcmask 130048  }
 0x8a5   : > { %11345 = vmatprep.subr.msk.bf16.mxu1 %vm11344_vm14, %v12758_v47  ;;  %vm6997_vm14 = vcmp.eq.s32.totalorder %v18162_v38, %v17193_v61  ;;  %vm20936_vm12 = vmmov %vm20934_vm2 }
 0x8a6   : > { %vm11354_vm9 = vmpackc.low %vm7000_vm11, %vm6997_vm14 }
 0x8a7   : > { %vm20937_vm13 = vmmov %vm20934_vm2 }
 0x8a8   : > { %7548 = vmatmul.mubr.bf16.gmra.mrb[84].mxu0 %v18314_v31  ;;  %11347 = vmatpush1.bf16.msk.msra.mxu1 %vm11346_vm10, %v12758_v47  ;;  %vm20931_vm10 = vmmov %vm20930_vm1 }
 0x8a9   : > { %11349 = vmatprep.subr.msk.bf16.mxu1 %vm11348_vm8, %v12758_v47  ;;  %v7308_v61 = vsel %vm20931_vm10, %v7294_v7, 0  ;;  %vm20932_vm8 = vcmask 1031168   ;;  %vm20938_vm0 = vmmov %vm20934_vm2  ;;  %vm12760_vm10 = vmmov 0  }
 0x8aa   : > { %vm20933_vm6 = vmmov %vm20932_vm8 }
 0x8ab   : > { %vm20939_vm15 = vmmov %vm20938_vm0 }
 0x8ac   : > { %11351 = vmatpush1.bf16.msk.msra.mxu1 %vm11350_vm7, %v12758_v47  ;;  %vm20940_vm7 = vmmov %vm20933_vm6 }
 0x8ad   : > { %11353 = vmatprep.subr.msk.bf16.mxu1 %vm11352_vm5, %v12758_v47  ;;  %vm20941_vm14 = vmmov %vm20933_vm6 }
 0x8ae   : > { %vm20942_vm11 = vmmov %vm20933_vm6 }
 0x8af   : > { %vm20943_vm5 = vmmov %vm20933_vm6 }
 0x8b0   : > { %11355 = vmatpush1.bf16.msk.msra.mxu1 %vm11354_vm9, %v12758_v47  ;;  %vm20944_vm9 = vmmov %vm20943_vm5 }
 0x8b1   : > { %11356 = vmatprep.subr.msk.bf16.mxu1 %vm20930_vm1, %v7295_v39  ;;  %vm20945_vm1 = vmmov %vm20943_vm5 }
 0x8b4   : > { %7410 = vmatpush1.bf16.msra.mxu1 %v7308_v61 }
 0x8b7   : > { %7412 = vmatmul.mubr.bf16.vlgmr.msra.gmra.mrb[64].mxu1 %v18034_v63 }
 0x8b8   : > { %11358 = vmatprep.mubr.msk.bf16.mxu1 %vm20932_vm8, %v18194_v51  ;;  %vm10500_vm8 = vcmask 523264  }
 0x8bf   : > { %7422 = vmatmul.mubr.bf16.gmra.mrb[68].mxu1 %v18180_v14 }
 0x8c0   : > { %11359 = vmatprep.mubr.msk.bf16.mxu1 %vm20933_vm6, %v18338_v52 }
 0x8c7   : > { %7432 = vmatmul.mubr.bf16.gmra.mrb[72].mxu1 %v18314_v31 }
 0x948   : > { %v11707_v20 = vpop.f32.mrb[64].mxu0 }
 0x949   : > { %v11708_v27 = vpop.f32.mrb[65].mxu0 }
 0x94a   : > { %v11709_v47 = vadd.f32 %v11708_v27, %v11707_v20  ;;  %v11710_v12 = vpop.f32.mrb[66].mxu0  ;;  %v12341_v20 = vld [vmem:[%s19352_s5 + $0x4] ss:$8 sps:$4 sm:$0xff]  }
 0x94b   : > { %v11711_v50 = vpop.f32.mrb[67].mxu0  ;;  %11427 = vmatprep.mubr.msk.bf16.mxu0 %vm7657_vm4, %v12341_v20  ;;  %v7637_v27 = vld [vmem:[%s19353_s6 + $0x8] sm:$0xff]  ;;  %v12371_v20 = vld [vmem:[%s19354_s7 + $0x38] sm:$0xff]  }
 0x94c   : > { %v11712_v40 = vadd.f32 %v11711_v50, %v11710_v12  ;;  %v12344_v12 = vld [vmem:[%s19354_s7 + $0xc0] sm:$0xff]  }
 0x94d   : > { %v12345_v50 = vld [vmem:[%s19354_s7 + $0x80] sm:$0xff]   ;;  %11781 = vmatprep.subr.bf16.mxu1 %v12344_v12 }
 0x94e   : > { %11782 = vmatpush3.bf16.msra.mxu1 %v12345_v50  ;;  %v12374_v12 = vld [vmem:[%s19354_s7 + $0x140] sm:$0xff]  }
 0x94f   : > { %v12376_v50 = vld [vmem:[%s19354_s7 + $0x1c0] sm:$0xff]  }
 0x951   : > { %v11713_v56 = vpop.f32.mrb[68].mxu0 }
 0x952   : > { %v11714_v58 = vpop.f32.mrb[69].mxu0 }
 0x953   : > { %v11715_v37 = vadd.f32 %v11714_v58, %v11713_v56  ;;  %v11716_v63 = vpop.f32.mrb[70].mxu0  ;;  %v12349_v56 = vld [vmem:[%s19354_s7 + $0x88] sm:$0xff]   ;;  %v12352_v58 = vld [vmem:[%s19354_s7 + $0xd0] sm:$0xff]  }
 0x954   : > { %v11717_v33 = vpop.f32.mrb[71].mxu0 }
 0x955   : > { %v11718_v6 = vadd.f32 %v11717_v33, %v11716_v63  ;;  %v12356_v63 = vld [vmem:[%s19354_s7 + $0xd8] sm:$0xff]  }
 0x956   : > { %v12357_v33 = vld [vmem:[%s19354_s7 + $0x98] sm:$0xff]  }
 0x95a   : > { %v11719_v60 = vpop.f32.mrb[72].mxu0 }
 0x95b   : > { %v11720_v42 = vpop.f32.mrb[73].mxu0 }
 0x95c   : > { %v11721_v38 = vadd.f32 %v11720_v42, %v11719_v60  ;;  %v11722_v46 = vpop.f32.mrb[74].mxu0  ;;  %v12361_v60 = vld [vmem:[%s19354_s7 + $0xa0] sm:$0xff]  }
 0x95d   : > { %v11723_v28 = vpop.f32.mrb[75].mxu0 }
 0x95e   : > { %v11724_v30 = vadd.f32 %v11723_v28, %v11722_v46 }
 0x96b   : > { %v11741_v19 = vpop.f32.mrb[76].mxu0 }
 0x96c   : > { %v11742_v15 = vpop.f32.mrb[77].mxu0 }
 0x96d   : > { %v11743_v4 = vadd.f32 %v11742_v15, %v11741_v19  ;;  %v11744_v14 = vpop.f32.mrb[78].mxu0 }
 0x96e   : > { %v11745_v34 = vpop.f32.mrb[79].mxu0 }
 0x96f   : > { %v7534_v35 = vadd.f32 %v11743_v4, %v11709_v47  ;;  %v11746_v54 = vadd.f32 %v11745_v34, %v11744_v14  ;;  %v7636_v47 = vld [vmem:[%s19353_s6] sm:$0xff] }
 0x971   : > { %v7537_v1 = vadd.f32 %v11746_v54, %v11712_v40  ;;  %v12348_v40 = vld [vmem:[%s19354_s7 + $0xc8] sm:$0xff]  }
 0x972   : > { %11783 = vmatprep.subr.bf16.mxu1 %v12348_v40 }
 0x973   : > { %v11747_v51 = vpop.f32.mrb[80].mxu0  ;;  %v7558_v24 = vpack.c.bf16 %v7537_v1, %v7534_v35  ;;  %11784 = vmatpush3.bf16.msra.mxu1 %v12349_v56 }
 0x974   : > { %v11748_v26 = vpop.f32.mrb[81].mxu0  ;;  %11785 = vmatprep.subr.bf16.mxu1 %v12352_v58 }
 0x975   : > { %v11749_v0 = vadd.f32 %v11748_v26, %v11747_v51  ;;  %v11750_v41 = vpop.f32.mrb[82].mxu0  ;;  %7578 = vrot.lane.b32.xlu0 %v7558_v24, %s12756_s14 }
 0x976   : > { %v11751_v29 = vpop.f32.mrb[83].mxu0 }
 0x977   : > { %v7542_v3 = vadd.f32 %v11749_v0, %v11715_v37  ;;  %v11752_v10 = vadd.f32 %v11751_v29, %v11750_v41  ;;  %v12353_v37 = vld [vmem:[%s19354_s7 + $0x90] sm:$0xff]  }
 0x978   : > { %11786 = vmatpush3.bf16.msra.mxu1 %v12353_v37 }
 0x979   : > { %v7545_v59 = vadd.f32 %v11752_v10, %v11718_v6  ;;  %11787 = vmatprep.subr.bf16.mxu1 %v12356_v63  ;;  %v12360_v6 = vld [vmem:[%s19354_s7 + $0xe0] sm:$0xff]  }
 0x97b   : > { %v11753_v22 = vpop.f32.mrb[84].mxu0  ;;  %v7561_v11 = vpack.c.bf16 %v7545_v59, %v7542_v3 }
 0x97c   : > { %v11754_v25 = vpop.f32.mrb[85].mxu0  ;;  %11788 = vmatpush3.bf16.msra.mxu1 %v12357_v33 }
 0x97d   : > { %v11755_v53 = vadd.f32 %v11754_v25, %v11753_v22  ;;  %v11756_v21 = vpop.f32.mrb[86].mxu0  ;;  %7584 = vrot.lane.b32.xlu1 %v7561_v11, %s12756_s14  ;;  %11789 = vmatprep.subr.bf16.mxu1 %v12360_v6 }
 0x97e   : > { %v11757_v57 = vpop.f32.mrb[87].mxu0 }
 0x97f   : > { %v7550_v23 = vadd.f32 %v11755_v53, %v11721_v38  ;;  %v11758_v62 = vadd.f32 %v11757_v57, %v11756_v21 }
 0x980   : > { %11790 = vmatpush3.bf16.msra.mxu1 %v12361_v60 }
 0x981   : > { %v7553_v43 = vadd.f32 %v11758_v62, %v11724_v30 }
 0x983   : > { %v7564_v2 = vpack.c.bf16 %v7553_v43, %v7550_v23  ;;  %v12342_v23 = vld [vmem:[%s19354_s7 + $0x40] sm:$0xff]  }
 0x985   : > { %7590 = vrot.lane.b32.xlu0 %v7564_v2, %s12756_s14 }
 0x98a   : > { %v7413_v32 = vpop.f32.mrb[64].mxu1 }
 0x98b   : > { %v7415_v44 = vpop.f32.mrb[65].mxu1 }
 0x98c   : > { %v7417_v48 = vpop.f32.mrb[66].mxu1 }
 0x98d   : > { %v7556_v18 = vpack.c.bf16 %v7417_v48, %v7413_v32  ;;  %v7419_v13 = vpop.f32.mrb[67].mxu1  ;;  %v12343_v32 = vld [vmem:[%s19354_s7] sm:$0xff]   ;;  %v12347_v48 = vld [vmem:[%s19354_s7 + $0x8] sm:$0xff]  }
 0x98e   : > { %v7557_v49 = vpack.c.bf16 %v7419_v13, %v7415_v44  ;;  %v12346_v44 = vld [vmem:[%s19354_s7 + $0x48] sm:$0xff]   ;;  %v12351_v13 = vld [vmem:[%s19354_s7 + $0x10] sm:$0xff]  }
 0x98f   : > { %7574 = vrot.lane.b32.xlu1 %v7556_v18, %s12756_s14 }
 0x990   : > { %7661 = vmatprep.subr.bf16.mxu0 %v7557_v49 }
 0x991   : > { %7662 = vmatpush1.bf16.msra.mxu0 %v7556_v18 }
 0x992   : > { %v7423_v31 = vpop.f32.mrb[68].mxu1 }
 0x993   : > { %7576 = vrot.lane.b32.xlu1 %v7557_v49, %s12756_s14  ;;  %v7425_v16 = vpop.f32.mrb[69].mxu1 }
 0x994   : > { %v7427_v55 = vpop.f32.mrb[70].mxu1 }
 0x995   : > { %v7559_v52 = vpack.c.bf16 %v7427_v55, %v7423_v31  ;;  %v7429_v5 = vpop.f32.mrb[71].mxu1  ;;  %v12355_v31 = vld [vmem:[%s19354_s7 + $0x18] sm:$0xff]   ;;  %v12359_v55 = vld [vmem:[%s19354_s7 + $0x20] sm:$0xff]  }
 0x996   : > { %v7560_v9 = vpack.c.bf16 %v7429_v5, %v7425_v16  ;;  %v12358_v16 = vld [vmem:[%s19354_s7 + $0x60] sm:$0xff]   ;;  %v12363_v5 = vld [vmem:[%s19354_s7 + $0x28] sm:$0xff]  }
 0x997   : > { %7608 = vrot.lane.b32.xlu1 %v7558_v24, %s12757_s15  ;;  %7580 = vrot.lane.b32.xlu0 %v7559_v52, %s12756_s14 }
 0x998   : > { %7663 = vmatprep.subr.bf16.mxu0 %v7560_v9 }
 0x999   : > { %7664 = vmatpush1.bf16.msra.mxu0 %v7559_v52 }
 0x99a   : > { %v7433_v45 = vpop.f32.mrb[72].mxu1 }
 0x99b   : > { %7582 = vrot.lane.b32.xlu0 %v7560_v9, %s12756_s14  ;;  %v7435_v8 = vpop.f32.mrb[73].mxu1 }
 0x99c   : > { %v7437_v17 = vpop.f32.mrb[74].mxu1 }
 0x99d   : > { %v7562_v39 = vpack.c.bf16 %v7437_v17, %v7433_v45  ;;  %v7439_v7 = vpop.f32.mrb[75].mxu1  ;;  %v12365_v45 = vld [vmem:[%s19354_s7 + $0xa8] sm:$0xff]   ;;  %v12367_v17 = vld [vmem:[%s19354_s7 + $0x30] sm:$0xff]  }
 0x99e   : > { %v7563_v61 = vpack.c.bf16 %v7439_v7, %v7435_v8  ;;  %v12366_v8 = vld [vmem:[%s19354_s7 + $0x70] sm:$0xff]  }
 0x99f   : > { %7606 = vrot.lane.b32.xlu0 %v7557_v49, %s12757_s15  ;;  %7586 = vrot.lane.b32.xlu1 %v7562_v39, %s12756_s14  ;;  %v12354_v49 = vld [vmem:[%s19354_s7 + $0x58] sm:$0xff]   ;;  %v12369_v7 = vld [vmem:[%s19354_s7 + $0xb0] sm:$0xff]  }
 0x9a0   : > { %7665 = vmatprep.subr.bf16.mxu0 %v7563_v61 }
 0x9a1   : > { %7666 = vmatpush1.bf16.msra.mxu0 %v7562_v39 }
 0x9a3   : > { %7604 = vrot.lane.b32.xlu0 %v7556_v18, %s12757_s15  ;;  %7588 = vrot.lane.b32.xlu1 %v7563_v61, %s12756_s14  ;;  %v12350_v18 = vld [vmem:[%s19354_s7 + $0x50] sm:$0xff]  }
 0x9a7   : > { %7614 = vrot.lane.b32.xlu0 %v7561_v11, %s12757_s15  ;;  %7612 = vrot.lane.b32.xlu1 %v7560_v9, %s12757_s15  ;;  %v12364_v9 = vld [vmem:[%s19354_s7 + $0xe8] sm:$0xff]  }
 0x9a8   : > { %11791 = vmatprep.subr.bf16.mxu1 %v12364_v9  ;;  %v12408_v9 = vld [vmem:[%s19354_s7 + $0x2c0] sm:$0xff]  }
 0x9a9   : > { %11792 = vmatpush3.bf16.msra.mxu1 %v12365_v45  ;;  %v12407_v45 = vld [vmem:[%s19354_s7 + $0x200] sm:$0xff]  }
 0x9ab   : > { %7618 = vrot.lane.b32.xlu0 %v7563_v61, %s12757_s15  ;;  %7610 = vrot.lane.b32.xlu1 %v7559_v52, %s12757_s15  ;;  %v12362_v52 = vld [vmem:[%s19354_s7 + $0x68] sm:$0xff]   ;;  %v12370_v61 = vld [vmem:[%s19354_s7 + $0x78] sm:$0xff]  }
 0x9af   : > { %7616 = vrot.lane.b32.xlu0 %v7562_v39, %s12757_s15  ;;  %7620 = vrot.lane.b32.xlu1 %v7564_v2, %s12757_s15  ;;  %v12339_v2 = vld [vmem:[%s19352_s5] ss:$8 sps:$4 sm:$0xff]   ;;  %v12368_v39 = vld [vmem:[%s19354_s7 + $0xf0] sm:$0xff]  }
 0x9b0   : > { %11793 = vmatprep.subr.bf16.mxu1 %v12368_v39 }
 0x9b1   : > { %11794 = vmatpush3.bf16.msra.mxu1 %v12369_v7  ;;  %v12409_v7 = vld [vmem:[%s19354_s7 + $0x280] sm:$0xff]  }
 0x9b3   : > { %7645 = vperm.xlu0 %12261, %v7637_v27   ;;  %7640 = vperm.xlu1 %12262, %v7636_v47   ;;  %v12372_v27 = vld [vmem:[%s19354_s7 + $0xf8] sm:$0xff]  }
 0x9b4   : > { %v12373_v47 = vld [vmem:[%s19354_s7 + $0xb8] sm:$0xff]   ;;  %11795 = vmatprep.subr.bf16.mxu1 %v12372_v27 }
 0x9b5   : > { %11796 = vmatpush3.bf16.msra.mxu1 %v12373_v47  ;;  %v12411_v47 = vld [vmem:[%s19354_s7 + $0x208] sm:$0xff]  }
 0x9b6   : > { %11825 = vmatprep.subr.bf16.mxu1 %v12376_v50  ;;  %v12413_v50 = vld [vmem:[%s19354_s7 + $0x288] sm:$0xff]  }
 0x9e7   : > { %v7579_v38 = vpop.permute.xlu0 %7578 }
 0x9ef   : > { %v7585_v42 = vpop.permute.xlu1 %7584 }
 0x9f7   : > { %v7591_v28 = vpop.permute.xlu0 %7590 }
 0xa01   : > { %v7575_v46 = vpop.permute.xlu1 %7574 }
 0xa05   : > { %v7577_v30 = vpop.permute.xlu1 %7576 }
 0xa06   : > { %v7592_v19 = vsel %vm20934_vm2, %v7575_v46, %v7577_v30  ;;  %v7593_v15 = vsel %vm20935_vm3, %v7577_v30, %v7579_v38 }
 0xa07   : > { %7667 = vmatprep.subr.bf16.mxu0 %v7593_v15 }
 0xa08   : > { %7668 = vmatpush1.bf16.msra.mxu0 %v7592_v19 }
 0xa09   : > { %v7581_v4 = vpop.permute.xlu0 %7580  ;;  %v7609_v14 = vpop.permute.xlu1 %7608 }
 0xa0d   : > { %v7583_v34 = vpop.permute.xlu0 %7582 }
 0xa0e   : > { %v7594_v35 = vsel %vm20936_vm12, %v7581_v4, %v7583_v34  ;;  %v7595_v54 = vsel %vm20937_vm13, %v7583_v34, %v7585_v42 }
 0xa0f   : > { %7669 = vmatprep.subr.bf16.mxu0 %v7595_v54  ;;  %v12377_v54 = vld [vmem:[%s19354_s7 + $0x180] sm:$0xff]  }
 0xa10   : > { %7670 = vmatpush1.bf16.msra.mxu0 %v7594_v35 }
 0xa11   : > { %v7607_v1 = vpop.permute.xlu0 %7606  ;;  %v7587_v51 = vpop.permute.xlu1 %7586 }
 0xa12   : > { %v7623_v29 = vsel %vm20940_vm7, %v7607_v1, %v7609_v14  ;;  %v12375_v14 = vld [vmem:[%s19354_s7 + $0x100] sm:$0xff]  }
 0xa15   : > { %v7605_v24 = vpop.permute.xlu0 %7604  ;;  %v7589_v26 = vpop.permute.xlu1 %7588 }
 0xa16   : > { %v7596_v0 = vsel %vm20938_vm0, %v7587_v51, %v7589_v26  ;;  %v7597_v41 = vsel %vm20939_vm15, %v7589_v26, %v7591_v28  ;;  %v7622_v59 = vsel %vm20941_vm14, %v7605_v24, %v7607_v1  ;;  %v12378_v1 = vld [vmem:[%s19354_s7 + $0x148] sm:$0xff]  }
 0xa17   : > { %7671 = vmatprep.subr.bf16.mxu0 %v7597_v41  ;;  %v12380_v24 = vld [vmem:[%s19354_s7 + $0x1c8] sm:$0xff]   ;;  %v12382_v41 = vld [vmem:[%s19354_s7 + $0x150] sm:$0xff]  }
 0xa18   : > { %7672 = vmatpush1.bf16.msra.mxu0 %v7596_v0  ;;  %v12379_v0 = vld [vmem:[%s19354_s7 + $0x108] sm:$0xff]  }
 0xa19   : > { %v7615_v3 = vpop.permute.xlu0 %7614  ;;  %v7613_v10 = vpop.permute.xlu1 %7612  ;;  %7673 = vmatprep.subr.bf16.mxu0 %v7623_v29  ;;  %v12381_v29 = vld [vmem:[%s19354_s7 + $0x188] sm:$0xff]  }
 0xa1a   : > { %v7625_v22 = vsel %vm20942_vm11, %v7613_v10, %v7615_v3  ;;  %v12384_v3 = vld [vmem:[%s19354_s7 + $0x1d0] sm:$0xff]  }
 0xa1c   : > { %7674 = vmatpush1.bf16.msra.mxu0 %v7622_v59  ;;  %v12386_v59 = vld [vmem:[%s19354_s7 + $0x158] sm:$0xff]  }
 0xa1d   : > { %v7619_v11 = vpop.permute.xlu0 %7618  ;;  %v7611_v25 = vpop.permute.xlu1 %7610  ;;  %7675 = vmatprep.subr.bf16.mxu0 %v7625_v22  ;;  %v12385_v22 = vld [vmem:[%s19354_s7 + $0x190] sm:$0xff]  }
 0xa1e   : > { %v7624_v53 = vsel %vm20943_vm5, %v7611_v25, %v7613_v10  ;;  %v12383_v10 = vld [vmem:[%s19354_s7 + $0x110] sm:$0xff]   ;;  %v12387_v25 = vld [vmem:[%s19354_s7 + $0x118] sm:$0xff]  }
 0xa20   : > { %7676 = vmatpush1.bf16.msra.mxu0 %v7624_v53  ;;  %v12390_v53 = vld [vmem:[%s19354_s7 + $0x160] sm:$0xff]  }
 0xa21   : > { %v7617_v21 = vpop.permute.xlu0 %7616  ;;  %v7621_v57 = vpop.permute.xlu1 %7620 }
 0xa22   : > { %v7626_v62 = vsel %vm20944_vm9, %v7617_v21, %v7619_v11  ;;  %v7627_v43 = vsel %vm20945_vm1, %v7619_v11, %v7621_v57  ;;  %v12388_v11 = vld [vmem:[%s19354_s7 + $0x1d8] sm:$0xff]   ;;  %v12392_v57 = vld [vmem:[%s19354_s7 + $0x1e0] sm:$0xff]  }
 0xa23   : > { %7677 = vmatprep.subr.bf16.mxu0 %v7627_v43  ;;  %v12389_v21 = vld [vmem:[%s19354_s7 + $0x198] sm:$0xff]   ;;  %v12393_v43 = vld [vmem:[%s19354_s7 + $0x1a0] sm:$0xff]  }
 0xa24   : > { %7678 = vmatpush1.bf16.msra.mxu0 %v7626_v62  ;;  %v12394_v62 = vld [vmem:[%s19354_s7 + $0x168] sm:$0xff]  }
 0xa25   : > { %11759 = vmatprep.subr.bf16.mxu0 %v12342_v23  ;;  %v12391_v23 = vld [vmem:[%s19354_s7 + $0x120] sm:$0xff]  }
 0xa27   : > { %7694 = vmatmul.mubr.bf16.vlgmr.msra.gmra.mrb[88].mxu0 %v12339_v2  ;;  %v12396_v2 = vld [vmem:[%s19354_s7 + $0x1e8] sm:$0xff]  }
 0xa28   : > { %11760 = vmatpush3.bf16.msra.mxu0 %v12343_v32  ;;  %v12395_v32 = vld [vmem:[%s19354_s7 + $0x128] sm:$0xff]  }
 0xa29   : > { %11761 = vmatprep.subr.bf16.mxu0 %v12346_v44  ;;  %v12398_v44 = vld [vmem:[%s19354_s7 + $0x170] sm:$0xff]  }
 0xa2c   : > { %11762 = vmatpush3.bf16.msra.mxu0 %v12347_v48  ;;  %v12397_v48 = vld [vmem:[%s19354_s7 + $0x1a8] sm:$0xff]  }
 0xa2d   : > { %11763 = vmatprep.subr.bf16.mxu0 %v12350_v18  ;;  %v12400_v18 = vld [vmem:[%s19354_s7 + $0x1f0] sm:$0xff]  }
 0xa30   : > { %11764 = vmatpush3.bf16.msra.mxu0 %v12351_v13  ;;  %v12399_v13 = vld [vmem:[%s19354_s7 + $0x130] sm:$0xff]  }
 0xa31   : > { %11765 = vmatprep.subr.bf16.mxu0 %v12354_v49  ;;  %v12402_v49 = vld [vmem:[%s19354_s7 + $0x178] sm:$0xff]  }
 0xa32   : > { %v7641_v40 = vpop.permute.xlu1 %7640  ;;  %v7646_v63 = vpop.permute.xlu0 %7645 }
 0xa34   : > { %11766 = vmatpush3.bf16.msra.mxu0 %v12355_v31  ;;  %v12401_v31 = vld [vmem:[%s19354_s7 + $0x1b0] sm:$0xff]  }
 0xa35   : > { %11767 = vmatprep.subr.bf16.mxu0 %v12358_v16  ;;  %v12404_v16 = vld [vmem:[%s19354_s7 + $0x1f8] sm:$0xff]  }
 0xa38   : > { %11768 = vmatpush3.bf16.msra.mxu0 %v12359_v55  ;;  %v12403_v55 = vld [vmem:[%s19354_s7 + $0x138] sm:$0xff]  }
 0xa39   : > { %11769 = vmatprep.subr.bf16.mxu0 %v12362_v52  ;;  %v12406_v52 = vld [vmem:[%s19354_s7 + $0x240] sm:$0xff]  }
 0xa3c   : > { %11770 = vmatpush3.bf16.msra.mxu0 %v12363_v5  ;;  %v12405_v5 = vld [vmem:[%s19354_s7 + $0x1b8] sm:$0xff]  }
 0xa3d   : > { %11771 = vmatprep.subr.bf16.mxu0 %v12366_v8 }
 0xa40   : > { %11772 = vmatpush3.bf16.msra.mxu0 %v12367_v17  ;;  %v12410_v17 = vld [vmem:[%s19354_s7 + $0x248] sm:$0xff]  }
 0xa41   : > { %11773 = vmatprep.subr.bf16.mxu0 %v12370_v61 }
 0xa44   : > { %11774 = vmatpush3.bf16.msra.mxu0 %v12371_v20  ;;  %v12412_v20 = vld [vmem:[%s19354_s7 + $0x2c8] sm:$0xff]  }
 0xa45   : > { %11803 = vmatprep.subr.bf16.mxu0 %v12374_v12  ;;  %v12414_v12 = vld [vmem:[%s19354_s7 + $0x250] sm:$0xff]  }
 0xafa   : > { %v7695_v56 = vpop.f32.mrb[88].mxu0 }
 0xafb   : > { %v7696_v58 = vadd.f32 %v7695_v56, %v7641_v40  ;;  %v7697_v37 = vpop.f32.mrb[89].mxu0  ;;  %v12415_v56 = vld [vmem:[%s19354_s7 + $0x210] sm:$0xff]  }
 0xafc   : > { %v7698_v33 = vadd.f32 %v7697_v37, %v7641_v40  ;;  %v7699_v6 = vpop.f32.mrb[90].mxu0  ;;  %v12416_v40 = vld [vmem:[%s19354_s7 + $0x2d0] sm:$0xff]  }
 0xafd   : > { %v7700_v60 = vadd.f32 %v7699_v6, %v7646_v63  ;;  %v7701_v42 = vpop.f32.mrb[91].mxu0  ;;  %v7704_v46 = vmax.f32 %v7696_v58, 0.0  ;;  %v12418_v58 = vld [vmem:[%s19354_s7 + $0x258] sm:$0xff]   ;;  %v12417_v37 = vld [vmem:[%s19354_s7 + $0x290] sm:$0xff]   ;;  %v12422_v6 = vld [vmem:[%s19354_s7 + $0x260] sm:$0xff]  }
 0xafe   : > { %v7702_v38 = vadd.f32 %v7701_v42, %v7646_v63  ;;  %v7705_v30 = vmax.f32 %v7698_v33, 0.0  ;;  %v12420_v63 = vld [vmem:[%s19354_s7 + $0x2d8] sm:$0xff]   ;;  %v12424_v42 = vld [vmem:[%s19354_s7 + $0x2e0] sm:$0xff]  }
 0xaff   : > { %v7706_v28 = vmax.f32 %v7700_v60, 0.0  ;;  %v12419_v33 = vld [vmem:[%s19354_s7 + $0x218] sm:$0xff]  }
 0xb00   : > { %v7707_v19 = vmax.f32 %v7702_v38, 0.0  ;;  %v12421_v60 = vld [vmem:[%s19354_s7 + $0x298] sm:$0xff]   ;;  %v12423_v38 = vld [vmem:[%s19354_s7 + $0x220] sm:$0xff]  }
 0xb01   : > { %v18609_v15 = vpack.c.bf16 %v7706_v28, %v7704_v46  ;;  %v12426_v46 = vld [vmem:[%s19354_s7 + $0x268] sm:$0xff]   ;;  %v12425_v28 = vld [vmem:[%s19354_s7 + $0x2a0] sm:$0xff]  }
 0xb02   : > { %v18611_v4 = vpack.c.bf16 %v7707_v19, %v7705_v30  ;;  %v12428_v30 = vld [vmem:[%s19354_s7 + $0x2e8] sm:$0xff]  }
 0xb03   : > { %v18629_v51 = vshrl.u32 %v18609_v15, 16  ;;  %v7720_v8 = vrot.slane %v18609_v15, 1  ;;  %v12427_v19 = vld [vmem:[%s19354_s7 + $0x228] sm:$0xff]  }
 0xb04   : > { %9857 = vmatprep.mubr.bf16.mxu0 %v18611_v4  ;;  %v18618_v34 = vshrl.u32 %v18611_v4, 16  ;;  %v7721_v35 = vrot.slane %v18611_v4, 1  ;;  %v7729_v39 = vrot.slane %v18611_v4, 2 }
 0xb05   : > { %9858 = vmatmul.mubr.bf16.vlgmr.msra.gmra.mrb[92].mxu0 %v18609_v15  ;;  %v7724_v61 = vrot.slane %v18629_v51, 1 }
 0xb06   : > { %11804 = vmatpush3.bf16.msra.mxu0 %v12375_v14  ;;  %9897 = vmatprep.mubr.bf16.mxu1 %v18618_v34  ;;  %v7725_v26 = vrot.slane %v18618_v34, 1  ;;  %v7733_v27 = vrot.slane %v18618_v34, 2  ;;  %v12430_v14 = vld [vmem:[%s19354_s7 + $0x270] sm:$0xff]  }
 0xb07   : > { %9937 = vmatprep.mubr.bf16.mxu0 %v7721_v35  ;;  %9898 = vmatmul.mubr.bf16.vlgmr.msra.gmra.mrb[76].mxu1 %v18629_v51  ;;  %v12429_v35 = vld [vmem:[%s19354_s7 + $0x2a8] sm:$0xff]  }
 0xb08   : > { %11826 = vmatpush3.bf16.msra.mxu1 %v12377_v54  ;;  %11805 = vmatprep.subr.bf16.mxu0 %v12378_v1  ;;  %v12432_v54 = vld [vmem:[%s19354_s7 + $0x2f0] sm:$0xff]  }
 0xb09   : > { %9977 = vmatprep.mubr.bf16.mxu1 %v7725_v26  ;;  %11827 = vmatprep.subr.bf16.mxu1 %v12380_v24  ;;  %v12431_v1 = vld [vmem:[%s19354_s7 + $0x230] sm:$0xff]   ;;  %v12434_v24 = vld [vmem:[%s19354_s7 + $0x278] sm:$0xff]  }
 0xb0a   : > { %11806 = vmatpush3.bf16.msra.mxu0 %v12379_v0  ;;  %v12433_v26 = vld [vmem:[%s19354_s7 + $0x2b0] sm:$0xff]   ;;  %v12436_v0 = vld [vmem:[%s19354_s7 + $0x2f8] sm:$0xff]  }
 0xb0b   : > { %11807 = vmatprep.subr.bf16.mxu0 %v12382_v41  ;;  %v12435_v41 = vld [vmem:[%s19354_s7 + $0x238] sm:$0xff]  }
 0xb0c   : > { %11828 = vmatpush3.bf16.msra.mxu1 %v12381_v29  ;;  %v12438_v29 = vld [vmem:[%s19354_s7 + $0x340] sm:$0xff]  }
 0xb0d   : > { %11829 = vmatprep.subr.bf16.mxu1 %v12384_v3  ;;  %v12437_v3 = vld [vmem:[%s19354_s7 + $0x2b8] sm:$0xff]  }
 0xb0e   : > { %11808 = vmatpush3.bf16.msra.mxu0 %v12383_v10  ;;  %v12440_v10 = vld [vmem:[%s19354_s7 + $0x3c0] sm:$0xff]  }
 0xb0f   : > { %11809 = vmatprep.subr.bf16.mxu0 %v12386_v59  ;;  %v12439_v59 = vld [vmem:[%s19354_s7 + $0x300] sm:$0xff]  }
 0xb10   : > { %11830 = vmatpush3.bf16.msra.mxu1 %v12385_v22  ;;  %v7728_v22 = vrot.slane %v18609_v15, 2 }
 0xb11   : > { %11831 = vmatprep.subr.bf16.mxu1 %v12388_v11  ;;  %v12442_v11 = vld [vmem:[%s19354_s7 + $0x348] sm:$0xff]  }
 0xb12   : > { %11810 = vmatpush3.bf16.msra.mxu0 %v12387_v25  ;;  %v7737_v25 = vrot.slane %v18611_v4, 3 }
 0xb13   : > { %11811 = vmatprep.subr.bf16.mxu0 %v12390_v53  ;;  %v12441_v53 = vld [vmem:[%s19354_s7 + $0x380] sm:$0xff]  }
 0xb14   : > { %11832 = vmatpush3.bf16.msra.mxu1 %v12389_v21  ;;  %v7732_v21 = vrot.slane %v18629_v51, 2 }
 0xb15   : > { %11833 = vmatprep.subr.bf16.mxu1 %v12392_v57  ;;  %v12444_v57 = vld [vmem:[%s19354_s7 + $0x3c8] sm:$0xff]  }
 0xb16   : > { %11812 = vmatpush3.bf16.msra.mxu0 %v12391_v23  ;;  %v7741_v23 = vrot.slane %v18618_v34, 3 }
 0xb17   : > { %11813 = vmatprep.subr.bf16.mxu0 %v12394_v62  ;;  %v12443_v62 = vld [vmem:[%s19354_s7 + $0x308] sm:$0xff]  }
 0xb18   : > { %11834 = vmatpush3.bf16.msra.mxu1 %v12393_v43  ;;  %v12446_v43 = vld [vmem:[%s19354_s7 + $0x350] sm:$0xff]  }
 0xb19   : > { %11835 = vmatprep.subr.bf16.mxu1 %v12396_v2  ;;  %v12445_v2 = vld [vmem:[%s19354_s7 + $0x388] sm:$0xff]  }
 0xb1a   : > { %11814 = vmatpush3.bf16.msra.mxu0 %v12395_v32  ;;  %v12448_v32 = vld [vmem:[%s19354_s7 + $0x3d0] sm:$0xff]  }
 0xb1b   : > { %11815 = vmatprep.subr.bf16.mxu0 %v12398_v44  ;;  %v12447_v44 = vld [vmem:[%s19354_s7 + $0x310] sm:$0xff]  }
 0xb1c   : > { %11836 = vmatpush3.bf16.msra.mxu1 %v12397_v48  ;;  %v12450_v48 = vld [vmem:[%s19354_s7 + $0x358] sm:$0xff]  }
 0xb1d   : > { %11837 = vmatprep.subr.bf16.mxu1 %v12400_v18  ;;  %v12449_v18 = vld [vmem:[%s19354_s7 + $0x390] sm:$0xff]  }
 0xb1e   : > { %11816 = vmatpush3.bf16.msra.mxu0 %v12399_v13  ;;  %v12452_v13 = vld [vmem:[%s19354_s7 + $0x3d8] sm:$0xff]  }
 0xb1f   : > { %11817 = vmatprep.subr.bf16.mxu0 %v12402_v49  ;;  %v12451_v49 = vld [vmem:[%s19354_s7 + $0x318] sm:$0xff]  }
 0xb20   : > { %11838 = vmatpush3.bf16.msra.mxu1 %v12401_v31  ;;  %v12454_v31 = vld [vmem:[%s19354_s7 + $0x360] sm:$0xff]  }
 0xb21   : > { %11839 = vmatprep.subr.bf16.mxu1 %v12404_v16  ;;  %v12453_v16 = vld [vmem:[%s19354_s7 + $0x398] sm:$0xff]  }
 0xb22   : > { %11818 = vmatpush3.bf16.msra.mxu0 %v12403_v55  ;;  %v12456_v55 = vld [vmem:[%s19354_s7 + $0x3e0] sm:$0xff]  }
 0xb23   : > { %11847 = vmatprep.subr.bf16.mxu0 %v12406_v52  ;;  %v12455_v52 = vld [vmem:[%s19354_s7 + $0x320] sm:$0xff]  }
 0xb24   : > { %11840 = vmatpush3.bf16.msra.mxu1 %v12405_v5  ;;  %v12458_v5 = vld [vmem:[%s19354_s7 + $0x368] sm:$0xff]  }
 0xb25   : > { %9938 = vmatmul.mubr.bf16.vlgmr.msra.gmra.mrb[96].mxu0 %v7720_v8  ;;  %11869 = vmatprep.subr.bf16.mxu1 %v12408_v9  ;;  %v12457_v9 = vld [vmem:[%s19354_s7 + $0x3a0] sm:$0xff]   ;;  %v12459_v8 = vld [vmem:[%s19354_s7 + $0x328] sm:$0xff]  }
 0xb26   : > { %11848 = vmatpush3.bf16.msra.mxu0 %v12407_v45  ;;  %10017 = vmatprep.mubr.bf16.mxu0 %v7729_v39  ;;  %v12460_v45 = vld [vmem:[%s19354_s7 + $0x3e8] sm:$0xff]  }
 0xb27   : > { %9978 = vmatmul.mubr.bf16.vlgmr.msra.gmra.mrb[80].mxu1 %v7724_v61  ;;  %11849 = vmatprep.subr.bf16.mxu0 %v12410_v17  ;;  %v12462_v17 = vld [vmem:[%s19354_s7 + $0x370] sm:$0xff]   ;;  %v12461_v39 = vld [vmem:[%s19354_s7 + $0x3a8] sm:$0xff]  }
 0xb28   : > { %11870 = vmatpush3.bf16.msra.mxu1 %v12409_v7  ;;  %10057 = vmatprep.mubr.bf16.mxu1 %v7733_v27  ;;  %v12464_v7 = vld [vmem:[%s19354_s7 + $0x3f0] sm:$0xff]  }
 0xb29   : > { %11871 = vmatprep.subr.bf16.mxu1 %v12412_v20  ;;  %v12463_v61 = vld [vmem:[%s19354_s7 + $0x330] sm:$0xff]   ;;  %v12466_v20 = vld [vmem:[%s19354_s7 + $0x378] sm:$0xff]  }
 0xb2a   : > { %11850 = vmatpush3.bf16.msra.mxu0 %v12411_v47  ;;  %v12465_v27 = vld [vmem:[%s19354_s7 + $0x3b0] sm:$0xff]   ;;  %v12468_v47 = vld [vmem:[%s19354_s7 + $0x3f8] sm:$0xff]  }
 0xb2b   : > { %11851 = vmatprep.subr.bf16.mxu0 %v12414_v12  ;;  %v12467_v12 = vld [vmem:[%s19354_s7 + $0x338] sm:$0xff]  }
 0xb2c   : > { %11872 = vmatpush3.bf16.msra.mxu1 %v12413_v50  ;;  %v12470_v50 = vld [vmem:[%s19354_s7 + $0x440] sm:$0xff]  }
 0xb2d   : > { %11873 = vmatprep.subr.bf16.mxu1 %v12416_v40  ;;  %v12469_v40 = vld [vmem:[%s19354_s7 + $0x3b8] sm:$0xff]  }
 0xb2e   : > { %11852 = vmatpush3.bf16.msra.mxu0 %v12415_v56  ;;  %v12472_v56 = vld [vmem:[%s19354_s7 + $0x4c0] sm:$0xff]  }
 0xb2f   : > { %11853 = vmatprep.subr.bf16.mxu0 %v12418_v58  ;;  %v12471_v58 = vld [vmem:[%s19354_s7 + $0x400] sm:$0xff]  }
 0xb30   : > { %11874 = vmatpush3.bf16.msra.mxu1 %v12417_v37  ;;  %v7736_v37 = vrot.slane %v18609_v15, 3 }
 0xb31   : > { %11875 = vmatprep.subr.bf16.mxu1 %v12420_v63  ;;  %v12474_v63 = vld [vmem:[%s19354_s7 + $0x448] sm:$0xff]  }
 0xb32   : > { %11854 = vmatpush3.bf16.msra.mxu0 %v12419_v33  ;;  %v7745_v33 = vrot.slane %v18611_v4, 4 }
 0xb33   : > { %11855 = vmatprep.subr.bf16.mxu0 %v12422_v6  ;;  %v12473_v6 = vld [vmem:[%s19354_s7 + $0x480] sm:$0xff]  }
 0xb34   : > { %11876 = vmatpush3.bf16.msra.mxu1 %v12421_v60  ;;  %v7740_v60 = vrot.slane %v18629_v51, 3 }
 0xb35   : > { %11877 = vmatprep.subr.bf16.mxu1 %v12424_v42  ;;  %v12476_v42 = vld [vmem:[%s19354_s7 + $0x4c8] sm:$0xff]  }
 0xb36   : > { %11856 = vmatpush3.bf16.msra.mxu0 %v12423_v38  ;;  %v7749_v38 = vrot.slane %v18618_v34, 4 }
 0xb37   : > { %11857 = vmatprep.subr.bf16.mxu0 %v12426_v46  ;;  %v12475_v46 = vld [vmem:[%s19354_s7 + $0x408] sm:$0xff]  }
 0xb38   : > { %11878 = vmatpush3.bf16.msra.mxu1 %v12425_v28  ;;  %v12478_v28 = vld [vmem:[%s19354_s7 + $0x450] sm:$0xff]  }
 0xb39   : > { %11879 = vmatprep.subr.bf16.mxu1 %v12428_v30  ;;  %v12477_v30 = vld [vmem:[%s19354_s7 + $0x488] sm:$0xff]  }
 0xb3a   : > { %11858 = vmatpush3.bf16.msra.mxu0 %v12427_v19  ;;  %v12480_v19 = vld [vmem:[%s19354_s7 + $0x4d0] sm:$0xff]  }
 0xb3b   : > { %11859 = vmatprep.subr.bf16.mxu0 %v12430_v14  ;;  %v12479_v14 = vld [vmem:[%s19354_s7 + $0x410] sm:$0xff]  }
 0xb3c   : > { %11880 = vmatpush3.bf16.msra.mxu1 %v12429_v35  ;;  %v12482_v35 = vld [vmem:[%s19354_s7 + $0x458] sm:$0xff]  }
 0xb3d   : > { %11881 = vmatprep.subr.bf16.mxu1 %v12432_v54  ;;  %v12481_v54 = vld [vmem:[%s19354_s7 + $0x490] sm:$0xff]  }
 0xb3e   : > { %11860 = vmatpush3.bf16.msra.mxu0 %v12431_v1  ;;  %v12484_v1 = vld [vmem:[%s19354_s7 + $0x4d8] sm:$0xff]  }
 0xb3f   : > { %11861 = vmatprep.subr.bf16.mxu0 %v12434_v24  ;;  %v12483_v24 = vld [vmem:[%s19354_s7 + $0x418] sm:$0xff]  }
 0xb40   : > { %11882 = vmatpush3.bf16.msra.mxu1 %v12433_v26  ;;  %v12486_v26 = vld [vmem:[%s19354_s7 + $0x460] sm:$0xff]  }
 0xb41   : > { %11883 = vmatprep.subr.bf16.mxu1 %v12436_v0  ;;  %v12485_v0 = vld [vmem:[%s19354_s7 + $0x498] sm:$0xff]  }
 0xb42   : > { %11862 = vmatpush3.bf16.msra.mxu0 %v12435_v41  ;;  %v12488_v41 = vld [vmem:[%s19354_s7 + $0x4e0] sm:$0xff]  }
 0xb43   : > { %11891 = vmatprep.subr.bf16.mxu0 %v12438_v29  ;;  %v12487_v29 = vld [vmem:[%s19354_s7 + $0x420] sm:$0xff]  }
 0xb44   : > { %11884 = vmatpush3.bf16.msra.mxu1 %v12437_v3  ;;  %v12490_v3 = vld [vmem:[%s19354_s7 + $0x468] sm:$0xff]  }
 0xb45   : > { %10018 = vmatmul.mubr.bf16.vlgmr.msra.gmra.mrb[100].mxu0 %v7728_v22  ;;  %11913 = vmatprep.subr.bf16.mxu1 %v12440_v10  ;;  %v12489_v10 = vld [vmem:[%s19354_s7 + $0x4a0] sm:$0xff]   ;;  %v12491_v22 = vld [vmem:[%s19354_s7 + $0x428] sm:$0xff]  }
 0xb46   : > { %11892 = vmatpush3.bf16.msra.mxu0 %v12439_v59  ;;  %10097 = vmatprep.mubr.bf16.mxu0 %v7737_v25  ;;  %v12492_v59 = vld [vmem:[%s19354_s7 + $0x4e8] sm:$0xff]  }
 0xb47   : > { %10058 = vmatmul.mubr.bf16.vlgmr.msra.gmra.mrb[84].mxu1 %v7732_v21  ;;  %11893 = vmatprep.subr.bf16.mxu0 %v12442_v11  ;;  %v12494_v11 = vld [vmem:[%s19354_s7 + $0x470] sm:$0xff]   ;;  %v12493_v25 = vld [vmem:[%s19354_s7 + $0x4a8] sm:$0xff]  }
 0xb48   : > { %11914 = vmatpush3.bf16.msra.mxu1 %v12441_v53  ;;  %10137 = vmatprep.mubr.bf16.mxu1 %v7741_v23  ;;  %v12496_v53 = vld [vmem:[%s19354_s7 + $0x4f0] sm:$0xff]  }
 0xb49   : > { %11915 = vmatprep.subr.bf16.mxu1 %v12444_v57  ;;  %v12495_v21 = vld [vmem:[%s19354_s7 + $0x430] sm:$0xff]   ;;  %v12498_v57 = vld [vmem:[%s19354_s7 + $0x478] sm:$0xff]  }
 0xb4a   : > { %11894 = vmatpush3.bf16.msra.mxu0 %v12443_v62  ;;  %v12497_v23 = vld [vmem:[%s19354_s7 + $0x4b0] sm:$0xff]   ;;  %v12500_v62 = vld [vmem:[%s19354_s7 + $0x4f8] sm:$0xff]  }
 0xb4b   : > { %11895 = vmatprep.subr.bf16.mxu0 %v12446_v43  ;;  %v12499_v43 = vld [vmem:[%s19354_s7 + $0x438] sm:$0xff]  }
 0xb4c   : > { %11916 = vmatpush3.bf16.msra.mxu1 %v12445_v2  ;;  %v12502_v2 = vld [vmem:[%s19354_s7 + $0x540] sm:$0xff]  }
 0xb4d   : > { %11917 = vmatprep.subr.bf16.mxu1 %v12448_v32  ;;  %v12501_v32 = vld [vmem:[%s19354_s7 + $0x4b8] sm:$0xff]  }
 0xb4e   : > { %11896 = vmatpush3.bf16.msra.mxu0 %v12447_v44  ;;  %v12504_v44 = vld [vmem:[%s19354_s7 + $0x5c0] sm:$0xff]  }
 0xb4f   : > { %11897 = vmatprep.subr.bf16.mxu0 %v12450_v48  ;;  %v12503_v48 = vld [vmem:[%s19354_s7 + $0x500] sm:$0xff]  }
 0xb50   : > { %11918 = vmatpush3.bf16.msra.mxu1 %v12449_v18  ;;  %v7744_v18 = vrot.slane %v18609_v15, 4 }
 0xb51   : > { %11919 = vmatprep.subr.bf16.mxu1 %v12452_v13  ;;  %v12506_v13 = vld [vmem:[%s19354_s7 + $0x548] sm:$0xff]  }
 0xb52   : > { %11898 = vmatpush3.bf16.msra.mxu0 %v12451_v49  ;;  %v7753_v49 = vrot.slane %v18611_v4, 5 }
 0xb53   : > { %11899 = vmatprep.subr.bf16.mxu0 %v12454_v31  ;;  %v12505_v31 = vld [vmem:[%s19354_s7 + $0x580] sm:$0xff]  }
 0xb54   : > { %11920 = vmatpush3.bf16.msra.mxu1 %v12453_v16  ;;  %v7748_v16 = vrot.slane %v18629_v51, 4 }
 0xb55   : > { %11921 = vmatprep.subr.bf16.mxu1 %v12456_v55  ;;  %v12508_v55 = vld [vmem:[%s19354_s7 + $0x5c8] sm:$0xff]  }
 0xb56   : > { %11900 = vmatpush3.bf16.msra.mxu0 %v12455_v52  ;;  %v7757_v52 = vrot.slane %v18618_v34, 5 }
 0xb57   : > { %11901 = vmatprep.subr.bf16.mxu0 %v12458_v5  ;;  %v12507_v5 = vld [vmem:[%s19354_s7 + $0x508] sm:$0xff]  }
 0xb58   : > { %11922 = vmatpush3.bf16.msra.mxu1 %v12457_v9  ;;  %v12510_v9 = vld [vmem:[%s19354_s7 + $0x550] sm:$0xff]  }
 0xb59   : > { %11923 = vmatprep.subr.bf16.mxu1 %v12460_v45  ;;  %v12509_v45 = vld [vmem:[%s19354_s7 + $0x588] sm:$0xff]  }
 0xb5a   : > { %11902 = vmatpush3.bf16.msra.mxu0 %v12459_v8  ;;  %v12512_v8 = vld [vmem:[%s19354_s7 + $0x5d0] sm:$0xff]  }
 0xb5b   : > { %11903 = vmatprep.subr.bf16.mxu0 %v12462_v17  ;;  %v12511_v17 = vld [vmem:[%s19354_s7 + $0x510] sm:$0xff]  }
 0xb5c   : > { %11924 = vmatpush3.bf16.msra.mxu1 %v12461_v39  ;;  %v12514_v39 = vld [vmem:[%s19354_s7 + $0x558] sm:$0xff]  }
 0xb5d   : > { %11925 = vmatprep.subr.bf16.mxu1 %v12464_v7  ;;  %v12513_v7 = vld [vmem:[%s19354_s7 + $0x590] sm:$0xff]  }
 0xb5e   : > { %11904 = vmatpush3.bf16.msra.mxu0 %v12463_v61  ;;  %v12516_v61 = vld [vmem:[%s19354_s7 + $0x5d8] sm:$0xff]  }
 0xb5f   : > { %11905 = vmatprep.subr.bf16.mxu0 %v12466_v20  ;;  %v12515_v20 = vld [vmem:[%s19354_s7 + $0x518] sm:$0xff]  }
 0xb60   : > { %11926 = vmatpush3.bf16.msra.mxu1 %v12465_v27  ;;  %v12518_v27 = vld [vmem:[%s19354_s7 + $0x560] sm:$0xff]  }
 0xb61   : > { %11927 = vmatprep.subr.bf16.mxu1 %v12468_v47  ;;  %v12517_v47 = vld [vmem:[%s19354_s7 + $0x598] sm:$0xff]  }
 0xb62   : > { %11906 = vmatpush3.bf16.msra.mxu0 %v12467_v12  ;;  %v12520_v12 = vld [vmem:[%s19354_s7 + $0x5e0] sm:$0xff]  }
 0xb63   : > { %11935 = vmatprep.subr.bf16.mxu0 %v12470_v50  ;;  %v12519_v50 = vld [vmem:[%s19354_s7 + $0x520] sm:$0xff]  }
 0xb64   : > { %11928 = vmatpush3.bf16.msra.mxu1 %v12469_v40  ;;  %v12522_v40 = vld [vmem:[%s19354_s7 + $0x568] sm:$0xff]  }
 0xb65   : > { %10098 = vmatmul.mubr.bf16.vlgmr.msra.gmra.mrb[104].mxu0 %v7736_v37  ;;  %11957 = vmatprep.subr.bf16.mxu1 %v12472_v56  ;;  %v12521_v56 = vld [vmem:[%s19354_s7 + $0x5a0] sm:$0xff]   ;;  %v12523_v37 = vld [vmem:[%s19354_s7 + $0x528] sm:$0xff]  }
 0xb66   : > { %11936 = vmatpush3.bf16.msra.mxu0 %v12471_v58  ;;  %10177 = vmatprep.mubr.bf16.mxu0 %v7745_v33  ;;  %v12524_v58 = vld [vmem:[%s19354_s7 + $0x5e8] sm:$0xff]  }
 0xb67   : > { %10138 = vmatmul.mubr.bf16.vlgmr.msra.gmra.mrb[88].mxu1 %v7740_v60  ;;  %11937 = vmatprep.subr.bf16.mxu0 %v12474_v63  ;;  %v12526_v63 = vld [vmem:[%s19354_s7 + $0x570] sm:$0xff]   ;;  %v12525_v33 = vld [vmem:[%s19354_s7 + $0x5a8] sm:$0xff]  }
 0xb68   : > { %11958 = vmatpush3.bf16.msra.mxu1 %v12473_v6  ;;  %10217 = vmatprep.mubr.bf16.mxu1 %v7749_v38  ;;  %v12528_v6 = vld [vmem:[%s19354_s7 + $0x5f0] sm:$0xff]  }
 0xb69   : > { %11959 = vmatprep.subr.bf16.mxu1 %v12476_v42  ;;  %v12527_v60 = vld [vmem:[%s19354_s7 + $0x530] sm:$0xff]   ;;  %v12530_v42 = vld [vmem:[%s19354_s7 + $0x578] sm:$0xff]  }
 0xb6a   : > { %11938 = vmatpush3.bf16.msra.mxu0 %v12475_v46  ;;  %v12529_v38 = vld [vmem:[%s19354_s7 + $0x5b0] sm:$0xff]   ;;  %v12532_v46 = vld [vmem:[%s19354_s7 + $0x5f8] sm:$0xff]  }
 0xb6b   : > { %11939 = vmatprep.subr.bf16.mxu0 %v12478_v28  ;;  %v12531_v28 = vld [vmem:[%s19354_s7 + $0x538] sm:$0xff]  }
 0xb6c   : > { %11960 = vmatpush3.bf16.msra.mxu1 %v12477_v30  ;;  %v12534_v30 = vld [vmem:[%s19354_s7 + $0x640] sm:$0xff]  }
 0xb6d   : > { %11961 = vmatprep.subr.bf16.mxu1 %v12480_v19  ;;  %v12533_v19 = vld [vmem:[%s19354_s7 + $0x5b8] sm:$0xff]  }
 0xb6e   : > { %11940 = vmatpush3.bf16.msra.mxu0 %v12479_v14  ;;  %v12536_v14 = vld [vmem:[%s19354_s7 + $0x6c0] sm:$0xff]  }
 0xb6f   : > { %11941 = vmatprep.subr.bf16.mxu0 %v12482_v35  ;;  %v12535_v35 = vld [vmem:[%s19354_s7 + $0x600] sm:$0xff]  }
 0xb70   : > { %11962 = vmatpush3.bf16.msra.mxu1 %v12481_v54  ;;  %v7752_v54 = vrot.slane %v18609_v15, 5 }
 0xb71   : > { %11963 = vmatprep.subr.bf16.mxu1 %v12484_v1  ;;  %v12538_v1 = vld [vmem:[%s19354_s7 + $0x648] sm:$0xff]  }
 0xb72   : > { %11942 = vmatpush3.bf16.msra.mxu0 %v12483_v24  ;;  %v7761_v24 = vrot.slane %v18611_v4, 6 }
 0xb73   : > { %11943 = vmatprep.subr.bf16.mxu0 %v12486_v26  ;;  %v12537_v26 = vld [vmem:[%s19354_s7 + $0x680] sm:$0xff]  }
 0xb74   : > { %11964 = vmatpush3.bf16.msra.mxu1 %v12485_v0  ;;  %v7756_v0 = vrot.slane %v18629_v51, 5 }
 0xb75   : > { %11965 = vmatprep.subr.bf16.mxu1 %v12488_v41  ;;  %v12540_v41 = vld [vmem:[%s19354_s7 + $0x6c8] sm:$0xff]  }
 0xb76   : > { %11944 = vmatpush3.bf16.msra.mxu0 %v12487_v29  ;;  %v7765_v29 = vrot.slane %v18618_v34, 6 }
 0xb77   : > { %11945 = vmatprep.subr.bf16.mxu0 %v12490_v3  ;;  %v12539_v3 = vld [vmem:[%s19354_s7 + $0x608] sm:$0xff]  }
 0xb78   : > { %11966 = vmatpush3.bf16.msra.mxu1 %v12489_v10  ;;  %v12542_v10 = vld [vmem:[%s19354_s7 + $0x650] sm:$0xff]  }
 0xb79   : > { %11967 = vmatprep.subr.bf16.mxu1 %v12492_v59  ;;  %v12541_v59 = vld [vmem:[%s19354_s7 + $0x688] sm:$0xff]  }
 0xb7a   : > { %11946 = vmatpush3.bf16.msra.mxu0 %v12491_v22  ;;  %v12544_v22 = vld [vmem:[%s19354_s7 + $0x6d0] sm:$0xff]  }
 0xb7b   : > { %11947 = vmatprep.subr.bf16.mxu0 %v12494_v11  ;;  %v12543_v11 = vld [vmem:[%s19354_s7 + $0x610] sm:$0xff]  }
 0xb7c   : > { %11968 = vmatpush3.bf16.msra.mxu1 %v12493_v25  ;;  %v12546_v25 = vld [vmem:[%s19354_s7 + $0x658] sm:$0xff]  }
 0xb7d   : > { %11969 = vmatprep.subr.bf16.mxu1 %v12496_v53  ;;  %v12545_v53 = vld [vmem:[%s19354_s7 + $0x690] sm:$0xff]  }
 0xb7e   : > { %11948 = vmatpush3.bf16.msra.mxu0 %v12495_v21  ;;  %v12548_v21 = vld [vmem:[%s19354_s7 + $0x6d8] sm:$0xff]  }
 0xb7f   : > { %11949 = vmatprep.subr.bf16.mxu0 %v12498_v57  ;;  %v12547_v57 = vld [vmem:[%s19354_s7 + $0x618] sm:$0xff]  }
 0xb80   : > { %11970 = vmatpush3.bf16.msra.mxu1 %v12497_v23  ;;  %v12550_v23 = vld [vmem:[%s19354_s7 + $0x660] sm:$0xff]  }
 0xb81   : > { %11971 = vmatprep.subr.bf16.mxu1 %v12500_v62  ;;  %v12549_v62 = vld [vmem:[%s19354_s7 + $0x698] sm:$0xff]  }
 0xb82   : > { %11950 = vmatpush3.bf16.msra.mxu0 %v12499_v43  ;;  %v12552_v43 = vld [vmem:[%s19354_s7 + $0x6e0] sm:$0xff]  }
 0xb83   : > { %11979 = vmatprep.subr.bf16.mxu0 %v12502_v2  ;;  %v12551_v2 = vld [vmem:[%s19354_s7 + $0x620] sm:$0xff]  }
 0xb84   : > { %11972 = vmatpush3.bf16.msra.mxu1 %v12501_v32  ;;  %v12554_v32 = vld [vmem:[%s19354_s7 + $0x668] sm:$0xff]  }
 0xb85   : > { %10178 = vmatmul.mubr.bf16.vlgmr.msra.gmra.mrb[108].mxu0 %v7744_v18  ;;  %12001 = vmatprep.subr.bf16.mxu1 %v12504_v44  ;;  %v12553_v44 = vld [vmem:[%s19354_s7 + $0x6a0] sm:$0xff]   ;;  %v12555_v18 = vld [vmem:[%s19354_s7 + $0x628] sm:$0xff]  }
 0xb86   : > { %11980 = vmatpush3.bf16.msra.mxu0 %v12503_v48  ;;  %10257 = vmatprep.mubr.bf16.mxu0 %v7753_v49  ;;  %v12556_v48 = vld [vmem:[%s19354_s7 + $0x6e8] sm:$0xff]  }
 0xb87   : > { %10218 = vmatmul.mubr.bf16.vlgmr.msra.gmra.mrb[92].mxu1 %v7748_v16  ;;  %11981 = vmatprep.subr.bf16.mxu0 %v12506_v13  ;;  %v12558_v13 = vld [vmem:[%s19354_s7 + $0x670] sm:$0xff]   ;;  %v12557_v49 = vld [vmem:[%s19354_s7 + $0x6a8] sm:$0xff]  }
 0xb88   : > { %12002 = vmatpush3.bf16.msra.mxu1 %v12505_v31  ;;  %10297 = vmatprep.mubr.bf16.mxu1 %v7757_v52  ;;  %v12560_v31 = vld [vmem:[%s19354_s7 + $0x6f0] sm:$0xff]  }
 0xb89   : > { %12003 = vmatprep.subr.bf16.mxu1 %v12508_v55  ;;  %v12559_v16 = vld [vmem:[%s19354_s7 + $0x630] sm:$0xff]   ;;  %v12562_v55 = vld [vmem:[%s19354_s7 + $0x678] sm:$0xff]  }
 0xb8a   : > { %11982 = vmatpush3.bf16.msra.mxu0 %v12507_v5  ;;  %v12561_v52 = vld [vmem:[%s19354_s7 + $0x6b0] sm:$0xff]   ;;  %v12564_v5 = vld [vmem:[%s19354_s7 + $0x6f8] sm:$0xff]  }
 0xb8b   : > { %11983 = vmatprep.subr.bf16.mxu0 %v12510_v9  ;;  %v12563_v9 = vld [vmem:[%s19354_s7 + $0x638] sm:$0xff]  }
 0xb8c   : > { %12004 = vmatpush3.bf16.msra.mxu1 %v12509_v45  ;;  %v12566_v45 = vld [vmem:[%s19354_s7 + $0x740] sm:$0xff]  }
 0xb8d   : > { %12005 = vmatprep.subr.bf16.mxu1 %v12512_v8  ;;  %v12565_v8 = vld [vmem:[%s19354_s7 + $0x6b8] sm:$0xff]  }
 0xb8e   : > { %11984 = vmatpush3.bf16.msra.mxu0 %v12511_v17  ;;  %v12568_v17 = vld [vmem:[%s19354_s7 + $0x7c0] sm:$0xff]  }
 0xb8f   : > { %11985 = vmatprep.subr.bf16.mxu0 %v12514_v39  ;;  %v12567_v39 = vld [vmem:[%s19354_s7 + $0x700] sm:$0xff]  }
 0xb90   : > { %12006 = vmatpush3.bf16.msra.mxu1 %v12513_v7  ;;  %v7760_v7 = vrot.slane %v18609_v15, 6 }
 0xb91   : > { %12007 = vmatprep.subr.bf16.mxu1 %v12516_v61  ;;  %v12570_v61 = vld [vmem:[%s19354_s7 + $0x748] sm:$0xff]  }
 0xb92   : > { %11986 = vmatpush3.bf16.msra.mxu0 %v12515_v20  ;;  %v7769_v20 = vrot.slane %v18611_v4, 7  ;;  %v12571_v4 = vld [vmem:[%s19354_s7 + $0x708] sm:$0xff]  }
 0xb93   : > { %11987 = vmatprep.subr.bf16.mxu0 %v12518_v27  ;;  %v12569_v27 = vld [vmem:[%s19354_s7 + $0x780] sm:$0xff]  }
 0xb94   : > { %12008 = vmatpush3.bf16.msra.mxu1 %v12517_v47  ;;  %v7764_v47 = vrot.slane %v18629_v51, 6 }
 0xb95   : > { %12009 = vmatprep.subr.bf16.mxu1 %v12520_v12  ;;  %v12572_v12 = vld [vmem:[%s19354_s7 + $0x7c8] sm:$0xff]  }
 0xb96   : > { %11988 = vmatpush3.bf16.msra.mxu0 %v12519_v50  ;;  %v7773_v50 = vrot.slane %v18618_v34, 7  ;;  %v12576_v34 = vld [vmem:[%s19354_s7 + $0x7d0] sm:$0xff]  }
 0xb97   : > { %11989 = vmatprep.subr.bf16.mxu0 %v12522_v40  ;;  %v12574_v40 = vld [vmem:[%s19354_s7 + $0x750] sm:$0xff]  }
 0xb98   : > { %12010 = vmatpush3.bf16.msra.mxu1 %v12521_v56  ;;  %v12573_v56 = vld [vmem:[%s19354_s7 + $0x788] sm:$0xff]  }
 0xb99   : > { %12011 = vmatprep.subr.bf16.mxu1 %v12524_v58  ;;  %v12575_v58 = vld [vmem:[%s19354_s7 + $0x710] sm:$0xff]  }
 0xb9a   : > { %11990 = vmatpush3.bf16.msra.mxu0 %v12523_v37  ;;  %v12578_v37 = vld [vmem:[%s19354_s7 + $0x758] sm:$0xff]  }
 0xb9b   : > { %11991 = vmatprep.subr.bf16.mxu0 %v12526_v63  ;;  %v12577_v63 = vld [vmem:[%s19354_s7 + $0x790] sm:$0xff]  }
 0xb9c   : > { %12012 = vmatpush3.bf16.msra.mxu1 %v12525_v33  ;;  %v12580_v33 = vld [vmem:[%s19354_s7 + $0x7d8] sm:$0xff]  }
 0xb9d   : > { %12013 = vmatprep.subr.bf16.mxu1 %v12528_v6  ;;  %v12579_v6 = vld [vmem:[%s19354_s7 + $0x718] sm:$0xff]  }
 0xb9e   : > { %11992 = vmatpush3.bf16.msra.mxu0 %v12527_v60  ;;  %v12582_v60 = vld [vmem:[%s19354_s7 + $0x760] sm:$0xff]  }
 0xb9f   : > { %11993 = vmatprep.subr.bf16.mxu0 %v12530_v42  ;;  %v12581_v42 = vld [vmem:[%s19354_s7 + $0x798] sm:$0xff]  }
 0xba0   : > { %12014 = vmatpush3.bf16.msra.mxu1 %v12529_v38  ;;  %v12584_v38 = vld [vmem:[%s19354_s7 + $0x7e0] sm:$0xff]  }
 0xba1   : > { %12015 = vmatprep.subr.bf16.mxu1 %v12532_v46  ;;  %v12583_v46 = vld [vmem:[%s19354_s7 + $0x720] sm:$0xff]  }
 0xba2   : > { %11994 = vmatpush3.bf16.msra.mxu0 %v12531_v28  ;;  %v12586_v28 = vld [vmem:[%s19354_s7 + $0x768] sm:$0xff]  }
 0xba3   : > { %12023 = vmatprep.subr.bf16.mxu0 %v12534_v30  ;;  %v12585_v30 = vld [vmem:[%s19354_s7 + $0x7a0] sm:$0xff]  }
 0xba4   : > { %12016 = vmatpush3.bf16.msra.mxu1 %v12533_v19  ;;  %v12588_v19 = vld [vmem:[%s19354_s7 + $0x7e8] sm:$0xff]  }
 0xba5   : > { %10258 = vmatmul.mubr.bf16.vlgmr.msra.gmra.mrb[112].mxu0 %v7752_v54  ;;  %12045 = vmatprep.subr.bf16.mxu1 %v12536_v14  ;;  %v12587_v14 = vld [vmem:[%s19354_s7 + $0x728] sm:$0xff]  }
 0xba6   : > { %12024 = vmatpush3.bf16.msra.mxu0 %v12535_v35  ;;  %10337 = vmatprep.mubr.bf16.mxu0 %v7761_v24  ;;  %v12590_v35 = vld [vmem:[%s19354_s7 + $0x770] sm:$0xff]   ;;  %v8288_v24 = vld [vmem:[%s19355_s8] sm:$0x1] }
 0xba7   : > { %10298 = vmatmul.mubr.bf16.vlgmr.msra.gmra.mrb[96].mxu1 %v7756_v0  ;;  %12025 = vmatprep.subr.bf16.mxu0 %v12538_v1  ;;  %v12589_v1 = vld [vmem:[%s19354_s7 + $0x7a8] sm:$0xff]   ;;  %v12592_v0 = vld [vmem:[%s19354_s7 + $0x7f0] sm:$0xff]  }
 0xba8   : > { %12046 = vmatpush3.bf16.msra.mxu1 %v12537_v26  ;;  %10377 = vmatprep.mubr.bf16.mxu1 %v7765_v29 }
 0xba9   : > { %12047 = vmatprep.subr.bf16.mxu1 %v12540_v41 }
 0xbaa   : > { %12026 = vmatpush3.bf16.msra.mxu0 %v12539_v3 }
 0xbab   : > { %12027 = vmatprep.subr.bf16.mxu0 %v12542_v10  ;;  %v12591_v10 = vld [vmem:[%s19354_s7 + $0x730] sm:$0xff]  }
 0xbac   : > { %12048 = vmatpush3.bf16.msra.mxu1 %v12541_v59 }
 0xbad   : > { %12049 = vmatprep.subr.bf16.mxu1 %v12544_v22 }
 0xbae   : > { %12028 = vmatpush3.bf16.msra.mxu0 %v12543_v11  ;;  %v12594_v11 = vld [vmem:[%s19354_s7 + $0x778] sm:$0xff]  }
 0xbaf   : > { %12029 = vmatprep.subr.bf16.mxu0 %v12546_v25 }
 0xbb0   : > { %12050 = vmatpush3.bf16.msra.mxu1 %v12545_v53 }
 0xbb1   : > { %12051 = vmatprep.subr.bf16.mxu1 %v12548_v21 }
 0xbb2   : > { %12030 = vmatpush3.bf16.msra.mxu0 %v12547_v57  ;;  %v12593_v57 = vld [vmem:[%s19354_s7 + $0x7b0] sm:$0xff]  }
 0xbb3   : > { %12031 = vmatprep.subr.bf16.mxu0 %v12550_v23 }
 0xbb4   : > { %12052 = vmatpush3.bf16.msra.mxu1 %v12549_v62  ;;  %v12596_v62 = vld [vmem:[%s19354_s7 + $0x7f8] sm:$0xff]  }
 0xbb5   : > { %12053 = vmatprep.subr.bf16.mxu1 %v12552_v43 }
 0xbb6   : > { %12032 = vmatpush3.bf16.msra.mxu0 %v12551_v2  ;;  %v12595_v2 = vld [vmem:[%s19354_s7 + $0x738] sm:$0xff]  }
 0xbb7   : > { %12033 = vmatprep.subr.bf16.mxu0 %v12554_v32  ;;  %v12597_v32 = vld [vmem:[%s19354_s7 + $0x7b8] sm:$0xff]  }
 0xbb8   : > { %12054 = vmatpush3.bf16.msra.mxu1 %v12553_v44  ;;  %v7768_v44 = vrot.slane %v18609_v15, 7 }
 0xbb9   : > { %12055 = vmatprep.subr.bf16.mxu1 %v12556_v48  ;;  %v7772_v48 = vrot.slane %v18629_v51, 7 }
 0xbba   : > { %12034 = vmatpush3.bf16.msra.mxu0 %v12555_v18 }
 0xbbb   : > { %12035 = vmatprep.subr.bf16.mxu0 %v12558_v13 }
 0xbbc   : > { %12056 = vmatpush3.bf16.msra.mxu1 %v12557_v49 }
 0xbbd   : > { %12057 = vmatprep.subr.bf16.mxu1 %v12560_v31 }
 0xbbe   : > { %12036 = vmatpush3.bf16.msra.mxu0 %v12559_v16 }
 0xbbf   : > { %12037 = vmatprep.subr.bf16.mxu0 %v12562_v55 }
 0xbc0   : > { %12058 = vmatpush3.bf16.msra.mxu1 %v12561_v52 }
 0xbc1   : > { %12059 = vmatprep.subr.bf16.mxu1 %v12564_v5 }
 0xbc2   : > { %12038 = vmatpush3.bf16.msra.mxu0 %v12563_v9 }
 0xbc3   : > { %12067 = vmatprep.subr.bf16.mxu0 %v12566_v45 }
 0xbc4   : > { %12060 = vmatpush3.bf16.msra.mxu1 %v12565_v8 }
 0xbc5   : > { %10338 = vmatmul.mubr.bf16.vlgmr.msra.gmra.mrb[116].mxu0 %v7760_v7  ;;  %12089 = vmatprep.subr.bf16.mxu1 %v12568_v17 }
 0xbc6   : > { %12068 = vmatpush3.bf16.msra.mxu0 %v12567_v39  ;;  %10417 = vmatprep.mubr.bf16.mxu0 %v7769_v20 }
 0xbc7   : > { %10378 = vmatmul.mubr.bf16.vlgmr.msra.gmra.mrb[100].mxu1 %v7764_v47  ;;  %12069 = vmatprep.subr.bf16.mxu0 %v12570_v61 }
 0xbc8   : > { %12090 = vmatpush3.bf16.msra.mxu1 %v12569_v27  ;;  %10457 = vmatprep.mubr.bf16.mxu1 %v7773_v50 }
 0xbc9   : > { %12091 = vmatprep.subr.bf16.mxu1 %v12572_v12 }
 0xbca   : > { %12070 = vmatpush3.bf16.msra.mxu0 %v12571_v4 }
 0xbcb   : > { %12071 = vmatprep.subr.bf16.mxu0 %v12574_v40 }
 0xbcc   : > { %12092 = vmatpush3.bf16.msra.mxu1 %v12573_v56  ;;  %v12598_v56 = vld [vmem:[%s19356_s9] sm:$0xff]  }
 0xbcd   : > { %12093 = vmatprep.subr.bf16.mxu1 %v12576_v34 }
 0xbce   : > { %12072 = vmatpush3.bf16.msra.mxu0 %v12575_v58 }
 0xbcf   : > { %12073 = vmatprep.subr.bf16.mxu0 %v12578_v37 }
 0xbd0   : > { %12094 = vmatpush3.bf16.msra.mxu1 %v12577_v63 }
 0xbd1   : > { %12095 = vmatprep.subr.bf16.mxu1 %v12580_v33 }
 0xbd2   : > { %12074 = vmatpush3.bf16.msra.mxu0 %v12579_v6 }
 0xbd3   : > { %12075 = vmatprep.subr.bf16.mxu0 %v12582_v60 }
 0xbd4   : > { %12096 = vmatpush3.bf16.msra.mxu1 %v12581_v42 }
 0xbd5   : > { %12097 = vmatprep.subr.bf16.mxu1 %v12584_v38 }
 0xbd6   : > { %12076 = vmatpush3.bf16.msra.mxu0 %v12583_v46 }
 0xbd7   : > { %12077 = vmatprep.subr.bf16.mxu0 %v12586_v28  ;;  %v12599_v28 = vld [vmem:[%s19356_s9 + $0x8] sm:$0xff]  }
 0xbd8   : > { %12098 = vmatpush3.bf16.msra.mxu1 %v12585_v30  ;;  %v11775_v54 = vpop.f32.mrb[92].mxu0 }
 0xbd9   : > { %v11776_v26 = vpop.f32.mrb[93].mxu0  ;;  %12099 = vmatprep.subr.bf16.mxu1 %v12588_v19 }
 0xbda   : > { %v11777_v41 = vadd.f32 %v11776_v26, %v11775_v54  ;;  %12078 = vmatpush3.bf16.msra.mxu0 %v12587_v14  ;;  %v11778_v29 = vpop.f32.mrb[94].mxu0  ;;  %v11797_v3 = vpop.f32.mrb[76].mxu1  ;;  %v12600_v14 = vld [vmem:[%s19356_s9 + $0x10] sm:$0xff]  }
 0xbdb   : > { %v11779_v59 = vpop.f32.mrb[95].mxu0  ;;  %v11798_v22 = vpop.f32.mrb[77].mxu1  ;;  %12079 = vmatprep.subr.bf16.mxu0 %v12590_v35  ;;  %v12601_v35 = vld [vmem:[%s19356_s9 + $0x18] sm:$0xff]  }
 0xbdc   : > { %v9860_v25 = vadd.f32 %v11777_v41, %v8288_v24  ;;  %v11799_v53 = vadd.f32 %v11798_v22, %v11797_v3  ;;  %12100 = vmatpush3.bf16.msra.mxu1 %v12589_v1  ;;  %v11800_v21 = vpop.f32.mrb[78].mxu1 }
 0xbdd   : > { %v11801_v23 = vpop.f32.mrb[79].mxu1  ;;  %12101 = vmatprep.subr.bf16.mxu1 %v12592_v0 }
 0xbde   : > { %v9900_v43 = vadd.f32 %v11799_v53, %v9860_v25  ;;  %12080 = vmatpush3.bf16.msra.mxu0 %v12591_v10 }
 0xbdf   : > { %12081 = vmatprep.subr.bf16.mxu0 %v12594_v11 }
 0xbe0   : > { %12102 = vmatpush3.bf16.msra.mxu1 %v12593_v57 }
 0xbe1   : > { %12103 = vmatprep.subr.bf16.mxu1 %v12596_v62 }
 0xbe2   : > { %12082 = vmatpush3.bf16.msra.mxu0 %v12595_v2 }
 0xbe3   : > { %12116 = vmatprep.subr.bf16.mxu0 %v12759_v36 }
 0xbe4   : > { %12104 = vmatpush3.bf16.msra.mxu1 %v12597_v32 }
 0xbe5   : > { %10418 = vmatmul.mubr.bf16.vlgmr.msra.gmra.mrb[120].mxu0 %v7768_v44 }
 0xbe6   : > { %12117 = vmatpush3.bf16.msra.mxu0 %v12598_v56  ;;  %12124 = vmatprep.mubr.msk.bf16.mxu0 %vm12760_vm10, %v12759_v36 }
 0xbe7   : > { %10458 = vmatmul.mubr.bf16.vlgmr.msra.gmra.mrb[104].mxu1 %v7772_v48  ;;  %12118 = vmatprep.subr.bf16.mxu0 %v12759_v36 }
 0xbea   : > { %12119 = vmatpush3.bf16.msra.mxu0 %v12599_v28 }
 0xbeb   : > { %12120 = vmatprep.subr.bf16.mxu0 %v12759_v36 }
 0xbee   : > { %12121 = vmatpush3.bf16.msra.mxu0 %v12600_v14 }
 0xbef   : > { %12122 = vmatprep.subr.bf16.mxu0 %v12759_v36 }
 0xbf2   : > { %12123 = vmatpush3.bf16.msra.mxu0 %v12601_v35 }
 0xbf8   : > { %v11819_v18 = vpop.f32.mrb[96].mxu0 }
 0xbf9   : > { %v11820_v13 = vpop.f32.mrb[97].mxu0 }
 0xbfa   : > { %v11821_v49 = vadd.f32 %v11820_v13, %v11819_v18  ;;  %v11822_v31 = vpop.f32.mrb[98].mxu0  ;;  %v11841_v16 = vpop.f32.mrb[80].mxu1 }
 0xbfb   : > { %v11823_v55 = vpop.f32.mrb[99].mxu0  ;;  %v11842_v52 = vpop.f32.mrb[81].mxu1 }
 0xbfc   : > { %v9940_v5 = vadd.f32 %v11821_v49, %v9900_v43  ;;  %v11843_v9 = vadd.f32 %v11842_v52, %v11841_v16  ;;  %v11844_v45 = vpop.f32.mrb[82].mxu1 }
 0xbfd   : > { %v11845_v8 = vpop.f32.mrb[83].mxu1 }
 0xbfe   : > { %v9980_v17 = vadd.f32 %v11843_v9, %v9940_v5 }
 0xc18   : > { %v11863_v15 = vpop.f32.mrb[100].mxu0 }
 0xc19   : > { %v11864_v39 = vpop.f32.mrb[101].mxu0 }
 0xc1a   : > { %v11865_v7 = vadd.f32 %v11864_v39, %v11863_v15  ;;  %v11866_v61 = vpop.f32.mrb[102].mxu0  ;;  %v11885_v20 = vpop.f32.mrb[84].mxu1 }
 0xc1b   : > { %v11867_v27 = vpop.f32.mrb[103].mxu0  ;;  %v11886_v51 = vpop.f32.mrb[85].mxu1 }
 0xc1c   : > { %v10020_v47 = vadd.f32 %v11865_v7, %v9980_v17  ;;  %v11887_v12 = vadd.f32 %v11886_v51, %v11885_v20  ;;  %v11888_v50 = vpop.f32.mrb[86].mxu1 }
 0xc1d   : > { %v11889_v4 = vpop.f32.mrb[87].mxu1 }
 0xc1e   : > { %v10060_v40 = vadd.f32 %v11887_v12, %v10020_v47 }
 0xc38   : > { %v11907_v34 = vpop.f32.mrb[104].mxu0 }
 0xc39   : > { %v11908_v58 = vpop.f32.mrb[105].mxu0 }
 0xc3a   : > { %v11909_v37 = vadd.f32 %v11908_v58, %v11907_v34  ;;  %v11910_v63 = vpop.f32.mrb[106].mxu0  ;;  %v11929_v33 = vpop.f32.mrb[88].mxu1  ;;  %v10475_v58 = vld [vmem:[%s19357_s10] sm:$0x1] }
 0xc3b   : > { %v11911_v6 = vpop.f32.mrb[107].mxu0  ;;  %v11930_v60 = vpop.f32.mrb[89].mxu1 }
 0xc3c   : > { %v10100_v42 = vadd.f32 %v11909_v37, %v10060_v40  ;;  %v11931_v38 = vadd.f32 %v11930_v60, %v11929_v33  ;;  %v11932_v46 = vpop.f32.mrb[90].mxu1 }
 0xc3d   : > { %v11933_v30 = vpop.f32.mrb[91].mxu1 }
 0xc3e   : > { %v10140_v19 = vadd.f32 %v11931_v38, %v10100_v42 }
 0xc58   : > { %v11951_v54 = vpop.f32.mrb[108].mxu0 }
 0xc59   : > { %v11952_v1 = vpop.f32.mrb[109].mxu0 }
 0xc5a   : > { %v11953_v24 = vadd.f32 %v11952_v1, %v11951_v54  ;;  %v11954_v26 = vpop.f32.mrb[110].mxu0  ;;  %v11973_v0 = vpop.f32.mrb[92].mxu1 }
 0xc5b   : > { %v11955_v41 = vpop.f32.mrb[111].mxu0  ;;  %v11974_v29 = vpop.f32.mrb[93].mxu1 }
 0xc5c   : > { %v10180_v3 = vadd.f32 %v11953_v24, %v10140_v19  ;;  %v11975_v10 = vadd.f32 %v11974_v29, %v11973_v0  ;;  %v11976_v59 = vpop.f32.mrb[94].mxu1 }
 0xc5d   : > { %v11977_v22 = vpop.f32.mrb[95].mxu1 }
 0xc5e   : > { %v10220_v11 = vadd.f32 %v11975_v10, %v10180_v3 }
 0xc78   : > { %v11995_v25 = vpop.f32.mrb[112].mxu0 }
 0xc79   : > { %v11996_v53 = vpop.f32.mrb[113].mxu0 }
 0xc7a   : > { %v11997_v21 = vadd.f32 %v11996_v53, %v11995_v25  ;;  %v11998_v57 = vpop.f32.mrb[114].mxu0  ;;  %v12017_v23 = vpop.f32.mrb[96].mxu1 }
 0xc7b   : > { %v11999_v62 = vpop.f32.mrb[115].mxu0  ;;  %v12018_v36 = vpop.f32.mrb[97].mxu1 }
 0xc7c   : > { %v10260_v43 = vadd.f32 %v11997_v21, %v10220_v11  ;;  %v12019_v2 = vadd.f32 %v12018_v36, %v12017_v23  ;;  %v12020_v32 = vpop.f32.mrb[98].mxu1 }
 0xc7d   : > { %v12021_v44 = vpop.f32.mrb[99].mxu1 }
 0xc7e   : > { %v10300_v48 = vadd.f32 %v12019_v2, %v10260_v43 }
 0xc98   : > { %v12039_v18 = vpop.f32.mrb[116].mxu0 }
 0xc99   : > { %v12040_v13 = vpop.f32.mrb[117].mxu0 }
 0xc9a   : > { %v12041_v49 = vadd.f32 %v12040_v13, %v12039_v18  ;;  %v12042_v31 = vpop.f32.mrb[118].mxu0  ;;  %v12061_v16 = vpop.f32.mrb[100].mxu1 }
 0xc9b   : > { %v12043_v55 = vpop.f32.mrb[119].mxu0  ;;  %v12062_v52 = vpop.f32.mrb[101].mxu1 }
 0xc9c   : > { %v10340_v5 = vadd.f32 %v12041_v49, %v10300_v48  ;;  %v12063_v9 = vadd.f32 %v12062_v52, %v12061_v16  ;;  %v12064_v45 = vpop.f32.mrb[102].mxu1 }
 0xc9d   : > { %v12065_v8 = vpop.f32.mrb[103].mxu1 }
 0xc9e   : > { %v10380_v17 = vadd.f32 %v12063_v9, %v10340_v5 }
 0xcb8   : > { %v12083_v15 = vpop.f32.mrb[120].mxu0 }
 0xcb9   : > { %v12084_v39 = vpop.f32.mrb[121].mxu0 }
 0xcba   : > { %v12085_v7 = vadd.f32 %v12084_v39, %v12083_v15  ;;  %v12086_v61 = vpop.f32.mrb[122].mxu0  ;;  %v12105_v20 = vpop.f32.mrb[104].mxu1 }
 0xcbb   : > { %v12087_v27 = vpop.f32.mrb[123].mxu0  ;;  %v12106_v51 = vpop.f32.mrb[105].mxu1 }
 0xcbc   : > { %v10420_v47 = vadd.f32 %v12085_v7, %v10380_v17  ;;  %v12107_v12 = vadd.f32 %v12106_v51, %v12105_v20  ;;  %v12108_v50 = vpop.f32.mrb[106].mxu1 }
 0xcbd   : > { %v12109_v4 = vpop.f32.mrb[107].mxu1 }
 0xcbe   : > { %v10460_v40 = vadd.f32 %v12107_v12, %v10420_v47 }
 0xcc0   : > { %v10465_v56 = vmax.f32 %v10460_v40, 0.0 }
 0xcc2   : > { %v10466_v34 = vpack.c.bf16 %v10465_v56, %v10465_v56 }
 0xcc4   : > { %12125 = vmatmul.mubr.msk.bf16.vlgmr.msra.gmra.mrb[124].mxu0 %vm10500_vm8, %v10466_v34 }
 0xd97   : > { %v10538_v37 = vpop.f32.mrb[124].mxu0 }
 0xd98   : > { %v10539_v63 = vadd.f32 %v10538_v37, %v10475_v58  ;;  %v12126_v33 = vpop.f32.mrb[125].mxu0 }
 0xd99   : > { %v10541_v6 = vpop.f32.mrb[126].mxu0 }
 0xd9a   : > { %10544 = vst [vmem:[%s382_s16] sm:$0x1] %v10539_v63  ;;  %v12127_v60 = vpop.f32.mrb[127].mxu0 }
 0xd9b PF: > { %s21_s17 = sadd.s32 1, %s12752_s17  }
 0xd9c   : > { %p18_p4 = scmp.ge.s32.totalorder %s21_s17, 4  }
 0xd9e   :  { %20 = sbr.rel (!%p18_p4) target bundleno = 1 (0x1), region = 94 }

</bundles_post_ra>
